<compile_context>
chip_gen: v6e
topology: v6e:2x2x1
jax: 0.10.0
libtpu: 0.0.40
codegen_flags: <defaults>
</compile_context>

<pallas_src>
import functools

import jax
import jax.numpy as jnp
from jax.experimental import pallas as pl
from jax.experimental.pallas import tpu as pltpu


def _conv_gn_kernel(x_ref, w_ref, r_ref, gmat_ref, bias_ref, gamma_ref, beta_ref,
                    o_ref, *, num_taps, eps):
    # x_ref    : (bt, Cin, Lp)      zero-padded, row-flattened input
    # w_ref    : (K*K, Cout, Cin)   LoRA-merged conv taps
    # r_ref    : (K*K, Lp, H*W)     0/1 gather matrices (tap window -> output raster)
    # gmat_ref : (Cout, Cout)       block-diagonal 1/N group-average matrix
    # bias/gamma/beta : (Cout, 1)
    # o_ref    : (bt, Cout, H*W)    lane-dense output slab
    bt = o_ref.shape[0]

    gmat = gmat_ref[...]
    bias = bias_ref[...]
    gamma = gamma_ref[...]
    beta = beta_ref[...]

    for b in range(bt):                                   # static unroll, bt is small
        xv = x_ref[b].astype(jnp.float32)                 # (Cin, Lp)

        # ---- convolution: sum over taps of  W_k @ (x gathered at tap offset k) ----
        acc = None
        for k in range(num_taps):
            g = jnp.dot(xv, r_ref[k], preferred_element_type=jnp.float32)    # (Cin, HW)
            t = jnp.dot(w_ref[k], g, preferred_element_type=jnp.float32)     # (Cout, HW)
            acc = t if acc is None else acc + t
        y = acc + bias                                                        # (Cout, HW)

        # ---- GroupNorm statistics: per-channel sums, then one small matmul each to
        #      reduce within the group and broadcast back to every channel. ----------
        s1 = jnp.sum(y, axis=1, keepdims=True)                                # (Cout, 1)
        s2 = jnp.sum(y * y, axis=1, keepdims=True)                            # (Cout, 1)
        mean = jnp.dot(gmat, s1, preferred_element_type=jnp.float32)          # (Cout, 1)
        meansq = jnp.dot(gmat, s2, preferred_element_type=jnp.float32)        # (Cout, 1)
        var = meansq - mean * mean                                            # biased var
        inv = jax.lax.rsqrt(var + eps)

        # ---- fold normalization + affine into a single scale/shift pair -----------
        scale = inv * gamma
        shift = beta - mean * scale
        o_ref[b] = (y * scale + shift).astype(o_ref.dtype)


def conv_gn_lora(x, conv_w, conv_b, lora_A, lora_B, gamma, beta, *,
                 groups=8, r=8, lora_alpha=1.0, eps=1e-5, batch_tile=None):
    """ConvGN_LoRA forward.  x: (B, Cin, H, W) -> (B, Cout, H, W)."""
    B, Cin, H, W = x.shape
    Cout, Cin_w, K, K2 = conv_w.shape
    assert Cin_w == Cin and K == K2 and Cout % groups == 0
    p = K // 2
    Hp, Wp = H + 2 * p, W + 2 * p
    HW = H * W
    Lp = ((Hp * Wp + 127) // 128) * 128        # flattened padded length, lane-aligned

    # ---- LoRA weight merge + tap layout (tiny, host side) ----------------------
    scaling = float(lora_alpha) / float(r)
    w_eff = (conv_w + (lora_B @ lora_A).reshape(conv_w.shape) * scaling
             ).astype(jnp.float32)
    w_taps = jnp.transpose(w_eff, (2, 3, 0, 1)).reshape(K * K, Cout, Cin)

    # ---- zero-pad + flatten input (the pad is the only non-free wrapper op) ----
    xp = jnp.pad(x, ((0, 0), (0, 0), (p, p), (p, p)))       # (B, Cin, Hp, Wp)
    xf = xp.reshape(B, Cin, Hp * Wp)                         # contiguous -> free
    xf = jnp.pad(xf, ((0, 0), (0, 0), (0, Lp - Hp * Wp)))    # lane-align tail

    # ---- host-precomputed constant operands -------------------------------------
    # gather[k, l, r*W+c] = 1  iff  l == (r + ky)*Wp + (c + kx)   with k = ky*K + kx
    base = (jnp.arange(H)[:, None] * Wp + jnp.arange(W)[None, :]).reshape(-1)      # (HW,)
    offs = (jnp.arange(K)[:, None] * Wp + jnp.arange(K)[None, :]).reshape(-1)      # (K*K,)
    src = base[None, :] + offs[:, None]                                            # (K*K, HW)
    gather = (jnp.arange(Lp)[None, :, None] == src[:, None, :]).astype(jnp.float32)

    # block-diagonal group-average matrix, pre-divided by N = (Cout/G) * H * W
    gid = jnp.arange(Cout) // (Cout // groups)
    gmat = (gid[:, None] == gid[None, :]).astype(jnp.float32) \
        / float((Cout // groups) * HW)

    bias_c = conv_b.reshape(Cout, 1).astype(jnp.float32)
    gamma_c = gamma.reshape(Cout, 1).astype(jnp.float32)
    beta_c = beta.reshape(Cout, 1).astype(jnp.float32)

    # ---- batch tiling: as many samples per grid step as evenly divide B ---------
    if batch_tile is None:
        batch_tile = next(bt for bt in (8, 4, 2, 1) if B % bt == 0)
    bt = batch_tile
    assert B % bt == 0

    kernel = functools.partial(_conv_gn_kernel, num_taps=K * K, eps=eps)

    out = pl.pallas_call(
        kernel,
        out_shape=jax.ShapeDtypeStruct((B, Cout, HW), x.dtype),
        grid_spec=pltpu.PrefetchScalarGridSpec(
            num_scalar_prefetch=0,
            grid=(B // bt,),
            in_specs=[
                pl.BlockSpec((bt, Cin, Lp), lambda i: (i, 0, 0)),
                pl.BlockSpec((K * K, Cout, Cin), lambda i: (0, 0, 0)),
                pl.BlockSpec((K * K, Lp, HW), lambda i: (0, 0, 0)),
                pl.BlockSpec((Cout, Cout), lambda i: (0, 0)),
                pl.BlockSpec((Cout, 1), lambda i: (0, 0)),
                pl.BlockSpec((Cout, 1), lambda i: (0, 0)),
                pl.BlockSpec((Cout, 1), lambda i: (0, 0)),
            ],
            out_specs=pl.BlockSpec((bt, Cout, HW), lambda i: (i, 0, 0)),
        ),
        compiler_params=pltpu.CompilerParams(
            dimension_semantics=("parallel",)),
    )(xf, w_taps, gather, gmat, bias_c, gamma_c, beta_c)

    return out.reshape(B, Cout, H, W)        # contiguous -> free, no transpose


def _reference(x, conv_w, conv_b, lora_A, lora_B, gamma, beta, *,
               groups=8, r=8, lora_alpha=1.0, eps=1e-5):
    """Pure-JAX reference matching the PyTorch module."""
    scaling = float(lora_alpha) / float(r)
    w_eff = conv_w + (lora_B @ lora_A).reshape(conv_w.shape) * scaling
    p = conv_w.shape[-1] // 2
    y = jax.lax.conv_general_dilated(
        x.astype(jnp.float32), w_eff.astype(jnp.float32),
        window_strides=(1, 1), padding=((p, p), (p, p)),
        dimension_numbers=("NCHW", "OIHW", "NCHW"),
        precision=jax.lax.Precision.HIGHEST)
    y = y + conv_b[None, :, None, None]
    B, C, H, W = y.shape
    yg = y.reshape(B, groups, -1)
    mean = yg.mean(axis=-1, keepdims=True)
    var = yg.var(axis=-1, keepdims=True)
    yn = ((yg - mean) * jax.lax.rsqrt(var + eps)).reshape(B, C, H, W)
    out = yn * gamma[None, :, None, None] + beta[None, :, None, None]
    return out.astype(x.dtype)


if __name__ == "__main__":
    # Module config: ConvGN_LoRA(indim=16, outdim=32, kernel_size=3, gn_groups=8), r=8.
    B, Cin, H, W = 2, 16, 16, 16
    Cout, K, G, r = 32, 3, 8, 8

    key = jax.random.PRNGKey(0)
    ks = jax.random.split(key, 7)
    x = jax.random.normal(ks[0], (B, Cin, H, W), dtype=jnp.float32)
    conv_w = jax.random.normal(ks[1], (Cout, Cin, K, K), dtype=jnp.float32) \
        * (1.0 / (Cin * K * K) ** 0.5)
    conv_b = 0.5 * jax.random.normal(ks[2], (Cout,), dtype=jnp.float32)
    # loralib Conv2d parameter shapes: A (r*K, Cin*K), B (Cout*K, r*K)
    lora_A = 0.3 * jax.random.normal(ks[3], (r * K, Cin * K), dtype=jnp.float32)
    lora_B = 0.3 * jax.random.normal(ks[4], (Cout * K, r * K), dtype=jnp.float32)
    gamma = 1.0 + 0.1 * jax.random.normal(ks[5], (Cout,), dtype=jnp.float32)
    beta = 0.1 * jax.random.normal(ks[6], (Cout,), dtype=jnp.float32)

    out = conv_gn_lora(x, conv_w, conv_b, lora_A, lora_B, gamma, beta,
                       groups=G, r=r)
    out = jax.block_until_ready(out)

    ref = _reference(x, conv_w, conv_b, lora_A, lora_B, gamma, beta,
                     groups=G, r=r)
    assert out.shape == (B, Cout, H, W)
    assert jnp.allclose(out, ref, atol=2e-2, rtol=2e-2), "mismatch vs reference"

    print("KERNEL_OK")
</pallas_src>

<mosaic_0001>
module attributes {stable_mosaic.version = 11 : i64} {
  func.func @_conv_gn_kernel(%arg0: i32, %arg1: memref<2x16x384xf32, #tpu.memory_space<vmem>>, %arg2: memref<9x32x16xf32, #tpu.memory_space<vmem>>, %arg3: memref<9x384x256xf32, #tpu.memory_space<vmem>>, %arg4: memref<32x32xf32, #tpu.memory_space<vmem>>, %arg5: memref<32x1xf32, #tpu.memory_space<vmem>>, %arg6: memref<32x1xf32, #tpu.memory_space<vmem>>, %arg7: memref<32x1xf32, #tpu.memory_space<vmem>>, %arg8: memref<2x32x256xf32, #tpu.memory_space<vmem>>) attributes {dimension_semantics = [#tpu.dimension_semantics<parallel>], iteration_bounds = array<i64: 1>, scalar_prefetch = 0 : i64, scratch_operands = 0 : i64, tpu.core_type = #tpu.core_type<tc>, window_params = [{transform_indices = @transform_0, window_bounds = array<i64: 2, 16, 384>}, {pipeline_mode = #tpu.pipeline_mode<synchronous>, transform_indices = @transform_1, window_bounds = array<i64: 9, 32, 16>}, {pipeline_mode = #tpu.pipeline_mode<synchronous>, transform_indices = @transform_2, window_bounds = array<i64: 9, 384, 256>}, {pipeline_mode = #tpu.pipeline_mode<synchronous>, transform_indices = @transform_3, window_bounds = array<i64: 32, 32>}, {pipeline_mode = #tpu.pipeline_mode<synchronous>, transform_indices = @transform_4, window_bounds = array<i64: 32, 1>}, {pipeline_mode = #tpu.pipeline_mode<synchronous>, transform_indices = @transform_5, window_bounds = array<i64: 32, 1>}, {pipeline_mode = #tpu.pipeline_mode<synchronous>, transform_indices = @transform_6, window_bounds = array<i64: 32, 1>}, {transform_indices = @transform_7, window_bounds = array<i64: 2, 32, 256>}]} {
    %c0 = arith.constant 0 : index
    %c0_0 = arith.constant 0 : index
    %0 = vector.load %arg4[%c0, %c0_0] : memref<32x32xf32, #tpu.memory_space<vmem>>, vector<32x32xf32>
    %c0_1 = arith.constant 0 : index
    %c0_2 = arith.constant 0 : index
    %1 = vector.load %arg5[%c0_1, %c0_2] : memref<32x1xf32, #tpu.memory_space<vmem>>, vector<32x1xf32>
    %c0_3 = arith.constant 0 : index
    %c0_4 = arith.constant 0 : index
    %2 = vector.load %arg6[%c0_3, %c0_4] : memref<32x1xf32, #tpu.memory_space<vmem>>, vector<32x1xf32>
    %c0_5 = arith.constant 0 : index
    %c0_6 = arith.constant 0 : index
    %3 = vector.load %arg7[%c0_5, %c0_6] : memref<32x1xf32, #tpu.memory_space<vmem>>, vector<32x1xf32>
    %c0_7 = arith.constant 0 : index
    %c0_8 = arith.constant 0 : index
    %c0_9 = arith.constant 0 : index
    %4 = vector.load %arg1[%c0_7, %c0_8, %c0_9] : memref<2x16x384xf32, #tpu.memory_space<vmem>>, vector<1x16x384xf32>
    %5 = vector.shape_cast %4 : vector<1x16x384xf32> to vector<16x384xf32>
    %c0_10 = arith.constant 0 : index
    %c0_11 = arith.constant 0 : index
    %c0_12 = arith.constant 0 : index
    %6 = vector.load %arg3[%c0_10, %c0_11, %c0_12] : memref<9x384x256xf32, #tpu.memory_space<vmem>>, vector<1x384x256xf32>
    %7 = vector.shape_cast %6 : vector<1x384x256xf32> to vector<384x256xf32>
    %cst = arith.constant dense<0.000000e+00> : vector<16x256xf32>
    %8 = tpu.matmul %5, %7, %cst {dimension_numbers = #tpu.dot_dimension_numbers<[1], [0], [0], [1], [0, 0, 1, 1], [], []>} : vector<16x384xf32>, vector<384x256xf32>, vector<16x256xf32> -> vector<16x256xf32>
    %c0_13 = arith.constant 0 : index
    %c0_14 = arith.constant 0 : index
    %c0_15 = arith.constant 0 : index
    %9 = vector.load %arg2[%c0_13, %c0_14, %c0_15] : memref<9x32x16xf32, #tpu.memory_space<vmem>>, vector<1x32x16xf32>
    %10 = vector.shape_cast %9 : vector<1x32x16xf32> to vector<32x16xf32>
    %cst_16 = arith.constant dense<0.000000e+00> : vector<32x256xf32>
    %11 = tpu.matmul %10, %8, %cst_16 {dimension_numbers = #tpu.dot_dimension_numbers<[1], [0], [0], [1], [0, 0, 1, 1], [], []>} : vector<32x16xf32>, vector<16x256xf32>, vector<32x256xf32> -> vector<32x256xf32>
    %c1 = arith.constant 1 : index
    %c0_17 = arith.constant 0 : index
    %c0_18 = arith.constant 0 : index
    %12 = vector.load %arg3[%c1, %c0_17, %c0_18] : memref<9x384x256xf32, #tpu.memory_space<vmem>>, vector<1x384x256xf32>
    %13 = vector.shape_cast %12 : vector<1x384x256xf32> to vector<384x256xf32>
    %cst_19 = arith.constant dense<0.000000e+00> : vector<16x256xf32>
    %14 = tpu.matmul %5, %13, %cst_19 {dimension_numbers = #tpu.dot_dimension_numbers<[1], [0], [0], [1], [0, 0, 1, 1], [], []>} : vector<16x384xf32>, vector<384x256xf32>, vector<16x256xf32> -> vector<16x256xf32>
    %c1_20 = arith.constant 1 : index
    %c0_21 = arith.constant 0 : index
    %c0_22 = arith.constant 0 : index
    %15 = vector.load %arg2[%c1_20, %c0_21, %c0_22] : memref<9x32x16xf32, #tpu.memory_space<vmem>>, vector<1x32x16xf32>
    %16 = vector.shape_cast %15 : vector<1x32x16xf32> to vector<32x16xf32>
    %cst_23 = arith.constant dense<0.000000e+00> : vector<32x256xf32>
    %17 = tpu.matmul %16, %14, %cst_23 {dimension_numbers = #tpu.dot_dimension_numbers<[1], [0], [0], [1], [0, 0, 1, 1], [], []>} : vector<32x16xf32>, vector<16x256xf32>, vector<32x256xf32> -> vector<32x256xf32>
    %18 = arith.addf %11, %17 : vector<32x256xf32>
    %c2 = arith.constant 2 : index
    %c0_24 = arith.constant 0 : index
    %c0_25 = arith.constant 0 : index
    %19 = vector.load %arg3[%c2, %c0_24, %c0_25] : memref<9x384x256xf32, #tpu.memory_space<vmem>>, vector<1x384x256xf32>
    %20 = vector.shape_cast %19 : vector<1x384x256xf32> to vector<384x256xf32>
    %cst_26 = arith.constant dense<0.000000e+00> : vector<16x256xf32>
    %21 = tpu.matmul %5, %20, %cst_26 {dimension_numbers = #tpu.dot_dimension_numbers<[1], [0], [0], [1], [0, 0, 1, 1], [], []>} : vector<16x384xf32>, vector<384x256xf32>, vector<16x256xf32> -> vector<16x256xf32>
    %c2_27 = arith.constant 2 : index
    %c0_28 = arith.constant 0 : index
    %c0_29 = arith.constant 0 : index
    %22 = vector.load %arg2[%c2_27, %c0_28, %c0_29] : memref<9x32x16xf32, #tpu.memory_space<vmem>>, vector<1x32x16xf32>
    %23 = vector.shape_cast %22 : vector<1x32x16xf32> to vector<32x16xf32>
    %cst_30 = arith.constant dense<0.000000e+00> : vector<32x256xf32>
    %24 = tpu.matmul %23, %21, %cst_30 {dimension_numbers = #tpu.dot_dimension_numbers<[1], [0], [0], [1], [0, 0, 1, 1], [], []>} : vector<32x16xf32>, vector<16x256xf32>, vector<32x256xf32> -> vector<32x256xf32>
    %25 = arith.addf %18, %24 : vector<32x256xf32>
    %c3 = arith.constant 3 : index
    %c0_31 = arith.constant 0 : index
    %c0_32 = arith.constant 0 : index
    %26 = vector.load %arg3[%c3, %c0_31, %c0_32] : memref<9x384x256xf32, #tpu.memory_space<vmem>>, vector<1x384x256xf32>
    %27 = vector.shape_cast %26 : vector<1x384x256xf32> to vector<384x256xf32>
    %cst_33 = arith.constant dense<0.000000e+00> : vector<16x256xf32>
    %28 = tpu.matmul %5, %27, %cst_33 {dimension_numbers = #tpu.dot_dimension_numbers<[1], [0], [0], [1], [0, 0, 1, 1], [], []>} : vector<16x384xf32>, vector<384x256xf32>, vector<16x256xf32> -> vector<16x256xf32>
    %c3_34 = arith.constant 3 : index
    %c0_35 = arith.constant 0 : index
    %c0_36 = arith.constant 0 : index
    %29 = vector.load %arg2[%c3_34, %c0_35, %c0_36] : memref<9x32x16xf32, #tpu.memory_space<vmem>>, vector<1x32x16xf32>
    %30 = vector.shape_cast %29 : vector<1x32x16xf32> to vector<32x16xf32>
    %cst_37 = arith.constant dense<0.000000e+00> : vector<32x256xf32>
    %31 = tpu.matmul %30, %28, %cst_37 {dimension_numbers = #tpu.dot_dimension_numbers<[1], [0], [0], [1], [0, 0, 1, 1], [], []>} : vector<32x16xf32>, vector<16x256xf32>, vector<32x256xf32> -> vector<32x256xf32>
    %32 = arith.addf %25, %31 : vector<32x256xf32>
    %c4 = arith.constant 4 : index
    %c0_38 = arith.constant 0 : index
    %c0_39 = arith.constant 0 : index
    %33 = vector.load %arg3[%c4, %c0_38, %c0_39] : memref<9x384x256xf32, #tpu.memory_space<vmem>>, vector<1x384x256xf32>
    %34 = vector.shape_cast %33 : vector<1x384x256xf32> to vector<384x256xf32>
    %cst_40 = arith.constant dense<0.000000e+00> : vector<16x256xf32>
    %35 = tpu.matmul %5, %34, %cst_40 {dimension_numbers = #tpu.dot_dimension_numbers<[1], [0], [0], [1], [0, 0, 1, 1], [], []>} : vector<16x384xf32>, vector<384x256xf32>, vector<16x256xf32> -> vector<16x256xf32>
    %c4_41 = arith.constant 4 : index
    %c0_42 = arith.constant 0 : index
    %c0_43 = arith.constant 0 : index
    %36 = vector.load %arg2[%c4_41, %c0_42, %c0_43] : memref<9x32x16xf32, #tpu.memory_space<vmem>>, vector<1x32x16xf32>
    %37 = vector.shape_cast %36 : vector<1x32x16xf32> to vector<32x16xf32>
    %cst_44 = arith.constant dense<0.000000e+00> : vector<32x256xf32>
    %38 = tpu.matmul %37, %35, %cst_44 {dimension_numbers = #tpu.dot_dimension_numbers<[1], [0], [0], [1], [0, 0, 1, 1], [], []>} : vector<32x16xf32>, vector<16x256xf32>, vector<32x256xf32> -> vector<32x256xf32>
    %39 = arith.addf %32, %38 : vector<32x256xf32>
    %c5 = arith.constant 5 : index
    %c0_45 = arith.constant 0 : index
    %c0_46 = arith.constant 0 : index
    %40 = vector.load %arg3[%c5, %c0_45, %c0_46] : memref<9x384x256xf32, #tpu.memory_space<vmem>>, vector<1x384x256xf32>
    %41 = vector.shape_cast %40 : vector<1x384x256xf32> to vector<384x256xf32>
    %cst_47 = arith.constant dense<0.000000e+00> : vector<16x256xf32>
    %42 = tpu.matmul %5, %41, %cst_47 {dimension_numbers = #tpu.dot_dimension_numbers<[1], [0], [0], [1], [0, 0, 1, 1], [], []>} : vector<16x384xf32>, vector<384x256xf32>, vector<16x256xf32> -> vector<16x256xf32>
    %c5_48 = arith.constant 5 : index
    %c0_49 = arith.constant 0 : index
    %c0_50 = arith.constant 0 : index
    %43 = vector.load %arg2[%c5_48, %c0_49, %c0_50] : memref<9x32x16xf32, #tpu.memory_space<vmem>>, vector<1x32x16xf32>
    %44 = vector.shape_cast %43 : vector<1x32x16xf32> to vector<32x16xf32>
    %cst_51 = arith.constant dense<0.000000e+00> : vector<32x256xf32>
    %45 = tpu.matmul %44, %42, %cst_51 {dimension_numbers = #tpu.dot_dimension_numbers<[1], [0], [0], [1], [0, 0, 1, 1], [], []>} : vector<32x16xf32>, vector<16x256xf32>, vector<32x256xf32> -> vector<32x256xf32>
    %46 = arith.addf %39, %45 : vector<32x256xf32>
    %c6 = arith.constant 6 : index
    %c0_52 = arith.constant 0 : index
    %c0_53 = arith.constant 0 : index
    %47 = vector.load %arg3[%c6, %c0_52, %c0_53] : memref<9x384x256xf32, #tpu.memory_space<vmem>>, vector<1x384x256xf32>
    %48 = vector.shape_cast %47 : vector<1x384x256xf32> to vector<384x256xf32>
    %cst_54 = arith.constant dense<0.000000e+00> : vector<16x256xf32>
    %49 = tpu.matmul %5, %48, %cst_54 {dimension_numbers = #tpu.dot_dimension_numbers<[1], [0], [0], [1], [0, 0, 1, 1], [], []>} : vector<16x384xf32>, vector<384x256xf32>, vector<16x256xf32> -> vector<16x256xf32>
    %c6_55 = arith.constant 6 : index
    %c0_56 = arith.constant 0 : index
    %c0_57 = arith.constant 0 : index
    %50 = vector.load %arg2[%c6_55, %c0_56, %c0_57] : memref<9x32x16xf32, #tpu.memory_space<vmem>>, vector<1x32x16xf32>
    %51 = vector.shape_cast %50 : vector<1x32x16xf32> to vector<32x16xf32>
    %cst_58 = arith.constant dense<0.000000e+00> : vector<32x256xf32>
    %52 = tpu.matmul %51, %49, %cst_58 {dimension_numbers = #tpu.dot_dimension_numbers<[1], [0], [0], [1], [0, 0, 1, 1], [], []>} : vector<32x16xf32>, vector<16x256xf32>, vector<32x256xf32> -> vector<32x256xf32>
    %53 = arith.addf %46, %52 : vector<32x256xf32>
    %c7 = arith.constant 7 : index
    %c0_59 = arith.constant 0 : index
    %c0_60 = arith.constant 0 : index
    %54 = vector.load %arg3[%c7, %c0_59, %c0_60] : memref<9x384x256xf32, #tpu.memory_space<vmem>>, vector<1x384x256xf32>
    %55 = vector.shape_cast %54 : vector<1x384x256xf32> to vector<384x256xf32>
    %cst_61 = arith.constant dense<0.000000e+00> : vector<16x256xf32>
    %56 = tpu.matmul %5, %55, %cst_61 {dimension_numbers = #tpu.dot_dimension_numbers<[1], [0], [0], [1], [0, 0, 1, 1], [], []>} : vector<16x384xf32>, vector<384x256xf32>, vector<16x256xf32> -> vector<16x256xf32>
    %c7_62 = arith.constant 7 : index
    %c0_63 = arith.constant 0 : index
    %c0_64 = arith.constant 0 : index
    %57 = vector.load %arg2[%c7_62, %c0_63, %c0_64] : memref<9x32x16xf32, #tpu.memory_space<vmem>>, vector<1x32x16xf32>
    %58 = vector.shape_cast %57 : vector<1x32x16xf32> to vector<32x16xf32>
    %cst_65 = arith.constant dense<0.000000e+00> : vector<32x256xf32>
    %59 = tpu.matmul %58, %56, %cst_65 {dimension_numbers = #tpu.dot_dimension_numbers<[1], [0], [0], [1], [0, 0, 1, 1], [], []>} : vector<32x16xf32>, vector<16x256xf32>, vector<32x256xf32> -> vector<32x256xf32>
    %60 = arith.addf %53, %59 : vector<32x256xf32>
    %c8 = arith.constant 8 : index
    %c0_66 = arith.constant 0 : index
    %c0_67 = arith.constant 0 : index
    %61 = vector.load %arg3[%c8, %c0_66, %c0_67] : memref<9x384x256xf32, #tpu.memory_space<vmem>>, vector<1x384x256xf32>
    %62 = vector.shape_cast %61 : vector<1x384x256xf32> to vector<384x256xf32>
    %cst_68 = arith.constant dense<0.000000e+00> : vector<16x256xf32>
    %63 = tpu.matmul %5, %62, %cst_68 {dimension_numbers = #tpu.dot_dimension_numbers<[1], [0], [0], [1], [0, 0, 1, 1], [], []>} : vector<16x384xf32>, vector<384x256xf32>, vector<16x256xf32> -> vector<16x256xf32>
    %c8_69 = arith.constant 8 : index
    %c0_70 = arith.constant 0 : index
    %c0_71 = arith.constant 0 : index
    %64 = vector.load %arg2[%c8_69, %c0_70, %c0_71] : memref<9x32x16xf32, #tpu.memory_space<vmem>>, vector<1x32x16xf32>
    %65 = vector.shape_cast %64 : vector<1x32x16xf32> to vector<32x16xf32>
    %cst_72 = arith.constant dense<0.000000e+00> : vector<32x256xf32>
    %66 = tpu.matmul %65, %63, %cst_72 {dimension_numbers = #tpu.dot_dimension_numbers<[1], [0], [0], [1], [0, 0, 1, 1], [], []>} : vector<32x16xf32>, vector<16x256xf32>, vector<32x256xf32> -> vector<32x256xf32>
    %67 = arith.addf %60, %66 : vector<32x256xf32>
    %68 = vector.broadcast %1 : vector<32x1xf32> to vector<32x256xf32>
    %69 = arith.addf %67, %68 : vector<32x256xf32>
    %cst_73 = arith.constant dense<0.000000e+00> : vector<32xf32>
    %70 = vector.multi_reduction <add>, %69, %cst_73 [1] : vector<32x256xf32> to vector<32xf32>
    %71 = vector.shape_cast %70 : vector<32xf32> to vector<32x1xf32>
    %72 = arith.mulf %69, %69 : vector<32x256xf32>
    %cst_74 = arith.constant dense<0.000000e+00> : vector<32xf32>
    %73 = vector.multi_reduction <add>, %72, %cst_74 [1] : vector<32x256xf32> to vector<32xf32>
    %74 = vector.shape_cast %73 : vector<32xf32> to vector<32x1xf32>
    %cst_75 = arith.constant dense<0.000000e+00> : vector<32x1xf32>
    %75 = tpu.matmul %0, %71, %cst_75 {dimension_numbers = #tpu.dot_dimension_numbers<[1], [0], [0], [1], [0, 0, 1, 1], [], []>} : vector<32x32xf32>, vector<32x1xf32>, vector<32x1xf32> -> vector<32x1xf32>
    %cst_76 = arith.constant dense<0.000000e+00> : vector<32x1xf32>
    %76 = tpu.matmul %0, %74, %cst_76 {dimension_numbers = #tpu.dot_dimension_numbers<[1], [0], [0], [1], [0, 0, 1, 1], [], []>} : vector<32x32xf32>, vector<32x1xf32>, vector<32x1xf32> -> vector<32x1xf32>
    %77 = arith.mulf %75, %75 : vector<32x1xf32>
    %78 = arith.subf %76, %77 : vector<32x1xf32>
    %cst_77 = arith.constant 9.99999974E-6 : f32
    %79 = vector.broadcast %cst_77 : f32 to vector<32x1xf32>
    %80 = arith.addf %78, %79 : vector<32x1xf32>
    %81 = math.rsqrt %80 : vector<32x1xf32>
    %82 = arith.mulf %81, %2 : vector<32x1xf32>
    %83 = arith.mulf %75, %82 : vector<32x1xf32>
    %84 = arith.subf %3, %83 : vector<32x1xf32>
    %85 = vector.broadcast %82 : vector<32x1xf32> to vector<32x256xf32>
    %86 = arith.mulf %69, %85 : vector<32x256xf32>
    %87 = vector.broadcast %84 : vector<32x1xf32> to vector<32x256xf32>
    %88 = arith.addf %86, %87 : vector<32x256xf32>
    %c0_78 = arith.constant 0 : index
    %c0_79 = arith.constant 0 : index
    %c0_80 = arith.constant 0 : index
    %89 = vector.load %arg8[%c0_78, %c0_79, %c0_80] : memref<2x32x256xf32, #tpu.memory_space<vmem>>, vector<1x32x256xf32>
    %90 = vector.shape_cast %89 : vector<1x32x256xf32> to vector<32x256xf32>
    %91 = vector.shape_cast %88 : vector<32x256xf32> to vector<1x32x256xf32>
    tpu.vector_store %arg8[%c0_78, %c0_79, %c0_80], %91 {strides = array<i32>} : memref<2x32x256xf32, #tpu.memory_space<vmem>>, vector<1x32x256xf32>,
    %c1_81 = arith.constant 1 : index
    %c0_82 = arith.constant 0 : index
    %c0_83 = arith.constant 0 : index
    %92 = vector.load %arg1[%c1_81, %c0_82, %c0_83] : memref<2x16x384xf32, #tpu.memory_space<vmem>>, vector<1x16x384xf32>
    %93 = vector.shape_cast %92 : vector<1x16x384xf32> to vector<16x384xf32>
    %c0_84 = arith.constant 0 : index
    %c0_85 = arith.constant 0 : index
    %c0_86 = arith.constant 0 : index
    %94 = vector.load %arg3[%c0_84, %c0_85, %c0_86] : memref<9x384x256xf32, #tpu.memory_space<vmem>>, vector<1x384x256xf32>
    %95 = vector.shape_cast %94 : vector<1x384x256xf32> to vector<384x256xf32>
    %cst_87 = arith.constant dense<0.000000e+00> : vector<16x256xf32>
    %96 = tpu.matmul %93, %95, %cst_87 {dimension_numbers = #tpu.dot_dimension_numbers<[1], [0], [0], [1], [0, 0, 1, 1], [], []>} : vector<16x384xf32>, vector<384x256xf32>, vector<16x256xf32> -> vector<16x256xf32>
    %c0_88 = arith.constant 0 : index
    %c0_89 = arith.constant 0 : index
    %c0_90 = arith.constant 0 : index
    %97 = vector.load %arg2[%c0_88, %c0_89, %c0_90] : memref<9x32x16xf32, #tpu.memory_space<vmem>>, vector<1x32x16xf32>
    %98 = vector.shape_cast %97 : vector<1x32x16xf32> to vector<32x16xf32>
    %cst_91 = arith.constant dense<0.000000e+00> : vector<32x256xf32>
    %99 = tpu.matmul %98, %96, %cst_91 {dimension_numbers = #tpu.dot_dimension_numbers<[1], [0], [0], [1], [0, 0, 1, 1], [], []>} : vector<32x16xf32>, vector<16x256xf32>, vector<32x256xf32> -> vector<32x256xf32>
    %c1_92 = arith.constant 1 : index
    %c0_93 = arith.constant 0 : index
    %c0_94 = arith.constant 0 : index
    %100 = vector.load %arg3[%c1_92, %c0_93, %c0_94] : memref<9x384x256xf32, #tpu.memory_space<vmem>>, vector<1x384x256xf32>
    %101 = vector.shape_cast %100 : vector<1x384x256xf32> to vector<384x256xf32>
    %cst_95 = arith.constant dense<0.000000e+00> : vector<16x256xf32>
    %102 = tpu.matmul %93, %101, %cst_95 {dimension_numbers = #tpu.dot_dimension_numbers<[1], [0], [0], [1], [0, 0, 1, 1], [], []>} : vector<16x384xf32>, vector<384x256xf32>, vector<16x256xf32> -> vector<16x256xf32>
    %c1_96 = arith.constant 1 : index
    %c0_97 = arith.constant 0 : index
    %c0_98 = arith.constant 0 : index
    %103 = vector.load %arg2[%c1_96, %c0_97, %c0_98] : memref<9x32x16xf32, #tpu.memory_space<vmem>>, vector<1x32x16xf32>
    %104 = vector.shape_cast %103 : vector<1x32x16xf32> to vector<32x16xf32>
    %cst_99 = arith.constant dense<0.000000e+00> : vector<32x256xf32>
    %105 = tpu.matmul %104, %102, %cst_99 {dimension_numbers = #tpu.dot_dimension_numbers<[1], [0], [0], [1], [0, 0, 1, 1], [], []>} : vector<32x16xf32>, vector<16x256xf32>, vector<32x256xf32> -> vector<32x256xf32>
    %106 = arith.addf %99, %105 : vector<32x256xf32>
    %c2_100 = arith.constant 2 : index
    %c0_101 = arith.constant 0 : index
    %c0_102 = arith.constant 0 : index
    %107 = vector.load %arg3[%c2_100, %c0_101, %c0_102] : memref<9x384x256xf32, #tpu.memory_space<vmem>>, vector<1x384x256xf32>
    %108 = vector.shape_cast %107 : vector<1x384x256xf32> to vector<384x256xf32>
    %cst_103 = arith.constant dense<0.000000e+00> : vector<16x256xf32>
    %109 = tpu.matmul %93, %108, %cst_103 {dimension_numbers = #tpu.dot_dimension_numbers<[1], [0], [0], [1], [0, 0, 1, 1], [], []>} : vector<16x384xf32>, vector<384x256xf32>, vector<16x256xf32> -> vector<16x256xf32>
    %c2_104 = arith.constant 2 : index
    %c0_105 = arith.constant 0 : index
    %c0_106 = arith.constant 0 : index
    %110 = vector.load %arg2[%c2_104, %c0_105, %c0_106] : memref<9x32x16xf32, #tpu.memory_space<vmem>>, vector<1x32x16xf32>
    %111 = vector.shape_cast %110 : vector<1x32x16xf32> to vector<32x16xf32>
    %cst_107 = arith.constant dense<0.000000e+00> : vector<32x256xf32>
    %112 = tpu.matmul %111, %109, %cst_107 {dimension_numbers = #tpu.dot_dimension_numbers<[1], [0], [0], [1], [0, 0, 1, 1], [], []>} : vector<32x16xf32>, vector<16x256xf32>, vector<32x256xf32> -> vector<32x256xf32>
    %113 = arith.addf %106, %112 : vector<32x256xf32>
    %c3_108 = arith.constant 3 : index
    %c0_109 = arith.constant 0 : index
    %c0_110 = arith.constant 0 : index
    %114 = vector.load %arg3[%c3_108, %c0_109, %c0_110] : memref<9x384x256xf32, #tpu.memory_space<vmem>>, vector<1x384x256xf32>
    %115 = vector.shape_cast %114 : vector<1x384x256xf32> to vector<384x256xf32>
    %cst_111 = arith.constant dense<0.000000e+00> : vector<16x256xf32>
    %116 = tpu.matmul %93, %115, %cst_111 {dimension_numbers = #tpu.dot_dimension_numbers<[1], [0], [0], [1], [0, 0, 1, 1], [], []>} : vector<16x384xf32>, vector<384x256xf32>, vector<16x256xf32> -> vector<16x256xf32>
    %c3_112 = arith.constant 3 : index
    %c0_113 = arith.constant 0 : index
    %c0_114 = arith.constant 0 : index
    %117 = vector.load %arg2[%c3_112, %c0_113, %c0_114] : memref<9x32x16xf32, #tpu.memory_space<vmem>>, vector<1x32x16xf32>
    %118 = vector.shape_cast %117 : vector<1x32x16xf32> to vector<32x16xf32>
    %cst_115 = arith.constant dense<0.000000e+00> : vector<32x256xf32>
    %119 = tpu.matmul %118, %116, %cst_115 {dimension_numbers = #tpu.dot_dimension_numbers<[1], [0], [0], [1], [0, 0, 1, 1], [], []>} : vector<32x16xf32>, vector<16x256xf32>, vector<32x256xf32> -> vector<32x256xf32>
    %120 = arith.addf %113, %119 : vector<32x256xf32>
    %c4_116 = arith.constant 4 : index
    %c0_117 = arith.constant 0 : index
    %c0_118 = arith.constant 0 : index
    %121 = vector.load %arg3[%c4_116, %c0_117, %c0_118] : memref<9x384x256xf32, #tpu.memory_space<vmem>>, vector<1x384x256xf32>
    %122 = vector.shape_cast %121 : vector<1x384x256xf32> to vector<384x256xf32>
    %cst_119 = arith.constant dense<0.000000e+00> : vector<16x256xf32>
    %123 = tpu.matmul %93, %122, %cst_119 {dimension_numbers = #tpu.dot_dimension_numbers<[1], [0], [0], [1], [0, 0, 1, 1], [], []>} : vector<16x384xf32>, vector<384x256xf32>, vector<16x256xf32> -> vector<16x256xf32>
    %c4_120 = arith.constant 4 : index
    %c0_121 = arith.constant 0 : index
    %c0_122 = arith.constant 0 : index
    %124 = vector.load %arg2[%c4_120, %c0_121, %c0_122] : memref<9x32x16xf32, #tpu.memory_space<vmem>>, vector<1x32x16xf32>
    %125 = vector.shape_cast %124 : vector<1x32x16xf32> to vector<32x16xf32>
    %cst_123 = arith.constant dense<0.000000e+00> : vector<32x256xf32>
    %126 = tpu.matmul %125, %123, %cst_123 {dimension_numbers = #tpu.dot_dimension_numbers<[1], [0], [0], [1], [0, 0, 1, 1], [], []>} : vector<32x16xf32>, vector<16x256xf32>, vector<32x256xf32> -> vector<32x256xf32>
    %127 = arith.addf %120, %126 : vector<32x256xf32>
    %c5_124 = arith.constant 5 : index
    %c0_125 = arith.constant 0 : index
    %c0_126 = arith.constant 0 : index
    %128 = vector.load %arg3[%c5_124, %c0_125, %c0_126] : memref<9x384x256xf32, #tpu.memory_space<vmem>>, vector<1x384x256xf32>
    %129 = vector.shape_cast %128 : vector<1x384x256xf32> to vector<384x256xf32>
    %cst_127 = arith.constant dense<0.000000e+00> : vector<16x256xf32>
    %130 = tpu.matmul %93, %129, %cst_127 {dimension_numbers = #tpu.dot_dimension_numbers<[1], [0], [0], [1], [0, 0, 1, 1], [], []>} : vector<16x384xf32>, vector<384x256xf32>, vector<16x256xf32> -> vector<16x256xf32>
    %c5_128 = arith.constant 5 : index
    %c0_129 = arith.constant 0 : index
    %c0_130 = arith.constant 0 : index
    %131 = vector.load %arg2[%c5_128, %c0_129, %c0_130] : memref<9x32x16xf32, #tpu.memory_space<vmem>>, vector<1x32x16xf32>
    %132 = vector.shape_cast %131 : vector<1x32x16xf32> to vector<32x16xf32>
    %cst_131 = arith.constant dense<0.000000e+00> : vector<32x256xf32>
    %133 = tpu.matmul %132, %130, %cst_131 {dimension_numbers = #tpu.dot_dimension_numbers<[1], [0], [0], [1], [0, 0, 1, 1], [], []>} : vector<32x16xf32>, vector<16x256xf32>, vector<32x256xf32> -> vector<32x256xf32>
    %134 = arith.addf %127, %133 : vector<32x256xf32>
    %c6_132 = arith.constant 6 : index
    %c0_133 = arith.constant 0 : index
    %c0_134 = arith.constant 0 : index
    %135 = vector.load %arg3[%c6_132, %c0_133, %c0_134] : memref<9x384x256xf32, #tpu.memory_space<vmem>>, vector<1x384x256xf32>
    %136 = vector.shape_cast %135 : vector<1x384x256xf32> to vector<384x256xf32>
    %cst_135 = arith.constant dense<0.000000e+00> : vector<16x256xf32>
    %137 = tpu.matmul %93, %136, %cst_135 {dimension_numbers = #tpu.dot_dimension_numbers<[1], [0], [0], [1], [0, 0, 1, 1], [], []>} : vector<16x384xf32>, vector<384x256xf32>, vector<16x256xf32> -> vector<16x256xf32>
    %c6_136 = arith.constant 6 : index
    %c0_137 = arith.constant 0 : index
    %c0_138 = arith.constant 0 : index
    %138 = vector.load %arg2[%c6_136, %c0_137, %c0_138] : memref<9x32x16xf32, #tpu.memory_space<vmem>>, vector<1x32x16xf32>
    %139 = vector.shape_cast %138 : vector<1x32x16xf32> to vector<32x16xf32>
    %cst_139 = arith.constant dense<0.000000e+00> : vector<32x256xf32>
    %140 = tpu.matmul %139, %137, %cst_139 {dimension_numbers = #tpu.dot_dimension_numbers<[1], [0], [0], [1], [0, 0, 1, 1], [], []>} : vector<32x16xf32>, vector<16x256xf32>, vector<32x256xf32> -> vector<32x256xf32>
    %141 = arith.addf %134, %140 : vector<32x256xf32>
    %c7_140 = arith.constant 7 : index
    %c0_141 = arith.constant 0 : index
    %c0_142 = arith.constant 0 : index
    %142 = vector.load %arg3[%c7_140, %c0_141, %c0_142] : memref<9x384x256xf32, #tpu.memory_space<vmem>>, vector<1x384x256xf32>
    %143 = vector.shape_cast %142 : vector<1x384x256xf32> to vector<384x256xf32>
    %cst_143 = arith.constant dense<0.000000e+00> : vector<16x256xf32>
    %144 = tpu.matmul %93, %143, %cst_143 {dimension_numbers = #tpu.dot_dimension_numbers<[1], [0], [0], [1], [0, 0, 1, 1], [], []>} : vector<16x384xf32>, vector<384x256xf32>, vector<16x256xf32> -> vector<16x256xf32>
    %c7_144 = arith.constant 7 : index
    %c0_145 = arith.constant 0 : index
    %c0_146 = arith.constant 0 : index
    %145 = vector.load %arg2[%c7_144, %c0_145, %c0_146] : memref<9x32x16xf32, #tpu.memory_space<vmem>>, vector<1x32x16xf32>
    %146 = vector.shape_cast %145 : vector<1x32x16xf32> to vector<32x16xf32>
    %cst_147 = arith.constant dense<0.000000e+00> : vector<32x256xf32>
    %147 = tpu.matmul %146, %144, %cst_147 {dimension_numbers = #tpu.dot_dimension_numbers<[1], [0], [0], [1], [0, 0, 1, 1], [], []>} : vector<32x16xf32>, vector<16x256xf32>, vector<32x256xf32> -> vector<32x256xf32>
    %148 = arith.addf %141, %147 : vector<32x256xf32>
    %c8_148 = arith.constant 8 : index
    %c0_149 = arith.constant 0 : index
    %c0_150 = arith.constant 0 : index
    %149 = vector.load %arg3[%c8_148, %c0_149, %c0_150] : memref<9x384x256xf32, #tpu.memory_space<vmem>>, vector<1x384x256xf32>
    %150 = vector.shape_cast %149 : vector<1x384x256xf32> to vector<384x256xf32>
    %cst_151 = arith.constant dense<0.000000e+00> : vector<16x256xf32>
    %151 = tpu.matmul %93, %150, %cst_151 {dimension_numbers = #tpu.dot_dimension_numbers<[1], [0], [0], [1], [0, 0, 1, 1], [], []>} : vector<16x384xf32>, vector<384x256xf32>, vector<16x256xf32> -> vector<16x256xf32>
    %c8_152 = arith.constant 8 : index
    %c0_153 = arith.constant 0 : index
    %c0_154 = arith.constant 0 : index
    %152 = vector.load %arg2[%c8_152, %c0_153, %c0_154] : memref<9x32x16xf32, #tpu.memory_space<vmem>>, vector<1x32x16xf32>
    %153 = vector.shape_cast %152 : vector<1x32x16xf32> to vector<32x16xf32>
    %cst_155 = arith.constant dense<0.000000e+00> : vector<32x256xf32>
    %154 = tpu.matmul %153, %151, %cst_155 {dimension_numbers = #tpu.dot_dimension_numbers<[1], [0], [0], [1], [0, 0, 1, 1], [], []>} : vector<32x16xf32>, vector<16x256xf32>, vector<32x256xf32> -> vector<32x256xf32>
    %155 = arith.addf %148, %154 : vector<32x256xf32>
    %156 = vector.broadcast %1 : vector<32x1xf32> to vector<32x256xf32>
    %157 = arith.addf %155, %156 : vector<32x256xf32>
    %cst_156 = arith.constant dense<0.000000e+00> : vector<32xf32>
    %158 = vector.multi_reduction <add>, %157, %cst_156 [1] : vector<32x256xf32> to vector<32xf32>
    %159 = vector.shape_cast %158 : vector<32xf32> to vector<32x1xf32>
    %160 = arith.mulf %157, %157 : vector<32x256xf32>
    %cst_157 = arith.constant dense<0.000000e+00> : vector<32xf32>
    %161 = vector.multi_reduction <add>, %160, %cst_157 [1] : vector<32x256xf32> to vector<32xf32>
    %162 = vector.shape_cast %161 : vector<32xf32> to vector<32x1xf32>
    %cst_158 = arith.constant dense<0.000000e+00> : vector<32x1xf32>
    %163 = tpu.matmul %0, %159, %cst_158 {dimension_numbers = #tpu.dot_dimension_numbers<[1], [0], [0], [1], [0, 0, 1, 1], [], []>} : vector<32x32xf32>, vector<32x1xf32>, vector<32x1xf32> -> vector<32x1xf32>
    %cst_159 = arith.constant dense<0.000000e+00> : vector<32x1xf32>
    %164 = tpu.matmul %0, %162, %cst_159 {dimension_numbers = #tpu.dot_dimension_numbers<[1], [0], [0], [1], [0, 0, 1, 1], [], []>} : vector<32x32xf32>, vector<32x1xf32>, vector<32x1xf32> -> vector<32x1xf32>
    %165 = arith.mulf %163, %163 : vector<32x1xf32>
    %166 = arith.subf %164, %165 : vector<32x1xf32>
    %cst_160 = arith.constant 9.99999974E-6 : f32
    %167 = vector.broadcast %cst_160 : f32 to vector<32x1xf32>
    %168 = arith.addf %166, %167 : vector<32x1xf32>
    %169 = math.rsqrt %168 : vector<32x1xf32>
    %170 = arith.mulf %169, %2 : vector<32x1xf32>
    %171 = arith.mulf %163, %170 : vector<32x1xf32>
    %172 = arith.subf %3, %171 : vector<32x1xf32>
    %173 = vector.broadcast %170 : vector<32x1xf32> to vector<32x256xf32>
    %174 = arith.mulf %157, %173 : vector<32x256xf32>
    %175 = vector.broadcast %172 : vector<32x1xf32> to vector<32x256xf32>
    %176 = arith.addf %174, %175 : vector<32x256xf32>
    %c1_161 = arith.constant 1 : index
    %c0_162 = arith.constant 0 : index
    %c0_163 = arith.constant 0 : index
    %177 = vector.load %arg8[%c1_161, %c0_162, %c0_163] : memref<2x32x256xf32, #tpu.memory_space<vmem>>, vector<1x32x256xf32>
    %178 = vector.shape_cast %177 : vector<1x32x256xf32> to vector<32x256xf32>
    %179 = vector.shape_cast %176 : vector<32x256xf32> to vector<1x32x256xf32>
    tpu.vector_store %arg8[%c1_161, %c0_162, %c0_163], %179 {strides = array<i32>} : memref<2x32x256xf32, #tpu.memory_space<vmem>>, vector<1x32x256xf32>,
    return
  }
  func.func @transform_0(%arg0: i32) -> (i32, i32, i32) {
    %c0_i32 = arith.constant 0 : i32
    %c0_i32_0 = arith.constant 0 : i32
    %c0_i32_1 = arith.constant 0 : i32
    return %arg0, %c0_i32, %c0_i32_0 : i32, i32, i32
  }
  func.func @transform_1(%arg0: i32) -> (i32, i32, i32) {
    %c0_i32 = arith.constant 0 : i32
    %c0_i32_0 = arith.constant 0 : i32
    %c0_i32_1 = arith.constant 0 : i32
    %c0_i32_2 = arith.constant 0 : i32
    return %c0_i32, %c0_i32_0, %c0_i32_1 : i32, i32, i32
  }
  func.func @transform_2(%arg0: i32) -> (i32, i32, i32) {
    %c0_i32 = arith.constant 0 : i32
    %c0_i32_0 = arith.constant 0 : i32
    %c0_i32_1 = arith.constant 0 : i32
    %c0_i32_2 = arith.constant 0 : i32
    return %c0_i32, %c0_i32_0, %c0_i32_1 : i32, i32, i32
  }
  func.func @transform_3(%arg0: i32) -> (i32, i32) {
    %c0_i32 = arith.constant 0 : i32
    %c0_i32_0 = arith.constant 0 : i32
    %c0_i32_1 = arith.constant 0 : i32
    return %c0_i32, %c0_i32_0 : i32, i32
  }
  func.func @transform_4(%arg0: i32) -> (i32, i32) {
    %c0_i32 = arith.constant 0 : i32
    %c0_i32_0 = arith.constant 0 : i32
    %c0_i32_1 = arith.constant 0 : i32
    return %c0_i32, %c0_i32_0 : i32, i32
  }
  func.func @transform_5(%arg0: i32) -> (i32, i32) {
    %c0_i32 = arith.constant 0 : i32
    %c0_i32_0 = arith.constant 0 : i32
    %c0_i32_1 = arith.constant 0 : i32
    return %c0_i32, %c0_i32_0 : i32, i32
  }
  func.func @transform_6(%arg0: i32) -> (i32, i32) {
    %c0_i32 = arith.constant 0 : i32
    %c0_i32_0 = arith.constant 0 : i32
    %c0_i32_1 = arith.constant 0 : i32
    return %c0_i32, %c0_i32_0 : i32, i32
  }
  func.func @transform_7(%arg0: i32) -> (i32, i32, i32) {
    %c0_i32 = arith.constant 0 : i32
    %c0_i32_0 = arith.constant 0 : i32
    %c0_i32_1 = arith.constant 0 : i32
    return %arg0, %c0_i32, %c0_i32_0 : i32, i32, i32
  }
}

</mosaic_0001>

<bundles_post_ra>
// kernel: tpu_custom_call.1
= control target key start
LH: loop header
LB: loop body
LE: loop exit
PB: predicated region body
PF: predicated region fallthrough
CT: control target
= control target key end

     0   :  { %12 = vsyncpa [#allocation3], 0  ;;  %s8860_s0 = inlined_call_operand.hbm [shape: f32[2,16,384], index: 0, kind: input, shape index: {}]   ;;  %s8861_s1 = inlined_call_operand.vmem [shape: f32[9,32,16], index: 1, kind: input, shape index: {}]   ;;  %s8862_s2 = inlined_call_operand.hbm [shape: f32[9,384,256], index: 2, kind: input, shape index: {}]   ;;  %s8863_s3 = inlined_call_operand.hbm [shape: f32[32,32], index: 3, kind: input, shape index: {}]   ;;  %s8864_s4 = inlined_call_operand.vmem [shape: f32[32,1], index: 4, kind: input, shape index: {}]   ;;  %s8865_s5 = inlined_call_operand.vmem [shape: f32[32,1], index: 5, kind: input, shape index: {}]   ;;  %s8866_s6 = inlined_call_operand.vmem [shape: f32[32,1], index: 6, kind: input, shape index: {}]   ;;  %s8867_s7 = inlined_call_operand.hbm [shape: f32[2,32,256], index: 7, kind: output, shape index: {}]  }
   0x1   :  { %13 = vsyncpa [#allocation6], 0 }
   0x2   :  { %14 = vsyncpa [#allocation4], 0  ;;  %s7663_s24 = smov [#allocation5]  }
   0x3   :  { %s34_s25 = sshll.u32 %s7663_s24, 4  ;;  %s35_s25 = int_to_ptr.vmem [resolvable:$true] %s34_s25 }
   0x4   :  { %s7585_s26 = scalar_lea.vmem %s35_s25, 110592  ;;  %p7590_p1 = scmp.lt.s32.totalorder %s35_s25, %s35_s25 }
   0x5   :  { %p7586_p0 = scmp.ne.s32.totalorder %s35_s25, %s7585_s26  ;;  %p7591_p2 = scmp.lt.s32.totalorder %s7585_s26, %s7585_s26 }
   0x7   :  { %p7592_p3 = por %p7591_p2, %p7590_p1 }
   0x9   :  { %p7593_p4 = pnand %p7592_p3, %p7586_p0 }
   0xb   :  { %7596 = shalt.err (!%p7593_p4)
}
   0xc   :  { %s7664_s27 = smov 256   ;;  %s7665_s28 = smov 16  }
   0xd   :  { %40 = dma.hbm_to_vmem [thread:$0]  %s8862_s2, 110592, %s35_s25, [#allocation6], %s7664_s27, %s7664_s27, %s7665_s28  }
   0xe   :  { %s7666_s8 = smov [#allocation2]  }
   0xf   :  { %s20_s9 = sshll.u32 %s7666_s8, 4  ;;  %s21_s9 = int_to_ptr.vmem [resolvable:$true] %s20_s9 }
  0x10   :  { %s7605_s10 = scalar_lea.vmem %s21_s9, 1536  ;;  %p7610_p6 = scmp.lt.s32.totalorder %s21_s9, %s21_s9 }
  0x11   :  { %p7606_p5 = scmp.ne.s32.totalorder %s21_s9, %s7605_s10  ;;  %p7611_p7 = scmp.lt.s32.totalorder %s7605_s10, %s7605_s10 }
  0x13   :  { %p7612_p8 = por %p7611_p7, %p7610_p6 }
  0x15   :  { %p7613_p9 = pnand %p7612_p8, %p7606_p5 }
  0x17   :  { %7616 = shalt.err (!%p7613_p9)
}
  0x18   :  { %s7667_s11 = smov 384   ;;  %s7668_s12 = smov 24  }
  0x19   :  { %26 = dma.hbm_to_vmem [thread:$0]  %s8860_s0, 1536, %s21_s9, [#allocation3], %s7667_s11, %s7667_s11, %s7668_s12  }
  0x1a   :  { %s7669_s15 = smov [#allocation7]  }
  0x1b   :  { %s46_s16 = sshll.u32 %s7669_s15, 4  ;;  %s47_s16 = int_to_ptr.vmem [resolvable:$true] %s46_s16 }
  0x1c   :  { %s7625_s2 = scalar_lea.vmem %s47_s16, 512  ;;  %p7630_p11 = scmp.lt.s32.totalorder %s47_s16, %s47_s16 }
  0x1d   :  { %p7626_p10 = scmp.ne.s32.totalorder %s47_s16, %s7625_s2  ;;  %p7631_p12 = scmp.lt.s32.totalorder %s7625_s2, %s7625_s2 }
  0x1f   :  { %p7632_p13 = por %p7631_p12, %p7630_p11 }
  0x21   :  { %p7633_p0 = pnand %p7632_p13, %p7626_p10 }
  0x23   :  { %7636 = shalt.err (!%p7633_p0)
}
  0x24   :  { %s7670_s17 = smov 128   ;;  %s7671_s18 = smov 8  }
  0x25   :  { %52 = dma.hbm_to_vmem [thread:$0]  %s8863_s3, 512, %s47_s16, [#allocation6], %s7670_s17, %s7670_s17, %s7671_s18  }
  0x26   :  { %7657 = dma.done.wait [#allocation3], 1536  }
  0x27   :  { %7658 = vsyncadd [#allocation3], 4294965760 }
  0x28   :  { %7659 = dma.done.wait [#allocation6], 111104  }
  0x29   :  { %7660 = vsyncadd [#allocation6], 4294856192  ;;  %v7672_v0 = vmov 0.0   ;;  %v121_v1 = vld [vmem:[#allocation5 + $0xf8] sm:$0xff]  ;;  %v120_v3 = vld [vmem:[#allocation5 + $0xf0] sm:$0xff]  ;;  %vm600_vm0 = vcmask 130048  }
  0x2a   :  { %327 = vmatprep.mubr.f32.mxu1 %v7672_v0  ;;  %v185_v2 = vld [vmem:[#allocation5 + $0x2f8] sm:$0xff]  ;;  %186 = vmatprep.subr.mxu0 %v121_v1  ;;  %v184_v4 = vld [vmem:[#allocation5 + $0x2f0] sm:$0xff]  ;;  %v119_v5 = vld [vmem:[#allocation5 + $0xe8] sm:$0xff]  ;;  %vm3418_vm1 = vcmask 261120  }
  0x2b   :  { %263 = vmatprep.subr.mxu1 %v185_v2  ;;  %v183_v6 = vld [vmem:[#allocation5 + $0x2e8] sm:$0xff]  ;;  %187 = vmatpush1.msra.mxu0 %v120_v3  ;;  %v118_v7 = vld [vmem:[#allocation5 + $0xe0] sm:$0xff]  ;;  %v117_v9 = vld [vmem:[#allocation5 + $0xd8] sm:$0xff] }
  0x2c   :  { %264 = vmatpush1.msra.mxu1 %v184_v4  ;;  %v182_v8 = vld [vmem:[#allocation5 + $0x2e0] sm:$0xff]  ;;  %188 = vmatprep.subr.mxu0 %v119_v5  ;;  %v181_v10 = vld [vmem:[#allocation5 + $0x2d8] sm:$0xff]  ;;  %v116_v11 = vld [vmem:[#allocation5 + $0xd0] sm:$0xff] }
  0x2d   :  { %265 = vmatprep.subr.mxu1 %v183_v6  ;;  %v180_v12 = vld [vmem:[#allocation5 + $0x2d0] sm:$0xff]  ;;  %189 = vmatpush1.msra.mxu0 %v118_v7  ;;  %v115_v13 = vld [vmem:[#allocation5 + $0xc8] sm:$0xff]  ;;  %v114_v15 = vld [vmem:[#allocation5 + $0xc0] sm:$0xff] }
  0x2e   :  { %266 = vmatpush1.msra.mxu1 %v182_v8  ;;  %v179_v14 = vld [vmem:[#allocation5 + $0x2c8] sm:$0xff]  ;;  %190 = vmatprep.subr.mxu0 %v117_v9  ;;  %v178_v16 = vld [vmem:[#allocation5 + $0x2c0] sm:$0xff]  ;;  %v113_v17 = vld [vmem:[#allocation5 + $0xb8] sm:$0xff] }
  0x2f   :  { %267 = vmatprep.subr.mxu1 %v181_v10  ;;  %191 = vmatpush1.msra.mxu0 %v116_v11  ;;  %v177_v18 = vld [vmem:[#allocation5 + $0x2b8] sm:$0xff]  ;;  %v112_v19 = vld [vmem:[#allocation5 + $0xb0] sm:$0xff]  ;;  %v111_v21 = vld [vmem:[#allocation5 + $0xa8] sm:$0xff] }
  0x30   :  { %268 = vmatpush1.msra.mxu1 %v180_v12  ;;  %192 = vmatprep.subr.mxu0 %v115_v13  ;;  %v176_v20 = vld [vmem:[#allocation5 + $0x2b0] sm:$0xff]  ;;  %v175_v22 = vld [vmem:[#allocation5 + $0x2a8] sm:$0xff]  ;;  %v110_v23 = vld [vmem:[#allocation5 + $0xa0] sm:$0xff] }
  0x31   :  { %269 = vmatprep.subr.mxu1 %v179_v14  ;;  %193 = vmatpush1.msra.mxu0 %v114_v15  ;;  %v174_v24 = vld [vmem:[#allocation5 + $0x2a0] sm:$0xff]  ;;  %v109_v25 = vld [vmem:[#allocation5 + $0x98] sm:$0xff]  ;;  %v108_v27 = vld [vmem:[#allocation5 + $0x90] sm:$0xff] }
  0x32   :  { %270 = vmatpush1.msra.mxu1 %v178_v16  ;;  %194 = vmatprep.subr.mxu0 %v113_v17  ;;  %v173_v26 = vld [vmem:[#allocation5 + $0x298] sm:$0xff]  ;;  %v172_v28 = vld [vmem:[#allocation5 + $0x290] sm:$0xff]  ;;  %v107_v29 = vld [vmem:[#allocation5 + $0x88] sm:$0xff] }
  0x33   :  { %271 = vmatprep.subr.mxu1 %v177_v18  ;;  %195 = vmatpush1.msra.mxu0 %v112_v19  ;;  %v171_v30 = vld [vmem:[#allocation5 + $0x288] sm:$0xff]  ;;  %v106_v31 = vld [vmem:[#allocation5 + $0x80] sm:$0xff]  ;;  %v105_v33 = vld [vmem:[#allocation5 + $0x78] sm:$0xff] }
  0x34   :  { %272 = vmatpush1.msra.mxu1 %v176_v20  ;;  %196 = vmatprep.subr.mxu0 %v111_v21  ;;  %v170_v32 = vld [vmem:[#allocation5 + $0x280] sm:$0xff]  ;;  %v169_v34 = vld [vmem:[#allocation5 + $0x278] sm:$0xff]  ;;  %v104_v35 = vld [vmem:[#allocation5 + $0x70] sm:$0xff] }
  0x35   :  { %273 = vmatprep.subr.mxu1 %v175_v22  ;;  %197 = vmatpush1.msra.mxu0 %v110_v23  ;;  %v168_v36 = vld [vmem:[#allocation5 + $0x270] sm:$0xff]  ;;  %v103_v37 = vld [vmem:[#allocation5 + $0x68] sm:$0xff]  ;;  %v102_v39 = vld [vmem:[#allocation5 + $0x60] sm:$0xff] }
  0x36   :  { %274 = vmatpush1.msra.mxu1 %v174_v24  ;;  %198 = vmatprep.subr.mxu0 %v109_v25  ;;  %v167_v38 = vld [vmem:[#allocation5 + $0x268] sm:$0xff]  ;;  %v166_v40 = vld [vmem:[#allocation5 + $0x260] sm:$0xff]  ;;  %v101_v41 = vld [vmem:[#allocation5 + $0x58] sm:$0xff] }
  0x37   :  { %275 = vmatprep.subr.mxu1 %v173_v26  ;;  %199 = vmatpush1.msra.mxu0 %v108_v27  ;;  %v165_v42 = vld [vmem:[#allocation5 + $0x258] sm:$0xff]  ;;  %v100_v43 = vld [vmem:[#allocation5 + $0x50] sm:$0xff]  ;;  %v99_v45 = vld [vmem:[#allocation5 + $0x48] sm:$0xff] }
  0x38   :  { %276 = vmatpush1.msra.mxu1 %v172_v28  ;;  %200 = vmatprep.subr.mxu0 %v107_v29  ;;  %v164_v44 = vld [vmem:[#allocation5 + $0x250] sm:$0xff]  ;;  %v163_v46 = vld [vmem:[#allocation5 + $0x248] sm:$0xff]  ;;  %v98_v47 = vld [vmem:[#allocation5 + $0x40] sm:$0xff] }
  0x39   :  { %277 = vmatprep.subr.mxu1 %v171_v30  ;;  %201 = vmatpush1.msra.mxu0 %v106_v31  ;;  %v162_v48 = vld [vmem:[#allocation5 + $0x240] sm:$0xff]  ;;  %v97_v49 = vld [vmem:[#allocation5 + $0x38] sm:$0xff]  ;;  %v96_v51 = vld [vmem:[#allocation5 + $0x30] sm:$0xff] }
  0x3a   :  { %278 = vmatpush1.msra.mxu1 %v170_v32  ;;  %202 = vmatprep.subr.mxu0 %v105_v33  ;;  %v161_v50 = vld [vmem:[#allocation5 + $0x238] sm:$0xff]  ;;  %v160_v52 = vld [vmem:[#allocation5 + $0x230] sm:$0xff]  ;;  %v95_v53 = vld [vmem:[#allocation5 + $0x28] sm:$0xff] }
  0x3b   :  { %279 = vmatprep.subr.mxu1 %v169_v34  ;;  %203 = vmatpush1.msra.mxu0 %v104_v35  ;;  %v159_v54 = vld [vmem:[#allocation5 + $0x228] sm:$0xff]  ;;  %v94_v55 = vld [vmem:[#allocation5 + $0x20] sm:$0xff]  ;;  %v93_v57 = vld [vmem:[#allocation5 + $0x18] sm:$0xff] }
  0x3c   :  { %280 = vmatpush1.msra.mxu1 %v168_v36  ;;  %204 = vmatprep.subr.mxu0 %v103_v37  ;;  %v158_v56 = vld [vmem:[#allocation5 + $0x220] sm:$0xff]  ;;  %v157_v58 = vld [vmem:[#allocation5 + $0x218] sm:$0xff]  ;;  %v92_v59 = vld [vmem:[#allocation5 + $0x10] sm:$0xff] }
  0x3d   :  { %281 = vmatprep.subr.mxu1 %v167_v38  ;;  %205 = vmatpush1.msra.mxu0 %v102_v39  ;;  %v156_v60 = vld [vmem:[#allocation5 + $0x210] sm:$0xff]  ;;  %v91_v61 = vld [vmem:[#allocation5 + $0x8] sm:$0xff]  ;;  %v90_v63 = vld [vmem:[#allocation5] sm:$0xff] }
  0x3e   :  { %282 = vmatpush1.msra.mxu1 %v166_v40  ;;  %206 = vmatprep.subr.mxu0 %v101_v41  ;;  %v155_v62 = vld [vmem:[#allocation5 + $0x208] sm:$0xff]  ;;  %v154_v1 = vld [vmem:[#allocation5 + $0x200] sm:$0xff]  ;;  %v153_v2 = vld [vmem:[#allocation5 + $0x1f8] sm:$0xff] }
  0x3f   :  { %283 = vmatprep.subr.mxu1 %v165_v42  ;;  %207 = vmatpush1.msra.mxu0 %v100_v43  ;;  %v7728_v3 = vld [vmem:[#allocation2 + $0x10] sm:$0xff]  ;;  %v376_v4 = vld [vmem:[#allocation5 + $0x3f8] sm:$0xff]  ;;  %v151_v7 = vld [vmem:[#allocation5 + $0x1e8] sm:$0xff] }
  0x40   :  { %284 = vmatpush1.msra.mxu1 %v164_v44  ;;  %208 = vmatprep.subr.mxu0 %v99_v45  ;;  %v152_v5 = vld [vmem:[#allocation5 + $0x1f0] sm:$0xff]  ;;  %v374_v8 = vld [vmem:[#allocation5 + $0x3e8] sm:$0xff]  ;;  %v150_v9 = vld [vmem:[#allocation5 + $0x1e0] sm:$0xff] }
  0x41   :  { %285 = vmatprep.subr.mxu1 %v163_v46  ;;  %209 = vmatpush1.msra.mxu0 %v98_v47  ;;  %v375_v6 = vld [vmem:[#allocation5 + $0x3f0] sm:$0xff]  ;;  %v373_v10 = vld [vmem:[#allocation5 + $0x3e0] sm:$0xff]  ;;  %v149_v11 = vld [vmem:[#allocation5 + $0x1d8] sm:$0xff] }
  0x42   :  { %286 = vmatpush1.msra.mxu1 %v162_v48  ;;  %210 = vmatprep.subr.mxu0 %v97_v49  ;;  %v372_v12 = vld [vmem:[#allocation5 + $0x3d8] sm:$0xff]  ;;  %v148_v13 = vld [vmem:[#allocation5 + $0x1d0] sm:$0xff]  ;;  %v147_v15 = vld [vmem:[#allocation5 + $0x1c8] sm:$0xff] }
  0x43   :  { %287 = vmatprep.subr.mxu1 %v161_v50  ;;  %211 = vmatpush1.msra.mxu0 %v96_v51  ;;  %v371_v14 = vld [vmem:[#allocation5 + $0x3d0] sm:$0xff]  ;;  %v370_v16 = vld [vmem:[#allocation5 + $0x3c8] sm:$0xff]  ;;  %v146_v17 = vld [vmem:[#allocation5 + $0x1c0] sm:$0xff] }
  0x44   :  { %288 = vmatpush1.msra.mxu1 %v160_v52  ;;  %212 = vmatprep.subr.mxu0 %v95_v53  ;;  %v369_v18 = vld [vmem:[#allocation5 + $0x3c0] sm:$0xff]  ;;  %v145_v19 = vld [vmem:[#allocation5 + $0x1b8] sm:$0xff]  ;;  %v144_v21 = vld [vmem:[#allocation5 + $0x1b0] sm:$0xff] }
  0x45   :  { %289 = vmatprep.subr.mxu1 %v159_v54  ;;  %213 = vmatpush1.msra.mxu0 %v94_v55  ;;  %v368_v20 = vld [vmem:[#allocation5 + $0x3b8] sm:$0xff]  ;;  %v367_v22 = vld [vmem:[#allocation5 + $0x3b0] sm:$0xff]  ;;  %v143_v23 = vld [vmem:[#allocation5 + $0x1a8] sm:$0xff] }
  0x46   :  { %290 = vmatpush1.msra.mxu1 %v158_v56  ;;  %214 = vmatprep.subr.mxu0 %v93_v57  ;;  %v366_v24 = vld [vmem:[#allocation5 + $0x3a8] sm:$0xff]  ;;  %v142_v25 = vld [vmem:[#allocation5 + $0x1a0] sm:$0xff]  ;;  %v141_v27 = vld [vmem:[#allocation5 + $0x198] sm:$0xff] }
  0x47   :  { %291 = vmatprep.subr.mxu1 %v157_v58  ;;  %215 = vmatpush1.msra.mxu0 %v92_v59  ;;  %v365_v26 = vld [vmem:[#allocation5 + $0x3a0] sm:$0xff]  ;;  %v364_v28 = vld [vmem:[#allocation5 + $0x398] sm:$0xff]  ;;  %v140_v29 = vld [vmem:[#allocation5 + $0x190] sm:$0xff] }
  0x48   :  { %292 = vmatpush1.msra.mxu1 %v156_v60  ;;  %216 = vmatprep.subr.mxu0 %v91_v61  ;;  %v363_v30 = vld [vmem:[#allocation5 + $0x390] sm:$0xff]  ;;  %v139_v31 = vld [vmem:[#allocation5 + $0x188] sm:$0xff]  ;;  %v138_v33 = vld [vmem:[#allocation5 + $0x180] sm:$0xff] }
  0x49   :  { %293 = vmatprep.subr.mxu1 %v155_v62  ;;  %217 = vmatpush1.msra.mxu0 %v90_v63  ;;  %v362_v32 = vld [vmem:[#allocation5 + $0x388] sm:$0xff]  ;;  %v361_v34 = vld [vmem:[#allocation5 + $0x380] sm:$0xff]  ;;  %v137_v35 = vld [vmem:[#allocation5 + $0x178] sm:$0xff] }
  0x4a   :  { %294 = vmatpush1.msra.mxu1 %v154_v1  ;;  %218 = vmatprep.subr.mxu0 %v153_v2  ;;  %v360_v36 = vld [vmem:[#allocation5 + $0x378] sm:$0xff]  ;;  %v136_v37 = vld [vmem:[#allocation5 + $0x170] sm:$0xff]  ;;  %v135_v39 = vld [vmem:[#allocation5 + $0x168] sm:$0xff] }
  0x4b   :  { %328 = vmatmul.mubr.f32.vlgmr.msra.gmra.mxu1 %v7728_v3  ;;  %441 = vmatprep.subr.mxu1 %v376_v4  ;;  %v359_v38 = vld [vmem:[#allocation5 + $0x370] sm:$0xff]  ;;  %v358_v40 = vld [vmem:[#allocation5 + $0x368] sm:$0xff]  ;;  %v134_v41 = vld [vmem:[#allocation5 + $0x160] sm:$0xff] }
  0x4c   :  { %219 = vmatpush2.msra.mxu0 %v152_v5  ;;  %442 = vmatpush1.msra.mxu1 %v375_v6  ;;  %v357_v42 = vld [vmem:[#allocation5 + $0x360] sm:$0xff]  ;;  %v133_v43 = vld [vmem:[#allocation5 + $0x158] sm:$0xff]  ;;  %v132_v45 = vld [vmem:[#allocation5 + $0x150] sm:$0xff] }
  0x4d   :  { %220 = vmatprep.subr.mxu0 %v151_v7  ;;  %443 = vmatprep.subr.mxu1 %v374_v8  ;;  %v356_v44 = vld [vmem:[#allocation5 + $0x358] sm:$0xff]  ;;  %v355_v46 = vld [vmem:[#allocation5 + $0x350] sm:$0xff]  ;;  %v131_v47 = vld [vmem:[#allocation5 + $0x148] sm:$0xff] }
  0x4e   :  { %221 = vmatpush2.msra.mxu0 %v150_v9  ;;  %444 = vmatpush1.msra.mxu1 %v373_v10  ;;  %v354_v48 = vld [vmem:[#allocation5 + $0x348] sm:$0xff]  ;;  %v130_v49 = vld [vmem:[#allocation5 + $0x140] sm:$0xff]  ;;  %v129_v51 = vld [vmem:[#allocation5 + $0x138] sm:$0xff] }
  0x4f   :  { %222 = vmatprep.subr.mxu0 %v149_v11  ;;  %445 = vmatprep.subr.mxu1 %v372_v12  ;;  %v353_v50 = vld [vmem:[#allocation5 + $0x340] sm:$0xff]  ;;  %v352_v52 = vld [vmem:[#allocation5 + $0x338] sm:$0xff]  ;;  %v128_v53 = vld [vmem:[#allocation5 + $0x130] sm:$0xff] }
  0x50   :  { %223 = vmatpush2.msra.mxu0 %v148_v13  ;;  %446 = vmatpush1.msra.mxu1 %v371_v14  ;;  %v351_v54 = vld [vmem:[#allocation5 + $0x330] sm:$0xff]  ;;  %v127_v55 = vld [vmem:[#allocation5 + $0x128] sm:$0xff]  ;;  %v126_v57 = vld [vmem:[#allocation5 + $0x120] sm:$0xff] }
  0x51   :  { %224 = vmatprep.subr.mxu0 %v147_v15  ;;  %447 = vmatprep.subr.mxu1 %v370_v16  ;;  %v350_v56 = vld [vmem:[#allocation5 + $0x328] sm:$0xff]  ;;  %v349_v58 = vld [vmem:[#allocation5 + $0x320] sm:$0xff]  ;;  %v125_v59 = vld [vmem:[#allocation5 + $0x118] sm:$0xff] }
  0x52   :  { %225 = vmatpush2.msra.mxu0 %v146_v17  ;;  %448 = vmatpush1.msra.mxu1 %v369_v18  ;;  %v348_v60 = vld [vmem:[#allocation5 + $0x318] sm:$0xff]  ;;  %v124_v61 = vld [vmem:[#allocation5 + $0x110] sm:$0xff]  ;;  %v123_v63 = vld [vmem:[#allocation5 + $0x108] sm:$0xff] }
  0x53   :  { %226 = vmatprep.subr.mxu0 %v145_v19  ;;  %449 = vmatprep.subr.mxu1 %v368_v20  ;;  %v347_v62 = vld [vmem:[#allocation5 + $0x310] sm:$0xff]  ;;  %v346_v1 = vld [vmem:[#allocation5 + $0x308] sm:$0xff]  ;;  %v122_v2 = vld [vmem:[#allocation5 + $0x100] sm:$0xff] }
  0x54   :  { %227 = vmatpush2.msra.mxu0 %v144_v21  ;;  %450 = vmatpush1.msra.mxu1 %v367_v22  ;;  %v7731_v4 = vld [vmem:[#allocation2 + $0x8] sm:$0xff]  ;;  %v345_v5 = vld [vmem:[#allocation5 + $0x300] sm:$0xff]  ;;  %v408_v7 = vld [vmem:[#allocation5 + $0x4f8] sm:$0xff] }
  0x55   :  { %228 = vmatprep.subr.mxu0 %v143_v23  ;;  %451 = vmatprep.subr.mxu1 %v366_v24  ;;  %v7733_v6 = vld [vmem:[#allocation2] sm:$0xff]  ;;  %v440_v8 = vld [vmem:[#allocation5 + $0x5f8] sm:$0xff]  ;;  %v407_v9 = vld [vmem:[#allocation5 + $0x4f0] sm:$0xff] }
  0x56   :  { %229 = vmatpush2.msra.mxu0 %v142_v25  ;;  %452 = vmatpush1.msra.mxu1 %v365_v26  ;;  %v439_v10 = vld [vmem:[#allocation5 + $0x5f0] sm:$0xff]  ;;  %v406_v11 = vld [vmem:[#allocation5 + $0x4e8] sm:$0xff]  ;;  %v7737_v13 = vld [vmem:[#allocation2 + $0x20] sm:$0xff] }
  0x57   :  { %230 = vmatprep.subr.mxu0 %v141_v27  ;;  %453 = vmatprep.subr.mxu1 %v364_v28  ;;  %v438_v12 = vld [vmem:[#allocation5 + $0x5e8] sm:$0xff]  ;;  %v405_v14 = vld [vmem:[#allocation5 + $0x4e0] sm:$0xff]  ;;  %v7742_v17 = vld [vmem:[#allocation2 + $0x18] sm:$0xff] }
  0x58   :  { %231 = vmatpush2.msra.mxu0 %v140_v29  ;;  %454 = vmatpush1.msra.mxu1 %v363_v30  ;;  %v437_v15 = vld [vmem:[#allocation5 + $0x5e0] sm:$0xff]  ;;  %v7739_v16 = vld [vmem:[#allocation2 + $0x28] sm:$0xff]  ;;  %v404_v18 = vld [vmem:[#allocation5 + $0x4d8] sm:$0xff] }
  0x59   :  { %232 = vmatprep.subr.mxu0 %v139_v31  ;;  %455 = vmatprep.subr.mxu1 %v362_v32  ;;  %v436_v19 = vld [vmem:[#allocation5 + $0x5d8] sm:$0xff]  ;;  %v403_v20 = vld [vmem:[#allocation5 + $0x4d0] sm:$0xff]  ;;  %v402_v22 = vld [vmem:[#allocation5 + $0x4c8] sm:$0xff] }
  0x5a   :  { %233 = vmatpush2.msra.mxu0 %v138_v33  ;;  %456 = vmatpush1.msra.mxu1 %v361_v34  ;;  %v435_v21 = vld [vmem:[#allocation5 + $0x5d0] sm:$0xff]  ;;  %v434_v23 = vld [vmem:[#allocation5 + $0x5c8] sm:$0xff]  ;;  %v401_v24 = vld [vmem:[#allocation5 + $0x4c0] sm:$0xff] }
  0x5b   :  { %234 = vmatprep.subr.mxu0 %v137_v35  ;;  %457 = vmatprep.subr.mxu1 %v360_v36  ;;  %v433_v25 = vld [vmem:[#allocation5 + $0x5c0] sm:$0xff]  ;;  %v400_v26 = vld [vmem:[#allocation5 + $0x4b8] sm:$0xff]  ;;  %v399_v28 = vld [vmem:[#allocation5 + $0x4b0] sm:$0xff] }
  0x5c   :  { %235 = vmatpush2.msra.mxu0 %v136_v37  ;;  %458 = vmatpush1.msra.mxu1 %v359_v38  ;;  %v432_v27 = vld [vmem:[#allocation5 + $0x5b8] sm:$0xff]  ;;  %v431_v29 = vld [vmem:[#allocation5 + $0x5b0] sm:$0xff]  ;;  %v398_v30 = vld [vmem:[#allocation5 + $0x4a8] sm:$0xff] }
  0x5d   :  { %236 = vmatprep.subr.mxu0 %v135_v39  ;;  %459 = vmatprep.subr.mxu1 %v358_v40  ;;  %v430_v31 = vld [vmem:[#allocation5 + $0x5a8] sm:$0xff]  ;;  %v397_v32 = vld [vmem:[#allocation5 + $0x4a0] sm:$0xff]  ;;  %v396_v34 = vld [vmem:[#allocation5 + $0x498] sm:$0xff] }
  0x5e   :  { %237 = vmatpush2.msra.mxu0 %v134_v41  ;;  %460 = vmatpush1.msra.mxu1 %v357_v42  ;;  %v429_v33 = vld [vmem:[#allocation5 + $0x5a0] sm:$0xff]  ;;  %v428_v35 = vld [vmem:[#allocation5 + $0x598] sm:$0xff]  ;;  %v395_v36 = vld [vmem:[#allocation5 + $0x490] sm:$0xff] }
  0x5f   :  { %238 = vmatprep.subr.mxu0 %v133_v43  ;;  %461 = vmatprep.subr.mxu1 %v356_v44  ;;  %v427_v37 = vld [vmem:[#allocation5 + $0x590] sm:$0xff]  ;;  %v394_v38 = vld [vmem:[#allocation5 + $0x488] sm:$0xff]  ;;  %v393_v40 = vld [vmem:[#allocation5 + $0x480] sm:$0xff] }
  0x60   :  { %239 = vmatpush2.msra.mxu0 %v132_v45  ;;  %462 = vmatpush1.msra.mxu1 %v355_v46  ;;  %v426_v39 = vld [vmem:[#allocation5 + $0x588] sm:$0xff]  ;;  %v425_v41 = vld [vmem:[#allocation5 + $0x580] sm:$0xff]  ;;  %v392_v42 = vld [vmem:[#allocation5 + $0x478] sm:$0xff] }
  0x61   :  { %240 = vmatprep.subr.mxu0 %v131_v47  ;;  %463 = vmatprep.subr.mxu1 %v354_v48  ;;  %v424_v43 = vld [vmem:[#allocation5 + $0x578] sm:$0xff]  ;;  %v391_v44 = vld [vmem:[#allocation5 + $0x470] sm:$0xff]  ;;  %v390_v46 = vld [vmem:[#allocation5 + $0x468] sm:$0xff] }
  0x62   :  { %241 = vmatpush2.msra.mxu0 %v130_v49  ;;  %464 = vmatpush1.msra.mxu1 %v353_v50  ;;  %v423_v45 = vld [vmem:[#allocation5 + $0x570] sm:$0xff]  ;;  %v422_v47 = vld [vmem:[#allocation5 + $0x568] sm:$0xff]  ;;  %v389_v48 = vld [vmem:[#allocation5 + $0x460] sm:$0xff] }
  0x63   :  { %242 = vmatprep.subr.mxu0 %v129_v51  ;;  %465 = vmatprep.subr.mxu1 %v352_v52  ;;  %v421_v49 = vld [vmem:[#allocation5 + $0x560] sm:$0xff]  ;;  %v388_v50 = vld [vmem:[#allocation5 + $0x458] sm:$0xff]  ;;  %v387_v52 = vld [vmem:[#allocation5 + $0x450] sm:$0xff] }
  0x64   :  { %243 = vmatpush2.msra.mxu0 %v128_v53  ;;  %466 = vmatpush1.msra.mxu1 %v351_v54  ;;  %v420_v51 = vld [vmem:[#allocation5 + $0x558] sm:$0xff]  ;;  %v419_v53 = vld [vmem:[#allocation5 + $0x550] sm:$0xff]  ;;  %v386_v54 = vld [vmem:[#allocation5 + $0x448] sm:$0xff] }
  0x65   :  { %244 = vmatprep.subr.mxu0 %v127_v55  ;;  %467 = vmatprep.subr.mxu1 %v350_v56  ;;  %v418_v55 = vld [vmem:[#allocation5 + $0x548] sm:$0xff]  ;;  %v385_v56 = vld [vmem:[#allocation5 + $0x440] sm:$0xff] }
  0x66   :  { %245 = vmatpush2.msra.mxu0 %v126_v57  ;;  %468 = vmatpush1.msra.mxu1 %v349_v58  ;;  %v417_v57 = vld [vmem:[#allocation5 + $0x540] sm:$0xff]  ;;  %v384_v58 = vld [vmem:[#allocation5 + $0x438] sm:$0xff] }
  0x67   :  { %246 = vmatprep.subr.mxu0 %v125_v59  ;;  %469 = vmatprep.subr.mxu1 %v348_v60  ;;  %v416_v59 = vld [vmem:[#allocation5 + $0x538] sm:$0xff]  ;;  %v383_v60 = vld [vmem:[#allocation5 + $0x430] sm:$0xff] }
  0x68   :  { %247 = vmatpush2.msra.mxu0 %v124_v61  ;;  %470 = vmatpush1.msra.mxu1 %v347_v62  ;;  %v415_v61 = vld [vmem:[#allocation5 + $0x530] sm:$0xff]  ;;  %v382_v62 = vld [vmem:[#allocation5 + $0x428] sm:$0xff] }
  0x69   :  { %248 = vmatprep.subr.mxu0 %v123_v63  ;;  %471 = vmatprep.subr.mxu1 %v346_v1  ;;  %v414_v63 = vld [vmem:[#allocation5 + $0x528] sm:$0xff]  ;;  %v381_v1 = vld [vmem:[#allocation5 + $0x420] sm:$0xff] }
  0x6a   :  { %249 = vmatpush2.msra.mxu0 %v122_v2  ;;  %250 = vmatprep.mubr.f32.mxu0 %v7731_v4  ;;  %v413_v2 = vld [vmem:[#allocation5 + $0x520] sm:$0xff] }
  0x6b   :  { %472 = vmatpush1.msra.mxu1 %v345_v5  ;;  %251 = vmatmul.mubr.f32.vlgmr.msra.gmra.mxu0 %v7733_v6  ;;  %v380_v5 = vld [vmem:[#allocation5 + $0x418] sm:$0xff] }
  0x6c   :  { %473 = vmatprep.subr.mxu1 %v408_v7  ;;  %518 = vmatprep.subr.mxu0 %v440_v8  ;;  %v412_v7 = vld [vmem:[#allocation5 + $0x518] sm:$0xff]  ;;  %v379_v8 = vld [vmem:[#allocation5 + $0x410] sm:$0xff] }
  0x6d   :  { %474 = vmatpush2.msra.mxu1 %v407_v9  ;;  %519 = vmatpush1.msra.mxu0 %v439_v10  ;;  %v411_v9 = vld [vmem:[#allocation5 + $0x510] sm:$0xff]  ;;  %v378_v10 = vld [vmem:[#allocation5 + $0x408] sm:$0xff] }
  0x6e   :  { %475 = vmatprep.subr.mxu1 %v406_v11  ;;  %520 = vmatprep.subr.mxu0 %v438_v12  ;;  %v410_v11 = vld [vmem:[#allocation5 + $0x508] sm:$0xff]  ;;  %v377_v12 = vld [vmem:[#allocation5 + $0x400] sm:$0xff] }
  0x6f   :  { %256 = vmatprep.mubr.f32.mxu0 %v7737_v13  ;;  %333 = vmatprep.mubr.f32.mxu1 %v7672_v0 }
  0x70   :  { %476 = vmatpush2.msra.mxu1 %v405_v14  ;;  %521 = vmatpush1.msra.mxu0 %v437_v15  ;;  %v409_v14 = vld [vmem:[#allocation5 + $0x500] sm:$0xff] }
  0x71   :  { %334 = vmatmul.mubr.f32.gmra.mxu1 %v7739_v16  ;;  %257 = vmatmul.mubr.f32.gmra.mxu0 %v7742_v17 }
  0x72   :  { %477 = vmatprep.subr.mxu1 %v404_v18  ;;  %522 = vmatprep.subr.mxu0 %v436_v19 }
  0x73   :  { %478 = vmatpush2.msra.mxu1 %v403_v20  ;;  %523 = vmatpush1.msra.mxu0 %v435_v21 }
  0x74   :  { %479 = vmatprep.subr.mxu1 %v402_v22  ;;  %524 = vmatprep.subr.mxu0 %v434_v23 }
  0x75   :  { %480 = vmatpush2.msra.mxu1 %v401_v24  ;;  %525 = vmatpush1.msra.mxu0 %v433_v25 }
  0x76   :  { %481 = vmatprep.subr.mxu1 %v400_v26  ;;  %526 = vmatprep.subr.mxu0 %v432_v27 }
  0x77   :  { %482 = vmatpush2.msra.mxu1 %v399_v28  ;;  %527 = vmatpush1.msra.mxu0 %v431_v29  ;;  %v340_v29 = vld [vmem:[%s8861_s1] sm:$0xff] }
  0x78   :  { %483 = vmatprep.subr.mxu1 %v398_v30  ;;  %528 = vmatprep.subr.mxu0 %v430_v31  ;;  %v899_v30 = vld [vmem:[#allocation5 + $0x8f8] sm:$0xff]  ;;  %v898_v31 = vld [vmem:[#allocation5 + $0x8f0] sm:$0xff] }
  0x79   :  { %484 = vmatpush2.msra.mxu1 %v397_v32  ;;  %529 = vmatpush1.msra.mxu0 %v429_v33  ;;  %v897_v32 = vld [vmem:[#allocation5 + $0x8e8] sm:$0xff]  ;;  %v896_v33 = vld [vmem:[#allocation5 + $0x8e0] sm:$0xff] }
  0x7a   :  { %485 = vmatprep.subr.mxu1 %v396_v34  ;;  %530 = vmatprep.subr.mxu0 %v428_v35  ;;  %v895_v34 = vld [vmem:[#allocation5 + $0x8d8] sm:$0xff]  ;;  %v341_v35 = vld [vmem:[%s8861_s1 + $0x8] sm:$0xff] }
  0x7b   :  { %486 = vmatpush2.msra.mxu1 %v395_v36  ;;  %531 = vmatpush1.msra.mxu0 %v427_v37  ;;  %v894_v36 = vld [vmem:[#allocation5 + $0x8d0] sm:$0xff]  ;;  %v893_v37 = vld [vmem:[#allocation5 + $0x8c8] sm:$0xff] }
  0x7c   :  { %487 = vmatprep.subr.mxu1 %v394_v38  ;;  %532 = vmatprep.subr.mxu0 %v426_v39  ;;  %v892_v38 = vld [vmem:[#allocation5 + $0x8c0] sm:$0xff]  ;;  %v891_v39 = vld [vmem:[#allocation5 + $0x8b8] sm:$0xff] }
  0x7d   :  { %488 = vmatpush2.msra.mxu1 %v393_v40  ;;  %533 = vmatpush1.msra.mxu0 %v425_v41  ;;  %v342_v40 = vld [vmem:[%s8861_s1 + $0x10] sm:$0xff] }
  0x7e   :  { %489 = vmatprep.subr.mxu1 %v392_v42  ;;  %534 = vmatprep.subr.mxu0 %v424_v43  ;;  %v890_v41 = vld [vmem:[#allocation5 + $0x8b0] sm:$0xff]  ;;  %v889_v42 = vld [vmem:[#allocation5 + $0x8a8] sm:$0xff]  ;;  %v888_v43 = vld [vmem:[#allocation5 + $0x8a0] sm:$0xff] }
  0x7f   :  { %490 = vmatpush2.msra.mxu1 %v391_v44  ;;  %535 = vmatpush1.msra.mxu0 %v423_v45  ;;  %v887_v44 = vld [vmem:[#allocation5 + $0x898] sm:$0xff] }
  0x80   :  { %491 = vmatprep.subr.mxu1 %v390_v46  ;;  %536 = vmatprep.subr.mxu0 %v422_v47  ;;  %v343_v45 = vld [vmem:[%s8861_s1 + $0x18] sm:$0xff]  ;;  %v886_v46 = vld [vmem:[#allocation5 + $0x890] sm:$0xff]  ;;  %v885_v47 = vld [vmem:[#allocation5 + $0x888] sm:$0xff] }
  0x81   :  { %492 = vmatpush2.msra.mxu1 %v389_v48  ;;  %537 = vmatpush1.msra.mxu0 %v421_v49  ;;  %v884_v48 = vld [vmem:[#allocation5 + $0x880] sm:$0xff]  ;;  %v883_v49 = vld [vmem:[#allocation5 + $0x878] sm:$0xff] }
  0x82   :  { %493 = vmatprep.subr.mxu1 %v388_v50  ;;  %538 = vmatprep.subr.mxu0 %v420_v51  ;;  %v882_v50 = vld [vmem:[#allocation5 + $0x870] sm:$0xff]  ;;  %v881_v51 = vld [vmem:[#allocation5 + $0x868] sm:$0xff] }
  0x83   :  { %494 = vmatpush2.msra.mxu1 %v387_v52  ;;  %539 = vmatpush1.msra.mxu0 %v419_v53  ;;  %v880_v52 = vld [vmem:[#allocation5 + $0x860] sm:$0xff]  ;;  %v879_v53 = vld [vmem:[#allocation5 + $0x858] sm:$0xff] }
  0x84   :  { %495 = vmatprep.subr.mxu1 %v386_v54  ;;  %540 = vmatprep.subr.mxu0 %v418_v55  ;;  %v878_v54 = vld [vmem:[#allocation5 + $0x850] sm:$0xff]  ;;  %v877_v55 = vld [vmem:[#allocation5 + $0x848] sm:$0xff] }
  0x85   :  { %496 = vmatpush2.msra.mxu1 %v385_v56  ;;  %541 = vmatpush1.msra.mxu0 %v417_v57  ;;  %v876_v57 = vld [vmem:[#allocation5 + $0x840] sm:$0xff] }
  0x86   :  { %497 = vmatprep.subr.mxu1 %v384_v58  ;;  %542 = vmatprep.subr.mxu0 %v416_v59  ;;  %v875_v59 = vld [vmem:[#allocation5 + $0x838] sm:$0xff] }
  0x87   :  { %498 = vmatpush2.msra.mxu1 %v383_v60  ;;  %543 = vmatpush1.msra.mxu0 %v415_v61  ;;  %v874_v61 = vld [vmem:[#allocation5 + $0x830] sm:$0xff] }
  0x88   :  { %499 = vmatprep.subr.mxu1 %v382_v62  ;;  %544 = vmatprep.subr.mxu0 %v414_v63  ;;  %v873_v63 = vld [vmem:[#allocation5 + $0x828] sm:$0xff] }
  0x89   :  { %500 = vmatpush2.msra.mxu1 %v381_v1  ;;  %545 = vmatpush1.msra.mxu0 %v413_v2  ;;  %v872_v2 = vld [vmem:[#allocation5 + $0x820] sm:$0xff] }
  0x8a   :  { %501 = vmatprep.subr.mxu1 %v380_v5  ;;  %546 = vmatprep.subr.mxu0 %v412_v7  ;;  %v871_v7 = vld [vmem:[#allocation5 + $0x818] sm:$0xff] }
  0x8b   :  { %502 = vmatpush2.msra.mxu1 %v379_v8  ;;  %547 = vmatpush1.msra.mxu0 %v411_v9  ;;  %v870_v9 = vld [vmem:[#allocation5 + $0x810] sm:$0xff] }
  0x8c   :  { %503 = vmatprep.subr.mxu1 %v378_v10  ;;  %548 = vmatprep.subr.mxu0 %v410_v11  ;;  %v869_v11 = vld [vmem:[#allocation5 + $0x808] sm:$0xff] }
  0x8d   :  { %504 = vmatpush2.msra.mxu1 %v377_v12  ;;  %505 = vmatprep.mubr.f32.mxu1 %v7731_v4 }
  0x8e   :  { %549 = vmatpush1.msra.mxu0 %v409_v14  ;;  %582 = vmatprep.mubr.f32.mxu0 %v7672_v0  ;;  %v868_v14 = vld [vmem:[#allocation5 + $0x800] sm:$0xff] }
  0x8f   :  { %506 = vmatmul.mubr.f32.vlgmr.msra.gmra.mxu1 %v7733_v6  ;;  %583 = vmatmul.mubr.f32.vlgmr.msra.gmra.mxu0 %v7728_v3 }
  0x90   :  { %511 = vmatprep.mubr.f32.mxu1 %v7737_v13  ;;  %588 = vmatprep.mubr.f32.mxu0 %v7672_v0 }
  0x93   :  { %512 = vmatmul.mubr.f32.gmra.mxu1 %v7742_v17  ;;  %589 = vmatmul.mubr.f32.gmra.mxu0 %v7739_v16 }
  0x94   :  { %778 = vmatprep.mubr.f32.mxu1 %v7672_v0  ;;  %677 = vmatprep.mubr.f32.mxu0 %v7672_v0 }
 0x10b   :  { %v329_v15 = vpop.f32.mrf.mxu1 }
 0x10d   :  { %v331_v20 = vpop.f32.mrf.mxu1 }
 0x12b   :  { %v252_v18 = vpop.f32.mrf.mxu0 }
 0x12c   :  { %v330_v28 = vadd.f32 %v329_v15, %v252_v18 }
 0x12d   :  { %v254_v19 = vpop.f32.mrf.mxu0 }
 0x12e   :  { %v332_v27 = vadd.f32 %v331_v20, %v254_v19  ;;  %v7272_v20 = vld [vmem:[%s8861_s1 + $0x20] sm:$0xff] }
 0x131   :  { %v335_v21 = vpop.f32.mrf.mxu1  ;;  %v258_v22 = vpop.f32.mrf.mxu0 }
 0x132   :  { %v336_v24 = vadd.f32 %v335_v21, %v258_v22  ;;  %v835_v21 = vld [vmem:[#allocation5 + $0x6f8] sm:$0xff]  ;;  %v834_v22 = vld [vmem:[#allocation5 + $0x6f0] sm:$0xff] }
 0x133   :  { %v337_v23 = vpop.f32.mrf.mxu1  ;;  %v260_v25 = vpop.f32.mrf.mxu0 }
 0x134   :  { %v338_v26 = vadd.f32 %v337_v23, %v260_v25  ;;  %v833_v23 = vld [vmem:[#allocation5 + $0x6e8] sm:$0xff]  ;;  %v831_v25 = vld [vmem:[#allocation5 + $0x6d8] sm:$0xff] }
 0x136   :  { %742 = vmatprep.subr.mxu1 %v338_v26  ;;  %v7273_v26 = vld [vmem:[%s8861_s1 + $0x28] sm:$0xff] }
 0x137   :  { %743 = vmatpush1.msra.mxu1 %v336_v24  ;;  %v832_v24 = vld [vmem:[#allocation5 + $0x6e0] sm:$0xff] }
 0x138   :  { %744 = vmatprep.subr.mxu1 %v332_v27  ;;  %v830_v27 = vld [vmem:[#allocation5 + $0x6d0] sm:$0xff] }
 0x139   :  { %745 = vmatpush1.msra.mxu1 %v330_v28  ;;  %v828_v28 = vld [vmem:[#allocation5 + $0x6c0] sm:$0xff] }
 0x13a   :  { %7280 = vmatmul.mubr.msk.f32.vlgmr.msra.gmra.mxu1 %vm600_vm0, %v340_v29  ;;  %977 = vmatprep.subr.mxu1 %v899_v30  ;;  %v827_v29 = vld [vmem:[#allocation5 + $0x6b8] sm:$0xff]  ;;  %v7274_v30 = vld [vmem:[%s8861_s1 + $0x30] sm:$0xff] }
 0x13b   :  { %978 = vmatpush1.msra.mxu1 %v898_v31  ;;  %784 = vmatprep.mubr.f32.mxu1 %v7672_v0  ;;  %v826_v31 = vld [vmem:[#allocation5 + $0x6b0] sm:$0xff] }
 0x13c   :  { %979 = vmatprep.subr.mxu1 %v897_v32  ;;  %v825_v32 = vld [vmem:[#allocation5 + $0x6a8] sm:$0xff] }
 0x13d   :  { %980 = vmatpush1.msra.mxu1 %v896_v33  ;;  %v824_v33 = vld [vmem:[#allocation5 + $0x6a0] sm:$0xff] }
 0x13e   :  { %981 = vmatprep.subr.mxu1 %v895_v34  ;;  %7281 = vmatmul.mubr.msk.f32.gmra.mxu1 %vm600_vm0, %v341_v35  ;;  %v823_v34 = vld [vmem:[#allocation5 + $0x698] sm:$0xff] }
 0x13f   :  { %982 = vmatpush1.msra.mxu1 %v894_v36  ;;  %790 = vmatprep.mubr.f32.mxu1 %v7672_v0  ;;  %v7275_v35 = vld [vmem:[%s8861_s1 + $0x38] sm:$0xff]  ;;  %v822_v36 = vld [vmem:[#allocation5 + $0x690] sm:$0xff] }
 0x140   :  { %983 = vmatprep.subr.mxu1 %v893_v37  ;;  %v821_v37 = vld [vmem:[#allocation5 + $0x688] sm:$0xff] }
 0x141   :  { %984 = vmatpush1.msra.mxu1 %v892_v38  ;;  %v820_v38 = vld [vmem:[#allocation5 + $0x680] sm:$0xff] }
 0x142   :  { %985 = vmatprep.subr.mxu1 %v891_v39  ;;  %7282 = vmatmul.mubr.msk.f32.gmra.mxu1 %vm600_vm0, %v342_v40  ;;  %v819_v39 = vld [vmem:[#allocation5 + $0x678] sm:$0xff]  ;;  %v818_v40 = vld [vmem:[#allocation5 + $0x670] sm:$0xff] }
 0x143   :  { %986 = vmatpush1.msra.mxu1 %v890_v41  ;;  %796 = vmatprep.mubr.f32.mxu1 %v7672_v0  ;;  %v817_v41 = vld [vmem:[#allocation5 + $0x668] sm:$0xff] }
 0x144   :  { %987 = vmatprep.subr.mxu1 %v889_v42  ;;  %v816_v42 = vld [vmem:[#allocation5 + $0x660] sm:$0xff] }
 0x145   :  { %988 = vmatpush1.msra.mxu1 %v888_v43  ;;  %v815_v43 = vld [vmem:[#allocation5 + $0x658] sm:$0xff] }
 0x146   :  { %989 = vmatprep.subr.mxu1 %v887_v44  ;;  %7283 = vmatmul.mubr.msk.f32.gmra.mxu1 %vm600_vm0, %v343_v45  ;;  %v814_v44 = vld [vmem:[#allocation5 + $0x650] sm:$0xff]  ;;  %v813_v45 = vld [vmem:[#allocation5 + $0x648] sm:$0xff] }
 0x147   :  { %990 = vmatpush1.msra.mxu1 %v886_v46  ;;  %1041 = vmatprep.mubr.f32.mxu1 %v7672_v0  ;;  %v812_v46 = vld [vmem:[#allocation5 + $0x640] sm:$0xff] }
 0x148   :  { %991 = vmatprep.subr.mxu1 %v885_v47  ;;  %v811_v47 = vld [vmem:[#allocation5 + $0x638] sm:$0xff] }
 0x149   :  { %992 = vmatpush1.msra.mxu1 %v884_v48  ;;  %v810_v48 = vld [vmem:[#allocation5 + $0x630] sm:$0xff] }
 0x14a   :  { %993 = vmatprep.subr.mxu1 %v883_v49  ;;  %v808_v49 = vld [vmem:[#allocation5 + $0x620] sm:$0xff] }
 0x14b   :  { %994 = vmatpush1.msra.mxu1 %v882_v50  ;;  %v807_v50 = vld [vmem:[#allocation5 + $0x618] sm:$0xff] }
 0x14c   :  { %995 = vmatprep.subr.mxu1 %v881_v51  ;;  %v806_v51 = vld [vmem:[#allocation5 + $0x610] sm:$0xff] }
 0x14d   :  { %996 = vmatpush1.msra.mxu1 %v880_v52  ;;  %v805_v52 = vld [vmem:[#allocation5 + $0x608] sm:$0xff] }
 0x14e   :  { %997 = vmatprep.subr.mxu1 %v879_v53  ;;  %v804_v53 = vld [vmem:[#allocation5 + $0x600] sm:$0xff] }
 0x14f   :  { %v507_v56 = vpop.f32.mrf.mxu1  ;;  %v584_v58 = vpop.f32.mrf.mxu0  ;;  %998 = vmatpush1.msra.mxu1 %v878_v54  ;;  %v867_v54 = vld [vmem:[#allocation5 + $0x7f8] sm:$0xff] }
 0x150   :  { %999 = vmatprep.subr.mxu1 %v877_v55  ;;  %v585_v19 = vadd.f32 %v584_v58, %v507_v56  ;;  %v866_v55 = vld [vmem:[#allocation5 + $0x7f0] sm:$0xff]  ;;  %v865_v56 = vld [vmem:[#allocation5 + $0x7e8] sm:$0xff]  ;;  %v863_v58 = vld [vmem:[#allocation5 + $0x7d8] sm:$0xff] }
 0x151   :  { %v509_v60 = vpop.f32.mrf.mxu1  ;;  %v586_v62 = vpop.f32.mrf.mxu0  ;;  %1000 = vmatpush1.msra.mxu1 %v876_v57  ;;  %v864_v57 = vld [vmem:[#allocation5 + $0x7e0] sm:$0xff] }
 0x152   :  { %1001 = vmatprep.subr.mxu1 %v875_v59  ;;  %v587_v18 = vadd.f32 %v586_v62, %v509_v60  ;;  %v862_v59 = vld [vmem:[#allocation5 + $0x7d0] sm:$0xff]  ;;  %v861_v60 = vld [vmem:[#allocation5 + $0x7c8] sm:$0xff]  ;;  %v859_v62 = vld [vmem:[#allocation5 + $0x7b8] sm:$0xff] }
 0x153   :  { %v513_v1 = vpop.f32.mrf.mxu1  ;;  %v590_v5 = vpop.f32.mrf.mxu0  ;;  %1002 = vmatpush1.msra.mxu1 %v874_v61  ;;  %v860_v61 = vld [vmem:[#allocation5 + $0x7c0] sm:$0xff] }
 0x154   :  { %1003 = vmatprep.subr.mxu1 %v873_v63  ;;  %v591_v15 = vadd.f32 %v590_v5, %v513_v1  ;;  %v858_v63 = vld [vmem:[#allocation5 + $0x7b0] sm:$0xff]  ;;  %v857_v1 = vld [vmem:[#allocation5 + $0x7a8] sm:$0xff]  ;;  %v855_v5 = vld [vmem:[#allocation5 + $0x798] sm:$0xff] }
 0x155   :  { %v515_v8 = vpop.f32.mrf.mxu1  ;;  %v592_v10 = vpop.f32.mrf.mxu0  ;;  %1004 = vmatpush1.msra.mxu1 %v872_v2  ;;  %v856_v2 = vld [vmem:[#allocation5 + $0x7a0] sm:$0xff] }
 0x156   :  { %v593_v12 = vadd.f32 %v592_v10, %v515_v8  ;;  %1005 = vmatprep.subr.mxu1 %v871_v7  ;;  %v854_v7 = vld [vmem:[#allocation5 + $0x790] sm:$0xff]  ;;  %v853_v8 = vld [vmem:[#allocation5 + $0x788] sm:$0xff]  ;;  %v851_v10 = vld [vmem:[#allocation5 + $0x778] sm:$0xff] }
 0x157   :  { %1006 = vmatpush1.msra.mxu1 %v870_v9  ;;  %v852_v9 = vld [vmem:[#allocation5 + $0x780] sm:$0xff] }
 0x158   :  { %641 = vmatprep.subr.mxu0 %v593_v12  ;;  %1007 = vmatprep.subr.mxu1 %v869_v11  ;;  %v850_v11 = vld [vmem:[#allocation5 + $0x770] sm:$0xff]  ;;  %v849_v12 = vld [vmem:[#allocation5 + $0x768] sm:$0xff] }
 0x159   :  { %642 = vmatpush1.msra.mxu0 %v591_v15  ;;  %1008 = vmatpush1.msra.mxu1 %v868_v14  ;;  %v848_v14 = vld [vmem:[#allocation5 + $0x760] sm:$0xff]  ;;  %v847_v15 = vld [vmem:[#allocation5 + $0x758] sm:$0xff] }
 0x15a   :  { %643 = vmatprep.subr.mxu0 %v587_v18  ;;  %1042 = vmatmul.mubr.f32.vlgmr.msra.gmra.mxu1 %v7728_v3  ;;  %v829_v3 = vld [vmem:[#allocation5 + $0x6c8] sm:$0xff]  ;;  %v846_v18 = vld [vmem:[#allocation5 + $0x750] sm:$0xff] }
 0x15b   :  { %644 = vmatpush1.msra.mxu0 %v585_v19  ;;  %1047 = vmatprep.mubr.f32.mxu1 %v7672_v0  ;;  %v845_v19 = vld [vmem:[#allocation5 + $0x748] sm:$0xff] }
 0x15c   :  { %7276 = vmatmul.mubr.msk.f32.vlgmr.msra.gmra.mxu0 %vm600_vm0, %v7272_v20  ;;  %900 = vmatprep.subr.mxu0 %v835_v21  ;;  %v844_v20 = vld [vmem:[#allocation5 + $0x740] sm:$0xff]  ;;  %v843_v21 = vld [vmem:[#allocation5 + $0x738] sm:$0xff] }
 0x15d   :  { %901 = vmatpush1.msra.mxu0 %v834_v22  ;;  %683 = vmatprep.mubr.f32.mxu0 %v7672_v0  ;;  %v842_v22 = vld [vmem:[#allocation5 + $0x730] sm:$0xff] }
 0x15e   :  { %902 = vmatprep.subr.mxu0 %v833_v23  ;;  %1048 = vmatmul.mubr.f32.gmra.mxu1 %v7739_v16  ;;  %v841_v23 = vld [vmem:[#allocation5 + $0x728] sm:$0xff] }
 0x15f   :  { %903 = vmatpush1.msra.mxu0 %v832_v24  ;;  %1135 = vmatprep.mubr.f32.mxu1 %v7672_v0  ;;  %v840_v24 = vld [vmem:[#allocation5 + $0x720] sm:$0xff] }
 0x160   :  { %904 = vmatprep.subr.mxu0 %v831_v25  ;;  %7277 = vmatmul.mubr.msk.f32.gmra.mxu0 %vm600_vm0, %v7273_v26  ;;  %v839_v25 = vld [vmem:[#allocation5 + $0x718] sm:$0xff]  ;;  %v838_v26 = vld [vmem:[#allocation5 + $0x710] sm:$0xff] }
 0x161   :  { %905 = vmatpush1.msra.mxu0 %v830_v27  ;;  %689 = vmatprep.mubr.f32.mxu0 %v7672_v0  ;;  %v837_v27 = vld [vmem:[#allocation5 + $0x708] sm:$0xff] }
 0x162   :  { %906 = vmatprep.subr.mxu0 %v829_v3  ;;  %v836_v3 = vld [vmem:[#allocation5 + $0x700] sm:$0xff] }
 0x163   :  { %907 = vmatpush1.msra.mxu0 %v828_v28  ;;  %v1264_v28 = vld [vmem:[#allocation5 + $0xbf8] sm:$0xff] }
 0x164   :  { %908 = vmatprep.subr.mxu0 %v827_v29  ;;  %7278 = vmatmul.mubr.msk.f32.gmra.mxu0 %vm600_vm0, %v7274_v30  ;;  %v1263_v29 = vld [vmem:[#allocation5 + $0xbf0] sm:$0xff]  ;;  %v1262_v30 = vld [vmem:[#allocation5 + $0xbe8] sm:$0xff] }
 0x165   :  { %909 = vmatpush1.msra.mxu0 %v826_v31  ;;  %695 = vmatprep.mubr.f32.mxu0 %v7672_v0  ;;  %v1261_v31 = vld [vmem:[#allocation5 + $0xbe0] sm:$0xff] }
 0x166   :  { %910 = vmatprep.subr.mxu0 %v825_v32  ;;  %v1260_v32 = vld [vmem:[#allocation5 + $0xbd8] sm:$0xff] }
 0x167   :  { %911 = vmatpush1.msra.mxu0 %v824_v33  ;;  %v1259_v33 = vld [vmem:[#allocation5 + $0xbd0] sm:$0xff] }
 0x168   :  { %912 = vmatprep.subr.mxu0 %v823_v34  ;;  %7279 = vmatmul.mubr.msk.f32.gmra.mxu0 %vm600_vm0, %v7275_v35  ;;  %v1258_v34 = vld [vmem:[#allocation5 + $0xbc8] sm:$0xff] }
 0x169   :  { %913 = vmatpush1.msra.mxu0 %v822_v36  ;;  %964 = vmatprep.mubr.f32.mxu0 %v7731_v4  ;;  %v809_v4 = vld [vmem:[#allocation5 + $0x628] sm:$0xff]  ;;  %v1253_v36 = vld [vmem:[#allocation5 + $0xba0] sm:$0xff] }
 0x16a   :  { %914 = vmatprep.subr.mxu0 %v821_v37  ;;  %v1254_v35 = vld [vmem:[#allocation5 + $0xba8] sm:$0xff] }
 0x16b   :  { %915 = vmatpush1.msra.mxu0 %v820_v38  ;;  %v1252_v38 = vld [vmem:[#allocation5 + $0xb98] sm:$0xff] }
 0x16c   :  { %916 = vmatprep.subr.mxu0 %v819_v39  ;;  %v1251_v39 = vld [vmem:[#allocation5 + $0xb90] sm:$0xff] }
 0x16d   :  { %917 = vmatpush1.msra.mxu0 %v818_v40  ;;  %v1250_v40 = vld [vmem:[#allocation5 + $0xb88] sm:$0xff] }
 0x16e   :  { %918 = vmatprep.subr.mxu0 %v817_v41  ;;  %v1249_v41 = vld [vmem:[#allocation5 + $0xb80] sm:$0xff] }
 0x16f   :  { %919 = vmatpush1.msra.mxu0 %v816_v42 }
 0x170   :  { %920 = vmatprep.subr.mxu0 %v815_v43  ;;  %v1248_v43 = vld [vmem:[#allocation5 + $0xb78] sm:$0xff] }
 0x171   :  { %921 = vmatpush1.msra.mxu0 %v814_v44  ;;  %v1247_v44 = vld [vmem:[#allocation5 + $0xb70] sm:$0xff] }
 0x172   :  { %922 = vmatprep.subr.mxu0 %v813_v45 }
 0x173   :  { %923 = vmatpush1.msra.mxu0 %v812_v46  ;;  %v1246_v46 = vld [vmem:[#allocation5 + $0xb68] sm:$0xff] }
 0x174   :  { %924 = vmatprep.subr.mxu0 %v811_v47  ;;  %v1245_v47 = vld [vmem:[#allocation5 + $0xb60] sm:$0xff] }
 0x175   :  { %925 = vmatpush1.msra.mxu0 %v810_v48  ;;  %v1244_v48 = vld [vmem:[#allocation5 + $0xb58] sm:$0xff] }
 0x176   :  { %926 = vmatprep.subr.mxu0 %v809_v4  ;;  %v1243_v4 = vld [vmem:[#allocation5 + $0xb50] sm:$0xff] }
 0x177   :  { %927 = vmatpush1.msra.mxu0 %v808_v49 }
 0x178   :  { %928 = vmatprep.subr.mxu0 %v807_v50 }
 0x179   :  { %929 = vmatpush1.msra.mxu0 %v806_v51  ;;  %v1242_v51 = vld [vmem:[#allocation5 + $0xb48] sm:$0xff] }
 0x17a   :  { %930 = vmatprep.subr.mxu0 %v805_v52 }
 0x17b   :  { %931 = vmatpush1.msra.mxu0 %v804_v53  ;;  %v1241_v53 = vld [vmem:[#allocation5 + $0xb40] sm:$0xff] }
 0x17c   :  { %932 = vmatprep.subr.mxu0 %v867_v54 }
 0x17d   :  { %933 = vmatpush2.msra.mxu0 %v866_v55  ;;  %v1240_v55 = vld [vmem:[#allocation5 + $0xb38] sm:$0xff] }
 0x17e   :  { %934 = vmatprep.subr.mxu0 %v865_v56  ;;  %v1239_v56 = vld [vmem:[#allocation5 + $0xb30] sm:$0xff] }
 0x17f   :  { %935 = vmatpush2.msra.mxu0 %v864_v57 }
 0x180   :  { %936 = vmatprep.subr.mxu0 %v863_v58 }
 0x181   :  { %937 = vmatpush2.msra.mxu0 %v862_v59  ;;  %v1238_v59 = vld [vmem:[#allocation5 + $0xb28] sm:$0xff] }
 0x182   :  { %938 = vmatprep.subr.mxu0 %v861_v60 }
 0x183   :  { %939 = vmatpush2.msra.mxu0 %v860_v61  ;;  %v1237_v61 = vld [vmem:[#allocation5 + $0xb20] sm:$0xff] }
 0x184   :  { %940 = vmatprep.subr.mxu0 %v859_v62 }
 0x185   :  { %941 = vmatpush2.msra.mxu0 %v858_v63  ;;  %v1236_v63 = vld [vmem:[#allocation5 + $0xb18] sm:$0xff] }
 0x186   :  { %942 = vmatprep.subr.mxu0 %v857_v1  ;;  %v1235_v1 = vld [vmem:[#allocation5 + $0xb10] sm:$0xff] }
 0x187   :  { %943 = vmatpush2.msra.mxu0 %v856_v2 }
 0x188   :  { %944 = vmatprep.subr.mxu0 %v855_v5 }
 0x189   :  { %945 = vmatpush2.msra.mxu0 %v854_v7  ;;  %v1234_v7 = vld [vmem:[#allocation5 + $0xb08] sm:$0xff] }
 0x18a   :  { %946 = vmatprep.subr.mxu0 %v853_v8 }
 0x18b   :  { %947 = vmatpush2.msra.mxu0 %v852_v9  ;;  %v1233_v9 = vld [vmem:[#allocation5 + $0xb00] sm:$0xff] }
 0x18c   :  { %948 = vmatprep.subr.mxu0 %v851_v10 }
 0x18d   :  { %949 = vmatpush2.msra.mxu0 %v850_v11  ;;  %v7823_v11 = vld [vmem:[#allocation2 + $0x10] sm:$0xff] }
 0x18e   :  { %950 = vmatprep.subr.mxu0 %v849_v12 }
 0x18f   :  { %951 = vmatpush2.msra.mxu0 %v848_v14 }
 0x190   :  { %952 = vmatprep.subr.mxu0 %v847_v15 }
 0x191   :  { %953 = vmatpush2.msra.mxu0 %v846_v18 }
 0x192   :  { %954 = vmatprep.subr.mxu0 %v845_v19 }
 0x193   :  { %955 = vmatpush2.msra.mxu0 %v844_v20 }
 0x194   :  { %956 = vmatprep.subr.mxu0 %v843_v21 }
 0x195   :  { %957 = vmatpush2.msra.mxu0 %v842_v22 }
 0x196   :  { %958 = vmatprep.subr.mxu0 %v841_v23 }
 0x197   :  { %959 = vmatpush2.msra.mxu0 %v840_v24 }
 0x198   :  { %960 = vmatprep.subr.mxu0 %v839_v25 }
 0x199   :  { %961 = vmatpush2.msra.mxu0 %v838_v26 }
 0x19a   :  { %962 = vmatprep.subr.mxu0 %v837_v27 }
 0x19b   :  { %963 = vmatpush2.msra.mxu0 %v836_v3 }
 0x19c   :  { %965 = vmatmul.mubr.f32.vlgmr.msra.gmra.mxu0 %v7733_v6  ;;  %1342 = vmatprep.subr.mxu0 %v1264_v28  ;;  %v1257_v6 = vld [vmem:[#allocation5 + $0xbc0] sm:$0xff] }
 0x19d   :  { %970 = vmatprep.mubr.f32.mxu0 %v7737_v13  ;;  %1343 = vmatpush1.msra.mxu0 %v1263_v29  ;;  %v1256_v13 = vld [vmem:[#allocation5 + $0xbb8] sm:$0xff] }
 0x19e   :  { %1344 = vmatprep.subr.mxu0 %v1262_v30 }
 0x19f   :  { %1345 = vmatpush1.msra.mxu0 %v1261_v31  ;;  %v1200_v31 = vld [vmem:[#allocation5 + $0x9f8] sm:$0xff] }
 0x1a0   :  { %971 = vmatmul.mubr.f32.gmra.mxu0 %v7742_v17  ;;  %1346 = vmatprep.subr.mxu0 %v1260_v32  ;;  %v1255_v17 = vld [vmem:[#allocation5 + $0xbb0] sm:$0xff] }
 0x1a1   :  { %1406 = vmatprep.mubr.f32.mxu0 %v7672_v0  ;;  %1347 = vmatpush1.msra.mxu0 %v1259_v33  ;;  %v1199_v32 = vld [vmem:[#allocation5 + $0x9f0] sm:$0xff]  ;;  %v1198_v33 = vld [vmem:[#allocation5 + $0x9e8] sm:$0xff] }
 0x1a2   :  { %1348 = vmatprep.subr.mxu0 %v1258_v34  ;;  %v1197_v34 = vld [vmem:[#allocation5 + $0x9e0] sm:$0xff] }
 0x1a3   :  { %1349 = vmatpush1.msra.mxu0 %v1257_v6  ;;  %v7285_v6 = vld [vmem:[%s8861_s1 + $0x48] sm:$0xff] }
 0x1a4   :  { %1350 = vmatprep.subr.mxu0 %v1256_v13  ;;  %v1196_v13 = vld [vmem:[#allocation5 + $0x9d8] sm:$0xff] }
 0x1a5   :  { %1351 = vmatpush1.msra.mxu0 %v1255_v17  ;;  %v1195_v17 = vld [vmem:[#allocation5 + $0x9d0] sm:$0xff] }
 0x1a6   :  { %1352 = vmatprep.subr.mxu0 %v1254_v35  ;;  %v1194_v35 = vld [vmem:[#allocation5 + $0x9c8] sm:$0xff] }
 0x1a7   :  { %1353 = vmatpush1.msra.mxu0 %v1253_v36  ;;  %v1193_v36 = vld [vmem:[#allocation5 + $0x9c0] sm:$0xff] }
 0x1a8   :  { %1354 = vmatprep.subr.mxu0 %v1252_v38  ;;  %v1192_v38 = vld [vmem:[#allocation5 + $0x9b8] sm:$0xff] }
 0x1a9   :  { %1355 = vmatpush1.msra.mxu0 %v1251_v39  ;;  %v1191_v39 = vld [vmem:[#allocation5 + $0x9b0] sm:$0xff] }
 0x1aa   :  { %1356 = vmatprep.subr.mxu0 %v1250_v40  ;;  %v1190_v40 = vld [vmem:[#allocation5 + $0x9a8] sm:$0xff] }
 0x1ab   :  { %1357 = vmatpush1.msra.mxu0 %v1249_v41  ;;  %v1189_v41 = vld [vmem:[#allocation5 + $0x9a0] sm:$0xff] }
 0x1ac   :  { %1358 = vmatprep.subr.mxu0 %v1248_v43  ;;  %v7287_v43 = vld [vmem:[%s8861_s1 + $0x58] sm:$0xff] }
 0x1ad   :  { %1359 = vmatpush1.msra.mxu0 %v1247_v44  ;;  %v1188_v44 = vld [vmem:[#allocation5 + $0x998] sm:$0xff] }
 0x1ae   :  { %1360 = vmatprep.subr.mxu0 %v1246_v46  ;;  %v1186_v46 = vld [vmem:[#allocation5 + $0x988] sm:$0xff] }
 0x1af   :  { %1361 = vmatpush1.msra.mxu0 %v1245_v47  ;;  %v1185_v47 = vld [vmem:[#allocation5 + $0x980] sm:$0xff] }
 0x1b0   :  { %1362 = vmatprep.subr.mxu0 %v1244_v48  ;;  %v1184_v48 = vld [vmem:[#allocation5 + $0x978] sm:$0xff] }
 0x1b1   :  { %1363 = vmatpush1.msra.mxu0 %v1243_v4  ;;  %v7854_v4 = vld [vmem:[#allocation2 + $0x8] sm:$0xff] }
 0x1b2   :  { %1364 = vmatprep.subr.mxu0 %v1242_v51  ;;  %v1182_v51 = vld [vmem:[#allocation5 + $0x968] sm:$0xff] }
 0x1b3   :  { %1365 = vmatpush1.msra.mxu0 %v1241_v53  ;;  %v1181_v53 = vld [vmem:[#allocation5 + $0x960] sm:$0xff] }
 0x1b4   :  { %1366 = vmatprep.subr.mxu0 %v1240_v55  ;;  %v1180_v55 = vld [vmem:[#allocation5 + $0x958] sm:$0xff] }
 0x1b5   :  { %1367 = vmatpush1.msra.mxu0 %v1239_v56  ;;  %v1179_v56 = vld [vmem:[#allocation5 + $0x950] sm:$0xff] }
 0x1b6   :  { %1368 = vmatprep.subr.mxu0 %v1238_v59  ;;  %v1176_v59 = vld [vmem:[#allocation5 + $0x938] sm:$0xff] }
 0x1b7   :  { %1369 = vmatpush1.msra.mxu0 %v1237_v61  ;;  %v1175_v61 = vld [vmem:[#allocation5 + $0x930] sm:$0xff] }
 0x1b8   :  { %1370 = vmatprep.subr.mxu0 %v1236_v63  ;;  %v1174_v63 = vld [vmem:[#allocation5 + $0x928] sm:$0xff] }
 0x1b9   :  { %1371 = vmatpush1.msra.mxu0 %v1235_v1  ;;  %v1173_v1 = vld [vmem:[#allocation5 + $0x920] sm:$0xff] }
 0x1ba   :  { %1372 = vmatprep.subr.mxu0 %v1234_v7  ;;  %v1171_v7 = vld [vmem:[#allocation5 + $0x910] sm:$0xff] }
 0x1bb   :  { %1373 = vmatpush1.msra.mxu0 %v1233_v9  ;;  %v1170_v9 = vld [vmem:[#allocation5 + $0x908] sm:$0xff] }
 0x1bc   :  { %1407 = vmatmul.mubr.f32.vlgmr.msra.gmra.mxu0 %v7823_v11 }
 0x1bd   :  { %1412 = vmatprep.mubr.f32.mxu0 %v7672_v0 }
 0x1c0   :  { %1413 = vmatmul.mubr.f32.gmra.mxu0 %v7739_v16  ;;  %v7284_v16 = vld [vmem:[%s8861_s1 + $0x40] sm:$0xff] }
 0x1c1   :  { %1500 = vmatprep.mubr.f32.mxu0 %v7672_v0 }
 0x1fa   :  { %v780_v37 = vpop.f32.mrf.mxu1 }
 0x1fc   :  { %v7805_v42 = vpop.f32.mrf.mxu1 }
 0x1fe   :  { %v786_v45 = vpop.f32.mrf.mxu1 }
 0x200   :  { %v7807_v50 = vpop.f32.mrf.mxu1 }
 0x202   :  { %v792_v58 = vpop.f32.mrf.mxu1 }
 0x204   :  { %v7817_v5 = vpop.f32.mrf.mxu1 }
 0x206   :  { %v798_v14 = vpop.f32.mrf.mxu1 }
 0x208   :  { %v7831_v18 = vpop.f32.mrf.mxu1 }
 0x21a   :  { %v1043_v19 = vpop.f32.mrf.mxu1 }
 0x21c   :  { %v679_v49 = vpop.f32.mrf.mxu0  ;;  %v1045_v21 = vpop.f32.mrf.mxu1 }
 0x21d   :  { %v7809_v52 = vadd.f32 %v780_v37, %v679_v49  ;;  %v7286_v37 = vld [vmem:[%s8861_s1 + $0x50] sm:$0xff] }
 0x21e   :  { %v7811_v54 = vpop.f32.mrf.mxu0  ;;  %v1049_v24 = vpop.f32.mrf.mxu1  ;;  %v1183_v49 = vld [vmem:[#allocation5 + $0x970] sm:$0xff] }
 0x220   :  { %v685_v57 = vpop.f32.mrf.mxu0  ;;  %v1051_v26 = vpop.f32.mrf.mxu1 }
 0x221   :  { %v7813_v60 = vadd.f32 %v786_v45, %v685_v57  ;;  %v1187_v45 = vld [vmem:[#allocation5 + $0x990] sm:$0xff]  ;;  %v1178_v57 = vld [vmem:[#allocation5 + $0x948] sm:$0xff] }
 0x222   :  { %v7815_v62 = vpop.f32.mrf.mxu0 }
 0x224   :  { %v691_v2 = vpop.f32.mrf.mxu0 }
 0x225   :  { %v7819_v8 = vadd.f32 %v792_v58, %v691_v2  ;;  %v1177_v58 = vld [vmem:[#allocation5 + $0x940] sm:$0xff]  ;;  %v1172_v2 = vld [vmem:[#allocation5 + $0x918] sm:$0xff] }
 0x226   :  { %v7821_v10 = vpop.f32.mrf.mxu0 }
 0x228   :  { %v697_v12 = vpop.f32.mrf.mxu0 }
 0x229   :  { %v7827_v15 = vadd.f32 %v798_v14, %v697_v12  ;;  %v1169_v12 = vld [vmem:[#allocation5 + $0x900] sm:$0xff]  ;;  %v1232_v14 = vld [vmem:[#allocation5 + $0xaf8] sm:$0xff] }
 0x22a   :  { %v7833_v20 = vpop.f32.mrf.mxu0 }
 0x25c   :  { %v966_v22 = vpop.f32.mrf.mxu0 }
 0x25d   :  { %v1044_v30 = vadd.f32 %v1043_v19, %v966_v22  ;;  %v1231_v19 = vld [vmem:[#allocation5 + $0xaf0] sm:$0xff]  ;;  %v1229_v22 = vld [vmem:[#allocation5 + $0xae0] sm:$0xff] }
 0x25e   :  { %v968_v23 = vpop.f32.mrf.mxu0 }
 0x25f   :  { %v1046_v29 = vadd.f32 %v1045_v21, %v968_v23  ;;  %v1230_v21 = vld [vmem:[#allocation5 + $0xae8] sm:$0xff]  ;;  %v1228_v23 = vld [vmem:[#allocation5 + $0xad8] sm:$0xff] }
 0x260   :  { %v972_v25 = vpop.f32.mrf.mxu0 }
 0x261   :  { %v1050_v28 = vadd.f32 %v1049_v24, %v972_v25  ;;  %v1227_v24 = vld [vmem:[#allocation5 + $0xad0] sm:$0xff]  ;;  %v1226_v25 = vld [vmem:[#allocation5 + $0xac8] sm:$0xff] }
 0x262   :  { %v974_v27 = vpop.f32.mrf.mxu0 }
 0x263   :  { %v1052_v3 = vadd.f32 %v1051_v26, %v974_v27  ;;  %v1225_v26 = vld [vmem:[#allocation5 + $0xac0] sm:$0xff]  ;;  %v1224_v27 = vld [vmem:[#allocation5 + $0xab8] sm:$0xff] }
 0x265   :  { %1099 = vmatprep.subr.mxu1 %v1052_v3  ;;  %v1223_v3 = vld [vmem:[#allocation5 + $0xab0] sm:$0xff] }
 0x266   :  { %1100 = vmatpush1.msra.mxu1 %v1050_v28  ;;  %v1222_v28 = vld [vmem:[#allocation5 + $0xaa8] sm:$0xff] }
 0x267   :  { %1101 = vmatprep.subr.mxu1 %v1046_v29  ;;  %v1221_v29 = vld [vmem:[#allocation5 + $0xaa0] sm:$0xff] }
 0x268   :  { %1102 = vmatpush1.msra.mxu1 %v1044_v30  ;;  %v1220_v30 = vld [vmem:[#allocation5 + $0xa98] sm:$0xff] }
 0x269   :  { %7288 = vmatmul.mubr.msk.f32.vlgmr.msra.gmra.mxu1 %vm600_vm0, %v7284_v16  ;;  %1265 = vmatprep.subr.mxu1 %v1200_v31  ;;  %v1219_v16 = vld [vmem:[#allocation5 + $0xa90] sm:$0xff]  ;;  %v1218_v31 = vld [vmem:[#allocation5 + $0xa88] sm:$0xff] }
 0x26a   :  { %1266 = vmatpush1.msra.mxu1 %v1199_v32  ;;  %1141 = vmatprep.mubr.f32.mxu1 %v7672_v0  ;;  %v1217_v32 = vld [vmem:[#allocation5 + $0xa80] sm:$0xff] }
 0x26b   :  { %1267 = vmatprep.subr.mxu1 %v1198_v33  ;;  %v1216_v33 = vld [vmem:[#allocation5 + $0xa78] sm:$0xff] }
 0x26c   :  { %1268 = vmatpush1.msra.mxu1 %v1197_v34  ;;  %v1215_v34 = vld [vmem:[#allocation5 + $0xa70] sm:$0xff] }
 0x26d   :  { %7289 = vmatmul.mubr.msk.f32.gmra.mxu1 %vm600_vm0, %v7285_v6  ;;  %1269 = vmatprep.subr.mxu1 %v1196_v13  ;;  %v1214_v6 = vld [vmem:[#allocation5 + $0xa68] sm:$0xff]  ;;  %v1213_v13 = vld [vmem:[#allocation5 + $0xa60] sm:$0xff] }
 0x26e   :  { %1270 = vmatpush1.msra.mxu1 %v1195_v17  ;;  %1147 = vmatprep.mubr.f32.mxu1 %v7672_v0  ;;  %v1212_v17 = vld [vmem:[#allocation5 + $0xa58] sm:$0xff] }
 0x26f   :  { %1271 = vmatprep.subr.mxu1 %v1194_v35  ;;  %v1211_v35 = vld [vmem:[#allocation5 + $0xa50] sm:$0xff] }
 0x270   :  { %1272 = vmatpush1.msra.mxu1 %v1193_v36  ;;  %v1210_v36 = vld [vmem:[#allocation5 + $0xa48] sm:$0xff] }
 0x271   :  { %7290 = vmatmul.mubr.msk.f32.gmra.mxu1 %vm600_vm0, %v7286_v37  ;;  %1273 = vmatprep.subr.mxu1 %v1192_v38  ;;  %v1209_v37 = vld [vmem:[#allocation5 + $0xa40] sm:$0xff]  ;;  %v1208_v38 = vld [vmem:[#allocation5 + $0xa38] sm:$0xff] }
 0x272   :  { %1274 = vmatpush1.msra.mxu1 %v1191_v39  ;;  %1153 = vmatprep.mubr.f32.mxu1 %v7672_v0  ;;  %v1207_v39 = vld [vmem:[#allocation5 + $0xa30] sm:$0xff] }
 0x273   :  { %1275 = vmatprep.subr.mxu1 %v1190_v40  ;;  %v1206_v40 = vld [vmem:[#allocation5 + $0xa28] sm:$0xff] }
 0x274   :  { %1276 = vmatpush1.msra.mxu1 %v1189_v41  ;;  %v1205_v41 = vld [vmem:[#allocation5 + $0xa20] sm:$0xff] }
 0x275   :  { %7291 = vmatmul.mubr.msk.f32.gmra.mxu1 %vm600_vm0, %v7287_v43  ;;  %1277 = vmatprep.subr.mxu1 %v1188_v44  ;;  %v1204_v43 = vld [vmem:[#allocation5 + $0xa18] sm:$0xff]  ;;  %v1203_v44 = vld [vmem:[#allocation5 + $0xa10] sm:$0xff] }
 0x276   :  { %1278 = vmatpush1.msra.mxu1 %v1187_v45  ;;  %1329 = vmatprep.mubr.f32.mxu1 %v7854_v4  ;;  %v1202_v45 = vld [vmem:[#allocation5 + $0xa08] sm:$0xff] }
 0x277   :  { %1279 = vmatprep.subr.mxu1 %v1186_v46  ;;  %v1201_v46 = vld [vmem:[#allocation5 + $0xa00] sm:$0xff] }
 0x278   :  { %1280 = vmatpush1.msra.mxu1 %v1185_v47  ;;  %v7857_v47 = vld [vmem:[#allocation2] sm:$0xff] }
 0x279   :  { %1281 = vmatprep.subr.mxu1 %v1184_v48  ;;  %v7860_v48 = vld [vmem:[#allocation2 + $0x20] sm:$0xff] }
 0x27a   :  { %1282 = vmatpush1.msra.mxu1 %v1183_v49  ;;  %v7863_v49 = vld [vmem:[#allocation2 + $0x18] sm:$0xff] }
 0x27b   :  { %1283 = vmatprep.subr.mxu1 %v1182_v51  ;;  %v1629_v51 = vld [vmem:[#allocation5 + $0xef8] sm:$0xff] }
 0x27c   :  { %1284 = vmatpush1.msra.mxu1 %v1181_v53  ;;  %v1628_v53 = vld [vmem:[#allocation5 + $0xef0] sm:$0xff] }
 0x27d   :  { %1285 = vmatprep.subr.mxu1 %v1180_v55  ;;  %v1627_v55 = vld [vmem:[#allocation5 + $0xee8] sm:$0xff] }
 0x27e   :  { %1286 = vmatpush1.msra.mxu1 %v1179_v56  ;;  %v1626_v56 = vld [vmem:[#allocation5 + $0xee0] sm:$0xff] }
 0x27f   :  { %1287 = vmatprep.subr.mxu1 %v1178_v57  ;;  %v1625_v57 = vld [vmem:[#allocation5 + $0xed8] sm:$0xff] }
 0x280   :  { %1288 = vmatpush1.msra.mxu1 %v1177_v58  ;;  %v1624_v58 = vld [vmem:[#allocation5 + $0xed0] sm:$0xff] }
 0x281   :  { %1289 = vmatprep.subr.mxu1 %v1176_v59  ;;  %v1623_v59 = vld [vmem:[#allocation5 + $0xec8] sm:$0xff] }
 0x282   :  { %1290 = vmatpush1.msra.mxu1 %v1175_v61  ;;  %v1622_v61 = vld [vmem:[#allocation5 + $0xec0] sm:$0xff] }
 0x283   :  { %1291 = vmatprep.subr.mxu1 %v1174_v63  ;;  %v1621_v63 = vld [vmem:[#allocation5 + $0xeb8] sm:$0xff] }
 0x284   :  { %1292 = vmatpush1.msra.mxu1 %v1173_v1  ;;  %v1620_v1 = vld [vmem:[#allocation5 + $0xeb0] sm:$0xff] }
 0x285   :  { %1293 = vmatprep.subr.mxu1 %v1172_v2  ;;  %v1619_v2 = vld [vmem:[#allocation5 + $0xea8] sm:$0xff] }
 0x286   :  { %1294 = vmatpush1.msra.mxu1 %v1171_v7  ;;  %v1618_v7 = vld [vmem:[#allocation5 + $0xea0] sm:$0xff] }
 0x287   :  { %1295 = vmatprep.subr.mxu1 %v1170_v9  ;;  %v1617_v9 = vld [vmem:[#allocation5 + $0xe98] sm:$0xff] }
 0x288   :  { %1296 = vmatpush1.msra.mxu1 %v1169_v12  ;;  %v1616_v12 = vld [vmem:[#allocation5 + $0xe90] sm:$0xff] }
 0x289   :  { %1297 = vmatprep.subr.mxu1 %v1232_v14  ;;  %v1615_v14 = vld [vmem:[#allocation5 + $0xe88] sm:$0xff] }
 0x28a   :  { %1298 = vmatpush2.msra.mxu1 %v1231_v19  ;;  %v1614_v19 = vld [vmem:[#allocation5 + $0xe80] sm:$0xff] }
 0x28b   :  { %1299 = vmatprep.subr.mxu1 %v1230_v21  ;;  %v1613_v21 = vld [vmem:[#allocation5 + $0xe78] sm:$0xff] }
 0x28c   :  { %1300 = vmatpush2.msra.mxu1 %v1229_v22  ;;  %v1612_v22 = vld [vmem:[#allocation5 + $0xe70] sm:$0xff] }
 0x28d   :  { %1301 = vmatprep.subr.mxu1 %v1228_v23  ;;  %v1611_v23 = vld [vmem:[#allocation5 + $0xe68] sm:$0xff] }
 0x28e   :  { %1302 = vmatpush2.msra.mxu1 %v1227_v24  ;;  %v1610_v24 = vld [vmem:[#allocation5 + $0xe60] sm:$0xff] }
 0x28f   :  { %1303 = vmatprep.subr.mxu1 %v1226_v25  ;;  %v1609_v25 = vld [vmem:[#allocation5 + $0xe58] sm:$0xff] }
 0x290   :  { %1304 = vmatpush2.msra.mxu1 %v1225_v26  ;;  %v1608_v26 = vld [vmem:[#allocation5 + $0xe50] sm:$0xff] }
 0x291   :  { %1305 = vmatprep.subr.mxu1 %v1224_v27 }
 0x292   :  { %1306 = vmatpush2.msra.mxu1 %v1223_v3  ;;  %v1607_v3 = vld [vmem:[#allocation5 + $0xe48] sm:$0xff] }
 0x293   :  { %1307 = vmatprep.subr.mxu1 %v1222_v28 }
 0x294   :  { %1308 = vmatpush2.msra.mxu1 %v1221_v29  ;;  %v1606_v29 = vld [vmem:[#allocation5 + $0xe40] sm:$0xff] }
 0x295   :  { %1309 = vmatprep.subr.mxu1 %v1220_v30 }
 0x296   :  { %1310 = vmatpush2.msra.mxu1 %v1219_v16  ;;  %v1605_v16 = vld [vmem:[#allocation5 + $0xe38] sm:$0xff] }
 0x297   :  { %1311 = vmatprep.subr.mxu1 %v1218_v31  ;;  %v1604_v31 = vld [vmem:[#allocation5 + $0xe30] sm:$0xff] }
 0x298   :  { %1312 = vmatpush2.msra.mxu1 %v1217_v32 }
 0x299   :  { %1313 = vmatprep.subr.mxu1 %v1216_v33  ;;  %v1603_v33 = vld [vmem:[#allocation5 + $0xe28] sm:$0xff] }
 0x29a   :  { %1314 = vmatpush2.msra.mxu1 %v1215_v34 }
 0x29b   :  { %1315 = vmatprep.subr.mxu1 %v1214_v6  ;;  %v1602_v6 = vld [vmem:[#allocation5 + $0xe20] sm:$0xff] }
 0x29c   :  { %1316 = vmatpush2.msra.mxu1 %v1213_v13 }
 0x29d   :  { %1317 = vmatprep.subr.mxu1 %v1212_v17  ;;  %v1600_v17 = vld [vmem:[#allocation5 + $0xe10] sm:$0xff] }
 0x29e   :  { %1318 = vmatpush2.msra.mxu1 %v1211_v35 }
 0x29f   :  { %1319 = vmatprep.subr.mxu1 %v1210_v36  ;;  %v1599_v36 = vld [vmem:[#allocation5 + $0xe08] sm:$0xff] }
 0x2a0   :  { %1320 = vmatpush2.msra.mxu1 %v1209_v37 }
 0x2a1   :  { %1321 = vmatprep.subr.mxu1 %v1208_v38  ;;  %v1598_v38 = vld [vmem:[#allocation5 + $0xe00] sm:$0xff] }
 0x2a2   :  { %1322 = vmatpush2.msra.mxu1 %v1207_v39 }
 0x2a3   :  { %1323 = vmatprep.subr.mxu1 %v1206_v40 }
 0x2a4   :  { %1324 = vmatpush2.msra.mxu1 %v1205_v41  ;;  %v7887_v41 = vld [vmem:[#allocation2 + $0x28] sm:$0xff] }
 0x2a5   :  { %1325 = vmatprep.subr.mxu1 %v1204_v43 }
 0x2a6   :  { %1326 = vmatpush2.msra.mxu1 %v1203_v44 }
 0x2a7   :  { %1327 = vmatprep.subr.mxu1 %v1202_v45 }
 0x2a8   :  { %1328 = vmatpush2.msra.mxu1 %v1201_v46 }
 0x2a9   :  { %1330 = vmatmul.mubr.f32.vlgmr.msra.gmra.mxu1 %v7857_v47  ;;  %1707 = vmatprep.subr.mxu1 %v1629_v51 }
 0x2aa   :  { %1335 = vmatprep.mubr.f32.mxu1 %v7860_v48  ;;  %1708 = vmatpush1.msra.mxu1 %v1628_v53 }
 0x2ab   :  { %1709 = vmatprep.subr.mxu1 %v1627_v55 }
 0x2ac   :  { %1710 = vmatpush1.msra.mxu1 %v1626_v56 }
 0x2ad   :  { %1336 = vmatmul.mubr.f32.gmra.mxu1 %v7863_v49  ;;  %1711 = vmatprep.subr.mxu1 %v1625_v57 }
 0x2ae   :  { %1771 = vmatprep.mubr.f32.mxu1 %v7672_v0  ;;  %1712 = vmatpush1.msra.mxu1 %v1624_v58 }
 0x2af   :  { %1713 = vmatprep.subr.mxu1 %v1623_v59 }
 0x2b0   :  { %1714 = vmatpush1.msra.mxu1 %v1622_v61  ;;  %v7292_v61 = vld [vmem:[%s8861_s1 + $0x60] sm:$0xff] }
 0x2b1   :  { %1715 = vmatprep.subr.mxu1 %v1621_v63  ;;  %v1565_v63 = vld [vmem:[#allocation5 + $0xcf8] sm:$0xff] }
 0x2b2   :  { %1716 = vmatpush1.msra.mxu1 %v1620_v1  ;;  %v1564_v1 = vld [vmem:[#allocation5 + $0xcf0] sm:$0xff] }
 0x2b3   :  { %1717 = vmatprep.subr.mxu1 %v1619_v2  ;;  %v1563_v2 = vld [vmem:[#allocation5 + $0xce8] sm:$0xff] }
 0x2b4   :  { %1718 = vmatpush1.msra.mxu1 %v1618_v7  ;;  %v1562_v7 = vld [vmem:[#allocation5 + $0xce0] sm:$0xff] }
 0x2b5   :  { %1719 = vmatprep.subr.mxu1 %v1617_v9  ;;  %v7293_v9 = vld [vmem:[%s8861_s1 + $0x68] sm:$0xff] }
 0x2b6   :  { %1720 = vmatpush1.msra.mxu1 %v1616_v12  ;;  %v1561_v12 = vld [vmem:[#allocation5 + $0xcd8] sm:$0xff] }
 0x2b7   :  { %1721 = vmatprep.subr.mxu1 %v1615_v14  ;;  %v1560_v14 = vld [vmem:[#allocation5 + $0xcd0] sm:$0xff] }
 0x2b8   :  { %1722 = vmatpush1.msra.mxu1 %v1614_v19  ;;  %v1559_v19 = vld [vmem:[#allocation5 + $0xcc8] sm:$0xff] }
 0x2b9   :  { %1723 = vmatprep.subr.mxu1 %v1613_v21  ;;  %v1558_v21 = vld [vmem:[#allocation5 + $0xcc0] sm:$0xff] }
 0x2ba   :  { %1724 = vmatpush1.msra.mxu1 %v1612_v22  ;;  %v7294_v22 = vld [vmem:[%s8861_s1 + $0x70] sm:$0xff] }
 0x2bb   :  { %1725 = vmatprep.subr.mxu1 %v1611_v23  ;;  %v1557_v23 = vld [vmem:[#allocation5 + $0xcb8] sm:$0xff] }
 0x2bc   :  { %1726 = vmatpush1.msra.mxu1 %v1610_v24  ;;  %v1556_v24 = vld [vmem:[#allocation5 + $0xcb0] sm:$0xff] }
 0x2bd   :  { %1727 = vmatprep.subr.mxu1 %v1609_v25  ;;  %v1555_v25 = vld [vmem:[#allocation5 + $0xca8] sm:$0xff] }
 0x2be   :  { %1728 = vmatpush1.msra.mxu1 %v1608_v26  ;;  %v1554_v26 = vld [vmem:[#allocation5 + $0xca0] sm:$0xff] }
 0x2bf   :  { %1729 = vmatprep.subr.mxu1 %v1607_v3  ;;  %v1553_v3 = vld [vmem:[#allocation5 + $0xc98] sm:$0xff] }
 0x2c0   :  { %1730 = vmatpush1.msra.mxu1 %v1606_v29  ;;  %v1552_v29 = vld [vmem:[#allocation5 + $0xc90] sm:$0xff] }
 0x2c1   :  { %1731 = vmatprep.subr.mxu1 %v1605_v16  ;;  %v1551_v16 = vld [vmem:[#allocation5 + $0xc88] sm:$0xff] }
 0x2c2   :  { %1732 = vmatpush1.msra.mxu1 %v1604_v31  ;;  %v1550_v31 = vld [vmem:[#allocation5 + $0xc80] sm:$0xff] }
 0x2c3   :  { %1733 = vmatprep.subr.mxu1 %v1603_v33  ;;  %v1548_v33 = vld [vmem:[#allocation5 + $0xc70] sm:$0xff] }
 0x2c4   :  { %1734 = vmatpush1.msra.mxu1 %v1602_v6  ;;  %v1547_v6 = vld [vmem:[#allocation5 + $0xc68] sm:$0xff] }
 0x329   :  { %v1137_v27 = vpop.f32.mrf.mxu1 }
 0x32a   :  { %v7868_v28 = vadd.f32 %v1137_v27, %v7809_v52  ;;  %v1601_v52 = vld [vmem:[#allocation5 + $0xe18] sm:$0xff] }
 0x32b   :  { %v7870_v30 = vpop.f32.mrf.mxu1  ;;  %1735 = vmatprep.subr.mxu1 %v1601_v52  ;;  %v7295_v27 = vld [vmem:[%s8861_s1 + $0x78] sm:$0xff]  ;;  %v1546_v52 = vld [vmem:[#allocation5 + $0xc60] sm:$0xff] }
 0x32c   :  { %1736 = vmatpush1.msra.mxu1 %v1600_v17  ;;  %v1545_v17 = vld [vmem:[#allocation5 + $0xc58] sm:$0xff] }
 0x32d   :  { %v1143_v32 = vpop.f32.mrf.mxu1  ;;  %1737 = vmatprep.subr.mxu1 %v1599_v36  ;;  %v1543_v36 = vld [vmem:[#allocation5 + $0xc48] sm:$0xff] }
 0x32e   :  { %v7873_v34 = vadd.f32 %v1143_v32, %v7813_v60  ;;  %1738 = vmatpush1.msra.mxu1 %v1598_v38  ;;  %v1549_v32 = vld [vmem:[#allocation5 + $0xc78] sm:$0xff]  ;;  %v1542_v38 = vld [vmem:[#allocation5 + $0xc40] sm:$0xff] }
 0x32f   :  { %v7875_v13 = vpop.f32.mrf.mxu1  ;;  %1772 = vmatmul.mubr.f32.vlgmr.msra.gmra.mxu1 %v7823_v11 }
 0x330   :  { %1777 = vmatprep.mubr.f32.mxu1 %v7672_v0 }
 0x331   :  { %v1149_v35 = vpop.f32.mrf.mxu1 }
 0x332   :  { %v7878_v37 = vadd.f32 %v1149_v35, %v7819_v8  ;;  %v1408_v8 = vpop.f32.mrf.mxu0  ;;  %v1544_v35 = vld [vmem:[#allocation5 + $0xc50] sm:$0xff] }
 0x333   :  { %v7880_v39 = vpop.f32.mrf.mxu1  ;;  %1778 = vmatmul.mubr.f32.gmra.mxu1 %v7887_v41 }
 0x334   :  { %1865 = vmatprep.mubr.f32.mxu1 %v7672_v0  ;;  %v1410_v44 = vpop.f32.mrf.mxu0 }
 0x335   :  { %v1155_v60 = vpop.f32.mrf.mxu1 }
 0x336   :  { %v7885_v40 = vadd.f32 %v1155_v60, %v7827_v15  ;;  %v1414_v51 = vpop.f32.mrf.mxu0  ;;  %v1541_v60 = vld [vmem:[#allocation5 + $0xc38] sm:$0xff] }
 0x337   :  { %v7891_v43 = vpop.f32.mrf.mxu1 }
 0x338   :  { %v1416_v55 = vpop.f32.mrf.mxu0 }
 0x369   :  { %v1331_v45 = vpop.f32.mrf.mxu1 }
 0x36a   :  { %v1409_v59 = vadd.f32 %v1408_v8, %v1331_v45  ;;  %v1540_v8 = vld [vmem:[#allocation5 + $0xc30] sm:$0xff]  ;;  %v1538_v45 = vld [vmem:[#allocation5 + $0xc20] sm:$0xff] }
 0x36b   :  { %v1333_v46 = vpop.f32.mrf.mxu1 }
 0x36c   :  { %v1411_v15 = vadd.f32 %v1410_v44, %v1333_v46  ;;  %v1539_v44 = vld [vmem:[#allocation5 + $0xc28] sm:$0xff]  ;;  %v1537_v46 = vld [vmem:[#allocation5 + $0xc18] sm:$0xff] }
 0x36d   :  { %v1337_v53 = vpop.f32.mrf.mxu1 }
 0x36e   :  { %v1415_v58 = vadd.f32 %v1414_v51, %v1337_v53  ;;  %v1536_v51 = vld [vmem:[#allocation5 + $0xc10] sm:$0xff]  ;;  %v1535_v53 = vld [vmem:[#allocation5 + $0xc08] sm:$0xff] }
 0x36f   :  { %v1339_v56 = vpop.f32.mrf.mxu1 }
 0x370   :  { %v1417_v57 = vadd.f32 %v1416_v55, %v1339_v56  ;;  %v1534_v55 = vld [vmem:[#allocation5 + $0xc00] sm:$0xff]  ;;  %v1597_v56 = vld [vmem:[#allocation5 + $0xdf8] sm:$0xff] }
 0x372   :  { %1464 = vmatprep.subr.mxu0 %v1417_v57  ;;  %v1596_v57 = vld [vmem:[#allocation5 + $0xdf0] sm:$0xff] }
 0x373   :  { %1465 = vmatpush1.msra.mxu0 %v1415_v58  ;;  %v1595_v58 = vld [vmem:[#allocation5 + $0xde8] sm:$0xff] }
 0x374   :  { %1466 = vmatprep.subr.mxu0 %v1411_v15  ;;  %v1594_v15 = vld [vmem:[#allocation5 + $0xde0] sm:$0xff] }
 0x375   :  { %1467 = vmatpush1.msra.mxu0 %v1409_v59  ;;  %v1593_v59 = vld [vmem:[#allocation5 + $0xdd8] sm:$0xff] }
 0x376   :  { %7296 = vmatmul.mubr.msk.f32.vlgmr.msra.gmra.mxu0 %vm600_vm0, %v7292_v61  ;;  %1630 = vmatprep.subr.mxu0 %v1565_v63  ;;  %v1592_v61 = vld [vmem:[#allocation5 + $0xdd0] sm:$0xff]  ;;  %v1591_v63 = vld [vmem:[#allocation5 + $0xdc8] sm:$0xff] }
 0x377   :  { %1631 = vmatpush1.msra.mxu0 %v1564_v1  ;;  %1506 = vmatprep.mubr.f32.mxu0 %v7672_v0  ;;  %v1590_v1 = vld [vmem:[#allocation5 + $0xdc0] sm:$0xff] }
 0x378   :  { %1632 = vmatprep.subr.mxu0 %v1563_v2  ;;  %v1589_v2 = vld [vmem:[#allocation5 + $0xdb8] sm:$0xff] }
 0x379   :  { %1633 = vmatpush1.msra.mxu0 %v1562_v7  ;;  %v1588_v7 = vld [vmem:[#allocation5 + $0xdb0] sm:$0xff] }
 0x37a   :  { %7297 = vmatmul.mubr.msk.f32.gmra.mxu0 %vm600_vm0, %v7293_v9  ;;  %1634 = vmatprep.subr.mxu0 %v1561_v12  ;;  %v1587_v9 = vld [vmem:[#allocation5 + $0xda8] sm:$0xff]  ;;  %v1586_v12 = vld [vmem:[#allocation5 + $0xda0] sm:$0xff] }
 0x37b   :  { %1635 = vmatpush1.msra.mxu0 %v1560_v14  ;;  %1512 = vmatprep.mubr.f32.mxu0 %v7672_v0  ;;  %v1585_v14 = vld [vmem:[#allocation5 + $0xd98] sm:$0xff] }
 0x37c   :  { %1636 = vmatprep.subr.mxu0 %v1559_v19  ;;  %v1584_v19 = vld [vmem:[#allocation5 + $0xd90] sm:$0xff] }
 0x37d   :  { %1637 = vmatpush1.msra.mxu0 %v1558_v21  ;;  %v1583_v21 = vld [vmem:[#allocation5 + $0xd88] sm:$0xff] }
 0x37e   :  { %7298 = vmatmul.mubr.msk.f32.gmra.mxu0 %vm600_vm0, %v7294_v22  ;;  %1638 = vmatprep.subr.mxu0 %v1557_v23  ;;  %v1582_v22 = vld [vmem:[#allocation5 + $0xd80] sm:$0xff]  ;;  %v1581_v23 = vld [vmem:[#allocation5 + $0xd78] sm:$0xff] }
 0x37f   :  { %1639 = vmatpush1.msra.mxu0 %v1556_v24  ;;  %1518 = vmatprep.mubr.f32.mxu0 %v7672_v0  ;;  %v1580_v24 = vld [vmem:[#allocation5 + $0xd70] sm:$0xff] }
 0x380   :  { %1640 = vmatprep.subr.mxu0 %v1555_v25  ;;  %v1579_v25 = vld [vmem:[#allocation5 + $0xd68] sm:$0xff] }
 0x381   :  { %1641 = vmatpush1.msra.mxu0 %v1554_v26  ;;  %v1578_v26 = vld [vmem:[#allocation5 + $0xd60] sm:$0xff] }
 0x382   :  { %7299 = vmatmul.mubr.msk.f32.gmra.mxu0 %vm600_vm0, %v7295_v27  ;;  %1642 = vmatprep.subr.mxu0 %v1553_v3  ;;  %v1577_v27 = vld [vmem:[#allocation5 + $0xd58] sm:$0xff]  ;;  %v1576_v3 = vld [vmem:[#allocation5 + $0xd50] sm:$0xff] }
 0x383   :  { %1643 = vmatpush1.msra.mxu0 %v1552_v29  ;;  %1694 = vmatprep.mubr.f32.mxu0 %v7854_v4  ;;  %v1575_v29 = vld [vmem:[#allocation5 + $0xd48] sm:$0xff] }
 0x384   :  { %1644 = vmatprep.subr.mxu0 %v1551_v16  ;;  %v1574_v16 = vld [vmem:[#allocation5 + $0xd40] sm:$0xff] }
 0x385   :  { %1645 = vmatpush1.msra.mxu0 %v1550_v31  ;;  %v1573_v31 = vld [vmem:[#allocation5 + $0xd38] sm:$0xff] }
 0x386   :  { %1646 = vmatprep.subr.mxu0 %v1549_v32  ;;  %v1572_v32 = vld [vmem:[#allocation5 + $0xd30] sm:$0xff] }
 0x387   :  { %1647 = vmatpush1.msra.mxu0 %v1548_v33  ;;  %v1571_v33 = vld [vmem:[#allocation5 + $0xd28] sm:$0xff] }
 0x388   :  { %1648 = vmatprep.subr.mxu0 %v1547_v6  ;;  %v1570_v6 = vld [vmem:[#allocation5 + $0xd20] sm:$0xff] }
 0x389   :  { %1649 = vmatpush1.msra.mxu0 %v1546_v52  ;;  %v1569_v52 = vld [vmem:[#allocation5 + $0xd18] sm:$0xff] }
 0x38a   :  { %1650 = vmatprep.subr.mxu0 %v1545_v17  ;;  %v1568_v17 = vld [vmem:[#allocation5 + $0xd10] sm:$0xff] }
 0x38b   :  { %1651 = vmatpush1.msra.mxu0 %v1544_v35  ;;  %v1567_v35 = vld [vmem:[#allocation5 + $0xd08] sm:$0xff] }
 0x38c   :  { %1652 = vmatprep.subr.mxu0 %v1543_v36  ;;  %v1566_v36 = vld [vmem:[#allocation5 + $0xd00] sm:$0xff] }
 0x38d   :  { %1653 = vmatpush1.msra.mxu0 %v1542_v38  ;;  %v1994_v38 = vld [vmem:[#allocation5 + $0x11f8] sm:$0xff] }
 0x38e   :  { %1654 = vmatprep.subr.mxu0 %v1541_v60  ;;  %v1993_v60 = vld [vmem:[#allocation5 + $0x11f0] sm:$0xff] }
 0x38f   :  { %1655 = vmatpush1.msra.mxu0 %v1540_v8  ;;  %v1992_v8 = vld [vmem:[#allocation5 + $0x11e8] sm:$0xff] }
 0x390   :  { %1656 = vmatprep.subr.mxu0 %v1539_v44  ;;  %v1991_v44 = vld [vmem:[#allocation5 + $0x11e0] sm:$0xff] }
 0x391   :  { %1657 = vmatpush1.msra.mxu0 %v1538_v45  ;;  %v1990_v45 = vld [vmem:[#allocation5 + $0x11d8] sm:$0xff] }
 0x392   :  { %1658 = vmatprep.subr.mxu0 %v1537_v46  ;;  %v1989_v46 = vld [vmem:[#allocation5 + $0x11d0] sm:$0xff] }
 0x393   :  { %1659 = vmatpush1.msra.mxu0 %v1536_v51  ;;  %v1988_v51 = vld [vmem:[#allocation5 + $0x11c8] sm:$0xff] }
 0x394   :  { %1660 = vmatprep.subr.mxu0 %v1535_v53  ;;  %v1987_v53 = vld [vmem:[#allocation5 + $0x11c0] sm:$0xff] }
 0x395   :  { %1661 = vmatpush1.msra.mxu0 %v1534_v55  ;;  %v1986_v55 = vld [vmem:[#allocation5 + $0x11b8] sm:$0xff] }
 0x396   :  { %1662 = vmatprep.subr.mxu0 %v1597_v56  ;;  %v1985_v56 = vld [vmem:[#allocation5 + $0x11b0] sm:$0xff] }
 0x397   :  { %1663 = vmatpush2.msra.mxu0 %v1596_v57  ;;  %v1984_v57 = vld [vmem:[#allocation5 + $0x11a8] sm:$0xff] }
 0x398   :  { %1664 = vmatprep.subr.mxu0 %v1595_v58  ;;  %v1983_v58 = vld [vmem:[#allocation5 + $0x11a0] sm:$0xff] }
 0x399   :  { %1665 = vmatpush2.msra.mxu0 %v1594_v15  ;;  %v1982_v15 = vld [vmem:[#allocation5 + $0x1198] sm:$0xff] }
 0x39a   :  { %1666 = vmatprep.subr.mxu0 %v1593_v59  ;;  %v1981_v59 = vld [vmem:[#allocation5 + $0x1190] sm:$0xff] }
 0x39b   :  { %1667 = vmatpush2.msra.mxu0 %v1592_v61  ;;  %v1980_v61 = vld [vmem:[#allocation5 + $0x1188] sm:$0xff] }
 0x39c   :  { %1668 = vmatprep.subr.mxu0 %v1591_v63  ;;  %v1979_v63 = vld [vmem:[#allocation5 + $0x1180] sm:$0xff] }
 0x39d   :  { %1669 = vmatpush2.msra.mxu0 %v1590_v1  ;;  %v1978_v1 = vld [vmem:[#allocation5 + $0x1178] sm:$0xff] }
 0x39e   :  { %1670 = vmatprep.subr.mxu0 %v1589_v2  ;;  %v1977_v2 = vld [vmem:[#allocation5 + $0x1170] sm:$0xff] }
 0x39f   :  { %1671 = vmatpush2.msra.mxu0 %v1588_v7  ;;  %v1976_v7 = vld [vmem:[#allocation5 + $0x1168] sm:$0xff] }
 0x3a0   :  { %1672 = vmatprep.subr.mxu0 %v1587_v9  ;;  %v1975_v9 = vld [vmem:[#allocation5 + $0x1160] sm:$0xff] }
 0x3a1   :  { %1673 = vmatpush2.msra.mxu0 %v1586_v12  ;;  %v1974_v12 = vld [vmem:[#allocation5 + $0x1158] sm:$0xff] }
 0x3a2   :  { %1674 = vmatprep.subr.mxu0 %v1585_v14  ;;  %v1973_v14 = vld [vmem:[#allocation5 + $0x1150] sm:$0xff] }
 0x3a3   :  { %1675 = vmatpush2.msra.mxu0 %v1584_v19 }
 0x3a4   :  { %1676 = vmatprep.subr.mxu0 %v1583_v21  ;;  %v1972_v21 = vld [vmem:[#allocation5 + $0x1148] sm:$0xff] }
 0x3a5   :  { %1677 = vmatpush2.msra.mxu0 %v1582_v22 }
 0x3a6   :  { %1678 = vmatprep.subr.mxu0 %v1581_v23  ;;  %v1971_v23 = vld [vmem:[#allocation5 + $0x1140] sm:$0xff] }
 0x3a7   :  { %1679 = vmatpush2.msra.mxu0 %v1580_v24 }
 0x3a8   :  { %1680 = vmatprep.subr.mxu0 %v1579_v25  ;;  %v1970_v25 = vld [vmem:[#allocation5 + $0x1138] sm:$0xff] }
 0x3a9   :  { %1681 = vmatpush2.msra.mxu0 %v1578_v26  ;;  %v1969_v26 = vld [vmem:[#allocation5 + $0x1130] sm:$0xff] }
 0x3aa   :  { %1682 = vmatprep.subr.mxu0 %v1577_v27 }
 0x3ab   :  { %1683 = vmatpush2.msra.mxu0 %v1576_v3  ;;  %v1968_v3 = vld [vmem:[#allocation5 + $0x1128] sm:$0xff] }
 0x3ac   :  { %1684 = vmatprep.subr.mxu0 %v1575_v29 }
 0x3ad   :  { %1685 = vmatpush2.msra.mxu0 %v1574_v16  ;;  %v1967_v16 = vld [vmem:[#allocation5 + $0x1120] sm:$0xff] }
 0x3ae   :  { %1686 = vmatprep.subr.mxu0 %v1573_v31 }
 0x3af   :  { %1687 = vmatpush2.msra.mxu0 %v1572_v32  ;;  %v1965_v32 = vld [vmem:[#allocation5 + $0x1110] sm:$0xff] }
 0x3b0   :  { %1688 = vmatprep.subr.mxu0 %v1571_v33 }
 0x3b1   :  { %1689 = vmatpush2.msra.mxu0 %v1570_v6  ;;  %v1964_v6 = vld [vmem:[#allocation5 + $0x1108] sm:$0xff] }
 0x3b2   :  { %1690 = vmatprep.subr.mxu0 %v1569_v52 }
 0x3b3   :  { %1691 = vmatpush2.msra.mxu0 %v1568_v17  ;;  %v1963_v17 = vld [vmem:[#allocation5 + $0x1100] sm:$0xff] }
 0x3b4   :  { %1692 = vmatprep.subr.mxu0 %v1567_v35 }
 0x3b5   :  { %1693 = vmatpush2.msra.mxu0 %v1566_v36 }
 0x3b6   :  { %1695 = vmatmul.mubr.f32.vlgmr.msra.gmra.mxu0 %v7857_v47  ;;  %2072 = vmatprep.subr.mxu0 %v1994_v38 }
 0x3b7   :  { %1700 = vmatprep.mubr.f32.mxu0 %v7860_v48  ;;  %2073 = vmatpush1.msra.mxu0 %v1993_v60 }
 0x3b8   :  { %2074 = vmatprep.subr.mxu0 %v1992_v8 }
 0x3b9   :  { %2075 = vmatpush1.msra.mxu0 %v1991_v44 }
 0x3ba   :  { %1701 = vmatmul.mubr.f32.gmra.mxu0 %v7863_v49  ;;  %2076 = vmatprep.subr.mxu0 %v1990_v45 }
 0x3bb   :  { %2136 = vmatprep.mubr.f32.mxu0 %v7672_v0  ;;  %2077 = vmatpush1.msra.mxu0 %v1989_v46 }
 0x3bc   :  { %2078 = vmatprep.subr.mxu0 %v1988_v51 }
 0x3bd   :  { %2079 = vmatpush1.msra.mxu0 %v1987_v53 }
 0x3be   :  { %2080 = vmatprep.subr.mxu0 %v1986_v55 }
 0x3bf   :  { %2081 = vmatpush1.msra.mxu0 %v1985_v56 }
 0x3c0   :  { %2082 = vmatprep.subr.mxu0 %v1984_v57  ;;  %v7300_v57 = vld [vmem:[%s8861_s1 + $0x80] sm:$0xff] }
 0x3c1   :  { %2083 = vmatpush1.msra.mxu0 %v1983_v58  ;;  %v1930_v58 = vld [vmem:[#allocation5 + $0xff8] sm:$0xff] }
 0x3c2   :  { %2084 = vmatprep.subr.mxu0 %v1982_v15  ;;  %v1929_v15 = vld [vmem:[#allocation5 + $0xff0] sm:$0xff] }
 0x3c3   :  { %2085 = vmatpush1.msra.mxu0 %v1981_v59  ;;  %v1928_v59 = vld [vmem:[#allocation5 + $0xfe8] sm:$0xff] }
 0x3c4   :  { %2086 = vmatprep.subr.mxu0 %v1980_v61  ;;  %v1927_v61 = vld [vmem:[#allocation5 + $0xfe0] sm:$0xff] }
 0x3c5   :  { %2087 = vmatpush1.msra.mxu0 %v1979_v63  ;;  %v7301_v63 = vld [vmem:[%s8861_s1 + $0x88] sm:$0xff] }
 0x3c6   :  { %2088 = vmatprep.subr.mxu0 %v1978_v1  ;;  %v1926_v1 = vld [vmem:[#allocation5 + $0xfd8] sm:$0xff] }
 0x3c7   :  { %2089 = vmatpush1.msra.mxu0 %v1977_v2  ;;  %v1925_v2 = vld [vmem:[#allocation5 + $0xfd0] sm:$0xff] }
 0x3c8   :  { %2090 = vmatprep.subr.mxu0 %v1976_v7  ;;  %v1924_v7 = vld [vmem:[#allocation5 + $0xfc8] sm:$0xff] }
 0x3c9   :  { %2091 = vmatpush1.msra.mxu0 %v1975_v9  ;;  %v1923_v9 = vld [vmem:[#allocation5 + $0xfc0] sm:$0xff] }
 0x3ca   :  { %2092 = vmatprep.subr.mxu0 %v1974_v12  ;;  %v7302_v12 = vld [vmem:[%s8861_s1 + $0x90] sm:$0xff] }
 0x3cb   :  { %2093 = vmatpush1.msra.mxu0 %v1973_v14  ;;  %v1922_v14 = vld [vmem:[#allocation5 + $0xfb8] sm:$0xff] }
 0x3cc   :  { %2094 = vmatprep.subr.mxu0 %v1972_v21  ;;  %v1920_v21 = vld [vmem:[#allocation5 + $0xfa8] sm:$0xff] }
 0x3cd   :  { %2095 = vmatpush1.msra.mxu0 %v1971_v23  ;;  %v1919_v23 = vld [vmem:[#allocation5 + $0xfa0] sm:$0xff] }
 0x3ce   :  { %2096 = vmatprep.subr.mxu0 %v1970_v25  ;;  %v7303_v25 = vld [vmem:[%s8861_s1 + $0x98] sm:$0xff] }
 0x3cf   :  { %2097 = vmatpush1.msra.mxu0 %v1969_v26  ;;  %v1918_v26 = vld [vmem:[#allocation5 + $0xf98] sm:$0xff] }
 0x3d0   :  { %2098 = vmatprep.subr.mxu0 %v1968_v3  ;;  %v1916_v3 = vld [vmem:[#allocation5 + $0xf88] sm:$0xff] }
 0x3d1   :  { %2099 = vmatpush1.msra.mxu0 %v1967_v16  ;;  %v1915_v16 = vld [vmem:[#allocation5 + $0xf80] sm:$0xff] }
 0x3ef   :  { %v1773_v38 = vpop.f32.mrf.mxu1 }
 0x3f1   :  { %v1775_v60 = vpop.f32.mrf.mxu1 }
 0x3f3   :  { %v1779_v45 = vpop.f32.mrf.mxu1 }
 0x3f5   :  { %v1781_v51 = vpop.f32.mrf.mxu1 }
 0x436   :  { %v1502_v19 = vpop.f32.mrf.mxu0 }
 0x437   :  { %v7918_v22 = vadd.f32 %v1502_v19, %v7868_v28  ;;  %v1966_v28 = vld [vmem:[#allocation5 + $0x1118] sm:$0xff]  ;;  %v1921_v19 = vld [vmem:[#allocation5 + $0xfb0] sm:$0xff] }
 0x438   :  { %v7920_v24 = vpop.f32.mrf.mxu0  ;;  %2100 = vmatprep.subr.mxu0 %v1966_v28  ;;  %v1914_v28 = vld [vmem:[#allocation5 + $0xf78] sm:$0xff] }
 0x439   :  { %2101 = vmatpush1.msra.mxu0 %v1965_v32  ;;  %v1913_v32 = vld [vmem:[#allocation5 + $0xf70] sm:$0xff] }
 0x43a   :  { %v1508_v27 = vpop.f32.mrf.mxu0  ;;  %2102 = vmatprep.subr.mxu0 %v1964_v6  ;;  %v1911_v6 = vld [vmem:[#allocation5 + $0xf60] sm:$0xff] }
 0x43b   :  { %v7923_v29 = vadd.f32 %v1508_v27, %v7873_v34  ;;  %2103 = vmatpush1.msra.mxu0 %v1963_v17  ;;  %v1917_v27 = vld [vmem:[#allocation5 + $0xf90] sm:$0xff]  ;;  %v1910_v17 = vld [vmem:[#allocation5 + $0xf58] sm:$0xff] }
 0x43c   :  { %v7925_v31 = vpop.f32.mrf.mxu0  ;;  %2137 = vmatmul.mubr.f32.vlgmr.msra.gmra.mxu0 %v7823_v11 }
 0x43d   :  { %2142 = vmatprep.mubr.f32.mxu0 %v7672_v0 }
 0x43e   :  { %v1514_v33 = vpop.f32.mrf.mxu0 }
 0x43f   :  { %v7928_v52 = vadd.f32 %v1514_v33, %v7878_v37  ;;  %v1912_v33 = vld [vmem:[#allocation5 + $0xf68] sm:$0xff] }
 0x440   :  { %v7930_v35 = vpop.f32.mrf.mxu0  ;;  %2143 = vmatmul.mubr.f32.gmra.mxu0 %v7887_v41 }
 0x441   :  { %2230 = vmatprep.mubr.f32.mxu0 %v7672_v0 }
 0x442   :  { %v1520_v34 = vpop.f32.mrf.mxu0 }
 0x443   :  { %v7935_v36 = vadd.f32 %v1520_v34, %v7885_v40  ;;  %v1909_v34 = vld [vmem:[#allocation5 + $0xf50] sm:$0xff] }
 0x444   :  { %v7939_v37 = vpop.f32.mrf.mxu0 }
 0x476   :  { %v1696_v8 = vpop.f32.mrf.mxu0 }
 0x477   :  { %v1774_v40 = vadd.f32 %v1773_v38, %v1696_v8  ;;  %v1908_v38 = vld [vmem:[#allocation5 + $0xf48] sm:$0xff]  ;;  %v1906_v8 = vld [vmem:[#allocation5 + $0xf38] sm:$0xff] }
 0x478   :  { %v1698_v44 = vpop.f32.mrf.mxu0 }
 0x479   :  { %v1776_v56 = vadd.f32 %v1775_v60, %v1698_v44  ;;  %v1907_v60 = vld [vmem:[#allocation5 + $0xf40] sm:$0xff]  ;;  %v1905_v44 = vld [vmem:[#allocation5 + $0xf30] sm:$0xff] }
 0x47a   :  { %v1702_v46 = vpop.f32.mrf.mxu0 }
 0x47b   :  { %v1780_v55 = vadd.f32 %v1779_v45, %v1702_v46  ;;  %v1903_v45 = vld [vmem:[#allocation5 + $0xf20] sm:$0xff]  ;;  %v1902_v46 = vld [vmem:[#allocation5 + $0xf18] sm:$0xff] }
 0x47c   :  { %v1704_v11 = vpop.f32.mrf.mxu0 }
 0x47d   :  { %v1782_v53 = vadd.f32 %v1781_v51, %v1704_v11  ;;  %v1901_v51 = vld [vmem:[#allocation5 + $0xf10] sm:$0xff]  ;;  %v1900_v11 = vld [vmem:[#allocation5 + $0xf08] sm:$0xff] }
 0x47f   :  { %1829 = vmatprep.subr.mxu1 %v1782_v53  ;;  %v1899_v53 = vld [vmem:[#allocation5 + $0xf00] sm:$0xff] }
 0x480   :  { %1830 = vmatpush1.msra.mxu1 %v1780_v55  ;;  %v1962_v55 = vld [vmem:[#allocation5 + $0x10f8] sm:$0xff] }
 0x481   :  { %1831 = vmatprep.subr.mxu1 %v1776_v56  ;;  %v1961_v56 = vld [vmem:[#allocation5 + $0x10f0] sm:$0xff] }
 0x482   :  { %1832 = vmatpush1.msra.mxu1 %v1774_v40  ;;  %v1960_v40 = vld [vmem:[#allocation5 + $0x10e8] sm:$0xff] }
 0x483   :  { %7304 = vmatmul.mubr.msk.f32.vlgmr.msra.gmra.mxu1 %vm600_vm0, %v7300_v57  ;;  %1995 = vmatprep.subr.mxu1 %v1930_v58  ;;  %v1959_v57 = vld [vmem:[#allocation5 + $0x10e0] sm:$0xff]  ;;  %v1958_v58 = vld [vmem:[#allocation5 + $0x10d8] sm:$0xff] }
 0x484   :  { %1996 = vmatpush1.msra.mxu1 %v1929_v15  ;;  %1871 = vmatprep.mubr.f32.mxu1 %v7672_v0  ;;  %v1957_v15 = vld [vmem:[#allocation5 + $0x10d0] sm:$0xff] }
 0x485   :  { %1997 = vmatprep.subr.mxu1 %v1928_v59  ;;  %v1956_v59 = vld [vmem:[#allocation5 + $0x10c8] sm:$0xff] }
 0x486   :  { %1998 = vmatpush1.msra.mxu1 %v1927_v61  ;;  %v1955_v61 = vld [vmem:[#allocation5 + $0x10c0] sm:$0xff] }
 0x487   :  { %7305 = vmatmul.mubr.msk.f32.gmra.mxu1 %vm600_vm0, %v7301_v63  ;;  %1999 = vmatprep.subr.mxu1 %v1926_v1  ;;  %v1954_v63 = vld [vmem:[#allocation5 + $0x10b8] sm:$0xff]  ;;  %v1953_v1 = vld [vmem:[#allocation5 + $0x10b0] sm:$0xff] }
 0x488   :  { %2000 = vmatpush1.msra.mxu1 %v1925_v2  ;;  %1877 = vmatprep.mubr.f32.mxu1 %v7672_v0  ;;  %v1952_v2 = vld [vmem:[#allocation5 + $0x10a8] sm:$0xff] }
 0x489   :  { %2001 = vmatprep.subr.mxu1 %v1924_v7  ;;  %v1951_v7 = vld [vmem:[#allocation5 + $0x10a0] sm:$0xff] }
 0x48a   :  { %2002 = vmatpush1.msra.mxu1 %v1923_v9  ;;  %v1950_v9 = vld [vmem:[#allocation5 + $0x1098] sm:$0xff] }
 0x48b   :  { %7306 = vmatmul.mubr.msk.f32.gmra.mxu1 %vm600_vm0, %v7302_v12  ;;  %2003 = vmatprep.subr.mxu1 %v1922_v14  ;;  %v1949_v12 = vld [vmem:[#allocation5 + $0x1090] sm:$0xff]  ;;  %v1948_v14 = vld [vmem:[#allocation5 + $0x1088] sm:$0xff] }
 0x48c   :  { %2004 = vmatpush1.msra.mxu1 %v1921_v19  ;;  %1883 = vmatprep.mubr.f32.mxu1 %v7672_v0  ;;  %v1947_v19 = vld [vmem:[#allocation5 + $0x1080] sm:$0xff] }
 0x48d   :  { %2005 = vmatprep.subr.mxu1 %v1920_v21  ;;  %v1946_v21 = vld [vmem:[#allocation5 + $0x1078] sm:$0xff] }
 0x48e   :  { %2006 = vmatpush1.msra.mxu1 %v1919_v23  ;;  %v1945_v23 = vld [vmem:[#allocation5 + $0x1070] sm:$0xff] }
 0x48f   :  { %7307 = vmatmul.mubr.msk.f32.gmra.mxu1 %vm600_vm0, %v7303_v25  ;;  %2007 = vmatprep.subr.mxu1 %v1918_v26  ;;  %v1944_v25 = vld [vmem:[#allocation5 + $0x1068] sm:$0xff]  ;;  %v1943_v26 = vld [vmem:[#allocation5 + $0x1060] sm:$0xff] }
 0x490   :  { %2008 = vmatpush1.msra.mxu1 %v1917_v27  ;;  %2059 = vmatprep.mubr.f32.mxu1 %v7854_v4  ;;  %v1904_v4 = vld [vmem:[#allocation5 + $0xf28] sm:$0xff]  ;;  %v1942_v27 = vld [vmem:[#allocation5 + $0x1058] sm:$0xff] }
 0x491   :  { %2009 = vmatprep.subr.mxu1 %v1916_v3  ;;  %v1941_v3 = vld [vmem:[#allocation5 + $0x1050] sm:$0xff] }
 0x492   :  { %2010 = vmatpush1.msra.mxu1 %v1915_v16  ;;  %v1940_v16 = vld [vmem:[#allocation5 + $0x1048] sm:$0xff] }
 0x493   :  { %2011 = vmatprep.subr.mxu1 %v1914_v28  ;;  %v1939_v28 = vld [vmem:[#allocation5 + $0x1040] sm:$0xff] }
 0x494   :  { %2012 = vmatpush1.msra.mxu1 %v1913_v32  ;;  %v1938_v32 = vld [vmem:[#allocation5 + $0x1038] sm:$0xff] }
 0x495   :  { %2013 = vmatprep.subr.mxu1 %v1912_v33  ;;  %v1937_v33 = vld [vmem:[#allocation5 + $0x1030] sm:$0xff] }
 0x496   :  { %2014 = vmatpush1.msra.mxu1 %v1911_v6  ;;  %v1936_v6 = vld [vmem:[#allocation5 + $0x1028] sm:$0xff] }
 0x497   :  { %2015 = vmatprep.subr.mxu1 %v1910_v17  ;;  %v1935_v17 = vld [vmem:[#allocation5 + $0x1020] sm:$0xff] }
 0x498   :  { %2016 = vmatpush1.msra.mxu1 %v1909_v34  ;;  %v1934_v34 = vld [vmem:[#allocation5 + $0x1018] sm:$0xff] }
 0x499   :  { %2017 = vmatprep.subr.mxu1 %v1908_v38  ;;  %v1933_v38 = vld [vmem:[#allocation5 + $0x1010] sm:$0xff] }
 0x49a   :  { %2018 = vmatpush1.msra.mxu1 %v1907_v60  ;;  %v1932_v60 = vld [vmem:[#allocation5 + $0x1008] sm:$0xff] }
 0x49b   :  { %2019 = vmatprep.subr.mxu1 %v1906_v8  ;;  %v1931_v8 = vld [vmem:[#allocation5 + $0x1000] sm:$0xff] }
 0x49c   :  { %2020 = vmatpush1.msra.mxu1 %v1905_v44  ;;  %v2359_v44 = vld [vmem:[#allocation5 + $0x14f8] sm:$0xff] }
 0x49d   :  { %2021 = vmatprep.subr.mxu1 %v1904_v4  ;;  %v2358_v4 = vld [vmem:[#allocation5 + $0x14f0] sm:$0xff] }
 0x49e   :  { %2022 = vmatpush1.msra.mxu1 %v1903_v45  ;;  %v2357_v45 = vld [vmem:[#allocation5 + $0x14e8] sm:$0xff] }
 0x49f   :  { %2023 = vmatprep.subr.mxu1 %v1902_v46  ;;  %v2356_v46 = vld [vmem:[#allocation5 + $0x14e0] sm:$0xff] }
 0x4a0   :  { %2024 = vmatpush1.msra.mxu1 %v1901_v51  ;;  %v2355_v51 = vld [vmem:[#allocation5 + $0x14d8] sm:$0xff] }
 0x4a1   :  { %2025 = vmatprep.subr.mxu1 %v1900_v11  ;;  %v2354_v11 = vld [vmem:[#allocation5 + $0x14d0] sm:$0xff] }
 0x4a2   :  { %2026 = vmatpush1.msra.mxu1 %v1899_v53  ;;  %v2353_v53 = vld [vmem:[#allocation5 + $0x14c8] sm:$0xff] }
 0x4a3   :  { %2027 = vmatprep.subr.mxu1 %v1962_v55  ;;  %v2349_v55 = vld [vmem:[#allocation5 + $0x14a8] sm:$0xff] }
 0x4a4   :  { %2028 = vmatpush2.msra.mxu1 %v1961_v56  ;;  %v2348_v56 = vld [vmem:[#allocation5 + $0x14a0] sm:$0xff] }
 0x4a5   :  { %2029 = vmatprep.subr.mxu1 %v1960_v40  ;;  %v2347_v40 = vld [vmem:[#allocation5 + $0x1498] sm:$0xff] }
 0x4a6   :  { %2030 = vmatpush2.msra.mxu1 %v1959_v57  ;;  %v2346_v57 = vld [vmem:[#allocation5 + $0x1490] sm:$0xff] }
 0x4a7   :  { %2031 = vmatprep.subr.mxu1 %v1958_v58  ;;  %v2345_v58 = vld [vmem:[#allocation5 + $0x1488] sm:$0xff] }
 0x4a8   :  { %2032 = vmatpush2.msra.mxu1 %v1957_v15  ;;  %v2344_v15 = vld [vmem:[#allocation5 + $0x1480] sm:$0xff] }
 0x4a9   :  { %2033 = vmatprep.subr.mxu1 %v1956_v59  ;;  %v2343_v59 = vld [vmem:[#allocation5 + $0x1478] sm:$0xff] }
 0x4aa   :  { %2034 = vmatpush2.msra.mxu1 %v1955_v61  ;;  %v2342_v61 = vld [vmem:[#allocation5 + $0x1470] sm:$0xff] }
 0x4ab   :  { %2035 = vmatprep.subr.mxu1 %v1954_v63  ;;  %v2341_v63 = vld [vmem:[#allocation5 + $0x1468] sm:$0xff] }
 0x4ac   :  { %2036 = vmatpush2.msra.mxu1 %v1953_v1  ;;  %v2340_v1 = vld [vmem:[#allocation5 + $0x1460] sm:$0xff] }
 0x4ad   :  { %2037 = vmatprep.subr.mxu1 %v1952_v2  ;;  %v2339_v2 = vld [vmem:[#allocation5 + $0x1458] sm:$0xff] }
 0x4ae   :  { %2038 = vmatpush2.msra.mxu1 %v1951_v7  ;;  %v2338_v7 = vld [vmem:[#allocation5 + $0x1450] sm:$0xff] }
 0x4af   :  { %2039 = vmatprep.subr.mxu1 %v1950_v9 }
 0x4b0   :  { %2040 = vmatpush2.msra.mxu1 %v1949_v12  ;;  %v2337_v12 = vld [vmem:[#allocation5 + $0x1448] sm:$0xff] }
 0x4b1   :  { %2041 = vmatprep.subr.mxu1 %v1948_v14 }
 0x4b2   :  { %2042 = vmatpush2.msra.mxu1 %v1947_v19  ;;  %v2336_v19 = vld [vmem:[#allocation5 + $0x1440] sm:$0xff] }
 0x4b3   :  { %2043 = vmatprep.subr.mxu1 %v1946_v21 }
 0x4b4   :  { %2044 = vmatpush2.msra.mxu1 %v1945_v23  ;;  %v2335_v23 = vld [vmem:[#allocation5 + $0x1438] sm:$0xff] }
 0x4b5   :  { %2045 = vmatprep.subr.mxu1 %v1944_v25  ;;  %v2334_v25 = vld [vmem:[#allocation5 + $0x1430] sm:$0xff] }
 0x4b6   :  { %2046 = vmatpush2.msra.mxu1 %v1943_v26 }
 0x4b7   :  { %2047 = vmatprep.subr.mxu1 %v1942_v27  ;;  %v2333_v27 = vld [vmem:[#allocation5 + $0x1428] sm:$0xff] }
 0x4b8   :  { %2048 = vmatpush2.msra.mxu1 %v1941_v3 }
 0x4b9   :  { %2049 = vmatprep.subr.mxu1 %v1940_v16  ;;  %v2332_v16 = vld [vmem:[#allocation5 + $0x1420] sm:$0xff] }
 0x4ba   :  { %2050 = vmatpush2.msra.mxu1 %v1939_v28 }
 0x4bb   :  { %2051 = vmatprep.subr.mxu1 %v1938_v32  ;;  %v2330_v32 = vld [vmem:[#allocation5 + $0x1410] sm:$0xff] }
 0x4bc   :  { %2052 = vmatpush2.msra.mxu1 %v1937_v33 }
 0x4bd   :  { %2053 = vmatprep.subr.mxu1 %v1936_v6  ;;  %v2329_v6 = vld [vmem:[#allocation5 + $0x1408] sm:$0xff] }
 0x4be   :  { %2054 = vmatpush2.msra.mxu1 %v1935_v17 }
 0x4bf   :  { %2055 = vmatprep.subr.mxu1 %v1934_v34  ;;  %v2328_v34 = vld [vmem:[#allocation5 + $0x1400] sm:$0xff] }
 0x4c0   :  { %2056 = vmatpush2.msra.mxu1 %v1933_v38 }
 0x4c1   :  { %2057 = vmatprep.subr.mxu1 %v1932_v60 }
 0x4c2   :  { %2058 = vmatpush2.msra.mxu1 %v1931_v8 }
 0x4c3   :  { %2060 = vmatmul.mubr.f32.vlgmr.msra.gmra.mxu1 %v7857_v47  ;;  %2437 = vmatprep.subr.mxu1 %v2359_v44  ;;  %v2352_v47 = vld [vmem:[#allocation5 + $0x14c0] sm:$0xff] }
 0x4c4   :  { %2065 = vmatprep.mubr.f32.mxu1 %v7860_v48  ;;  %2438 = vmatpush1.msra.mxu1 %v2358_v4  ;;  %v2351_v48 = vld [vmem:[#allocation5 + $0x14b8] sm:$0xff] }
 0x4c5   :  { %2439 = vmatprep.subr.mxu1 %v2357_v45 }
 0x4c6   :  { %2440 = vmatpush1.msra.mxu1 %v2356_v46 }
 0x4c7   :  { %2066 = vmatmul.mubr.f32.gmra.mxu1 %v7863_v49  ;;  %2441 = vmatprep.subr.mxu1 %v2355_v51  ;;  %v2350_v49 = vld [vmem:[#allocation5 + $0x14b0] sm:$0xff] }
 0x4c8   :  { %2501 = vmatprep.mubr.f32.mxu1 %v7672_v0  ;;  %2442 = vmatpush1.msra.mxu1 %v2354_v11 }
 0x4c9   :  { %2443 = vmatprep.subr.mxu1 %v2353_v53 }
 0x4ca   :  { %2444 = vmatpush1.msra.mxu1 %v2352_v47 }
 0x4cb   :  { %2445 = vmatprep.subr.mxu1 %v2351_v48 }
 0x4cc   :  { %2446 = vmatpush1.msra.mxu1 %v2350_v49 }
 0x4cd   :  { %2447 = vmatprep.subr.mxu1 %v2349_v55 }
 0x4ce   :  { %2448 = vmatpush1.msra.mxu1 %v2348_v56  ;;  %v2295_v56 = vld [vmem:[#allocation5 + $0x12f8] sm:$0xff] }
 0x4cf   :  { %2449 = vmatprep.subr.mxu1 %v2347_v40  ;;  %v2294_v40 = vld [vmem:[#allocation5 + $0x12f0] sm:$0xff] }
 0x4d0   :  { %2450 = vmatpush1.msra.mxu1 %v2346_v57  ;;  %v2293_v57 = vld [vmem:[#allocation5 + $0x12e8] sm:$0xff] }
 0x4d1   :  { %2451 = vmatprep.subr.mxu1 %v2345_v58  ;;  %v2292_v58 = vld [vmem:[#allocation5 + $0x12e0] sm:$0xff] }
 0x4d2   :  { %2452 = vmatpush1.msra.mxu1 %v2344_v15  ;;  %v7309_v15 = vld [vmem:[%s8861_s1 + $0xa8] sm:$0xff] }
 0x4d3   :  { %2453 = vmatprep.subr.mxu1 %v2343_v59  ;;  %v2291_v59 = vld [vmem:[#allocation5 + $0x12d8] sm:$0xff] }
 0x4d4   :  { %2454 = vmatpush1.msra.mxu1 %v2342_v61  ;;  %v2290_v61 = vld [vmem:[#allocation5 + $0x12d0] sm:$0xff] }
 0x4d5   :  { %2455 = vmatprep.subr.mxu1 %v2341_v63  ;;  %v2289_v63 = vld [vmem:[#allocation5 + $0x12c8] sm:$0xff] }
 0x4d6   :  { %2456 = vmatpush1.msra.mxu1 %v2340_v1  ;;  %v2288_v1 = vld [vmem:[#allocation5 + $0x12c0] sm:$0xff] }
 0x4d7   :  { %2457 = vmatprep.subr.mxu1 %v2339_v2  ;;  %v7310_v2 = vld [vmem:[%s8861_s1 + $0xb0] sm:$0xff] }
 0x4d8   :  { %2458 = vmatpush1.msra.mxu1 %v2338_v7  ;;  %v2287_v7 = vld [vmem:[#allocation5 + $0x12b8] sm:$0xff] }
 0x4d9   :  { %2459 = vmatprep.subr.mxu1 %v2337_v12  ;;  %v2285_v12 = vld [vmem:[#allocation5 + $0x12a8] sm:$0xff] }
 0x4da   :  { %2460 = vmatpush1.msra.mxu1 %v2336_v19  ;;  %v2284_v19 = vld [vmem:[#allocation5 + $0x12a0] sm:$0xff] }
 0x4db   :  { %2461 = vmatprep.subr.mxu1 %v2335_v23  ;;  %v7311_v23 = vld [vmem:[%s8861_s1 + $0xb8] sm:$0xff] }
 0x4dc   :  { %2462 = vmatpush1.msra.mxu1 %v2334_v25  ;;  %v2283_v25 = vld [vmem:[#allocation5 + $0x1298] sm:$0xff] }
 0x4dd   :  { %2463 = vmatprep.subr.mxu1 %v2333_v27  ;;  %v2281_v27 = vld [vmem:[#allocation5 + $0x1288] sm:$0xff] }
 0x4de   :  { %2464 = vmatpush1.msra.mxu1 %v2332_v16  ;;  %v2280_v16 = vld [vmem:[#allocation5 + $0x1280] sm:$0xff] }
 0x543   :  { %v1867_v9 = vpop.f32.mrf.mxu1 }
 0x544   :  { %v7966_v14 = vadd.f32 %v1867_v9, %v7918_v22  ;;  %v2331_v22 = vld [vmem:[#allocation5 + $0x1418] sm:$0xff]  ;;  %v2286_v9 = vld [vmem:[#allocation5 + $0x12b0] sm:$0xff] }
 0x545   :  { %v7968_v21 = vpop.f32.mrf.mxu1  ;;  %2465 = vmatprep.subr.mxu1 %v2331_v22  ;;  %v2279_v22 = vld [vmem:[#allocation5 + $0x1278] sm:$0xff] }
 0x546   :  { %2466 = vmatpush1.msra.mxu1 %v2330_v32  ;;  %v8010_v32 = vld [vmem:[#allocation2 + $0x8] sm:$0xff] }
 0x547   :  { %v1873_v26 = vpop.f32.mrf.mxu1  ;;  %2467 = vmatprep.subr.mxu1 %v2329_v6  ;;  %v2277_v6 = vld [vmem:[#allocation5 + $0x1268] sm:$0xff] }
 0x548   :  { %v7971_v3 = vadd.f32 %v1873_v26, %v7923_v29  ;;  %2468 = vmatpush1.msra.mxu1 %v2328_v34  ;;  %v7980_v29 = vld [vmem:[#allocation2 + $0x10] sm:$0xff]  ;;  %v2276_v34 = vld [vmem:[#allocation5 + $0x1260] sm:$0xff] }
 0x549   :  { %v7973_v28 = vpop.f32.mrf.mxu1  ;;  %2502 = vmatmul.mubr.f32.vlgmr.msra.gmra.mxu1 %v7980_v29  ;;  %v2282_v26 = vld [vmem:[#allocation5 + $0x1290] sm:$0xff] }
 0x54a   :  { %2507 = vmatprep.mubr.f32.mxu1 %v7672_v0 }
 0x54b   :  { %v1879_v33 = vpop.f32.mrf.mxu1 }
 0x54c   :  { %v7976_v17 = vadd.f32 %v1879_v33, %v7928_v52  ;;  %v2138_v52 = vpop.f32.mrf.mxu0  ;;  %v2278_v33 = vld [vmem:[#allocation5 + $0x1270] sm:$0xff] }
 0x54d   :  { %v7978_v38 = vpop.f32.mrf.mxu1  ;;  %2508 = vmatmul.mubr.f32.gmra.mxu1 %v7887_v41  ;;  %v7308_v41 = vld [vmem:[%s8861_s1 + $0xa0] sm:$0xff] }
 0x54e   :  { %2595 = vmatprep.mubr.f32.mxu1 %v7672_v0  ;;  %v2140_v4 = vpop.f32.mrf.mxu0 }
 0x54f   :  { %v1885_v60 = vpop.f32.mrf.mxu1 }
 0x550   :  { %v7985_v8 = vadd.f32 %v1885_v60, %v7935_v36  ;;  %v2144_v51 = vpop.f32.mrf.mxu0  ;;  %v2275_v60 = vld [vmem:[#allocation5 + $0x1258] sm:$0xff] }
 0x551   :  { %v7989_v44 = vpop.f32.mrf.mxu1 }
 0x552   :  { %v2146_v53 = vpop.f32.mrf.mxu0 }
 0x583   :  { %v2061_v45 = vpop.f32.mrf.mxu1 }
 0x584   :  { %v2139_v36 = vadd.f32 %v2138_v52, %v2061_v45  ;;  %v2274_v52 = vld [vmem:[#allocation5 + $0x1250] sm:$0xff]  ;;  %v2272_v45 = vld [vmem:[#allocation5 + $0x1240] sm:$0xff] }
 0x585   :  { %v2063_v46 = vpop.f32.mrf.mxu1 }
 0x586   :  { %v2141_v55 = vadd.f32 %v2140_v4, %v2063_v46  ;;  %v2273_v4 = vld [vmem:[#allocation5 + $0x1248] sm:$0xff]  ;;  %v2271_v46 = vld [vmem:[#allocation5 + $0x1238] sm:$0xff] }
 0x587   :  { %v2067_v11 = vpop.f32.mrf.mxu1 }
 0x588   :  { %v2145_v49 = vadd.f32 %v2144_v51, %v2067_v11  ;;  %v2270_v51 = vld [vmem:[#allocation5 + $0x1230] sm:$0xff]  ;;  %v2269_v11 = vld [vmem:[#allocation5 + $0x1228] sm:$0xff] }
 0x589   :  { %v2069_v47 = vpop.f32.mrf.mxu1 }
 0x58a   :  { %v2147_v48 = vadd.f32 %v2146_v53, %v2069_v47  ;;  %v2268_v53 = vld [vmem:[#allocation5 + $0x1220] sm:$0xff]  ;;  %v2267_v47 = vld [vmem:[#allocation5 + $0x1218] sm:$0xff] }
 0x58c   :  { %2194 = vmatprep.subr.mxu0 %v2147_v48  ;;  %v2266_v48 = vld [vmem:[#allocation5 + $0x1210] sm:$0xff] }
 0x58d   :  { %2195 = vmatpush1.msra.mxu0 %v2145_v49  ;;  %v2265_v49 = vld [vmem:[#allocation5 + $0x1208] sm:$0xff] }
 0x58e   :  { %2196 = vmatprep.subr.mxu0 %v2141_v55  ;;  %v2264_v55 = vld [vmem:[#allocation5 + $0x1200] sm:$0xff] }
 0x58f   :  { %2197 = vmatpush1.msra.mxu0 %v2139_v36  ;;  %v2327_v36 = vld [vmem:[#allocation5 + $0x13f8] sm:$0xff] }
 0x590   :  { %7312 = vmatmul.mubr.msk.f32.vlgmr.msra.gmra.mxu0 %vm600_vm0, %v7308_v41  ;;  %2360 = vmatprep.subr.mxu0 %v2295_v56  ;;  %v2326_v41 = vld [vmem:[#allocation5 + $0x13f0] sm:$0xff]  ;;  %v2325_v56 = vld [vmem:[#allocation5 + $0x13e8] sm:$0xff] }
 0x591   :  { %2361 = vmatpush1.msra.mxu0 %v2294_v40  ;;  %2236 = vmatprep.mubr.f32.mxu0 %v7672_v0  ;;  %v2324_v40 = vld [vmem:[#allocation5 + $0x13e0] sm:$0xff] }
 0x592   :  { %2362 = vmatprep.subr.mxu0 %v2293_v57  ;;  %v2323_v57 = vld [vmem:[#allocation5 + $0x13d8] sm:$0xff] }
 0x593   :  { %2363 = vmatpush1.msra.mxu0 %v2292_v58  ;;  %v2322_v58 = vld [vmem:[#allocation5 + $0x13d0] sm:$0xff] }
 0x594   :  { %7313 = vmatmul.mubr.msk.f32.gmra.mxu0 %vm600_vm0, %v7309_v15  ;;  %2364 = vmatprep.subr.mxu0 %v2291_v59  ;;  %v2321_v15 = vld [vmem:[#allocation5 + $0x13c8] sm:$0xff]  ;;  %v2320_v59 = vld [vmem:[#allocation5 + $0x13c0] sm:$0xff] }
 0x595   :  { %2365 = vmatpush1.msra.mxu0 %v2290_v61  ;;  %2242 = vmatprep.mubr.f32.mxu0 %v7672_v0  ;;  %v2319_v61 = vld [vmem:[#allocation5 + $0x13b8] sm:$0xff] }
 0x596   :  { %2366 = vmatprep.subr.mxu0 %v2289_v63  ;;  %v2318_v63 = vld [vmem:[#allocation5 + $0x13b0] sm:$0xff] }
 0x597   :  { %2367 = vmatpush1.msra.mxu0 %v2288_v1  ;;  %v2317_v1 = vld [vmem:[#allocation5 + $0x13a8] sm:$0xff] }
 0x598   :  { %7314 = vmatmul.mubr.msk.f32.gmra.mxu0 %vm600_vm0, %v7310_v2  ;;  %2368 = vmatprep.subr.mxu0 %v2287_v7  ;;  %v2316_v2 = vld [vmem:[#allocation5 + $0x13a0] sm:$0xff]  ;;  %v2315_v7 = vld [vmem:[#allocation5 + $0x1398] sm:$0xff] }
 0x599   :  { %2369 = vmatpush1.msra.mxu0 %v2286_v9  ;;  %2248 = vmatprep.mubr.f32.mxu0 %v7672_v0  ;;  %v2314_v9 = vld [vmem:[#allocation5 + $0x1390] sm:$0xff] }
 0x59a   :  { %2370 = vmatprep.subr.mxu0 %v2285_v12  ;;  %v2313_v12 = vld [vmem:[#allocation5 + $0x1388] sm:$0xff] }
 0x59b   :  { %2371 = vmatpush1.msra.mxu0 %v2284_v19  ;;  %v2312_v19 = vld [vmem:[#allocation5 + $0x1380] sm:$0xff] }
 0x59c   :  { %7315 = vmatmul.mubr.msk.f32.gmra.mxu0 %vm600_vm0, %v7311_v23  ;;  %2372 = vmatprep.subr.mxu0 %v2283_v25  ;;  %v2311_v23 = vld [vmem:[#allocation5 + $0x1378] sm:$0xff]  ;;  %v2310_v25 = vld [vmem:[#allocation5 + $0x1370] sm:$0xff] }
 0x59d   :  { %2373 = vmatpush1.msra.mxu0 %v2282_v26  ;;  %2424 = vmatprep.mubr.f32.mxu0 %v8010_v32  ;;  %v2309_v26 = vld [vmem:[#allocation5 + $0x1368] sm:$0xff] }
 0x59e   :  { %2374 = vmatprep.subr.mxu0 %v2281_v27  ;;  %v2308_v27 = vld [vmem:[#allocation5 + $0x1360] sm:$0xff] }
 0x59f   :  { %2375 = vmatpush1.msra.mxu0 %v2280_v16  ;;  %v2307_v16 = vld [vmem:[#allocation5 + $0x1358] sm:$0xff] }
 0x5a0   :  { %2376 = vmatprep.subr.mxu0 %v2279_v22  ;;  %v2306_v22 = vld [vmem:[#allocation5 + $0x1350] sm:$0xff] }
 0x5a1   :  { %2377 = vmatpush1.msra.mxu0 %v2278_v33  ;;  %v2305_v33 = vld [vmem:[#allocation5 + $0x1348] sm:$0xff] }
 0x5a2   :  { %2378 = vmatprep.subr.mxu0 %v2277_v6  ;;  %v2304_v6 = vld [vmem:[#allocation5 + $0x1340] sm:$0xff] }
 0x5a3   :  { %2379 = vmatpush1.msra.mxu0 %v2276_v34  ;;  %v2303_v34 = vld [vmem:[#allocation5 + $0x1338] sm:$0xff] }
 0x5a4   :  { %2380 = vmatprep.subr.mxu0 %v2275_v60  ;;  %v2302_v60 = vld [vmem:[#allocation5 + $0x1330] sm:$0xff] }
 0x5a5   :  { %2381 = vmatpush1.msra.mxu0 %v2274_v52  ;;  %v2301_v52 = vld [vmem:[#allocation5 + $0x1328] sm:$0xff] }
 0x5a6   :  { %2382 = vmatprep.subr.mxu0 %v2273_v4  ;;  %v2300_v4 = vld [vmem:[#allocation5 + $0x1320] sm:$0xff] }
 0x5a7   :  { %2383 = vmatpush1.msra.mxu0 %v2272_v45  ;;  %v2299_v45 = vld [vmem:[#allocation5 + $0x1318] sm:$0xff] }
 0x5a8   :  { %2384 = vmatprep.subr.mxu0 %v2271_v46  ;;  %v2298_v46 = vld [vmem:[#allocation5 + $0x1310] sm:$0xff] }
 0x5a9   :  { %2385 = vmatpush1.msra.mxu0 %v2270_v51  ;;  %v2297_v51 = vld [vmem:[#allocation5 + $0x1308] sm:$0xff] }
 0x5aa   :  { %2386 = vmatprep.subr.mxu0 %v2269_v11  ;;  %v2296_v11 = vld [vmem:[#allocation5 + $0x1300] sm:$0xff] }
 0x5ab   :  { %2387 = vmatpush1.msra.mxu0 %v2268_v53  ;;  %v8013_v53 = vld [vmem:[#allocation2] sm:$0xff] }
 0x5ac   :  { %2388 = vmatprep.subr.mxu0 %v2267_v47  ;;  %v8016_v47 = vld [vmem:[#allocation2 + $0x20] sm:$0xff] }
 0x5ad   :  { %2389 = vmatpush1.msra.mxu0 %v2266_v48  ;;  %v8019_v48 = vld [vmem:[#allocation2 + $0x18] sm:$0xff] }
 0x5ae   :  { %2390 = vmatprep.subr.mxu0 %v2265_v49  ;;  %v2724_v49 = vld [vmem:[#allocation5 + $0x17f8] sm:$0xff] }
 0x5af   :  { %2391 = vmatpush1.msra.mxu0 %v2264_v55  ;;  %v2723_v55 = vld [vmem:[#allocation5 + $0x17f0] sm:$0xff] }
 0x5b0   :  { %2392 = vmatprep.subr.mxu0 %v2327_v36  ;;  %v2722_v36 = vld [vmem:[#allocation5 + $0x17e8] sm:$0xff] }
 0x5b1   :  { %2393 = vmatpush2.msra.mxu0 %v2326_v41  ;;  %v2721_v41 = vld [vmem:[#allocation5 + $0x17e0] sm:$0xff] }
 0x5b2   :  { %2394 = vmatprep.subr.mxu0 %v2325_v56  ;;  %v2720_v56 = vld [vmem:[#allocation5 + $0x17d8] sm:$0xff] }
 0x5b3   :  { %2395 = vmatpush2.msra.mxu0 %v2324_v40  ;;  %v2719_v40 = vld [vmem:[#allocation5 + $0x17d0] sm:$0xff] }
 0x5b4   :  { %2396 = vmatprep.subr.mxu0 %v2323_v57  ;;  %v2718_v57 = vld [vmem:[#allocation5 + $0x17c8] sm:$0xff] }
 0x5b5   :  { %2397 = vmatpush2.msra.mxu0 %v2322_v58  ;;  %v2717_v58 = vld [vmem:[#allocation5 + $0x17c0] sm:$0xff] }
 0x5b6   :  { %2398 = vmatprep.subr.mxu0 %v2321_v15  ;;  %v2716_v15 = vld [vmem:[#allocation5 + $0x17b8] sm:$0xff] }
 0x5b7   :  { %2399 = vmatpush2.msra.mxu0 %v2320_v59  ;;  %v2715_v59 = vld [vmem:[#allocation5 + $0x17b0] sm:$0xff] }
 0x5b8   :  { %2400 = vmatprep.subr.mxu0 %v2319_v61  ;;  %v2714_v61 = vld [vmem:[#allocation5 + $0x17a8] sm:$0xff] }
 0x5b9   :  { %2401 = vmatpush2.msra.mxu0 %v2318_v63  ;;  %v2713_v63 = vld [vmem:[#allocation5 + $0x17a0] sm:$0xff] }
 0x5ba   :  { %2402 = vmatprep.subr.mxu0 %v2317_v1  ;;  %v2712_v1 = vld [vmem:[#allocation5 + $0x1798] sm:$0xff] }
 0x5bb   :  { %2403 = vmatpush2.msra.mxu0 %v2316_v2  ;;  %v2711_v2 = vld [vmem:[#allocation5 + $0x1790] sm:$0xff] }
 0x5bc   :  { %2404 = vmatprep.subr.mxu0 %v2315_v7  ;;  %v2710_v7 = vld [vmem:[#allocation5 + $0x1788] sm:$0xff] }
 0x5bd   :  { %2405 = vmatpush2.msra.mxu0 %v2314_v9  ;;  %v2709_v9 = vld [vmem:[#allocation5 + $0x1780] sm:$0xff] }
 0x5be   :  { %2406 = vmatprep.subr.mxu0 %v2313_v12  ;;  %v2708_v12 = vld [vmem:[#allocation5 + $0x1778] sm:$0xff] }
 0x5bf   :  { %2407 = vmatpush2.msra.mxu0 %v2312_v19  ;;  %v783_v19 = vadd.f32 %v7805_v42, %v7811_v54  ;;  %v2702_v42 = vld [vmem:[#allocation5 + $0x1748] sm:$0xff] }
 0x5c0   :  { %2408 = vmatprep.subr.mxu0 %v2311_v23  ;;  %v2707_v23 = vld [vmem:[#allocation5 + $0x1770] sm:$0xff] }
 0x5c1   :  { %2409 = vmatpush2.msra.mxu0 %v2310_v25  ;;  %v2706_v25 = vld [vmem:[#allocation5 + $0x1768] sm:$0xff] }
 0x5c2   :  { %2410 = vmatprep.subr.mxu0 %v2309_v26  ;;  %v1161_v26 = vadd.f32 %v7870_v30, %v783_v19 }
 0x5c3   :  { %2411 = vmatpush2.msra.mxu0 %v2308_v27  ;;  %v2705_v27 = vld [vmem:[#allocation5 + $0x1760] sm:$0xff] }
 0x5c4   :  { %2412 = vmatprep.subr.mxu0 %v2307_v16  ;;  %v2704_v16 = vld [vmem:[#allocation5 + $0x1758] sm:$0xff] }
 0x5c5   :  { %2413 = vmatpush2.msra.mxu0 %v2306_v22  ;;  %v789_v22 = vadd.f32 %v7807_v50, %v7815_v62  ;;  %v795_v50 = vadd.f32 %v7817_v5, %v7821_v10  ;;  %v2696_v5 = vld [vmem:[#allocation5 + $0x1718] sm:$0xff]  ;;  %v801_v10 = vadd.f32 %v7831_v18, %v7833_v20 }
 0x5c6   :  { %2414 = vmatprep.subr.mxu0 %v2305_v33  ;;  %v1526_v33 = vadd.f32 %v7920_v24, %v1161_v26  ;;  %v2660_v26 = vld [vmem:[#allocation5 + $0x15f8] sm:$0xff] }
 0x5c7   :  { %2415 = vmatpush2.msra.mxu0 %v2304_v6  ;;  %v2703_v6 = vld [vmem:[#allocation5 + $0x1750] sm:$0xff]  ;;  %v1163_v54 = vadd.f32 %v7875_v13, %v789_v22  ;;  %v2657_v22 = vld [vmem:[#allocation5 + $0x15e0] sm:$0xff] }
 0x5c8   :  { %2416 = vmatprep.subr.mxu0 %v2303_v34 }
 0x5c9   :  { %2417 = vmatpush2.msra.mxu0 %v2302_v60  ;;  %v1891_v60 = vadd.f32 %v7968_v21, %v1526_v33  ;;  %v1528_v62 = vadd.f32 %v7925_v31, %v1163_v54  ;;  %v2698_v21 = vld [vmem:[#allocation5 + $0x1728] sm:$0xff]  ;;  %v2653_v54 = vld [vmem:[#allocation5 + $0x15c0] sm:$0xff] }
 0x5ca   :  { %2418 = vmatprep.subr.mxu0 %v2301_v52  ;;  %v2701_v52 = vld [vmem:[#allocation5 + $0x1740] sm:$0xff]  ;;  %v7317_v33 = vld [vmem:[%s8861_s1 + $0xc8] sm:$0xff] }
 0x5cb   :  { %2419 = vmatpush2.msra.mxu0 %v2300_v4 }
 0x5cc   :  { %2420 = vmatprep.subr.mxu0 %v2299_v45  ;;  %v2700_v45 = vld [vmem:[#allocation5 + $0x1738] sm:$0xff] }
 0x5cd   :  { %2421 = vmatpush2.msra.mxu0 %v2298_v46  ;;  %v2699_v46 = vld [vmem:[#allocation5 + $0x1730] sm:$0xff] }
 0x5ce   :  { %2422 = vmatprep.subr.mxu0 %v2297_v51  ;;  %v1893_v51 = vadd.f32 %v7973_v28, %v1528_v62  ;;  %v2694_v28 = vld [vmem:[#allocation5 + $0x1708] sm:$0xff]  ;;  %v7319_v62 = vld [vmem:[%s8861_s1 + $0xd8] sm:$0xff] }
 0x5cf   :  { %2423 = vmatpush2.msra.mxu0 %v2296_v11 }
 0x5d0   :  { %2425 = vmatmul.mubr.f32.vlgmr.msra.gmra.mxu0 %v8013_v53  ;;  %2802 = vmatprep.subr.mxu0 %v2724_v49  ;;  %v2697_v49 = vld [vmem:[#allocation5 + $0x1720] sm:$0xff] }
 0x5d1   :  { %2430 = vmatprep.mubr.f32.mxu0 %v8016_v47  ;;  %2803 = vmatpush1.msra.mxu0 %v2723_v55 }
 0x5d2   :  { %2804 = vmatprep.subr.mxu0 %v2722_v36 }
 0x5d3   :  { %2805 = vmatpush1.msra.mxu0 %v2721_v41  ;;  %v2695_v41 = vld [vmem:[#allocation5 + $0x1710] sm:$0xff] }
 0x5d4   :  { %2431 = vmatmul.mubr.f32.gmra.mxu0 %v8019_v48  ;;  %2806 = vmatprep.subr.mxu0 %v2720_v56 }
 0x5d5   :  { %2866 = vmatprep.mubr.f32.mxu0 %v7672_v0  ;;  %2807 = vmatpush1.msra.mxu0 %v2719_v40 }
 0x5d6   :  { %2808 = vmatprep.subr.mxu0 %v2718_v57  ;;  %v2693_v57 = vld [vmem:[#allocation5 + $0x1700] sm:$0xff] }
 0x5d7   :  { %2809 = vmatpush1.msra.mxu0 %v2717_v58 }
 0x5d8   :  { %2810 = vmatprep.subr.mxu0 %v2716_v15 }
 0x5d9   :  { %2811 = vmatpush1.msra.mxu0 %v2715_v59  ;;  %v8065_v59 = vld [vmem:[#allocation2 + $0x28] sm:$0xff] }
 0x5da   :  { %2812 = vmatprep.subr.mxu0 %v2714_v61 }
 0x5db   :  { %2813 = vmatpush1.msra.mxu0 %v2713_v63 }
 0x5dc   :  { %2814 = vmatprep.subr.mxu0 %v2712_v1 }
 0x5dd   :  { %2815 = vmatpush1.msra.mxu0 %v2711_v2 }
 0x5de   :  { %2816 = vmatprep.subr.mxu0 %v2710_v7 }
 0x5df   :  { %2817 = vmatpush1.msra.mxu0 %v2709_v9 }
 0x5e0   :  { %2818 = vmatprep.subr.mxu0 %v2708_v12 }
 0x5e1   :  { %2819 = vmatpush1.msra.mxu0 %v2707_v23 }
 0x5e2   :  { %2820 = vmatprep.subr.mxu0 %v2706_v25  ;;  %v7316_v25 = vld [vmem:[%s8861_s1 + $0xc0] sm:$0xff] }
 0x5e3   :  { %2821 = vmatpush1.msra.mxu0 %v2705_v27  ;;  %v2659_v27 = vld [vmem:[#allocation5 + $0x15f0] sm:$0xff] }
 0x5e4   :  { %2822 = vmatprep.subr.mxu0 %v2704_v16  ;;  %v2658_v16 = vld [vmem:[#allocation5 + $0x15e8] sm:$0xff] }
 0x5e5   :  { %2823 = vmatpush1.msra.mxu0 %v2703_v6  ;;  %v2656_v6 = vld [vmem:[#allocation5 + $0x15d8] sm:$0xff] }
 0x5e6   :  { %2824 = vmatprep.subr.mxu0 %v2702_v42  ;;  %v2654_v42 = vld [vmem:[#allocation5 + $0x15c8] sm:$0xff] }
 0x5e7   :  { %2825 = vmatpush1.msra.mxu0 %v2701_v52  ;;  %v2652_v52 = vld [vmem:[#allocation5 + $0x15b8] sm:$0xff] }
 0x5e8   :  { %2826 = vmatprep.subr.mxu0 %v2700_v45  ;;  %v2650_v45 = vld [vmem:[#allocation5 + $0x15a8] sm:$0xff] }
 0x5e9   :  { %2827 = vmatpush1.msra.mxu0 %v2699_v46  ;;  %v2648_v46 = vld [vmem:[#allocation5 + $0x1598] sm:$0xff] }
 0x5ea   :  { %2828 = vmatprep.subr.mxu0 %v2698_v21  ;;  %v2646_v21 = vld [vmem:[#allocation5 + $0x1588] sm:$0xff] }
 0x5eb   :  { %2829 = vmatpush1.msra.mxu0 %v2697_v49  ;;  %v2643_v49 = vld [vmem:[#allocation5 + $0x1570] sm:$0xff] }
 0x5ec   :  { %2830 = vmatprep.subr.mxu0 %v2696_v5  ;;  %v2641_v5 = vld [vmem:[#allocation5 + $0x1560] sm:$0xff] }
 0x5ed   :  { %2831 = vmatpush1.msra.mxu0 %v2695_v41  ;;  %v2638_v41 = vld [vmem:[#allocation5 + $0x1548] sm:$0xff] }
 0x5ee   :  { %2832 = vmatprep.subr.mxu0 %v2694_v28  ;;  %v2636_v28 = vld [vmem:[#allocation5 + $0x1538] sm:$0xff] }
 0x5ef   :  { %2833 = vmatpush1.msra.mxu0 %v2693_v57  ;;  %v2633_v57 = vld [vmem:[#allocation5 + $0x1520] sm:$0xff] }
 0x5f0   :  { %2867 = vmatmul.mubr.f32.vlgmr.msra.gmra.mxu0 %v7980_v29 }
 0x5f1   :  { %2872 = vmatprep.mubr.f32.mxu0 %v7672_v0 }
 0x5f4   :  { %2873 = vmatmul.mubr.f32.gmra.mxu0 %v8065_v59 }
 0x5f5   :  { %2960 = vmatprep.mubr.f32.mxu0 %v7672_v0 }
 0x650   :  { %v2232_v34 = vpop.f32.mrf.mxu0 }
 0x651   :  { %v8032_v30 = vadd.f32 %v2232_v34, %v7966_v14  ;;  %v1165_v14 = vadd.f32 %v7880_v39, %v795_v50  ;;  %v2655_v34 = vld [vmem:[#allocation5 + $0x15d0] sm:$0xff]  ;;  %v2649_v50 = vld [vmem:[#allocation5 + $0x15a0] sm:$0xff] }
 0x652   :  { %v2234_v4 = vpop.f32.mrf.mxu0 }
 0x653   :  { %v8037_v24 = vadd.f32 %v2234_v4, %v1891_v60  ;;  %v1530_v31 = vadd.f32 %v7930_v35, %v1165_v14  ;;  %v7318_v60 = vld [vmem:[%s8861_s1 + $0xd0] sm:$0xff]  ;;  %v2645_v14 = vld [vmem:[#allocation5 + $0x1580] sm:$0xff] }
 0x654   :  { %v2238_v13 = vpop.f32.mrf.mxu0  ;;  %v2651_v4 = vld [vmem:[#allocation5 + $0x15b0] sm:$0xff] }
 0x655   :  { %v8042_v11 = vadd.f32 %v2238_v13, %v7971_v3  ;;  %v1167_v3 = vadd.f32 %v7891_v43, %v801_v10  ;;  %v1895_v56 = vadd.f32 %v7978_v38, %v1530_v31  ;;  %v2647_v13 = vld [vmem:[#allocation5 + $0x1590] sm:$0xff]  ;;  %v2640_v10 = vld [vmem:[#allocation5 + $0x1558] sm:$0xff] }
 0x656   :  { %v2240_v55 = vpop.f32.mrf.mxu0  ;;  %v2639_v31 = vld [vmem:[#allocation5 + $0x1550] sm:$0xff] }
 0x657   :  { %v8047_v36 = vadd.f32 %v2240_v55, %v1893_v51  ;;  %v1532_v18 = vadd.f32 %v7939_v37, %v1167_v3  ;;  %v2503_v37 = vpop.f32.mrf.mxu1  ;;  %v2644_v51 = vld [vmem:[#allocation5 + $0x1578] sm:$0xff]  ;;  %v2642_v55 = vld [vmem:[#allocation5 + $0x1568] sm:$0xff]  ;;  %v2635_v3 = vld [vmem:[#allocation5 + $0x1530] sm:$0xff] }
 0x658   :  { %v2244_v39 = vpop.f32.mrf.mxu0 }
 0x659   :  { %v8052_v40 = vadd.f32 %v2244_v39, %v7976_v17  ;;  %v1897_v43 = vadd.f32 %v7989_v44, %v1532_v18  ;;  %v2505_v61 = vpop.f32.mrf.mxu1  ;;  %v2637_v39 = vld [vmem:[#allocation5 + $0x1540] sm:$0xff]  ;;  %v2631_v18 = vld [vmem:[#allocation5 + $0x1510] sm:$0xff] }
 0x65a   :  { %v2246_v58 = vpop.f32.mrf.mxu0 }
 0x65b   :  { %v8055_v20 = vadd.f32 %v2246_v58, %v1895_v56  ;;  %v2509_v2 = vpop.f32.mrf.mxu1  ;;  %v2634_v56 = vld [vmem:[#allocation5 + $0x1528] sm:$0xff]  ;;  %v2632_v58 = vld [vmem:[#allocation5 + $0x1518] sm:$0xff] }
 0x65c   :  { %v2250_v35 = vpop.f32.mrf.mxu0 }
 0x65d   :  { %v8061_v38 = vadd.f32 %v2250_v35, %v7985_v8  ;;  %v2511_v9 = vpop.f32.mrf.mxu1  ;;  %v2630_v35 = vld [vmem:[#allocation5 + $0x1508] sm:$0xff] }
 0x65e   :  { %v2252_v17 = vpop.f32.mrf.mxu0 }
 0x65f   :  { %v8063_v15 = vadd.f32 %v2252_v17, %v1897_v43  ;;  %v2629_v43 = vld [vmem:[#allocation5 + $0x1500] sm:$0xff]  ;;  %v2692_v17 = vld [vmem:[#allocation5 + $0x16f8] sm:$0xff] }
 0x690   :  { %v2426_v63 = vpop.f32.mrf.mxu0 }
 0x691   :  { %v2504_v23 = vadd.f32 %v2503_v37, %v2426_v63  ;;  %v2691_v37 = vld [vmem:[#allocation5 + $0x16f0] sm:$0xff]  ;;  %v2689_v63 = vld [vmem:[#allocation5 + $0x16e0] sm:$0xff] }
 0x692   :  { %v2428_v1 = vpop.f32.mrf.mxu0 }
 0x693   :  { %v2506_v19 = vadd.f32 %v2505_v61, %v2428_v1  ;;  %v2690_v61 = vld [vmem:[#allocation5 + $0x16e8] sm:$0xff]  ;;  %v2688_v1 = vld [vmem:[#allocation5 + $0x16d8] sm:$0xff] }
 0x694   :  { %v2432_v7 = vpop.f32.mrf.mxu0 }
 0x695   :  { %v2510_v8 = vadd.f32 %v2509_v2, %v2432_v7  ;;  %v2687_v2 = vld [vmem:[#allocation5 + $0x16d0] sm:$0xff]  ;;  %v2686_v7 = vld [vmem:[#allocation5 + $0x16c8] sm:$0xff] }
 0x696   :  { %v2434_v44 = vpop.f32.mrf.mxu0 }
 0x697   :  { %v2512_v12 = vadd.f32 %v2511_v9, %v2434_v44  ;;  %v2685_v9 = vld [vmem:[#allocation5 + $0x16c0] sm:$0xff]  ;;  %v2684_v44 = vld [vmem:[#allocation5 + $0x16b8] sm:$0xff] }
 0x699   :  { %2559 = vmatprep.subr.mxu1 %v2512_v12  ;;  %v2683_v12 = vld [vmem:[#allocation5 + $0x16b0] sm:$0xff] }
 0x69a   :  { %2560 = vmatpush1.msra.mxu1 %v2510_v8  ;;  %v2682_v8 = vld [vmem:[#allocation5 + $0x16a8] sm:$0xff] }
 0x69b   :  { %2561 = vmatprep.subr.mxu1 %v2506_v19  ;;  %v2681_v19 = vld [vmem:[#allocation5 + $0x16a0] sm:$0xff] }
 0x69c   :  { %2562 = vmatpush1.msra.mxu1 %v2504_v23  ;;  %v2680_v23 = vld [vmem:[#allocation5 + $0x1698] sm:$0xff] }
 0x69d   :  { %7320 = vmatmul.mubr.msk.f32.vlgmr.msra.gmra.mxu1 %vm600_vm0, %v7316_v25  ;;  %2725 = vmatprep.subr.mxu1 %v2660_v26  ;;  %v2679_v25 = vld [vmem:[#allocation5 + $0x1690] sm:$0xff]  ;;  %v2678_v26 = vld [vmem:[#allocation5 + $0x1688] sm:$0xff] }
 0x69e   :  { %2726 = vmatpush1.msra.mxu1 %v2659_v27  ;;  %2601 = vmatprep.mubr.f32.mxu1 %v7672_v0  ;;  %v2677_v27 = vld [vmem:[#allocation5 + $0x1680] sm:$0xff] }
 0x69f   :  { %2727 = vmatprep.subr.mxu1 %v2658_v16  ;;  %v2676_v16 = vld [vmem:[#allocation5 + $0x1678] sm:$0xff] }
 0x6a0   :  { %2728 = vmatpush1.msra.mxu1 %v2657_v22  ;;  %v2675_v22 = vld [vmem:[#allocation5 + $0x1670] sm:$0xff] }
 0x6a1   :  { %7321 = vmatmul.mubr.msk.f32.gmra.mxu1 %vm600_vm0, %v7317_v33  ;;  %2729 = vmatprep.subr.mxu1 %v2656_v6  ;;  %v2674_v33 = vld [vmem:[#allocation5 + $0x1668] sm:$0xff]  ;;  %v2673_v6 = vld [vmem:[#allocation5 + $0x1660] sm:$0xff] }
 0x6a2   :  { %2730 = vmatpush1.msra.mxu1 %v2655_v34  ;;  %2607 = vmatprep.mubr.f32.mxu1 %v7672_v0  ;;  %v2672_v34 = vld [vmem:[#allocation5 + $0x1658] sm:$0xff] }
 0x6a3   :  { %2731 = vmatprep.subr.mxu1 %v2654_v42  ;;  %v2671_v42 = vld [vmem:[#allocation5 + $0x1650] sm:$0xff] }
 0x6a4   :  { %2732 = vmatpush1.msra.mxu1 %v2653_v54  ;;  %v2670_v54 = vld [vmem:[#allocation5 + $0x1648] sm:$0xff] }
 0x6a5   :  { %7322 = vmatmul.mubr.msk.f32.gmra.mxu1 %vm600_vm0, %v7318_v60  ;;  %2733 = vmatprep.subr.mxu1 %v2652_v52  ;;  %v2669_v60 = vld [vmem:[#allocation5 + $0x1640] sm:$0xff]  ;;  %v2668_v52 = vld [vmem:[#allocation5 + $0x1638] sm:$0xff] }
 0x6a6   :  { %2734 = vmatpush1.msra.mxu1 %v2651_v4  ;;  %2613 = vmatprep.mubr.f32.mxu1 %v7672_v0  ;;  %v2667_v4 = vld [vmem:[#allocation5 + $0x1630] sm:$0xff] }
 0x6a7   :  { %2735 = vmatprep.subr.mxu1 %v2650_v45  ;;  %v2666_v45 = vld [vmem:[#allocation5 + $0x1628] sm:$0xff] }
 0x6a8   :  { %2736 = vmatpush1.msra.mxu1 %v2649_v50  ;;  %v2665_v50 = vld [vmem:[#allocation5 + $0x1620] sm:$0xff] }
 0x6a9   :  { %7323 = vmatmul.mubr.msk.f32.gmra.mxu1 %vm600_vm0, %v7319_v62  ;;  %2737 = vmatprep.subr.mxu1 %v2648_v46  ;;  %v2664_v62 = vld [vmem:[#allocation5 + $0x1618] sm:$0xff]  ;;  %v2663_v46 = vld [vmem:[#allocation5 + $0x1610] sm:$0xff] }
 0x6aa   :  { %2738 = vmatpush1.msra.mxu1 %v2647_v13  ;;  %2789 = vmatprep.mubr.f32.mxu1 %v8010_v32  ;;  %v2662_v13 = vld [vmem:[#allocation5 + $0x1608] sm:$0xff] }
 0x6ab   :  { %2739 = vmatprep.subr.mxu1 %v2646_v21  ;;  %v2661_v21 = vld [vmem:[#allocation5 + $0x1600] sm:$0xff] }
 0x6ac   :  { %2740 = vmatpush1.msra.mxu1 %v2645_v14  ;;  %v3089_v14 = vld [vmem:[#allocation5 + $0x1af8] sm:$0xff] }
 0x6ad   :  { %2741 = vmatprep.subr.mxu1 %v2644_v51  ;;  %v3088_v51 = vld [vmem:[#allocation5 + $0x1af0] sm:$0xff] }
 0x6ae   :  { %2742 = vmatpush1.msra.mxu1 %v2643_v49  ;;  %v3087_v49 = vld [vmem:[#allocation5 + $0x1ae8] sm:$0xff] }
 0x6af   :  { %2743 = vmatprep.subr.mxu1 %v2642_v55  ;;  %v3086_v55 = vld [vmem:[#allocation5 + $0x1ae0] sm:$0xff] }
 0x6b0   :  { %2744 = vmatpush1.msra.mxu1 %v2641_v5  ;;  %v3085_v5 = vld [vmem:[#allocation5 + $0x1ad8] sm:$0xff] }
 0x6b1   :  { %2745 = vmatprep.subr.mxu1 %v2640_v10  ;;  %v3084_v10 = vld [vmem:[#allocation5 + $0x1ad0] sm:$0xff] }
 0x6b2   :  { %2746 = vmatpush1.msra.mxu1 %v2639_v31  ;;  %v3083_v31 = vld [vmem:[#allocation5 + $0x1ac8] sm:$0xff] }
 0x6b3   :  { %2747 = vmatprep.subr.mxu1 %v2638_v41  ;;  %v3082_v41 = vld [vmem:[#allocation5 + $0x1ac0] sm:$0xff] }
 0x6b4   :  { %2748 = vmatpush1.msra.mxu1 %v2637_v39  ;;  %v3081_v39 = vld [vmem:[#allocation5 + $0x1ab8] sm:$0xff] }
 0x6b5   :  { %2749 = vmatprep.subr.mxu1 %v2636_v28  ;;  %v3080_v28 = vld [vmem:[#allocation5 + $0x1ab0] sm:$0xff] }
 0x6b6   :  { %2750 = vmatpush1.msra.mxu1 %v2635_v3  ;;  %v3079_v3 = vld [vmem:[#allocation5 + $0x1aa8] sm:$0xff] }
 0x6b7   :  { %2751 = vmatprep.subr.mxu1 %v2634_v56  ;;  %v3078_v56 = vld [vmem:[#allocation5 + $0x1aa0] sm:$0xff] }
 0x6b8   :  { %2752 = vmatpush1.msra.mxu1 %v2633_v57  ;;  %v3077_v57 = vld [vmem:[#allocation5 + $0x1a98] sm:$0xff] }
 0x6b9   :  { %2753 = vmatprep.subr.mxu1 %v2632_v58  ;;  %v3076_v58 = vld [vmem:[#allocation5 + $0x1a90] sm:$0xff] }
 0x6ba   :  { %2754 = vmatpush1.msra.mxu1 %v2631_v18  ;;  %v3075_v18 = vld [vmem:[#allocation5 + $0x1a88] sm:$0xff] }
 0x6bb   :  { %2755 = vmatprep.subr.mxu1 %v2630_v35  ;;  %v3074_v35 = vld [vmem:[#allocation5 + $0x1a80] sm:$0xff] }
 0x6bc   :  { %2756 = vmatpush1.msra.mxu1 %v2629_v43  ;;  %v3073_v43 = vld [vmem:[#allocation5 + $0x1a78] sm:$0xff] }
 0x6bd   :  { %2757 = vmatprep.subr.mxu1 %v2692_v17  ;;  %v3072_v17 = vld [vmem:[#allocation5 + $0x1a70] sm:$0xff] }
 0x6be   :  { %2758 = vmatpush2.msra.mxu1 %v2691_v37  ;;  %v3071_v37 = vld [vmem:[#allocation5 + $0x1a68] sm:$0xff] }
 0x6bf   :  { %2759 = vmatprep.subr.mxu1 %v2690_v61  ;;  %v3070_v61 = vld [vmem:[#allocation5 + $0x1a60] sm:$0xff] }
 0x6c0   :  { %2760 = vmatpush2.msra.mxu1 %v2689_v63  ;;  %v3069_v63 = vld [vmem:[#allocation5 + $0x1a58] sm:$0xff] }
 0x6c1   :  { %2761 = vmatprep.subr.mxu1 %v2688_v1  ;;  %v3068_v1 = vld [vmem:[#allocation5 + $0x1a50] sm:$0xff] }
 0x6c2   :  { %2762 = vmatpush2.msra.mxu1 %v2687_v2 }
 0x6c3   :  { %2763 = vmatprep.subr.mxu1 %v2686_v7  ;;  %v3067_v7 = vld [vmem:[#allocation5 + $0x1a48] sm:$0xff] }
 0x6c4   :  { %2764 = vmatpush2.msra.mxu1 %v2685_v9 }
 0x6c5   :  { %2765 = vmatprep.subr.mxu1 %v2684_v44  ;;  %v3066_v44 = vld [vmem:[#allocation5 + $0x1a40] sm:$0xff] }
 0x6c6   :  { %2766 = vmatpush2.msra.mxu1 %v2683_v12 }
 0x6c7   :  { %2767 = vmatprep.subr.mxu1 %v2682_v8  ;;  %v3065_v8 = vld [vmem:[#allocation5 + $0x1a38] sm:$0xff] }
 0x6c8   :  { %2768 = vmatpush2.msra.mxu1 %v2681_v19  ;;  %v3064_v19 = vld [vmem:[#allocation5 + $0x1a30] sm:$0xff] }
 0x6c9   :  { %2769 = vmatprep.subr.mxu1 %v2680_v23 }
 0x6ca   :  { %2770 = vmatpush2.msra.mxu1 %v2679_v25  ;;  %v3063_v25 = vld [vmem:[#allocation5 + $0x1a28] sm:$0xff] }
 0x6cb   :  { %2771 = vmatprep.subr.mxu1 %v2678_v26 }
 0x6cc   :  { %2772 = vmatpush2.msra.mxu1 %v2677_v27  ;;  %v3062_v27 = vld [vmem:[#allocation5 + $0x1a20] sm:$0xff] }
 0x6cd   :  { %2773 = vmatprep.subr.mxu1 %v2676_v16 }
 0x6ce   :  { %2774 = vmatpush2.msra.mxu1 %v2675_v22  ;;  %v3060_v22 = vld [vmem:[#allocation5 + $0x1a10] sm:$0xff] }
 0x6cf   :  { %2775 = vmatprep.subr.mxu1 %v2674_v33 }
 0x6d0   :  { %2776 = vmatpush2.msra.mxu1 %v2673_v6  ;;  %v3059_v6 = vld [vmem:[#allocation5 + $0x1a08] sm:$0xff] }
 0x6d1   :  { %2777 = vmatprep.subr.mxu1 %v2672_v34 }
 0x6d2   :  { %2778 = vmatpush2.msra.mxu1 %v2671_v42  ;;  %v3058_v42 = vld [vmem:[#allocation5 + $0x1a00] sm:$0xff] }
 0x6d3   :  { %2779 = vmatprep.subr.mxu1 %v2670_v54 }
 0x6d4   :  { %2780 = vmatpush2.msra.mxu1 %v2669_v60 }
 0x6d5   :  { %2781 = vmatprep.subr.mxu1 %v2668_v52 }
 0x6d6   :  { %2782 = vmatpush2.msra.mxu1 %v2667_v4 }
 0x6d7   :  { %2783 = vmatprep.subr.mxu1 %v2666_v45 }
 0x6d8   :  { %2784 = vmatpush2.msra.mxu1 %v2665_v50 }
 0x6d9   :  { %2785 = vmatprep.subr.mxu1 %v2664_v62 }
 0x6da   :  { %2786 = vmatpush2.msra.mxu1 %v2663_v46 }
 0x6db   :  { %2787 = vmatprep.subr.mxu1 %v2662_v13 }
 0x6dc   :  { %2788 = vmatpush2.msra.mxu1 %v2661_v21 }
 0x6dd   :  { %2790 = vmatmul.mubr.f32.vlgmr.msra.gmra.mxu1 %v8013_v53  ;;  %3167 = vmatprep.subr.mxu1 %v3089_v14 }
 0x6de   :  { %2795 = vmatprep.mubr.f32.mxu1 %v8016_v47  ;;  %3168 = vmatpush1.msra.mxu1 %v3088_v51 }
 0x6df   :  { %3169 = vmatprep.subr.mxu1 %v3087_v49 }
 0x6e0   :  { %3170 = vmatpush1.msra.mxu1 %v3086_v55  ;;  %v3024_v55 = vld [vmem:[#allocation5 + $0x18f0] sm:$0xff] }
 0x6e1   :  { %2796 = vmatmul.mubr.f32.gmra.mxu1 %v8019_v48  ;;  %3171 = vmatprep.subr.mxu1 %v3085_v5  ;;  %v3023_v5 = vld [vmem:[#allocation5 + $0x18e8] sm:$0xff] }
 0x6e2   :  { %3231 = vmatprep.mubr.f32.mxu1 %v7672_v0  ;;  %3172 = vmatpush1.msra.mxu1 %v3084_v10  ;;  %v3022_v10 = vld [vmem:[#allocation5 + $0x18e0] sm:$0xff] }
 0x6e3   :  { %3173 = vmatprep.subr.mxu1 %v3083_v31  ;;  %v7325_v31 = vld [vmem:[%s8861_s1 + $0xe8] sm:$0xff] }
 0x6e4   :  { %3174 = vmatpush1.msra.mxu1 %v3082_v41  ;;  %v3021_v41 = vld [vmem:[#allocation5 + $0x18d8] sm:$0xff] }
 0x6e5   :  { %3175 = vmatprep.subr.mxu1 %v3081_v39  ;;  %v3020_v39 = vld [vmem:[#allocation5 + $0x18d0] sm:$0xff] }
 0x6e6   :  { %3176 = vmatpush1.msra.mxu1 %v3080_v28  ;;  %v3019_v28 = vld [vmem:[#allocation5 + $0x18c8] sm:$0xff] }
 0x6e7   :  { %3177 = vmatprep.subr.mxu1 %v3079_v3  ;;  %v3018_v3 = vld [vmem:[#allocation5 + $0x18c0] sm:$0xff] }
 0x6e8   :  { %3178 = vmatpush1.msra.mxu1 %v3078_v56  ;;  %v7326_v56 = vld [vmem:[%s8861_s1 + $0xf0] sm:$0xff] }
 0x6e9   :  { %3179 = vmatprep.subr.mxu1 %v3077_v57  ;;  %v3017_v57 = vld [vmem:[#allocation5 + $0x18b8] sm:$0xff] }
 0x6ea   :  { %3180 = vmatpush1.msra.mxu1 %v3076_v58  ;;  %v3016_v58 = vld [vmem:[#allocation5 + $0x18b0] sm:$0xff] }
 0x6eb   :  { %3181 = vmatprep.subr.mxu1 %v3075_v18  ;;  %v3015_v18 = vld [vmem:[#allocation5 + $0x18a8] sm:$0xff] }
 0x6ec   :  { %3182 = vmatpush1.msra.mxu1 %v3074_v35  ;;  %v3014_v35 = vld [vmem:[#allocation5 + $0x18a0] sm:$0xff] }
 0x6ed   :  { %3183 = vmatprep.subr.mxu1 %v3073_v43  ;;  %v7327_v43 = vld [vmem:[%s8861_s1 + $0xf8] sm:$0xff] }
 0x6ee   :  { %3184 = vmatpush1.msra.mxu1 %v3072_v17  ;;  %v3013_v17 = vld [vmem:[#allocation5 + $0x1898] sm:$0xff] }
 0x6ef   :  { %3185 = vmatprep.subr.mxu1 %v3071_v37  ;;  %v3012_v37 = vld [vmem:[#allocation5 + $0x1890] sm:$0xff] }
 0x6f0   :  { %3186 = vmatpush1.msra.mxu1 %v3070_v61  ;;  %v3011_v61 = vld [vmem:[#allocation5 + $0x1888] sm:$0xff] }
 0x6f1   :  { %3187 = vmatprep.subr.mxu1 %v3069_v63  ;;  %v3010_v63 = vld [vmem:[#allocation5 + $0x1880] sm:$0xff] }
 0x6f2   :  { %3188 = vmatpush1.msra.mxu1 %v3068_v1  ;;  %v3009_v1 = vld [vmem:[#allocation5 + $0x1878] sm:$0xff] }
 0x6f3   :  { %3189 = vmatprep.subr.mxu1 %v3067_v7  ;;  %v3007_v7 = vld [vmem:[#allocation5 + $0x1868] sm:$0xff] }
 0x6f4   :  { %3190 = vmatpush1.msra.mxu1 %v3066_v44  ;;  %v3006_v44 = vld [vmem:[#allocation5 + $0x1860] sm:$0xff] }
 0x6f5   :  { %3191 = vmatprep.subr.mxu1 %v3065_v8  ;;  %v3005_v8 = vld [vmem:[#allocation5 + $0x1858] sm:$0xff] }
 0x6f6   :  { %3192 = vmatpush1.msra.mxu1 %v3064_v19  ;;  %v3004_v19 = vld [vmem:[#allocation5 + $0x1850] sm:$0xff] }
 0x6f7   :  { %3193 = vmatprep.subr.mxu1 %v3063_v25  ;;  %v3002_v25 = vld [vmem:[#allocation5 + $0x1840] sm:$0xff] }
 0x6f8   :  { %3194 = vmatpush1.msra.mxu1 %v3062_v27  ;;  %v3001_v27 = vld [vmem:[#allocation5 + $0x1838] sm:$0xff] }
 0x75d   :  { %v2597_v2 = vpop.f32.mrf.mxu1 }
 0x75e   :  { %v8094_v9 = vadd.f32 %v2597_v2, %v8032_v30  ;;  %v3061_v30 = vld [vmem:[#allocation5 + $0x1a18] sm:$0xff]  ;;  %v3008_v2 = vld [vmem:[#allocation5 + $0x1870] sm:$0xff] }
 0x75f   :  { %v8096_v12 = vpop.f32.mrf.mxu1  ;;  %3195 = vmatprep.subr.mxu1 %v3061_v30  ;;  %v3000_v30 = vld [vmem:[#allocation5 + $0x1830] sm:$0xff] }
 0x760   :  { %3196 = vmatpush1.msra.mxu1 %v3060_v22  ;;  %v2998_v22 = vld [vmem:[#allocation5 + $0x1820] sm:$0xff] }
 0x761   :  { %v2603_v23 = vpop.f32.mrf.mxu1  ;;  %3197 = vmatprep.subr.mxu1 %v3059_v6  ;;  %v2996_v6 = vld [vmem:[#allocation5 + $0x1810] sm:$0xff] }
 0x762   :  { %v8099_v26 = vadd.f32 %v2603_v23, %v8042_v11  ;;  %3198 = vmatpush1.msra.mxu1 %v3058_v42  ;;  %v3003_v23 = vld [vmem:[#allocation5 + $0x1848] sm:$0xff] }
 0x763   :  { %v8101_v16 = vpop.f32.mrf.mxu1  ;;  %3232 = vmatmul.mubr.f32.vlgmr.msra.gmra.mxu1 %v7980_v29  ;;  %v2995_v42 = vld [vmem:[#allocation5 + $0x1808] sm:$0xff] }
 0x764   :  { %3237 = vmatprep.mubr.f32.mxu1 %v7672_v0 }
 0x765   :  { %v2609_v33 = vpop.f32.mrf.mxu1 }
 0x766   :  { %v8104_v34 = vadd.f32 %v2609_v33, %v8052_v40  ;;  %v2868_v40 = vpop.f32.mrf.mxu0  ;;  %v2997_v33 = vld [vmem:[#allocation5 + $0x1818] sm:$0xff] }
 0x767   :  { %v2611_v54 = vpop.f32.mrf.mxu1  ;;  %3238 = vmatmul.mubr.f32.gmra.mxu1 %v8065_v59  ;;  %v3025_v59 = vld [vmem:[#allocation5 + $0x18f8] sm:$0xff] }
 0x768   :  { %v8107_v11 = vadd.f32 %v2611_v54, %v8055_v20  ;;  %3325 = vmatprep.mubr.f32.mxu1 %v7672_v0  ;;  %v2870_v50 = vpop.f32.mrf.mxu0  ;;  %v2994_v54 = vld [vmem:[#allocation5 + $0x1800] sm:$0xff] }
 0x769   :  { %v2615_v60 = vpop.f32.mrf.mxu1 }
 0x76a   :  { %v8112_v52 = vadd.f32 %v2615_v60, %v8061_v38  ;;  %v2874_v46 = vpop.f32.mrf.mxu0  ;;  %v3057_v60 = vld [vmem:[#allocation5 + $0x19f8] sm:$0xff] }
 0x76b   :  { %v2617_v4 = vpop.f32.mrf.mxu1 }
 0x76c   :  { %v8115_v45 = vadd.f32 %v2617_v4, %v8063_v15  ;;  %v2876_v13 = vpop.f32.mrf.mxu0  ;;  %v7324_v15 = vld [vmem:[%s8861_s1 + $0xe0] sm:$0xff]  ;;  %v3056_v4 = vld [vmem:[#allocation5 + $0x19f0] sm:$0xff] }
 0x79d   :  { %v2791_v20 = vpop.f32.mrf.mxu1 }
 0x79e   :  { %v2869_v49 = vadd.f32 %v2868_v40, %v2791_v20  ;;  %v3055_v40 = vld [vmem:[#allocation5 + $0x19e8] sm:$0xff]  ;;  %v3053_v20 = vld [vmem:[#allocation5 + $0x19d8] sm:$0xff] }
 0x79f   :  { %v2793_v62 = vpop.f32.mrf.mxu1 }
 0x7a0   :  { %v2871_v38 = vadd.f32 %v2870_v50, %v2793_v62  ;;  %v3054_v50 = vld [vmem:[#allocation5 + $0x19e0] sm:$0xff]  ;;  %v3052_v62 = vld [vmem:[#allocation5 + $0x19d0] sm:$0xff] }
 0x7a1   :  { %v2797_v29 = vpop.f32.mrf.mxu1 }
 0x7a2   :  { %v2875_v51 = vadd.f32 %v2874_v46, %v2797_v29  ;;  %v3051_v46 = vld [vmem:[#allocation5 + $0x19c8] sm:$0xff]  ;;  %v3050_v29 = vld [vmem:[#allocation5 + $0x19c0] sm:$0xff] }
 0x7a3   :  { %v2799_v21 = vpop.f32.mrf.mxu1 }
 0x7a4   :  { %v2877_v14 = vadd.f32 %v2876_v13, %v2799_v21  ;;  %v3049_v13 = vld [vmem:[#allocation5 + $0x19b8] sm:$0xff]  ;;  %v3048_v21 = vld [vmem:[#allocation5 + $0x19b0] sm:$0xff] }
 0x7a6   :  { %2924 = vmatprep.subr.mxu0 %v2877_v14  ;;  %v3047_v14 = vld [vmem:[#allocation5 + $0x19a8] sm:$0xff] }
 0x7a7   :  { %2925 = vmatpush1.msra.mxu0 %v2875_v51  ;;  %v3046_v51 = vld [vmem:[#allocation5 + $0x19a0] sm:$0xff] }
 0x7a8   :  { %2926 = vmatprep.subr.mxu0 %v2871_v38  ;;  %v3045_v38 = vld [vmem:[#allocation5 + $0x1998] sm:$0xff] }
 0x7a9   :  { %2927 = vmatpush1.msra.mxu0 %v2869_v49  ;;  %v3044_v49 = vld [vmem:[#allocation5 + $0x1990] sm:$0xff] }
 0x7aa   :  { %7328 = vmatmul.mubr.msk.f32.vlgmr.msra.gmra.mxu0 %vm600_vm0, %v7324_v15  ;;  %3090 = vmatprep.subr.mxu0 %v3025_v59  ;;  %v3043_v15 = vld [vmem:[#allocation5 + $0x1988] sm:$0xff]  ;;  %v3042_v59 = vld [vmem:[#allocation5 + $0x1980] sm:$0xff] }
 0x7ab   :  { %3091 = vmatpush1.msra.mxu0 %v3024_v55  ;;  %2966 = vmatprep.mubr.f32.mxu0 %v7672_v0  ;;  %v3041_v55 = vld [vmem:[#allocation5 + $0x1978] sm:$0xff] }
 0x7ac   :  { %3092 = vmatprep.subr.mxu0 %v3023_v5  ;;  %v3040_v5 = vld [vmem:[#allocation5 + $0x1970] sm:$0xff] }
 0x7ad   :  { %3093 = vmatpush1.msra.mxu0 %v3022_v10  ;;  %v3039_v10 = vld [vmem:[#allocation5 + $0x1968] sm:$0xff] }
 0x7ae   :  { %7329 = vmatmul.mubr.msk.f32.gmra.mxu0 %vm600_vm0, %v7325_v31  ;;  %3094 = vmatprep.subr.mxu0 %v3021_v41  ;;  %v3038_v31 = vld [vmem:[#allocation5 + $0x1960] sm:$0xff]  ;;  %v3037_v41 = vld [vmem:[#allocation5 + $0x1958] sm:$0xff] }
 0x7af   :  { %3095 = vmatpush1.msra.mxu0 %v3020_v39  ;;  %2972 = vmatprep.mubr.f32.mxu0 %v7672_v0  ;;  %v3036_v39 = vld [vmem:[#allocation5 + $0x1950] sm:$0xff] }
 0x7b0   :  { %3096 = vmatprep.subr.mxu0 %v3019_v28  ;;  %v3035_v28 = vld [vmem:[#allocation5 + $0x1948] sm:$0xff] }
 0x7b1   :  { %3097 = vmatpush1.msra.mxu0 %v3018_v3  ;;  %v3034_v3 = vld [vmem:[#allocation5 + $0x1940] sm:$0xff] }
 0x7b2   :  { %7330 = vmatmul.mubr.msk.f32.gmra.mxu0 %vm600_vm0, %v7326_v56  ;;  %3098 = vmatprep.subr.mxu0 %v3017_v57  ;;  %v3033_v56 = vld [vmem:[#allocation5 + $0x1938] sm:$0xff]  ;;  %v3032_v57 = vld [vmem:[#allocation5 + $0x1930] sm:$0xff] }
 0x7b3   :  { %3099 = vmatpush1.msra.mxu0 %v3016_v58  ;;  %2978 = vmatprep.mubr.f32.mxu0 %v7672_v0  ;;  %v3031_v58 = vld [vmem:[#allocation5 + $0x1928] sm:$0xff] }
 0x7b4   :  { %3100 = vmatprep.subr.mxu0 %v3015_v18  ;;  %v3030_v18 = vld [vmem:[#allocation5 + $0x1920] sm:$0xff] }
 0x7b5   :  { %3101 = vmatpush1.msra.mxu0 %v3014_v35  ;;  %v3029_v35 = vld [vmem:[#allocation5 + $0x1918] sm:$0xff] }
 0x7b6   :  { %7331 = vmatmul.mubr.msk.f32.gmra.mxu0 %vm600_vm0, %v7327_v43  ;;  %3102 = vmatprep.subr.mxu0 %v3013_v17  ;;  %v3028_v43 = vld [vmem:[#allocation5 + $0x1910] sm:$0xff]  ;;  %v3027_v17 = vld [vmem:[#allocation5 + $0x1908] sm:$0xff] }
 0x7b7   :  { %3103 = vmatpush1.msra.mxu0 %v3012_v37  ;;  %3154 = vmatprep.mubr.f32.mxu0 %v8010_v32  ;;  %v2999_v32 = vld [vmem:[#allocation5 + $0x1828] sm:$0xff]  ;;  %v3026_v37 = vld [vmem:[#allocation5 + $0x1900] sm:$0xff] }
 0x7b8   :  { %3104 = vmatprep.subr.mxu0 %v3011_v61  ;;  %v73_v61 = vld [vmem:[%s8864_s4 + $0x8] sm:$0xff] }
 0x7b9   :  { %3105 = vmatpush1.msra.mxu0 %v3010_v63  ;;  %v75_v63 = vld [vmem:[%s8864_s4 + $0x18] sm:$0xff] }
 0x7ba   :  { %3106 = vmatprep.subr.mxu0 %v3009_v1  ;;  %v7673_v1 = vmov 0  }
 0x7bb   :  { %3107 = vmatpush1.msra.mxu0 %v3008_v2  ;;  %7525 = vset.pattern.permute.xlu1 %v7673_v1  ;;  %v2621_v2 = vadd.f32 %v8096_v12, %v8037_v24 }
 0x7bc   :  { %3108 = vmatprep.subr.mxu0 %v3007_v7  ;;  %7524 = vset.pattern.permute.xlu0 %v7673_v1 }
 0x7bd   :  { %3109 = vmatpush1.msra.mxu0 %v3006_v44  ;;  %3365 = vperm.xlu1 %7525, %v73_v61  }
 0x7be   :  { %3110 = vmatprep.subr.mxu0 %v3005_v8  ;;  %3375 = vperm.xlu0 %7524, %v75_v63  }
 0x7bf   :  { %3111 = vmatpush1.msra.mxu0 %v3004_v19 }
 0x7c0   :  { %3112 = vmatprep.subr.mxu0 %v3003_v23  ;;  %v2623_v23 = vadd.f32 %v8101_v16, %v8047_v36 }
 0x7c1   :  { %3113 = vmatpush1.msra.mxu0 %v3002_v25 }
 0x7c2   :  { %3114 = vmatprep.subr.mxu0 %v3001_v27 }
 0x7c3   :  { %3115 = vmatpush1.msra.mxu0 %v3000_v30 }
 0x7c4   :  { %3116 = vmatprep.subr.mxu0 %v2999_v32 }
 0x7c5   :  { %3117 = vmatpush1.msra.mxu0 %v2998_v22 }
 0x7c6   :  { %3118 = vmatprep.subr.mxu0 %v2997_v33 }
 0x7c7   :  { %3119 = vmatpush1.msra.mxu0 %v2996_v6 }
 0x7c8   :  { %3120 = vmatprep.subr.mxu0 %v2995_v42 }
 0x7c9   :  { %3121 = vmatpush1.msra.mxu0 %v2994_v54 }
 0x7ca   :  { %3122 = vmatprep.subr.mxu0 %v3057_v60 }
 0x7cb   :  { %3123 = vmatpush2.msra.mxu0 %v3056_v4 }
 0x7cc   :  { %3124 = vmatprep.subr.mxu0 %v3055_v40 }
 0x7cd   :  { %3125 = vmatpush2.msra.mxu0 %v3054_v50 }
 0x7ce   :  { %3126 = vmatprep.subr.mxu0 %v3053_v20 }
 0x7cf   :  { %3127 = vmatpush2.msra.mxu0 %v3052_v62 }
 0x7d0   :  { %3128 = vmatprep.subr.mxu0 %v3051_v46  ;;  %v7334_v46 = vld [vmem:[%s8861_s1 + $0x110] sm:$0xff] }
 0x7d1   :  { %3129 = vmatpush2.msra.mxu0 %v3050_v29  ;;  %v7335_v29 = vld [vmem:[%s8861_s1 + $0x118] sm:$0xff] }
 0x7d2   :  { %3130 = vmatprep.subr.mxu0 %v3049_v13  ;;  %v3731_v13 = vld [vmem:[#allocation5 + $0xf8] sm:$0xff] }
 0x7d3   :  { %3131 = vmatpush2.msra.mxu0 %v3048_v21  ;;  %v3730_v21 = vld [vmem:[#allocation5 + $0xf0] sm:$0xff] }
 0x7d4   :  { %3132 = vmatprep.subr.mxu0 %v3047_v14  ;;  %v3729_v14 = vld [vmem:[#allocation5 + $0xe8] sm:$0xff] }
 0x7d5   :  { %3133 = vmatpush2.msra.mxu0 %v3046_v51  ;;  %v3728_v51 = vld [vmem:[#allocation5 + $0xe0] sm:$0xff] }
 0x7d6   :  { %3134 = vmatprep.subr.mxu0 %v3045_v38  ;;  %v3727_v38 = vld [vmem:[#allocation5 + $0xd8] sm:$0xff] }
 0x7d7   :  { %3135 = vmatpush2.msra.mxu0 %v3044_v49  ;;  %v3726_v49 = vld [vmem:[#allocation5 + $0xd0] sm:$0xff] }
 0x7d8   :  { %3136 = vmatprep.subr.mxu0 %v3043_v15  ;;  %v3725_v15 = vld [vmem:[#allocation5 + $0xc8] sm:$0xff] }
 0x7d9   :  { %3137 = vmatpush2.msra.mxu0 %v3042_v59  ;;  %v3724_v59 = vld [vmem:[#allocation5 + $0xc0] sm:$0xff] }
 0x7da   :  { %3138 = vmatprep.subr.mxu0 %v3041_v55  ;;  %v3723_v55 = vld [vmem:[#allocation5 + $0xb8] sm:$0xff] }
 0x7db   :  { %3139 = vmatpush2.msra.mxu0 %v3040_v5  ;;  %v3722_v5 = vld [vmem:[#allocation5 + $0xb0] sm:$0xff] }
 0x7dc   :  { %3140 = vmatprep.subr.mxu0 %v3039_v10 }
 0x7dd   :  { %3141 = vmatpush2.msra.mxu0 %v3038_v31 }
 0x7de   :  { %3142 = vmatprep.subr.mxu0 %v3037_v41 }
 0x7df   :  { %3143 = vmatpush2.msra.mxu0 %v3036_v39 }
 0x7e0   :  { %3144 = vmatprep.subr.mxu0 %v3035_v28 }
 0x7e1   :  { %3145 = vmatpush2.msra.mxu0 %v3034_v3 }
 0x7e2   :  { %3146 = vmatprep.subr.mxu0 %v3033_v56 }
 0x7e3   :  { %3147 = vmatpush2.msra.mxu0 %v3032_v57 }
 0x7e4   :  { %3148 = vmatprep.subr.mxu0 %v3031_v58 }
 0x7e5   :  { %3149 = vmatpush2.msra.mxu0 %v3030_v18 }
 0x7e6   :  { %3150 = vmatprep.subr.mxu0 %v3029_v35 }
 0x7e7   :  { %3151 = vmatpush2.msra.mxu0 %v3028_v43 }
 0x7e8   :  { %3152 = vmatprep.subr.mxu0 %v3027_v17 }
 0x7e9   :  { %3153 = vmatpush2.msra.mxu0 %v3026_v37 }
 0x7ea   :  { %3155 = vmatmul.mubr.f32.vlgmr.msra.gmra.mxu0 %v8013_v53  ;;  %v72_v53 = vld [vmem:[%s8864_s4] sm:$0xff]  ;;  %3796 = vmatprep.subr.mxu0 %v3731_v13 }
 0x7eb   :  { %3160 = vmatprep.mubr.f32.mxu0 %v8016_v47  ;;  %v74_v47 = vld [vmem:[%s8864_s4 + $0x10] sm:$0xff]  ;;  %3360 = vperm.xlu1 %7525, %v72_v53   ;;  %v3712_v13 = vld [vmem:[#allocation5 + $0x60] sm:$0xff] }
 0x7ec   :  { %3370 = vperm.xlu0 %7524, %v74_v47   ;;  %3797 = vmatpush1.msra.mxu0 %v3730_v21  ;;  %v3711_v21 = vld [vmem:[#allocation5 + $0x58] sm:$0xff] }
 0x7ed   :  { %3798 = vmatprep.subr.mxu0 %v3729_v14  ;;  %v3710_v14 = vld [vmem:[#allocation5 + $0x50] sm:$0xff] }
 0x7ee   :  { %3161 = vmatmul.mubr.f32.gmra.mxu0 %v8019_v48 }
 0x7ef   :  { %3799 = vmatpush1.msra.mxu0 %v3728_v51  ;;  %v3709_v51 = vld [vmem:[#allocation5 + $0x48] sm:$0xff] }
 0x7f0   :  { %3800 = vmatprep.subr.mxu0 %v3727_v38  ;;  %v8257_v38 = vld [vmem:[#allocation7] sm:$0xff] }
 0x7f1   :  { %3801 = vmatpush1.msra.mxu0 %v3726_v49  ;;  %v3708_v49 = vld [vmem:[#allocation5 + $0x40] sm:$0xff] }
 0x7f2   :  { %3802 = vmatprep.subr.mxu0 %v3725_v15  ;;  %v3707_v15 = vld [vmem:[#allocation5 + $0x38] sm:$0xff] }
 0x7f3   :  { %3803 = vmatpush1.msra.mxu0 %v3724_v59  ;;  %v3706_v59 = vld [vmem:[#allocation5 + $0x30] sm:$0xff] }
 0x7f4   :  { %3804 = vmatprep.subr.mxu0 %v3723_v55  ;;  %v3705_v55 = vld [vmem:[#allocation5 + $0x28] sm:$0xff] }
 0x7f5   :  { %3805 = vmatpush1.msra.mxu0 %v3722_v5  ;;  %v3704_v5 = vld [vmem:[#allocation5 + $0x20] sm:$0xff] }
 0x823   :  { %v3233_v36 = vpop.f32.mrf.mxu1 }
 0x839   :  { %v8195_v39 = vpop.permute.xlu0 %3375 }
 0x867   :  { %v8197_v58 = vpop.permute.xlu0 %3370 }
 0x86a   :  { %v2962_v48 = vpop.f32.mrf.mxu0 }
 0x86b   :  { %v8157_v7 = vadd.f32 %v2962_v48, %v8094_v9 }
 0x86c   :  { %v2964_v44 = vpop.f32.mrf.mxu0 }
 0x86d   :  { %v8159_v8 = vadd.f32 %v2964_v44, %v2621_v2  ;;  %v8214_v2 = vpop.permute.xlu1 %3365 }
 0x86e   :  { %v2968_v19 = vpop.f32.mrf.mxu0 }
 0x86f   :  { %v8164_v25 = vadd.f32 %v2968_v19, %v8099_v26  ;;  %v3235_v26 = vpop.f32.mrf.mxu1 }
 0x870   :  { %v2970_v27 = vpop.f32.mrf.mxu0 }
 0x871   :  { %v8166_v30 = vadd.f32 %v2970_v27, %v2623_v23  ;;  %v3239_v60 = vpop.f32.mrf.mxu1 }
 0x872   :  { %v2974_v32 = vpop.f32.mrf.mxu0 }
 0x873   :  { %v2989_v22 = vadd.f32 %v2974_v32, %v8104_v34  ;;  %v3241_v40 = vpop.f32.mrf.mxu1 }
 0x874   :  { %v2976_v24 = vpop.f32.mrf.mxu0 }
 0x875   :  { %v2990_v9 = vadd.f32 %v2976_v24, %v8107_v11 }
 0x876   :  { %v2980_v12 = vpop.f32.mrf.mxu0 }
 0x877   :  { %v8171_v33 = vadd.f32 %v2980_v12, %v8112_v52  ;;  %v7332_v52 = vld [vmem:[%s8861_s1 + $0x100] sm:$0xff] }
 0x878   :  { %v2982_v6 = vpop.f32.mrf.mxu0 }
 0x879   :  { %v8174_v42 = vadd.f32 %v2982_v6, %v8115_v45  ;;  %v7333_v45 = vld [vmem:[%s8861_s1 + $0x108] sm:$0xff] }
 0x8aa   :  { %v3156_v16 = vpop.f32.mrf.mxu0 }
 0x8ab   :  { %v3234_v11 = vadd.f32 %v3233_v36, %v3156_v16  ;;  %v3721_v36 = vld [vmem:[#allocation5 + $0xa8] sm:$0xff]  ;;  %v3719_v16 = vld [vmem:[#allocation5 + $0x98] sm:$0xff] }
 0x8ac   :  { %v3158_v54 = vpop.f32.mrf.mxu0  ;;  %3806 = vmatprep.subr.mxu0 %v3721_v36  ;;  %v3742_v36 = vld [vmem:[#allocation5 + $0x150] sm:$0xff] }
 0x8ad   :  { %v3236_v62 = vadd.f32 %v3235_v26, %v3158_v54  ;;  %v3720_v26 = vld [vmem:[#allocation5 + $0xa0] sm:$0xff] }
 0x8ae   :  { %v3162_v4 = vpop.f32.mrf.mxu0  ;;  %3807 = vmatpush1.msra.mxu0 %v3720_v26  ;;  %v3741_v26 = vld [vmem:[#allocation5 + $0x148] sm:$0xff] }
 0x8af   :  { %v3240_v20 = vadd.f32 %v3239_v60, %v3162_v4  ;;  %v3718_v4 = vld [vmem:[#allocation5 + $0x90] sm:$0xff]  ;;  %3808 = vmatprep.subr.mxu0 %v3719_v16  ;;  %v3740_v16 = vld [vmem:[#allocation5 + $0x140] sm:$0xff] }
 0x8b0   :  { %v3164_v50 = vpop.f32.mrf.mxu0  ;;  %3809 = vmatpush1.msra.mxu0 %v3718_v4  ;;  %v3737_v4 = vld [vmem:[#allocation5 + $0x128] sm:$0xff] }
 0x8b1   :  { %v3242_v34 = vadd.f32 %v3241_v40, %v3164_v50  ;;  %v3717_v50 = vld [vmem:[#allocation5 + $0x88] sm:$0xff] }
 0x8b2   :  { %3810 = vmatprep.subr.mxu0 %v3717_v50  ;;  %v3735_v50 = vld [vmem:[#allocation5 + $0x118] sm:$0xff] }
 0x8b3   :  { %3289 = vmatprep.subr.mxu1 %v3242_v34 }
 0x8b4   :  { %3290 = vmatpush1.msra.mxu1 %v3240_v20 }
 0x8b5   :  { %3291 = vmatprep.subr.mxu1 %v3236_v62  ;;  %v3716_v62 = vld [vmem:[#allocation5 + $0x80] sm:$0xff] }
 0x8b6   :  { %3292 = vmatpush1.msra.mxu1 %v3234_v11  ;;  %3811 = vmatpush1.msra.mxu0 %v3716_v62  ;;  %v3715_v11 = vld [vmem:[#allocation5 + $0x78] sm:$0xff]  ;;  %v3732_v62 = vld [vmem:[#allocation5 + $0x100] sm:$0xff] }
 0x8b7   :  { %7336 = vmatmul.mubr.msk.f32.vlgmr.msra.gmra.mxu1 %vm600_vm0, %v7332_v52  ;;  %3812 = vmatprep.subr.mxu0 %v3715_v11  ;;  %v8261_v11 = vld [vmem:[#allocation2 + $0x38] sm:$0xff] }
 0x8b8   :  { %3331 = vmatprep.mubr.f32.mxu1 %v7672_v0  ;;  %3860 = vmatprep.mubr.f32.mxu0 %v8261_v11 }
 0x8bb   :  { %7337 = vmatmul.mubr.msk.f32.gmra.mxu1 %vm600_vm0, %v7333_v45  ;;  %v3714_v45 = vld [vmem:[#allocation5 + $0x70] sm:$0xff] }
 0x8bc   :  { %3337 = vmatprep.mubr.f32.mxu1 %v7672_v0  ;;  %3813 = vmatpush1.msra.mxu0 %v3714_v45  ;;  %v8267_v45 = vld [vmem:[#allocation2 + $0x50] sm:$0xff] }
 0x8bf   :  { %7338 = vmatmul.mubr.msk.f32.gmra.mxu1 %vm600_vm0, %v7334_v46  ;;  %v3713_v46 = vld [vmem:[#allocation5 + $0x68] sm:$0xff] }
 0x8c0   :  { %3343 = vmatprep.mubr.f32.mxu1 %v7672_v0  ;;  %3814 = vmatprep.subr.mxu0 %v3713_v46  ;;  %v8270_v46 = vld [vmem:[#allocation2 + $0x48] sm:$0xff] }
 0x8c1   :  { %3815 = vmatpush1.msra.mxu0 %v3712_v13  ;;  %v4048_v13 = vld [vmem:[#allocation5 + $0x5f0] sm:$0xff] }
 0x8c2   :  { %3816 = vmatprep.subr.mxu0 %v3711_v21  ;;  %v4047_v21 = vld [vmem:[#allocation5 + $0x5e8] sm:$0xff] }
 0x8c3   :  { %7339 = vmatmul.mubr.msk.f32.gmra.mxu1 %vm600_vm0, %v7335_v29  ;;  %3817 = vmatpush1.msra.mxu0 %v3710_v14  ;;  %v4046_v14 = vld [vmem:[#allocation5 + $0x5e0] sm:$0xff] }
 0x8c4   :  { %3818 = vmatprep.subr.mxu0 %v3709_v51  ;;  %7464 = vmatprep.mubr.msk.f32.mxu1 %vm3418_vm1, %v8257_v38  ;;  %v4045_v51 = vld [vmem:[#allocation5 + $0x5d8] sm:$0xff] }
 0x8c5   :  { %3819 = vmatpush1.msra.mxu0 %v3708_v49  ;;  %v4044_v49 = vld [vmem:[#allocation5 + $0x5d0] sm:$0xff] }
 0x8c6   :  { %3820 = vmatprep.subr.mxu0 %v3707_v15  ;;  %v4043_v15 = vld [vmem:[#allocation5 + $0x5c8] sm:$0xff] }
 0x8c7   :  { %3821 = vmatpush1.msra.mxu0 %v3706_v59  ;;  %v4042_v59 = vld [vmem:[#allocation5 + $0x5c0] sm:$0xff] }
 0x8c8   :  { %3822 = vmatprep.subr.mxu0 %v3705_v55  ;;  %v4041_v55 = vld [vmem:[#allocation5 + $0x5b8] sm:$0xff] }
 0x8c9   :  { %3823 = vmatpush1.msra.mxu0 %v3704_v5  ;;  %v4040_v5 = vld [vmem:[#allocation5 + $0x5b0] sm:$0xff] }
 0x977   :  { %v3327_v10 = vpop.f32.mrf.mxu1 }
 0x979   :  { %v3329_v31 = vpop.f32.mrf.mxu1 }
 0x97a   :  { %v3351_v23 = vadd.f32 %v3329_v31, %v8159_v8  ;;  %v8235_v8 = vpop.permute.xlu1 %3360  ;;  %v3702_v31 = vld [vmem:[#allocation5 + $0x10] sm:$0xff] }
 0x97b   :  { %v3333_v41 = vpop.f32.mrf.mxu1 }
 0x97c   :  { %v3352_v1 = vadd.f32 %v3333_v41, %v8164_v25  ;;  %v8238_v12 = vadd.f32 %v8235_v8, %v3351_v23  ;;  %v3701_v41 = vld [vmem:[#allocation5 + $0x8] sm:$0xff]  ;;  %v3752_v23 = vld [vmem:[#allocation5 + $0x1a0] sm:$0xff] }
 0x97d   :  { %v3335_v28 = vpop.f32.mrf.mxu1 }
 0x97e   :  { %v3353_v43 = vadd.f32 %v3335_v28, %v8166_v30  ;;  %v8224_v25 = vadd.f32 %v8214_v2, %v3352_v1  ;;  %v3399_v20 = vmul.f32 %v8238_v12, %v8238_v12  ;;  %v3700_v28 = vld [vmem:[#allocation5] sm:$0xff]  ;;  %v3755_v1 = vld [vmem:[#allocation5 + $0x1b8] sm:$0xff] }
 0x97f   :  { %v3339_v3 = vpop.f32.mrf.mxu1 }
 0x980   :  { %v3354_v56 = vadd.f32 %v3339_v3, %v2989_v22  ;;  %v8217_v44 = vadd.f32 %v8214_v2, %v3353_v43  ;;  %v3350_v22 = vadd.f32 %v3327_v10, %v8157_v7  ;;  %v3400_v6 = vmul.f32 %v8224_v25, %v8224_v25  ;;  %v3703_v10 = vld [vmem:[#allocation5 + $0x18] sm:$0xff]  ;;  %v3758_v43 = vld [vmem:[#allocation5 + $0x1d0] sm:$0xff] }
 0x981   :  { %v3341_v57 = vpop.f32.mrf.mxu1  ;;  %3824 = vmatprep.subr.mxu0 %v3703_v10  ;;  %v3763_v3 = vld [vmem:[#allocation5 + $0x1f8] sm:$0xff]  ;;  %v4039_v10 = vld [vmem:[#allocation5 + $0x5a8] sm:$0xff] }
 0x982   :  { %v3355_v18 = vadd.f32 %v3341_v57, %v2990_v9  ;;  %v8201_v17 = vadd.f32 %v8197_v58, %v3354_v56  ;;  %v3401_v9 = vmul.f32 %v8217_v44, %v8217_v44  ;;  %3825 = vmatpush1.msra.mxu0 %v3702_v31  ;;  %v3762_v56 = vld [vmem:[#allocation5 + $0x1f0] sm:$0xff]  ;;  %v3761_v57 = vld [vmem:[#allocation5 + $0x1e8] sm:$0xff]  ;;  %v4038_v31 = vld [vmem:[#allocation5 + $0x5a0] sm:$0xff] }
 0x983   :  { %v3345_v35 = vpop.f32.mrf.mxu1  ;;  %3826 = vmatprep.subr.mxu0 %v3701_v41  ;;  %v4037_v41 = vld [vmem:[#allocation5 + $0x598] sm:$0xff] }
 0x984   :  { %v8204_v37 = vadd.f32 %v8197_v58, %v3355_v18  ;;  %v3356_v61 = vadd.f32 %v3345_v35, %v8171_v33  ;;  %v3389_v33 = vadd.f32 %v8217_v44, %v8224_v25  ;;  %v3409_v7 = vadd.f32 %v3401_v9, %v3400_v6  ;;  %3827 = vmatpush1.msra.mxu0 %v3700_v28  ;;  %v3760_v18 = vld [vmem:[#allocation5 + $0x1e0] sm:$0xff]  ;;  %v3759_v35 = vld [vmem:[#allocation5 + $0x1d8] sm:$0xff]  ;;  %v3746_v9 = vld [vmem:[#allocation5 + $0x170] sm:$0xff] }
 0x985   :  { %v3347_v63 = vpop.f32.mrf.mxu1  ;;  %v3402_v40 = vmul.f32 %v8201_v17, %v8201_v17  ;;  %3828 = vmatprep.subr.mxu0 %v3763_v3  ;;  %v3744_v6 = vld [vmem:[#allocation5 + $0x160] sm:$0xff]  ;;  %v4036_v28 = vld [vmem:[#allocation5 + $0x590] sm:$0xff]  ;;  %v4035_v3 = vld [vmem:[#allocation5 + $0x588] sm:$0xff] }
 0x986   :  { %v8209_v53 = vadd.f32 %v8195_v39, %v3356_v61  ;;  %v3357_v47 = vadd.f32 %v3347_v63, %v8174_v42  ;;  %v3392_v48 = vadd.f32 %v8204_v37, %v8201_v17  ;;  %v8245_v42 = vadd.f32 %v8235_v8, %v3350_v22  ;;  %3829 = vmatpush2.msra.mxu0 %v3762_v56  ;;  %v3757_v61 = vld [vmem:[#allocation5 + $0x1c8] sm:$0xff]  ;;  %v3756_v63 = vld [vmem:[#allocation5 + $0x1c0] sm:$0xff] }
 0x987   :  { %v3403_v60 = vmul.f32 %v8204_v37, %v8204_v37  ;;  %3830 = vmatprep.subr.mxu0 %v3761_v57  ;;  %v3748_v22 = vld [vmem:[#allocation5 + $0x180] sm:$0xff]  ;;  %v4033_v57 = vld [vmem:[#allocation5 + $0x578] sm:$0xff] }
 0x988   :  { %v8220_v19 = vadd.f32 %v8195_v39, %v3357_v47  ;;  %3393 = vadd.xlane.f32.xlu1 %v3392_v48  ;;  %v3404_v30 = vmul.f32 %v8209_v53, %v8209_v53  ;;  %v3386_v54 = vadd.f32 %v8238_v12, %v8245_v42  ;;  %v3398_v52 = vmul.f32 %v8245_v42, %v8245_v42  ;;  %v3754_v47 = vld [vmem:[#allocation5 + $0x1b0] sm:$0xff]  ;;  %v3753_v48 = vld [vmem:[#allocation5 + $0x1a8] sm:$0xff]  ;;  %v4034_v56 = vld [vmem:[#allocation5 + $0x580] sm:$0xff] }
 0x989   :  { %v3412_v34 = vadd.f32 %v3403_v60, %v3402_v40  ;;  %3831 = vmatpush2.msra.mxu0 %v3760_v18  ;;  %v3738_v60 = vld [vmem:[#allocation5 + $0x130] sm:$0xff]  ;;  %v3736_v40 = vld [vmem:[#allocation5 + $0x120] sm:$0xff] }
 0x98a   :  { %v3395_v27 = vadd.f32 %v8220_v19, %v8209_v53  ;;  %v3405_v32 = vmul.f32 %v8220_v19, %v8220_v19  ;;  %v3406_v29 = vadd.f32 %v3399_v20, %v3398_v52  ;;  %3832 = vmatprep.subr.mxu0 %v3759_v35  ;;  %v3733_v20 = vld [vmem:[#allocation5 + $0x108] sm:$0xff]  ;;  %v8264_v52 = vld [vmem:[#allocation2 + $0x30] sm:$0xff] }
 0x98b   :  { %3833 = vmatpush2.msra.mxu0 %v3758_v43  ;;  %v4032_v18 = vld [vmem:[#allocation5 + $0x570] sm:$0xff]  ;;  %v4031_v35 = vld [vmem:[#allocation5 + $0x568] sm:$0xff]  ;;  %v4030_v43 = vld [vmem:[#allocation5 + $0x560] sm:$0xff] }
 0x98c   :  { %3396 = vadd.xlane.f32.xlu0 %v3395_v27  ;;  %v3415_v24 = vadd.f32 %v3405_v32, %v3404_v30  ;;  %3834 = vmatprep.subr.mxu0 %v3757_v61  ;;  %v3751_v27 = vld [vmem:[#allocation5 + $0x198] sm:$0xff]  ;;  %v3750_v30 = vld [vmem:[#allocation5 + $0x190] sm:$0xff]  ;;  %v3749_v32 = vld [vmem:[#allocation5 + $0x188] sm:$0xff] }
 0x98d   :  { %3835 = vmatpush2.msra.mxu0 %v3756_v63  ;;  %v4029_v61 = vld [vmem:[#allocation5 + $0x558] sm:$0xff]  ;;  %v4028_v63 = vld [vmem:[#allocation5 + $0x550] sm:$0xff] }
 0x98e   :  { %3416 = vadd.xlane.f32.xlu1 %v3415_v24  ;;  %3836 = vmatprep.subr.mxu0 %v3755_v1  ;;  %v3747_v24 = vld [vmem:[#allocation5 + $0x178] sm:$0xff]  ;;  %v4027_v1 = vld [vmem:[#allocation5 + $0x548] sm:$0xff] }
 0x98f   :  { %3837 = vmatpush2.msra.mxu0 %v3754_v47  ;;  %v4026_v47 = vld [vmem:[#allocation5 + $0x540] sm:$0xff] }
 0x990   :  { %3390 = vadd.xlane.f32.xlu0 %v3389_v33  ;;  %3838 = vmatprep.subr.mxu0 %v3753_v48  ;;  %v3745_v33 = vld [vmem:[#allocation5 + $0x168] sm:$0xff]  ;;  %v4025_v48 = vld [vmem:[#allocation5 + $0x538] sm:$0xff] }
 0x991   :  { %3839 = vmatpush2.msra.mxu0 %v3752_v23  ;;  %v4024_v23 = vld [vmem:[#allocation5 + $0x530] sm:$0xff] }
 0x992   :  { %3410 = vadd.xlane.f32.xlu1 %v3409_v7  ;;  %3840 = vmatprep.subr.mxu0 %v3751_v27  ;;  %v3743_v7 = vld [vmem:[#allocation5 + $0x158] sm:$0xff]  ;;  %v4023_v27 = vld [vmem:[#allocation5 + $0x528] sm:$0xff] }
 0x993   :  { %3841 = vmatpush2.msra.mxu0 %v3750_v30  ;;  %v4022_v30 = vld [vmem:[#allocation5 + $0x520] sm:$0xff] }
 0x994   :  { %3387 = vadd.xlane.f32.xlu0 %v3386_v54  ;;  %3842 = vmatprep.subr.mxu0 %v3749_v32  ;;  %v3739_v54 = vld [vmem:[#allocation5 + $0x138] sm:$0xff] }
 0x995   :  { %3843 = vmatpush2.msra.mxu0 %v3748_v22  ;;  %v4021_v32 = vld [vmem:[#allocation5 + $0x518] sm:$0xff]  ;;  %v4020_v22 = vld [vmem:[#allocation5 + $0x510] sm:$0xff] }
 0x996   :  { %3844 = vmatprep.subr.mxu0 %v3747_v24  ;;  %v4019_v24 = vld [vmem:[#allocation5 + $0x508] sm:$0xff] }
 0x997   :  { %3845 = vmatpush2.msra.mxu0 %v3746_v9  ;;  %v4018_v9 = vld [vmem:[#allocation5 + $0x500] sm:$0xff] }
 0x998   :  { %3413 = vadd.xlane.f32.xlu0 %v3412_v34  ;;  %3846 = vmatprep.subr.mxu0 %v3745_v33  ;;  %v3734_v34 = vld [vmem:[#allocation5 + $0x110] sm:$0xff]  ;;  %v8274_v33 = vld [vmem:[#allocation2 + $0x40] sm:$0xff] }
 0x999   :  { %3847 = vmatpush2.msra.mxu0 %v3744_v6  ;;  %v8278_v6 = vld [vmem:[#allocation2 + $0x58] sm:$0xff] }
 0x99a   :  { %3848 = vmatprep.subr.mxu0 %v3743_v7 }
 0x99b   :  { %3849 = vmatpush2.msra.mxu0 %v3742_v36 }
 0x99c   :  { %3407 = vadd.xlane.f32.xlu0 %v3406_v29  ;;  %3850 = vmatprep.subr.mxu0 %v3741_v26  ;;  %v4049_v29 = vld [vmem:[#allocation5 + $0x5f8] sm:$0xff] }
 0x99d   :  { %3851 = vmatpush2.msra.mxu0 %v3740_v16 }
 0x99e   :  { %3852 = vmatprep.subr.mxu0 %v3739_v54 }
 0x99f   :  { %3853 = vmatpush2.msra.mxu0 %v3738_v60  ;;  %v69_v60 = vld [vmem:[#allocation7 + $0x8] sm:$0xff] }
 0x9a0   :  { %3854 = vmatprep.subr.mxu0 %v3737_v4  ;;  %v70_v4 = vld [vmem:[#allocation7 + $0x10] sm:$0xff] }
 0x9a1   :  { %3855 = vmatpush2.msra.mxu0 %v3736_v40 }
 0x9a2   :  { %3856 = vmatprep.subr.mxu0 %v3735_v50  ;;  %v71_v50 = vld [vmem:[#allocation7 + $0x18] sm:$0xff] }
 0x9a3   :  { %3857 = vmatpush2.msra.mxu0 %v3734_v34 }
 0x9a4   :  { %3858 = vmatprep.subr.mxu0 %v3733_v20 }
 0x9a5   :  { %3859 = vmatpush2.msra.mxu0 %v3732_v62  ;;  %v3795_v62 = vld [vmem:[#allocation5 + $0x2f8] sm:$0xff] }
 0x9a6   :  { %3861 = vmatmul.mubr.f32.vlgmr.msra.gmra.mxu0 %v8264_v52  ;;  %4127 = vmatprep.subr.mxu0 %v4049_v29  ;;  %v3794_v29 = vld [vmem:[#allocation5 + $0x2f0] sm:$0xff] }
 0x9a7   :  { %3866 = vmatprep.mubr.f32.mxu0 %v8267_v45  ;;  %4128 = vmatpush1.msra.mxu0 %v4048_v13  ;;  %v3793_v13 = vld [vmem:[#allocation5 + $0x2e8] sm:$0xff] }
 0x9a8   :  { %4129 = vmatprep.subr.mxu0 %v4047_v21  ;;  %v3792_v21 = vld [vmem:[#allocation5 + $0x2e0] sm:$0xff] }
 0x9a9   :  { %4130 = vmatpush1.msra.mxu0 %v4046_v14  ;;  %v3791_v14 = vld [vmem:[#allocation5 + $0x2d8] sm:$0xff] }
 0x9aa   :  { %3867 = vmatmul.mubr.f32.gmra.mxu0 %v8270_v46  ;;  %4131 = vmatprep.subr.mxu0 %v4045_v51  ;;  %v3790_v51 = vld [vmem:[#allocation5 + $0x2d0] sm:$0xff] }
 0x9ab   :  { %4191 = vmatprep.mubr.f32.mxu0 %v7672_v0  ;;  %4132 = vmatpush1.msra.mxu0 %v4044_v49  ;;  %v3789_v49 = vld [vmem:[#allocation5 + $0x2c8] sm:$0xff] }
 0x9ac   :  { %4133 = vmatprep.subr.mxu0 %v4043_v15  ;;  %v3787_v15 = vld [vmem:[#allocation5 + $0x2b8] sm:$0xff] }
 0x9ad   :  { %4134 = vmatpush1.msra.mxu0 %v4042_v59  ;;  %v3786_v59 = vld [vmem:[#allocation5 + $0x2b0] sm:$0xff] }
 0x9ae   :  { %4135 = vmatprep.subr.mxu0 %v4041_v55  ;;  %v3785_v55 = vld [vmem:[#allocation5 + $0x2a8] sm:$0xff] }
 0x9af   :  { %4136 = vmatpush1.msra.mxu0 %v4040_v5  ;;  %v3784_v5 = vld [vmem:[#allocation5 + $0x2a0] sm:$0xff] }
 0x9b0   :  { %4137 = vmatprep.subr.mxu0 %v4039_v10  ;;  %v3783_v10 = vld [vmem:[#allocation5 + $0x298] sm:$0xff] }
 0x9b1   :  { %4138 = vmatpush1.msra.mxu0 %v4038_v31  ;;  %v3782_v31 = vld [vmem:[#allocation5 + $0x290] sm:$0xff] }
 0x9b2   :  { %4139 = vmatprep.subr.mxu0 %v4037_v41  ;;  %v3781_v41 = vld [vmem:[#allocation5 + $0x288] sm:$0xff] }
 0x9b3   :  { %4140 = vmatpush1.msra.mxu0 %v4036_v28  ;;  %v3780_v28 = vld [vmem:[#allocation5 + $0x280] sm:$0xff] }
 0x9b4   :  { %4141 = vmatprep.subr.mxu0 %v4035_v3  ;;  %v3779_v3 = vld [vmem:[#allocation5 + $0x278] sm:$0xff] }
 0x9b5   :  { %4142 = vmatpush1.msra.mxu0 %v4034_v56  ;;  %v3778_v56 = vld [vmem:[#allocation5 + $0x270] sm:$0xff] }
 0x9b6   :  { %4143 = vmatprep.subr.mxu0 %v4033_v57  ;;  %v3777_v57 = vld [vmem:[#allocation5 + $0x268] sm:$0xff] }
 0x9b7   :  { %4144 = vmatpush1.msra.mxu0 %v4032_v18  ;;  %v3776_v18 = vld [vmem:[#allocation5 + $0x260] sm:$0xff] }
 0x9b8   :  { %4145 = vmatprep.subr.mxu0 %v4031_v35  ;;  %v3775_v35 = vld [vmem:[#allocation5 + $0x258] sm:$0xff] }
 0x9b9   :  { %4146 = vmatpush1.msra.mxu0 %v4030_v43  ;;  %v3774_v43 = vld [vmem:[#allocation5 + $0x250] sm:$0xff] }
 0x9ba   :  { %4147 = vmatprep.subr.mxu0 %v4029_v61  ;;  %v3773_v61 = vld [vmem:[#allocation5 + $0x248] sm:$0xff] }
 0x9bb   :  { %4148 = vmatpush1.msra.mxu0 %v4028_v63  ;;  %v3772_v63 = vld [vmem:[#allocation5 + $0x240] sm:$0xff] }
 0x9bc   :  { %4149 = vmatprep.subr.mxu0 %v4027_v1  ;;  %v3771_v1 = vld [vmem:[#allocation5 + $0x238] sm:$0xff] }
 0x9bd   :  { %4150 = vmatpush1.msra.mxu0 %v4026_v47  ;;  %v3770_v47 = vld [vmem:[#allocation5 + $0x230] sm:$0xff] }
 0x9be   :  { %4151 = vmatprep.subr.mxu0 %v4025_v48  ;;  %v3769_v48 = vld [vmem:[#allocation5 + $0x228] sm:$0xff] }
 0x9bf   :  { %4152 = vmatpush1.msra.mxu0 %v4024_v23  ;;  %v3768_v23 = vld [vmem:[#allocation5 + $0x220] sm:$0xff] }
 0x9c0   :  { %4153 = vmatprep.subr.mxu0 %v4023_v27  ;;  %v3767_v27 = vld [vmem:[#allocation5 + $0x218] sm:$0xff] }
 0x9c1   :  { %4154 = vmatpush1.msra.mxu0 %v4022_v30  ;;  %v3766_v30 = vld [vmem:[#allocation5 + $0x210] sm:$0xff] }
 0x9c2   :  { %4155 = vmatprep.subr.mxu0 %v4021_v32  ;;  %v3765_v32 = vld [vmem:[#allocation5 + $0x208] sm:$0xff] }
 0x9c3   :  { %4156 = vmatpush1.msra.mxu0 %v4020_v22  ;;  %v3764_v22 = vld [vmem:[#allocation5 + $0x200] sm:$0xff] }
 0x9c4   :  { %4157 = vmatprep.subr.mxu0 %v4019_v24  ;;  %v3985_v24 = vld [vmem:[#allocation5 + $0x3f8] sm:$0xff] }
 0x9c5   :  { %4158 = vmatpush1.msra.mxu0 %v4018_v9  ;;  %v3984_v9 = vld [vmem:[#allocation5 + $0x3f0] sm:$0xff] }
 0x9c6   :  { %4192 = vmatmul.mubr.f32.vlgmr.msra.gmra.mxu0 %v8274_v33 }
 0x9c7   :  { %4197 = vmatprep.mubr.f32.mxu0 %v7672_v0 }
 0x9ca   :  { %4198 = vmatmul.mubr.f32.gmra.mxu0 %v8278_v6 }
 0x9cb   :  { %4284 = vmatprep.mubr.f32.mxu0 %v7672_v0 }
 0xa11   :  { %v3394_v36 = vpop.xlane.xlu1 %3393 }
 0xa15   :  { %v3397_v7 = vpop.xlane.xlu0 %3396 }
 0xa16   :  { %7456 = vmatprep.subr.mxu1 %v3397_v7 }
 0xa17   :  { %7457 = vmatpush3.msra.mxu1 %v3397_v7  ;;  %v3417_v16 = vpop.xlane.xlu1 %3416  ;;  %v3983_v7 = vld [vmem:[#allocation5 + $0x3e8] sm:$0xff] }
 0xa18   :  { %7458 = vmatprep.subr.mxu1 %v3394_v36 }
 0xa19   :  { %v3391_v26 = vpop.xlane.xlu0 %3390  ;;  %7459 = vmatpush3.msra.mxu1 %v3394_v36  ;;  %v3982_v36 = vld [vmem:[#allocation5 + $0x3e0] sm:$0xff] }
 0xa1a   :  { %7460 = vmatprep.subr.mxu1 %v3391_v26 }
 0xa1b   :  { %7461 = vmatpush3.msra.mxu1 %v3391_v26  ;;  %v3411_v34 = vpop.xlane.xlu1 %3410  ;;  %v3981_v26 = vld [vmem:[#allocation5 + $0x3d8] sm:$0xff] }
 0xa1d   :  { %v3388_v54 = vpop.xlane.xlu0 %3387 }
 0xa1e   :  { %7462 = vmatprep.subr.mxu1 %v3388_v54 }
 0xa1f   :  { %7463 = vmatpush3.msra.mxu1 %v3388_v54  ;;  %v3979_v54 = vld [vmem:[#allocation5 + $0x3c8] sm:$0xff] }
 0xa20   :  { %7465 = vmatmul.mubr.msk.f32.vlgmr.msra.gmra.mxu1 %vm3418_vm1, %v69_v60  ;;  %7470 = vmatprep.subr.mxu1 %v3417_v16 }
 0xa21   :  { %v3414_v40 = vpop.xlane.xlu0 %3413  ;;  %7471 = vmatpush3.msra.mxu1 %v3417_v16  ;;  %7467 = vmatprep.mubr.msk.f32.mxu1 %vm3418_vm1, %v70_v4  ;;  %v3980_v16 = vld [vmem:[#allocation5 + $0x3d0] sm:$0xff] }
 0xa22   :  { %7472 = vmatprep.subr.mxu1 %v3414_v40 }
 0xa23   :  { %7473 = vmatpush3.msra.mxu1 %v3414_v40  ;;  %v3976_v40 = vld [vmem:[#allocation5 + $0x3b0] sm:$0xff] }
 0xa24   :  { %7468 = vmatmul.mubr.msk.f32.gmra.mxu1 %vm3418_vm1, %v71_v50  ;;  %7474 = vmatprep.subr.mxu1 %v3411_v34 }
 0xa25   :  { %v3408_v20 = vpop.xlane.xlu0 %3407  ;;  %7475 = vmatpush3.msra.mxu1 %v3411_v34  ;;  %7478 = vmatprep.mubr.msk.f32.mxu1 %vm3418_vm1, %v8257_v38  ;;  %v3788_v38 = vld [vmem:[#allocation5 + $0x2c0] sm:$0xff] }
 0xa26   :  { %7476 = vmatprep.subr.mxu1 %v3408_v20  ;;  %v3974_v34 = vld [vmem:[#allocation5 + $0x3a0] sm:$0xff] }
 0xa27   :  { %7477 = vmatpush3.msra.mxu1 %v3408_v20  ;;  %v3973_v20 = vld [vmem:[#allocation5 + $0x398] sm:$0xff] }
 0xa28   :  { %7479 = vmatmul.mubr.msk.f32.vlgmr.msra.gmra.mxu1 %vm3418_vm1, %v69_v60  ;;  %3873 = vmatprep.subr.mxu1 %v3795_v62  ;;  %v3978_v60 = vld [vmem:[#allocation5 + $0x3c0] sm:$0xff]  ;;  %v3972_v62 = vld [vmem:[#allocation5 + $0x390] sm:$0xff] }
 0xa29   :  { %3874 = vmatpush1.msra.mxu1 %v3794_v29  ;;  %7481 = vmatprep.mubr.msk.f32.mxu1 %vm3418_vm1, %v70_v4  ;;  %v3977_v4 = vld [vmem:[#allocation5 + $0x3b8] sm:$0xff]  ;;  %v3971_v29 = vld [vmem:[#allocation5 + $0x388] sm:$0xff] }
 0xa2a   :  { %3875 = vmatprep.subr.mxu1 %v3793_v13  ;;  %v3970_v13 = vld [vmem:[#allocation5 + $0x380] sm:$0xff] }
 0xa2b   :  { %3876 = vmatpush1.msra.mxu1 %v3792_v21  ;;  %v3969_v21 = vld [vmem:[#allocation5 + $0x378] sm:$0xff] }
 0xa2c   :  { %7482 = vmatmul.mubr.msk.f32.gmra.mxu1 %vm3418_vm1, %v71_v50  ;;  %3877 = vmatprep.subr.mxu1 %v3791_v14  ;;  %v3975_v50 = vld [vmem:[#allocation5 + $0x3a8] sm:$0xff]  ;;  %v3968_v14 = vld [vmem:[#allocation5 + $0x370] sm:$0xff] }
 0xa2d   :  { %3878 = vmatpush1.msra.mxu1 %v3790_v51  ;;  %3937 = vmatprep.mubr.f32.mxu1 %v7672_v0  ;;  %v3967_v51 = vld [vmem:[#allocation5 + $0x368] sm:$0xff] }
 0xa2e   :  { %3879 = vmatprep.subr.mxu1 %v3789_v49  ;;  %v3966_v49 = vld [vmem:[#allocation5 + $0x360] sm:$0xff] }
 0xa2f   :  { %3880 = vmatpush1.msra.mxu1 %v3788_v38  ;;  %v3965_v38 = vld [vmem:[#allocation5 + $0x358] sm:$0xff] }
 0xa30   :  { %3881 = vmatprep.subr.mxu1 %v3787_v15  ;;  %v3964_v15 = vld [vmem:[#allocation5 + $0x350] sm:$0xff] }
 0xa31   :  { %3882 = vmatpush1.msra.mxu1 %v3786_v59  ;;  %v3963_v59 = vld [vmem:[#allocation5 + $0x348] sm:$0xff] }
 0xa32   :  { %3883 = vmatprep.subr.mxu1 %v3785_v55  ;;  %v3962_v55 = vld [vmem:[#allocation5 + $0x340] sm:$0xff] }
 0xa33   :  { %3884 = vmatpush1.msra.mxu1 %v3784_v5  ;;  %v3961_v5 = vld [vmem:[#allocation5 + $0x338] sm:$0xff] }
 0xa34   :  { %3885 = vmatprep.subr.mxu1 %v3783_v10  ;;  %v3960_v10 = vld [vmem:[#allocation5 + $0x330] sm:$0xff] }
 0xa35   :  { %3886 = vmatpush1.msra.mxu1 %v3782_v31  ;;  %v3959_v31 = vld [vmem:[#allocation5 + $0x328] sm:$0xff] }
 0xa36   :  { %3887 = vmatprep.subr.mxu1 %v3781_v41  ;;  %v3958_v41 = vld [vmem:[#allocation5 + $0x320] sm:$0xff] }
 0xa37   :  { %3888 = vmatpush1.msra.mxu1 %v3780_v28  ;;  %v3957_v28 = vld [vmem:[#allocation5 + $0x318] sm:$0xff] }
 0xa38   :  { %3889 = vmatprep.subr.mxu1 %v3779_v3  ;;  %v3956_v3 = vld [vmem:[#allocation5 + $0x310] sm:$0xff] }
 0xa39   :  { %3890 = vmatpush1.msra.mxu1 %v3778_v56  ;;  %v3955_v56 = vld [vmem:[#allocation5 + $0x308] sm:$0xff] }
 0xa3a   :  { %3891 = vmatprep.subr.mxu1 %v3777_v57  ;;  %v3954_v57 = vld [vmem:[#allocation5 + $0x300] sm:$0xff] }
 0xa3b   :  { %3892 = vmatpush1.msra.mxu1 %v3776_v18  ;;  %v4017_v18 = vld [vmem:[#allocation5 + $0x4f8] sm:$0xff] }
 0xa3c   :  { %3893 = vmatprep.subr.mxu1 %v3775_v35  ;;  %v4016_v35 = vld [vmem:[#allocation5 + $0x4f0] sm:$0xff] }
 0xa3d   :  { %3894 = vmatpush1.msra.mxu1 %v3774_v43  ;;  %v4015_v43 = vld [vmem:[#allocation5 + $0x4e8] sm:$0xff] }
 0xa3e   :  { %3895 = vmatprep.subr.mxu1 %v3773_v61  ;;  %v4014_v61 = vld [vmem:[#allocation5 + $0x4e0] sm:$0xff] }
 0xa3f   :  { %3896 = vmatpush1.msra.mxu1 %v3772_v63  ;;  %v4013_v63 = vld [vmem:[#allocation5 + $0x4d8] sm:$0xff] }
 0xa40   :  { %3897 = vmatprep.subr.mxu1 %v3771_v1  ;;  %v4012_v1 = vld [vmem:[#allocation5 + $0x4d0] sm:$0xff] }
 0xa41   :  { %3898 = vmatpush1.msra.mxu1 %v3770_v47  ;;  %v4011_v47 = vld [vmem:[#allocation5 + $0x4c8] sm:$0xff] }
 0xa42   :  { %3899 = vmatprep.subr.mxu1 %v3769_v48  ;;  %v4010_v48 = vld [vmem:[#allocation5 + $0x4c0] sm:$0xff] }
 0xa43   :  { %3900 = vmatpush1.msra.mxu1 %v3768_v23  ;;  %v4009_v23 = vld [vmem:[#allocation5 + $0x4b8] sm:$0xff] }
 0xa44   :  { %3901 = vmatprep.subr.mxu1 %v3767_v27  ;;  %v4008_v27 = vld [vmem:[#allocation5 + $0x4b0] sm:$0xff] }
 0xa45   :  { %3902 = vmatpush1.msra.mxu1 %v3766_v30  ;;  %v4007_v30 = vld [vmem:[#allocation5 + $0x4a8] sm:$0xff] }
 0xa46   :  { %3903 = vmatprep.subr.mxu1 %v3765_v32  ;;  %v4006_v32 = vld [vmem:[#allocation5 + $0x4a0] sm:$0xff] }
 0xa47   :  { %3904 = vmatpush1.msra.mxu1 %v3764_v22  ;;  %v4005_v22 = vld [vmem:[#allocation5 + $0x498] sm:$0xff] }
 0xa48   :  { %3938 = vmatmul.mubr.f32.vlgmr.msra.gmra.mxu1 %v8274_v33  ;;  %4050 = vmatprep.subr.mxu1 %v3985_v24  ;;  %v4004_v24 = vld [vmem:[#allocation5 + $0x490] sm:$0xff] }
 0xa49   :  { %4051 = vmatpush1.msra.mxu1 %v3984_v9  ;;  %3943 = vmatprep.mubr.f32.mxu1 %v7672_v0  ;;  %v4003_v9 = vld [vmem:[#allocation5 + $0x488] sm:$0xff] }
 0xa4a   :  { %4052 = vmatprep.subr.mxu1 %v3983_v7  ;;  %v4002_v7 = vld [vmem:[#allocation5 + $0x480] sm:$0xff] }
 0xa4b   :  { %4053 = vmatpush1.msra.mxu1 %v3982_v36  ;;  %v4001_v36 = vld [vmem:[#allocation5 + $0x478] sm:$0xff] }
 0xa4c   :  { %3944 = vmatmul.mubr.f32.gmra.mxu1 %v8278_v6  ;;  %4054 = vmatprep.subr.mxu1 %v3981_v26  ;;  %v4000_v26 = vld [vmem:[#allocation5 + $0x470] sm:$0xff] }
 0xa4d   :  { %4055 = vmatpush1.msra.mxu1 %v3980_v16  ;;  %4114 = vmatprep.mubr.f32.mxu1 %v8261_v11  ;;  %v3999_v16 = vld [vmem:[#allocation5 + $0x468] sm:$0xff] }
 0xa4e   :  { %4056 = vmatprep.subr.mxu1 %v3979_v54  ;;  %v3998_v54 = vld [vmem:[#allocation5 + $0x460] sm:$0xff] }
 0xa4f   :  { %4057 = vmatpush1.msra.mxu1 %v3978_v60  ;;  %v3997_v60 = vld [vmem:[#allocation5 + $0x458] sm:$0xff] }
 0xa50   :  { %4058 = vmatprep.subr.mxu1 %v3977_v4  ;;  %v3996_v4 = vld [vmem:[#allocation5 + $0x450] sm:$0xff] }
 0xa51   :  { %4059 = vmatpush1.msra.mxu1 %v3976_v40  ;;  %v3995_v40 = vld [vmem:[#allocation5 + $0x448] sm:$0xff] }
 0xa52   :  { %4060 = vmatprep.subr.mxu1 %v3975_v50  ;;  %v3994_v50 = vld [vmem:[#allocation5 + $0x440] sm:$0xff] }
 0xa53   :  { %4061 = vmatpush1.msra.mxu1 %v3974_v34  ;;  %v3993_v34 = vld [vmem:[#allocation5 + $0x438] sm:$0xff] }
 0xa54   :  { %4062 = vmatprep.subr.mxu1 %v3973_v20  ;;  %v3992_v20 = vld [vmem:[#allocation5 + $0x430] sm:$0xff] }
 0xa55   :  { %4063 = vmatpush1.msra.mxu1 %v3972_v62  ;;  %v3991_v62 = vld [vmem:[#allocation5 + $0x428] sm:$0xff] }
 0xa56   :  { %4064 = vmatprep.subr.mxu1 %v3971_v29  ;;  %v3990_v29 = vld [vmem:[#allocation5 + $0x420] sm:$0xff] }
 0xa57   :  { %4065 = vmatpush1.msra.mxu1 %v3970_v13  ;;  %v3989_v13 = vld [vmem:[#allocation5 + $0x418] sm:$0xff] }
 0xa58   :  { %4066 = vmatprep.subr.mxu1 %v3969_v21  ;;  %v3988_v21 = vld [vmem:[#allocation5 + $0x410] sm:$0xff] }
 0xa59   :  { %4067 = vmatpush1.msra.mxu1 %v3968_v14  ;;  %v3987_v14 = vld [vmem:[#allocation5 + $0x408] sm:$0xff] }
 0xa5a   :  { %4068 = vmatprep.subr.mxu1 %v3967_v51  ;;  %v3986_v51 = vld [vmem:[#allocation5 + $0x400] sm:$0xff] }
 0xa5b   :  { %4069 = vmatpush1.msra.mxu1 %v3966_v49 }
 0xa5c   :  { %4070 = vmatprep.subr.mxu1 %v3965_v38 }
 0xa5d   :  { %4071 = vmatpush1.msra.mxu1 %v3964_v15 }
 0xa5e   :  { %4072 = vmatprep.subr.mxu1 %v3963_v59 }
 0xa5f   :  { %4073 = vmatpush1.msra.mxu1 %v3962_v55 }
 0xa60   :  { %4074 = vmatprep.subr.mxu1 %v3961_v5 }
 0xa61   :  { %4075 = vmatpush1.msra.mxu1 %v3960_v10 }
 0xa62   :  { %4076 = vmatprep.subr.mxu1 %v3959_v31 }
 0xa63   :  { %4077 = vmatpush1.msra.mxu1 %v3958_v41 }
 0xa64   :  { %4078 = vmatprep.subr.mxu1 %v3957_v28 }
 0xa65   :  { %4079 = vmatpush1.msra.mxu1 %v3956_v3 }
 0xa66   :  { %4080 = vmatprep.subr.mxu1 %v3955_v56 }
 0xa67   :  { %4081 = vmatpush1.msra.mxu1 %v3954_v57 }
 0xa68   :  { %4082 = vmatprep.subr.mxu1 %v4017_v18 }
 0xa69   :  { %4083 = vmatpush2.msra.mxu1 %v4016_v35 }
 0xa6a   :  { %4084 = vmatprep.subr.mxu1 %v4015_v43 }
 0xa6b   :  { %4085 = vmatpush2.msra.mxu1 %v4014_v61 }
 0xa6c   :  { %4086 = vmatprep.subr.mxu1 %v4013_v63  ;;  %v77_v63 = vld [vmem:[%s8865_s5 + $0x8] sm:$0xff] }
 0xa6d   :  { %4087 = vmatpush2.msra.mxu1 %v4012_v1 }
 0xa6e   :  { %4088 = vmatprep.subr.mxu1 %v4011_v47  ;;  %v76_v47 = vld [vmem:[%s8865_s5] sm:$0xff] }
 0xa6f   :  { %4089 = vmatpush2.msra.mxu1 %v4010_v48 }
 0xa70   :  { %4090 = vmatprep.subr.mxu1 %v4009_v23 }
 0xa71   :  { %4091 = vmatpush2.msra.mxu1 %v4008_v27  ;;  %v79_v27 = vld [vmem:[%s8865_s5 + $0x18] sm:$0xff] }
 0xa72   :  { %4092 = vmatprep.subr.mxu1 %v4007_v30 }
 0xa73   :  { %4093 = vmatpush2.msra.mxu1 %v4006_v32 }
 0xa74   :  { %4094 = vmatprep.subr.mxu1 %v4005_v22 }
 0xa75   :  { %4095 = vmatpush2.msra.mxu1 %v4004_v24  ;;  %v78_v24 = vld [vmem:[%s8865_s5 + $0x10] sm:$0xff] }
 0xa76   :  { %4096 = vmatprep.subr.mxu1 %v4003_v9 }
 0xa77   :  { %4097 = vmatpush2.msra.mxu1 %v4002_v7 }
 0xa78   :  { %4098 = vmatprep.subr.mxu1 %v4001_v36 }
 0xa79   :  { %4099 = vmatpush2.msra.mxu1 %v4000_v26  ;;  %v3862_v26 = vpop.f32.mrf.mxu0 }
 0xa7a   :  { %4100 = vmatprep.subr.mxu1 %v3999_v16 }
 0xa7b   :  { %4101 = vmatpush2.msra.mxu1 %v3998_v54 }
 0xa7c   :  { %4102 = vmatprep.subr.mxu1 %v3997_v60 }
 0xa7d   :  { %4103 = vmatpush2.msra.mxu1 %v3996_v4  ;;  %v3864_v4 = vpop.f32.mrf.mxu0 }
 0xa7e   :  { %4104 = vmatprep.subr.mxu1 %v3995_v40 }
 0xa7f   :  { %4105 = vmatpush2.msra.mxu1 %v3994_v50  ;;  %v3868_v50 = vpop.f32.mrf.mxu0 }
 0xa80   :  { %4106 = vmatprep.subr.mxu1 %v3993_v34 }
 0xa81   :  { %4107 = vmatpush2.msra.mxu1 %v3992_v20 }
 0xa82   :  { %4108 = vmatprep.subr.mxu1 %v3991_v62  ;;  %v3870_v62 = vpop.f32.mrf.mxu0 }
 0xa83   :  { %4109 = vmatpush2.msra.mxu1 %v3990_v29 }
 0xa84   :  { %4110 = vmatprep.subr.mxu1 %v3989_v13 }
 0xa85   :  { %4111 = vmatpush2.msra.mxu1 %v3988_v21 }
 0xa86   :  { %4112 = vmatprep.subr.mxu1 %v3987_v14 }
 0xa87   :  { %4113 = vmatpush2.msra.mxu1 %v3986_v51 }
 0xa88   :  { %4115 = vmatmul.mubr.f32.vlgmr.msra.gmra.mxu1 %v8264_v52 }
 0xa89   :  { %4120 = vmatprep.mubr.f32.mxu1 %v8267_v45 }
 0xa8c   :  { %4121 = vmatmul.mubr.f32.gmra.mxu1 %v8270_v46 }
 0xa8d   :  { %4385 = vmatprep.mubr.f32.mxu1 %v7672_v0 }
 0xae0   :  { %v7466_v49 = vpop.f32.mrf.mxu1 }
 0xae1   :  { %v3602_v55 = vmul.f32 %v7466_v49, %v7466_v49 }
 0xae2   :  { %v3497_v38 = vpop.f32.mrf.mxu1 }
 0xae3   :  { %v3601_v10 = vmul.f32 %v3497_v38, %v3497_v38 }
 0xae4   :  { %v7469_v15 = vpop.f32.mrf.mxu1 }
 0xae5   :  { %v3604_v28 = vmul.f32 %v7469_v15, %v7469_v15 }
 0xae6   :  { %v3507_v59 = vpop.f32.mrf.mxu1 }
 0xae7   :  { %v3603_v52 = vmul.f32 %v3507_v59, %v3507_v59 }
 0xae8   :  { %v7480_v5 = vpop.f32.mrf.mxu1 }
 0xae9   :  { %v3606_v31 = vsub.f32 %v7480_v5, %v3602_v55  ;;  %v4502_v55 = vld [vmem:[#allocation5 + $0x8e0] sm:$0xff]  ;;  %v4501_v5 = vld [vmem:[#allocation5 + $0x8d8] sm:$0xff] }
 0xaea   :  { %v3582_v41 = vpop.f32.mrf.mxu1 }
 0xaeb   :  { %v3610_v3 = vadd.f32 1e-05, %v3606_v31  ;;  %v3605_v56 = vsub.f32 %v3582_v41, %v3601_v10  ;;  %v3951_v10 = vld [vmem:[%s8861_s1 + $0x8] sm:$0xff]  ;;  %v4500_v31 = vld [vmem:[#allocation5 + $0x8d0] sm:$0xff] }
 0xaec   :  { %v7483_v57 = vpop.f32.mrf.mxu1  ;;  %v4499_v41 = vld [vmem:[#allocation5 + $0x8c8] sm:$0xff] }
 0xaed   :  { %7526 = vrsqrt.f32 %v3610_v3  ;;  %v3609_v45 = vadd.f32 1e-05, %v3605_v56  ;;  %v3608_v18 = vsub.f32 %v7483_v57, %v3604_v28  ;;  %v4498_v28 = vld [vmem:[#allocation5 + $0x8c0] sm:$0xff]  ;;  %v4497_v3 = vld [vmem:[#allocation5 + $0x8b8] sm:$0xff]  ;;  %v3952_v56 = vld [vmem:[%s8861_s1 + $0x10] sm:$0xff] }
 0xaee   :  { %v3592_v46 = vpop.f32.mrf.mxu1  ;;  %v4496_v57 = vld [vmem:[#allocation5 + $0x8b0] sm:$0xff] }
 0xaef   :  { %7528 = vrsqrt.f32 %v3609_v45  ;;  %v3612_v35 = vadd.f32 1e-05, %v3608_v18  ;;  %v3607_v43 = vsub.f32 %v3592_v46, %v3603_v52  ;;  %v4495_v52 = vld [vmem:[#allocation5 + $0x8a8] sm:$0xff]  ;;  %v4494_v45 = vld [vmem:[#allocation5 + $0x8a0] sm:$0xff]  ;;  %v4493_v18 = vld [vmem:[#allocation5 + $0x898] sm:$0xff] }
 0xaf0   :  { %v3953_v46 = vld [vmem:[%s8861_s1 + $0x18] sm:$0xff] }
 0xaf1   :  { %7530 = vrsqrt.f32 %v3612_v35  ;;  %v3611_v61 = vadd.f32 1e-05, %v3607_v43  ;;  %v4492_v35 = vld [vmem:[#allocation5 + $0x890] sm:$0xff]  ;;  %v4491_v43 = vld [vmem:[#allocation5 + $0x888] sm:$0xff] }
 0xaf3   :  { %7532 = vrsqrt.f32 %v3611_v61  ;;  %v4490_v61 = vld [vmem:[#allocation5 + $0x880] sm:$0xff] }
 0xafa   :  { %v7527_v1 = vpop.eup %7526 }
 0xafb   :  { %v8305_v48 = vmul.f32 %v7527_v1, %v77_v63  ;;  %v4489_v63 = vld [vmem:[#allocation5 + $0x878] sm:$0xff]  ;;  %v4488_v1 = vld [vmem:[#allocation5 + $0x870] sm:$0xff] }
 0xafc   :  { %v7529_v23 = vpop.eup %7528 }
 0xafd   :  { %v8310_v30 = vmul.f32 %v7529_v23, %v76_v47  ;;  %v8313_v32 = vmul.f32 %v7466_v49, %v8305_v48  ;;  %v3950_v49 = vld [vmem:[%s8861_s1] sm:$0xff]  ;;  %v4487_v47 = vld [vmem:[#allocation5 + $0x868] sm:$0xff] }
 0xafe   :  { %v7531_v22 = vpop.eup %7530  ;;  %v4486_v23 = vld [vmem:[#allocation5 + $0x860] sm:$0xff] }
 0xaff   :  { %v8319_v9 = vmul.f32 %v8310_v30, %v3497_v38  ;;  %v8321_v7 = vmul.f32 %v7531_v22, %v79_v27  ;;  %v4505_v38 = vld [vmem:[#allocation5 + $0x8f8] sm:$0xff]  ;;  %v4484_v22 = vld [vmem:[#allocation5 + $0x850] sm:$0xff] }
 0xb00   :  { %v7533_v36 = vpop.eup %7532  ;;  %v4485_v27 = vld [vmem:[#allocation5 + $0x858] sm:$0xff] }
 0xb01   :  { %v8323_v16 = vmul.f32 %v7533_v36, %v78_v24  ;;  %v8326_v54 = vmul.f32 %v7469_v15, %v8321_v7  ;;  %v4504_v15 = vld [vmem:[#allocation5 + $0x8f0] sm:$0xff]  ;;  %v4483_v24 = vld [vmem:[#allocation5 + $0x848] sm:$0xff]  ;;  %v4482_v36 = vld [vmem:[#allocation5 + $0x840] sm:$0xff] }
 0xb03   :  { %v8329_v60 = vmul.f32 %v8323_v16, %v3507_v59  ;;  %v4503_v59 = vld [vmem:[#allocation5 + $0x8e8] sm:$0xff] }
 0xb08   :  { %v3939_v40 = vpop.f32.mrf.mxu1 }
 0xb09   :  { %v3940_v51 = vadd.f32 %v3939_v40, %v3862_v26  ;;  %v4481_v26 = vld [vmem:[#allocation5 + $0x838] sm:$0xff]  ;;  %v4479_v40 = vld [vmem:[#allocation5 + $0x828] sm:$0xff] }
 0xb0a   :  { %v3941_v34 = vpop.f32.mrf.mxu1 }
 0xb0b   :  { %v3942_v14 = vadd.f32 %v3941_v34, %v3864_v4  ;;  %v4480_v4 = vld [vmem:[#allocation5 + $0x830] sm:$0xff]  ;;  %v4477_v34 = vld [vmem:[#allocation5 + $0x818] sm:$0xff] }
 0xb0c   :  { %v3945_v20 = vpop.f32.mrf.mxu1 }
 0xb0d   :  { %v3946_v29 = vadd.f32 %v3945_v20, %v3868_v50  ;;  %v4478_v50 = vld [vmem:[#allocation5 + $0x820] sm:$0xff]  ;;  %v4476_v20 = vld [vmem:[#allocation5 + $0x810] sm:$0xff] }
 0xb0e   :  { %v3947_v13 = vpop.f32.mrf.mxu1 }
 0xb0f   :  { %v3948_v21 = vadd.f32 %v3947_v13, %v3870_v62  ;;  %v4475_v62 = vld [vmem:[#allocation5 + $0x808] sm:$0xff]  ;;  %v4193_v13 = vpop.f32.mrf.mxu0 }
 0xb11   :  { %4349 = vmatprep.subr.mxu1 %v3948_v21  ;;  %v4195_v21 = vpop.f32.mrf.mxu0 }
 0xb12   :  { %4350 = vmatpush1.msra.mxu1 %v3946_v29  ;;  %v4474_v29 = vld [vmem:[#allocation5 + $0x800] sm:$0xff] }
 0xb13   :  { %4351 = vmatprep.subr.mxu1 %v3942_v14 }
 0xb14   :  { %4352 = vmatpush1.msra.mxu1 %v3940_v51 }
 0xb15   :  { %7356 = vmatmul.mubr.msk.f32.vlgmr.msra.gmra.mxu1 %vm600_vm0, %v3950_v49  ;;  %4583 = vmatprep.subr.mxu1 %v4505_v38  ;;  %v4199_v49 = vpop.f32.mrf.mxu0 }
 0xb16   :  { %4584 = vmatpush1.msra.mxu1 %v4504_v15  ;;  %4391 = vmatprep.mubr.f32.mxu1 %v7672_v0 }
 0xb17   :  { %4585 = vmatprep.subr.mxu1 %v4503_v59  ;;  %v4201_v15 = vpop.f32.mrf.mxu0 }
 0xb18   :  { %4586 = vmatpush1.msra.mxu1 %v4502_v55 }
 0xb19   :  { %4587 = vmatprep.subr.mxu1 %v4501_v5  ;;  %7357 = vmatmul.mubr.msk.f32.gmra.mxu1 %vm600_vm0, %v3951_v10 }
 0xb1a   :  { %4588 = vmatpush1.msra.mxu1 %v4500_v31  ;;  %4397 = vmatprep.mubr.f32.mxu1 %v7672_v0 }
 0xb1b   :  { %4589 = vmatprep.subr.mxu1 %v4499_v41  ;;  %v4440_v41 = vld [vmem:[#allocation5 + $0x6f0] sm:$0xff] }
 0xb1c   :  { %4590 = vmatpush1.msra.mxu1 %v4498_v28  ;;  %v4439_v28 = vld [vmem:[#allocation5 + $0x6e8] sm:$0xff] }
 0xb1d   :  { %4591 = vmatprep.subr.mxu1 %v4497_v3  ;;  %7358 = vmatmul.mubr.msk.f32.gmra.mxu1 %vm600_vm0, %v3952_v56  ;;  %v4438_v3 = vld [vmem:[#allocation5 + $0x6e0] sm:$0xff]  ;;  %v4437_v56 = vld [vmem:[#allocation5 + $0x6d8] sm:$0xff] }
 0xb1e   :  { %4592 = vmatpush1.msra.mxu1 %v4496_v57  ;;  %4403 = vmatprep.mubr.f32.mxu1 %v7672_v0  ;;  %v7349_v57 = vld [vmem:[%s8861_s1 + $0x28] sm:$0xff] }
 0xb1f   :  { %4593 = vmatprep.subr.mxu1 %v4495_v52  ;;  %v4436_v52 = vld [vmem:[#allocation5 + $0x6d0] sm:$0xff] }
 0xb20   :  { %4594 = vmatpush1.msra.mxu1 %v4494_v45  ;;  %v4435_v45 = vld [vmem:[#allocation5 + $0x6c8] sm:$0xff] }
 0xb21   :  { %4595 = vmatprep.subr.mxu1 %v4493_v18  ;;  %7359 = vmatmul.mubr.msk.f32.gmra.mxu1 %vm600_vm0, %v3953_v46  ;;  %v4434_v18 = vld [vmem:[#allocation5 + $0x6c0] sm:$0xff]  ;;  %v4433_v46 = vld [vmem:[#allocation5 + $0x6b8] sm:$0xff] }
 0xb22   :  { %4596 = vmatpush1.msra.mxu1 %v4492_v35  ;;  %4647 = vmatprep.mubr.f32.mxu1 %v7672_v0  ;;  %v7350_v35 = vld [vmem:[%s8861_s1 + $0x30] sm:$0xff] }
 0xb23   :  { %4597 = vmatprep.subr.mxu1 %v4491_v43  ;;  %v4432_v43 = vld [vmem:[#allocation5 + $0x6b0] sm:$0xff] }
 0xb24   :  { %4598 = vmatpush1.msra.mxu1 %v4490_v61  ;;  %v4431_v61 = vld [vmem:[#allocation5 + $0x6a8] sm:$0xff] }
 0xb25   :  { %4599 = vmatprep.subr.mxu1 %v4489_v63  ;;  %v4430_v63 = vld [vmem:[#allocation5 + $0x6a0] sm:$0xff] }
 0xb26   :  { %4600 = vmatpush1.msra.mxu1 %v4488_v1  ;;  %v4429_v1 = vld [vmem:[#allocation5 + $0x698] sm:$0xff] }
 0xb27   :  { %4601 = vmatprep.subr.mxu1 %v4487_v47  ;;  %v7351_v47 = vld [vmem:[%s8861_s1 + $0x38] sm:$0xff] }
 0xb28   :  { %4602 = vmatpush1.msra.mxu1 %v4486_v23  ;;  %v4428_v23 = vld [vmem:[#allocation5 + $0x690] sm:$0xff] }
 0xb29   :  { %4603 = vmatprep.subr.mxu1 %v4485_v27  ;;  %v4427_v27 = vld [vmem:[#allocation5 + $0x688] sm:$0xff] }
 0xb2a   :  { %4604 = vmatpush1.msra.mxu1 %v4484_v22  ;;  %v4426_v22 = vld [vmem:[#allocation5 + $0x680] sm:$0xff] }
 0xb2b   :  { %4605 = vmatprep.subr.mxu1 %v4483_v24  ;;  %v4425_v24 = vld [vmem:[#allocation5 + $0x678] sm:$0xff] }
 0xb2c   :  { %4606 = vmatpush1.msra.mxu1 %v4482_v36  ;;  %v4424_v36 = vld [vmem:[#allocation5 + $0x670] sm:$0xff] }
 0xb2d   :  { %4607 = vmatprep.subr.mxu1 %v4481_v26  ;;  %v4423_v26 = vld [vmem:[#allocation5 + $0x668] sm:$0xff] }
 0xb2e   :  { %4608 = vmatpush1.msra.mxu1 %v4480_v4  ;;  %v4422_v4 = vld [vmem:[#allocation5 + $0x660] sm:$0xff] }
 0xb2f   :  { %4609 = vmatprep.subr.mxu1 %v4479_v40  ;;  %v4421_v40 = vld [vmem:[#allocation5 + $0x658] sm:$0xff] }
 0xb30   :  { %4610 = vmatpush1.msra.mxu1 %v4478_v50  ;;  %v4420_v50 = vld [vmem:[#allocation5 + $0x650] sm:$0xff] }
 0xb31   :  { %4611 = vmatprep.subr.mxu1 %v4477_v34  ;;  %v4419_v34 = vld [vmem:[#allocation5 + $0x648] sm:$0xff] }
 0xb32   :  { %4612 = vmatpush1.msra.mxu1 %v4476_v20  ;;  %v4418_v20 = vld [vmem:[#allocation5 + $0x640] sm:$0xff] }
 0xb33   :  { %4613 = vmatprep.subr.mxu1 %v4475_v62  ;;  %v4417_v62 = vld [vmem:[#allocation5 + $0x638] sm:$0xff] }
 0xb34   :  { %4614 = vmatpush1.msra.mxu1 %v4474_v29  ;;  %v4416_v29 = vld [vmem:[#allocation5 + $0x630] sm:$0xff] }
 0xb35   :  { %4648 = vmatmul.mubr.f32.vlgmr.msra.gmra.mxu1 %v8274_v33  ;;  %v7348_v33 = vld [vmem:[%s8861_s1 + $0x20] sm:$0xff] }
 0xb36   :  { %4653 = vmatprep.mubr.f32.mxu1 %v7672_v0 }
 0xb39   :  { %4654 = vmatmul.mubr.f32.gmra.mxu1 %v8278_v6  ;;  %v4441_v6 = vld [vmem:[#allocation5 + $0x6f8] sm:$0xff] }
 0xb3a   :  { %4740 = vmatprep.mubr.f32.mxu1 %v7672_v0 }
 0xb48   :  { %v4116_v14 = vpop.f32.mrf.mxu1 }
 0xb49   :  { %v4194_v31 = vadd.f32 %v4193_v13, %v4116_v14  ;;  %v4414_v13 = vld [vmem:[#allocation5 + $0x620] sm:$0xff]  ;;  %v4412_v14 = vld [vmem:[#allocation5 + $0x610] sm:$0xff] }
 0xb4a   :  { %v4118_v51 = vpop.f32.mrf.mxu1 }
 0xb4b   :  { %v4196_v10 = vadd.f32 %v4195_v21, %v4118_v51  ;;  %v4413_v21 = vld [vmem:[#allocation5 + $0x618] sm:$0xff]  ;;  %v4411_v51 = vld [vmem:[#allocation5 + $0x608] sm:$0xff] }
 0xb4c   :  { %v4122_v38 = vpop.f32.mrf.mxu1 }
 0xb4d   :  { %v4200_v5 = vadd.f32 %v4199_v49, %v4122_v38  ;;  %v4410_v49 = vld [vmem:[#allocation5 + $0x600] sm:$0xff]  ;;  %v4473_v38 = vld [vmem:[#allocation5 + $0x7f8] sm:$0xff] }
 0xb4e   :  { %v4124_v59 = vpop.f32.mrf.mxu1 }
 0xb4f   :  { %v4202_v55 = vadd.f32 %v4201_v15, %v4124_v59  ;;  %v4472_v15 = vld [vmem:[#allocation5 + $0x7f0] sm:$0xff]  ;;  %v4471_v59 = vld [vmem:[#allocation5 + $0x7e8] sm:$0xff] }
 0xb51   :  { %4248 = vmatprep.subr.mxu0 %v4202_v55  ;;  %v4470_v55 = vld [vmem:[#allocation5 + $0x7e0] sm:$0xff] }
 0xb52   :  { %4249 = vmatpush1.msra.mxu0 %v4200_v5  ;;  %v4469_v5 = vld [vmem:[#allocation5 + $0x7d8] sm:$0xff] }
 0xb53   :  { %4250 = vmatprep.subr.mxu0 %v4196_v10  ;;  %v4468_v10 = vld [vmem:[#allocation5 + $0x7d0] sm:$0xff] }
 0xb54   :  { %4251 = vmatpush1.msra.mxu0 %v4194_v31  ;;  %v4467_v31 = vld [vmem:[#allocation5 + $0x7c8] sm:$0xff] }
 0xb55   :  { %7352 = vmatmul.mubr.msk.f32.vlgmr.msra.gmra.mxu0 %vm600_vm0, %v7348_v33  ;;  %4506 = vmatprep.subr.mxu0 %v4441_v6  ;;  %v4466_v33 = vld [vmem:[#allocation5 + $0x7c0] sm:$0xff]  ;;  %v4465_v6 = vld [vmem:[#allocation5 + $0x7b8] sm:$0xff] }
 0xb56   :  { %4507 = vmatpush1.msra.mxu0 %v4440_v41  ;;  %4290 = vmatprep.mubr.f32.mxu0 %v7672_v0  ;;  %v4464_v41 = vld [vmem:[#allocation5 + $0x7b0] sm:$0xff] }
 0xb57   :  { %4508 = vmatprep.subr.mxu0 %v4439_v28  ;;  %v4463_v28 = vld [vmem:[#allocation5 + $0x7a8] sm:$0xff] }
 0xb58   :  { %4509 = vmatpush1.msra.mxu0 %v4438_v3  ;;  %v4462_v3 = vld [vmem:[#allocation5 + $0x7a0] sm:$0xff] }
 0xb59   :  { %4510 = vmatprep.subr.mxu0 %v4437_v56  ;;  %7353 = vmatmul.mubr.msk.f32.gmra.mxu0 %vm600_vm0, %v7349_v57  ;;  %v4461_v56 = vld [vmem:[#allocation5 + $0x798] sm:$0xff]  ;;  %v4460_v57 = vld [vmem:[#allocation5 + $0x790] sm:$0xff] }
 0xb5a   :  { %4511 = vmatpush1.msra.mxu0 %v4436_v52  ;;  %4296 = vmatprep.mubr.f32.mxu0 %v7672_v0  ;;  %v4459_v52 = vld [vmem:[#allocation5 + $0x788] sm:$0xff] }
 0xb5b   :  { %4512 = vmatprep.subr.mxu0 %v4435_v45  ;;  %v4458_v45 = vld [vmem:[#allocation5 + $0x780] sm:$0xff] }
 0xb5c   :  { %4513 = vmatpush1.msra.mxu0 %v4434_v18  ;;  %v4457_v18 = vld [vmem:[#allocation5 + $0x778] sm:$0xff] }
 0xb5d   :  { %4514 = vmatprep.subr.mxu0 %v4433_v46  ;;  %7354 = vmatmul.mubr.msk.f32.gmra.mxu0 %vm600_vm0, %v7350_v35  ;;  %v4456_v46 = vld [vmem:[#allocation5 + $0x770] sm:$0xff]  ;;  %v4455_v35 = vld [vmem:[#allocation5 + $0x768] sm:$0xff] }
 0xb5e   :  { %4515 = vmatpush1.msra.mxu0 %v4432_v43  ;;  %4302 = vmatprep.mubr.f32.mxu0 %v7672_v0  ;;  %v4454_v43 = vld [vmem:[#allocation5 + $0x760] sm:$0xff] }
 0xb5f   :  { %4516 = vmatprep.subr.mxu0 %v4431_v61  ;;  %v4453_v61 = vld [vmem:[#allocation5 + $0x758] sm:$0xff] }
 0xb60   :  { %4517 = vmatpush1.msra.mxu0 %v4430_v63  ;;  %v4452_v63 = vld [vmem:[#allocation5 + $0x750] sm:$0xff] }
 0xb61   :  { %4518 = vmatprep.subr.mxu0 %v4429_v1  ;;  %7355 = vmatmul.mubr.msk.f32.gmra.mxu0 %vm600_vm0, %v7351_v47  ;;  %v4451_v1 = vld [vmem:[#allocation5 + $0x748] sm:$0xff]  ;;  %v4450_v47 = vld [vmem:[#allocation5 + $0x740] sm:$0xff] }
 0xb62   :  { %4519 = vmatpush1.msra.mxu0 %v4428_v23  ;;  %4570 = vmatprep.mubr.f32.mxu0 %v8261_v11  ;;  %v4415_v11 = vld [vmem:[#allocation5 + $0x628] sm:$0xff]  ;;  %v4449_v23 = vld [vmem:[#allocation5 + $0x738] sm:$0xff] }
 0xb63   :  { %4520 = vmatprep.subr.mxu0 %v4427_v27  ;;  %v4448_v27 = vld [vmem:[#allocation5 + $0x730] sm:$0xff] }
 0xb64   :  { %4521 = vmatpush1.msra.mxu0 %v4426_v22  ;;  %v4447_v22 = vld [vmem:[#allocation5 + $0x728] sm:$0xff] }
 0xb65   :  { %4522 = vmatprep.subr.mxu0 %v4425_v24  ;;  %v4446_v24 = vld [vmem:[#allocation5 + $0x720] sm:$0xff] }
 0xb66   :  { %4523 = vmatpush1.msra.mxu0 %v4424_v36  ;;  %v4445_v36 = vld [vmem:[#allocation5 + $0x718] sm:$0xff] }
 0xb67   :  { %4524 = vmatprep.subr.mxu0 %v4423_v26  ;;  %v4444_v26 = vld [vmem:[#allocation5 + $0x710] sm:$0xff] }
 0xb68   :  { %4525 = vmatpush1.msra.mxu0 %v4422_v4  ;;  %v4443_v4 = vld [vmem:[#allocation5 + $0x708] sm:$0xff] }
 0xb69   :  { %4526 = vmatprep.subr.mxu0 %v4421_v40  ;;  %v4442_v40 = vld [vmem:[#allocation5 + $0x700] sm:$0xff] }
 0xb6a   :  { %4527 = vmatpush1.msra.mxu0 %v4420_v50  ;;  %v8375_v50 = vld [vmem:[#allocation2 + $0x30] sm:$0xff] }
 0xb6b   :  { %4528 = vmatprep.subr.mxu0 %v4419_v34  ;;  %v8378_v34 = vld [vmem:[#allocation2 + $0x50] sm:$0xff] }
 0xb6c   :  { %4529 = vmatpush1.msra.mxu0 %v4418_v20  ;;  %v8381_v20 = vld [vmem:[#allocation2 + $0x48] sm:$0xff] }
 0xb6d   :  { %4530 = vmatprep.subr.mxu0 %v4417_v62  ;;  %v4868_v62 = vld [vmem:[#allocation5 + $0xbf8] sm:$0xff] }
 0xb6e   :  { %4531 = vmatpush1.msra.mxu0 %v4416_v29  ;;  %v4867_v29 = vld [vmem:[#allocation5 + $0xbf0] sm:$0xff] }
 0xb6f   :  { %4532 = vmatprep.subr.mxu0 %v4415_v11  ;;  %v4866_v11 = vld [vmem:[#allocation5 + $0xbe8] sm:$0xff] }
 0xb70   :  { %4533 = vmatpush1.msra.mxu0 %v4414_v13  ;;  %v4865_v13 = vld [vmem:[#allocation5 + $0xbe0] sm:$0xff] }
 0xb71   :  { %4534 = vmatprep.subr.mxu0 %v4413_v21  ;;  %v4864_v21 = vld [vmem:[#allocation5 + $0xbd8] sm:$0xff] }
 0xb72   :  { %4535 = vmatpush1.msra.mxu0 %v4412_v14  ;;  %v4863_v14 = vld [vmem:[#allocation5 + $0xbd0] sm:$0xff] }
 0xb73   :  { %4536 = vmatprep.subr.mxu0 %v4411_v51  ;;  %v4862_v51 = vld [vmem:[#allocation5 + $0xbc8] sm:$0xff] }
 0xb74   :  { %4537 = vmatpush1.msra.mxu0 %v4410_v49  ;;  %v4861_v49 = vld [vmem:[#allocation5 + $0xbc0] sm:$0xff] }
 0xb75   :  { %4538 = vmatprep.subr.mxu0 %v4473_v38 }
 0xb76   :  { %4539 = vmatpush2.msra.mxu0 %v4472_v15  ;;  %v4860_v15 = vld [vmem:[#allocation5 + $0xbb8] sm:$0xff] }
 0xb77   :  { %4540 = vmatprep.subr.mxu0 %v4471_v59  ;;  %v4859_v59 = vld [vmem:[#allocation5 + $0xbb0] sm:$0xff] }
 0xb78   :  { %4541 = vmatpush2.msra.mxu0 %v4470_v55  ;;  %v4858_v55 = vld [vmem:[#allocation5 + $0xba8] sm:$0xff] }
 0xb79   :  { %4542 = vmatprep.subr.mxu0 %v4469_v5  ;;  %v4857_v5 = vld [vmem:[#allocation5 + $0xba0] sm:$0xff] }
 0xb7a   :  { %4543 = vmatpush2.msra.mxu0 %v4468_v10 }
 0xb7b   :  { %4544 = vmatprep.subr.mxu0 %v4467_v31  ;;  %v4856_v31 = vld [vmem:[#allocation5 + $0xb98] sm:$0xff] }
 0xb7c   :  { %4545 = vmatpush2.msra.mxu0 %v4466_v33  ;;  %v4855_v33 = vld [vmem:[#allocation5 + $0xb90] sm:$0xff] }
 0xb7d   :  { %4546 = vmatprep.subr.mxu0 %v4465_v6 }
 0xb7e   :  { %4547 = vmatpush2.msra.mxu0 %v4464_v41  ;;  %v4854_v41 = vld [vmem:[#allocation5 + $0xb88] sm:$0xff] }
 0xb7f   :  { %4548 = vmatprep.subr.mxu0 %v4463_v28  ;;  %v4853_v28 = vld [vmem:[#allocation5 + $0xb80] sm:$0xff] }
 0xb80   :  { %4549 = vmatpush2.msra.mxu0 %v4462_v3  ;;  %v4852_v3 = vld [vmem:[#allocation5 + $0xb78] sm:$0xff] }
 0xb81   :  { %4550 = vmatprep.subr.mxu0 %v4461_v56  ;;  %v4851_v56 = vld [vmem:[#allocation5 + $0xb70] sm:$0xff] }
 0xb82   :  { %4551 = vmatpush2.msra.mxu0 %v4460_v57 }
 0xb83   :  { %4552 = vmatprep.subr.mxu0 %v4459_v52  ;;  %v4850_v52 = vld [vmem:[#allocation5 + $0xb68] sm:$0xff] }
 0xb84   :  { %4553 = vmatpush2.msra.mxu0 %v4458_v45  ;;  %v4849_v45 = vld [vmem:[#allocation5 + $0xb60] sm:$0xff] }
 0xb85   :  { %4554 = vmatprep.subr.mxu0 %v4457_v18  ;;  %v4848_v18 = vld [vmem:[#allocation5 + $0xb58] sm:$0xff] }
 0xb86   :  { %4555 = vmatpush2.msra.mxu0 %v4456_v46  ;;  %v4847_v46 = vld [vmem:[#allocation5 + $0xb50] sm:$0xff] }
 0xb87   :  { %4556 = vmatprep.subr.mxu0 %v4455_v35 }
 0xb88   :  { %4557 = vmatpush2.msra.mxu0 %v4454_v43 }
 0xb89   :  { %4558 = vmatprep.subr.mxu0 %v4453_v61  ;;  %v4846_v61 = vld [vmem:[#allocation5 + $0xb48] sm:$0xff] }
 0xb8a   :  { %4559 = vmatpush2.msra.mxu0 %v4452_v63 }
 0xb8b   :  { %4560 = vmatprep.subr.mxu0 %v4451_v1  ;;  %v4845_v1 = vld [vmem:[#allocation5 + $0xb40] sm:$0xff] }
 0xb8c   :  { %4561 = vmatpush2.msra.mxu0 %v4450_v47 }
 0xb8d   :  { %4562 = vmatprep.subr.mxu0 %v4449_v23  ;;  %v4844_v23 = vld [vmem:[#allocation5 + $0xb38] sm:$0xff] }
 0xb8e   :  { %4563 = vmatpush2.msra.mxu0 %v4448_v27 }
 0xb8f   :  { %4564 = vmatprep.subr.mxu0 %v4447_v22  ;;  %v4843_v22 = vld [vmem:[#allocation5 + $0xb30] sm:$0xff] }
 0xb90   :  { %4565 = vmatpush2.msra.mxu0 %v4446_v24 }
 0xb91   :  { %4566 = vmatprep.subr.mxu0 %v4445_v36 }
 0xb92   :  { %4567 = vmatpush2.msra.mxu0 %v4444_v26  ;;  %v4842_v26 = vld [vmem:[#allocation5 + $0xb28] sm:$0xff] }
 0xb93   :  { %4568 = vmatprep.subr.mxu0 %v4443_v4 }
 0xb94   :  { %4569 = vmatpush2.msra.mxu0 %v4442_v40  ;;  %v4841_v40 = vld [vmem:[#allocation5 + $0xb20] sm:$0xff] }
 0xb95   :  { %4571 = vmatmul.mubr.f32.vlgmr.msra.gmra.mxu0 %v8375_v50  ;;  %4946 = vmatprep.subr.mxu0 %v4868_v62 }
 0xb96   :  { %4576 = vmatprep.mubr.f32.mxu0 %v8378_v34  ;;  %4947 = vmatpush1.msra.mxu0 %v4867_v29  ;;  %v4840_v29 = vld [vmem:[#allocation5 + $0xb18] sm:$0xff] }
 0xb97   :  { %4948 = vmatprep.subr.mxu0 %v4866_v11 }
 0xb98   :  { %4949 = vmatpush1.msra.mxu0 %v4865_v13  ;;  %v4839_v13 = vld [vmem:[#allocation5 + $0xb10] sm:$0xff] }
 0xb99   :  { %4577 = vmatmul.mubr.f32.gmra.mxu0 %v8381_v20  ;;  %4950 = vmatprep.subr.mxu0 %v4864_v21 }
 0xb9a   :  { %5010 = vmatprep.mubr.f32.mxu0 %v7672_v0  ;;  %4951 = vmatpush1.msra.mxu0 %v4863_v14 }
 0xb9b   :  { %4952 = vmatprep.subr.mxu0 %v4862_v51  ;;  %v4838_v51 = vld [vmem:[#allocation5 + $0xb08] sm:$0xff] }
 0xb9c   :  { %4953 = vmatpush1.msra.mxu0 %v4861_v49 }
 0xb9d   :  { %4954 = vmatprep.subr.mxu0 %v4860_v15 }
 0xb9e   :  { %4955 = vmatpush1.msra.mxu0 %v4859_v59 }
 0xb9f   :  { %4956 = vmatprep.subr.mxu0 %v4858_v55  ;;  %v8397_v55 = vld [vmem:[#allocation2 + $0x40] sm:$0xff] }
 0xba0   :  { %4957 = vmatpush1.msra.mxu0 %v4857_v5 }
 0xba1   :  { %4958 = vmatprep.subr.mxu0 %v4856_v31 }
 0xba2   :  { %4959 = vmatpush1.msra.mxu0 %v4855_v33 }
 0xba3   :  { %4960 = vmatprep.subr.mxu0 %v4854_v41  ;;  %v8405_v41 = vld [vmem:[#allocation2 + $0x58] sm:$0xff] }
 0xba4   :  { %4961 = vmatpush1.msra.mxu0 %v4853_v28 }
 0xba5   :  { %4962 = vmatprep.subr.mxu0 %v4852_v3 }
 0xba6   :  { %4963 = vmatpush1.msra.mxu0 %v4851_v56 }
 0xba7   :  { %4964 = vmatprep.subr.mxu0 %v4850_v52 }
 0xba8   :  { %4965 = vmatpush1.msra.mxu0 %v4849_v45 }
 0xba9   :  { %4966 = vmatprep.subr.mxu0 %v4848_v18 }
 0xbaa   :  { %4967 = vmatpush1.msra.mxu0 %v4847_v46 }
 0xbab   :  { %4968 = vmatprep.subr.mxu0 %v4846_v61 }
 0xbac   :  { %4969 = vmatpush1.msra.mxu0 %v4845_v1 }
 0xbad   :  { %4970 = vmatprep.subr.mxu0 %v4844_v23  ;;  %v4804_v23 = vld [vmem:[#allocation5 + $0x9f8] sm:$0xff] }
 0xbae   :  { %4971 = vmatpush1.msra.mxu0 %v4843_v22  ;;  %v4803_v22 = vld [vmem:[#allocation5 + $0x9f0] sm:$0xff] }
 0xbaf   :  { %4972 = vmatprep.subr.mxu0 %v4842_v26  ;;  %v7361_v26 = vld [vmem:[%s8861_s1 + $0x48] sm:$0xff] }
 0xbb0   :  { %4973 = vmatpush1.msra.mxu0 %v4841_v40  ;;  %v4800_v40 = vld [vmem:[#allocation5 + $0x9d8] sm:$0xff] }
 0xbb1   :  { %4974 = vmatprep.subr.mxu0 %v4840_v29  ;;  %v4798_v29 = vld [vmem:[#allocation5 + $0x9c8] sm:$0xff] }
 0xbb2   :  { %4975 = vmatpush1.msra.mxu0 %v4839_v13  ;;  %v4797_v13 = vld [vmem:[#allocation5 + $0x9c0] sm:$0xff] }
 0xbb3   :  { %4976 = vmatprep.subr.mxu0 %v4838_v51  ;;  %v4795_v51 = vld [vmem:[#allocation5 + $0x9b0] sm:$0xff] }
 0xbd5   :  { %v4387_v38 = vpop.f32.mrf.mxu1 }
 0xbd7   :  { %v4389_v10 = vpop.f32.mrf.mxu1 }
 0xbd9   :  { %v4393_v6 = vpop.f32.mrf.mxu1 }
 0xbdb   :  { %v4395_v57 = vpop.f32.mrf.mxu1 }
 0xbdd   :  { %v4399_v43 = vpop.f32.mrf.mxu1 }
 0xbdf   :  { %v4401_v36 = vpop.f32.mrf.mxu1 }
 0xbe1   :  { %v4405_v14 = vpop.f32.mrf.mxu1 }
 0xc15   :  { %v4286_v35 = vpop.f32.mrf.mxu0 }
 0xc16   :  { %v8385_v63 = vadd.f32 %v4387_v38, %v4286_v35  ;;  %v4837_v38 = vld [vmem:[#allocation5 + $0xb00] sm:$0xff] }
 0xc17   :  { %v4288_v47 = vpop.f32.mrf.mxu0  ;;  %4977 = vmatpush1.msra.mxu0 %v4837_v38  ;;  %v4794_v38 = vld [vmem:[#allocation5 + $0x9a8] sm:$0xff] }
 0xc18   :  { %v8387_v27 = vadd.f32 %v4389_v10, %v4288_v47  ;;  %5011 = vmatmul.mubr.f32.vlgmr.msra.gmra.mxu0 %v8397_v55  ;;  %v4407_v10 = vpop.f32.mrf.mxu1  ;;  %v7360_v47 = vld [vmem:[%s8861_s1 + $0x40] sm:$0xff] }
 0xc19   :  { %v4292_v24 = vpop.f32.mrf.mxu0  ;;  %5016 = vmatprep.mubr.f32.mxu0 %v7672_v0 }
 0xc1a   :  { %v8389_v4 = vadd.f32 %v4393_v6, %v4292_v24  ;;  %v4649_v28 = vpop.f32.mrf.mxu1  ;;  %v4802_v24 = vld [vmem:[#allocation5 + $0x9e8] sm:$0xff] }
 0xc1b   :  { %v4294_v62 = vpop.f32.mrf.mxu0 }
 0xc1c   :  { %v8391_v11 = vadd.f32 %v4395_v57, %v4294_v62  ;;  %5017 = vmatmul.mubr.f32.gmra.mxu0 %v8405_v41  ;;  %v4651_v3 = vpop.f32.mrf.mxu1  ;;  %v4799_v62 = vld [vmem:[#allocation5 + $0x9d0] sm:$0xff] }
 0xc1d   :  { %v4298_v21 = vpop.f32.mrf.mxu0  ;;  %5103 = vmatprep.mubr.f32.mxu0 %v7672_v0 }
 0xc1e   :  { %v8393_v49 = vadd.f32 %v4399_v43, %v4298_v21  ;;  %v4655_v52 = vpop.f32.mrf.mxu1  ;;  %v7362_v21 = vld [vmem:[%s8861_s1 + $0x50] sm:$0xff] }
 0xc1f   :  { %v4300_v15 = vpop.f32.mrf.mxu0 }
 0xc20   :  { %v8395_v59 = vadd.f32 %v4401_v36, %v4300_v15  ;;  %v4657_v18 = vpop.f32.mrf.mxu1  ;;  %v4801_v36 = vld [vmem:[#allocation5 + $0x9e0] sm:$0xff] }
 0xc21   :  { %v4304_v5 = vpop.f32.mrf.mxu0  ;;  %v4793_v15 = vld [vmem:[#allocation5 + $0x9a0] sm:$0xff] }
 0xc22   :  { %v8401_v31 = vadd.f32 %v4405_v14, %v4304_v5  ;;  %v4796_v14 = vld [vmem:[#allocation5 + $0x9b8] sm:$0xff] }
 0xc23   :  { %v4306_v33 = vpop.f32.mrf.mxu0  ;;  %v7363_v5 = vld [vmem:[%s8861_s1 + $0x58] sm:$0xff] }
 0xc24   :  { %v8403_v6 = vadd.f32 %v4407_v10, %v4306_v33  ;;  %v4792_v10 = vld [vmem:[#allocation5 + $0x998] sm:$0xff]  ;;  %v4791_v33 = vld [vmem:[#allocation5 + $0x990] sm:$0xff] }
 0xc55   :  { %v4572_v56 = vpop.f32.mrf.mxu0 }
 0xc56   :  { %v4650_v1 = vadd.f32 %v4649_v28, %v4572_v56  ;;  %v4790_v28 = vld [vmem:[#allocation5 + $0x988] sm:$0xff]  ;;  %v4788_v56 = vld [vmem:[#allocation5 + $0x978] sm:$0xff] }
 0xc57   :  { %v4574_v57 = vpop.f32.mrf.mxu0 }
 0xc58   :  { %v4652_v61 = vadd.f32 %v4651_v3, %v4574_v57  ;;  %v4789_v3 = vld [vmem:[#allocation5 + $0x980] sm:$0xff]  ;;  %v8428_v57 = vld [vmem:[#allocation2 + $0x38] sm:$0xff] }
 0xc59   :  { %v4578_v45 = vpop.f32.mrf.mxu0 }
 0xc5a   :  { %v4656_v43 = vadd.f32 %v4655_v52, %v4578_v45  ;;  %v4787_v52 = vld [vmem:[#allocation5 + $0x970] sm:$0xff]  ;;  %v4786_v45 = vld [vmem:[#allocation5 + $0x968] sm:$0xff] }
 0xc5b   :  { %v4580_v46 = vpop.f32.mrf.mxu0 }
 0xc5c   :  { %v4658_v35 = vadd.f32 %v4657_v18, %v4580_v46  ;;  %v4785_v18 = vld [vmem:[#allocation5 + $0x960] sm:$0xff]  ;;  %v4784_v46 = vld [vmem:[#allocation5 + $0x958] sm:$0xff] }
 0xc5e   :  { %4704 = vmatprep.subr.mxu1 %v4658_v35  ;;  %v4783_v35 = vld [vmem:[#allocation5 + $0x950] sm:$0xff] }
 0xc5f   :  { %4705 = vmatpush1.msra.mxu1 %v4656_v43  ;;  %v4782_v43 = vld [vmem:[#allocation5 + $0x948] sm:$0xff] }
 0xc60   :  { %4706 = vmatprep.subr.mxu1 %v4652_v61  ;;  %v4781_v61 = vld [vmem:[#allocation5 + $0x940] sm:$0xff] }
 0xc61   :  { %4707 = vmatpush1.msra.mxu1 %v4650_v1  ;;  %v4780_v1 = vld [vmem:[#allocation5 + $0x938] sm:$0xff] }
 0xc62   :  { %7364 = vmatmul.mubr.msk.f32.vlgmr.msra.gmra.mxu1 %vm600_vm0, %v7360_v47  ;;  %4869 = vmatprep.subr.mxu1 %v4804_v23  ;;  %v4779_v47 = vld [vmem:[#allocation5 + $0x930] sm:$0xff]  ;;  %v4778_v23 = vld [vmem:[#allocation5 + $0x928] sm:$0xff] }
 0xc63   :  { %4870 = vmatpush1.msra.mxu1 %v4803_v22  ;;  %4746 = vmatprep.mubr.f32.mxu1 %v7672_v0  ;;  %v4777_v22 = vld [vmem:[#allocation5 + $0x920] sm:$0xff] }
 0xc64   :  { %4871 = vmatprep.subr.mxu1 %v4802_v24  ;;  %v4776_v24 = vld [vmem:[#allocation5 + $0x918] sm:$0xff] }
 0xc65   :  { %4872 = vmatpush1.msra.mxu1 %v4801_v36  ;;  %v4775_v36 = vld [vmem:[#allocation5 + $0x910] sm:$0xff] }
 0xc66   :  { %7365 = vmatmul.mubr.msk.f32.gmra.mxu1 %vm600_vm0, %v7361_v26  ;;  %4873 = vmatprep.subr.mxu1 %v4800_v40  ;;  %v4774_v26 = vld [vmem:[#allocation5 + $0x908] sm:$0xff]  ;;  %v4773_v40 = vld [vmem:[#allocation5 + $0x900] sm:$0xff] }
 0xc67   :  { %4874 = vmatpush1.msra.mxu1 %v4799_v62  ;;  %4752 = vmatprep.mubr.f32.mxu1 %v7672_v0  ;;  %v4836_v62 = vld [vmem:[#allocation5 + $0xaf8] sm:$0xff] }
 0xc68   :  { %4875 = vmatprep.subr.mxu1 %v4798_v29  ;;  %v4835_v29 = vld [vmem:[#allocation5 + $0xaf0] sm:$0xff] }
 0xc69   :  { %4876 = vmatpush1.msra.mxu1 %v4797_v13  ;;  %v4834_v13 = vld [vmem:[#allocation5 + $0xae8] sm:$0xff] }
 0xc6a   :  { %7366 = vmatmul.mubr.msk.f32.gmra.mxu1 %vm600_vm0, %v7362_v21  ;;  %4877 = vmatprep.subr.mxu1 %v4796_v14  ;;  %v4833_v21 = vld [vmem:[#allocation5 + $0xae0] sm:$0xff]  ;;  %v4832_v14 = vld [vmem:[#allocation5 + $0xad8] sm:$0xff] }
 0xc6b   :  { %4878 = vmatpush1.msra.mxu1 %v4795_v51  ;;  %4758 = vmatprep.mubr.f32.mxu1 %v7672_v0  ;;  %v4831_v51 = vld [vmem:[#allocation5 + $0xad0] sm:$0xff] }
 0xc6c   :  { %4879 = vmatprep.subr.mxu1 %v4794_v38  ;;  %v4830_v38 = vld [vmem:[#allocation5 + $0xac8] sm:$0xff] }
 0xc6d   :  { %4880 = vmatpush1.msra.mxu1 %v4793_v15  ;;  %v4829_v15 = vld [vmem:[#allocation5 + $0xac0] sm:$0xff] }
 0xc6e   :  { %7367 = vmatmul.mubr.msk.f32.gmra.mxu1 %vm600_vm0, %v7363_v5  ;;  %4881 = vmatprep.subr.mxu1 %v4792_v10  ;;  %v4828_v5 = vld [vmem:[#allocation5 + $0xab8] sm:$0xff]  ;;  %v4827_v10 = vld [vmem:[#allocation5 + $0xab0] sm:$0xff] }
 0xc6f   :  { %4882 = vmatpush1.msra.mxu1 %v4791_v33  ;;  %4933 = vmatprep.mubr.f32.mxu1 %v8428_v57  ;;  %v4826_v33 = vld [vmem:[#allocation5 + $0xaa8] sm:$0xff] }
 0xc70   :  { %4883 = vmatprep.subr.mxu1 %v4790_v28  ;;  %v4825_v28 = vld [vmem:[#allocation5 + $0xaa0] sm:$0xff] }
 0xc71   :  { %4884 = vmatpush1.msra.mxu1 %v4789_v3  ;;  %v4824_v3 = vld [vmem:[#allocation5 + $0xa98] sm:$0xff] }
 0xc72   :  { %4885 = vmatprep.subr.mxu1 %v4788_v56  ;;  %v4823_v56 = vld [vmem:[#allocation5 + $0xa90] sm:$0xff] }
 0xc73   :  { %4886 = vmatpush1.msra.mxu1 %v4787_v52  ;;  %v4822_v52 = vld [vmem:[#allocation5 + $0xa88] sm:$0xff] }
 0xc74   :  { %4887 = vmatprep.subr.mxu1 %v4786_v45  ;;  %v4821_v45 = vld [vmem:[#allocation5 + $0xa80] sm:$0xff] }
 0xc75   :  { %4888 = vmatpush1.msra.mxu1 %v4785_v18  ;;  %v4820_v18 = vld [vmem:[#allocation5 + $0xa78] sm:$0xff] }
 0xc76   :  { %4889 = vmatprep.subr.mxu1 %v4784_v46  ;;  %v4819_v46 = vld [vmem:[#allocation5 + $0xa70] sm:$0xff] }
 0xc77   :  { %4890 = vmatpush1.msra.mxu1 %v4783_v35  ;;  %v4818_v35 = vld [vmem:[#allocation5 + $0xa68] sm:$0xff] }
 0xc78   :  { %4891 = vmatprep.subr.mxu1 %v4782_v43  ;;  %v4817_v43 = vld [vmem:[#allocation5 + $0xa60] sm:$0xff] }
 0xc79   :  { %4892 = vmatpush1.msra.mxu1 %v4781_v61  ;;  %v4816_v61 = vld [vmem:[#allocation5 + $0xa58] sm:$0xff] }
 0xc7a   :  { %4893 = vmatprep.subr.mxu1 %v4780_v1  ;;  %v4815_v1 = vld [vmem:[#allocation5 + $0xa50] sm:$0xff] }
 0xc7b   :  { %4894 = vmatpush1.msra.mxu1 %v4779_v47  ;;  %v4814_v47 = vld [vmem:[#allocation5 + $0xa48] sm:$0xff] }
 0xc7c   :  { %4895 = vmatprep.subr.mxu1 %v4778_v23  ;;  %v4813_v23 = vld [vmem:[#allocation5 + $0xa40] sm:$0xff] }
 0xc7d   :  { %4896 = vmatpush1.msra.mxu1 %v4777_v22  ;;  %v4812_v22 = vld [vmem:[#allocation5 + $0xa38] sm:$0xff] }
 0xc7e   :  { %4897 = vmatprep.subr.mxu1 %v4776_v24  ;;  %v4811_v24 = vld [vmem:[#allocation5 + $0xa30] sm:$0xff] }
 0xc7f   :  { %4898 = vmatpush1.msra.mxu1 %v4775_v36  ;;  %v4810_v36 = vld [vmem:[#allocation5 + $0xa28] sm:$0xff] }
 0xc80   :  { %4899 = vmatprep.subr.mxu1 %v4774_v26  ;;  %v4809_v26 = vld [vmem:[#allocation5 + $0xa20] sm:$0xff] }
 0xc81   :  { %4900 = vmatpush1.msra.mxu1 %v4773_v40  ;;  %v4808_v40 = vld [vmem:[#allocation5 + $0xa18] sm:$0xff] }
 0xc82   :  { %4901 = vmatprep.subr.mxu1 %v4836_v62  ;;  %v4807_v62 = vld [vmem:[#allocation5 + $0xa10] sm:$0xff] }
 0xc83   :  { %4902 = vmatpush2.msra.mxu1 %v4835_v29  ;;  %v4806_v29 = vld [vmem:[#allocation5 + $0xa08] sm:$0xff] }
 0xc84   :  { %4903 = vmatprep.subr.mxu1 %v4834_v13  ;;  %v4805_v13 = vld [vmem:[#allocation5 + $0xa00] sm:$0xff] }
 0xc85   :  { %4904 = vmatpush2.msra.mxu1 %v4833_v21  ;;  %v5231_v21 = vld [vmem:[#allocation5 + $0xef8] sm:$0xff] }
 0xc86   :  { %4905 = vmatprep.subr.mxu1 %v4832_v14  ;;  %v5230_v14 = vld [vmem:[#allocation5 + $0xef0] sm:$0xff] }
 0xc87   :  { %4906 = vmatpush2.msra.mxu1 %v4831_v51  ;;  %v5229_v51 = vld [vmem:[#allocation5 + $0xee8] sm:$0xff] }
 0xc88   :  { %4907 = vmatprep.subr.mxu1 %v4830_v38  ;;  %v5228_v38 = vld [vmem:[#allocation5 + $0xee0] sm:$0xff] }
 0xc89   :  { %4908 = vmatpush2.msra.mxu1 %v4829_v15  ;;  %v5227_v15 = vld [vmem:[#allocation5 + $0xed8] sm:$0xff] }
 0xc8a   :  { %4909 = vmatprep.subr.mxu1 %v4828_v5  ;;  %v5226_v5 = vld [vmem:[#allocation5 + $0xed0] sm:$0xff] }
 0xc8b   :  { %4910 = vmatpush2.msra.mxu1 %v4827_v10  ;;  %v5225_v10 = vld [vmem:[#allocation5 + $0xec8] sm:$0xff] }
 0xc8c   :  { %4911 = vmatprep.subr.mxu1 %v4826_v33  ;;  %v5224_v33 = vld [vmem:[#allocation5 + $0xec0] sm:$0xff] }
 0xc8d   :  { %4912 = vmatpush2.msra.mxu1 %v4825_v28  ;;  %v5223_v28 = vld [vmem:[#allocation5 + $0xeb8] sm:$0xff] }
 0xc8e   :  { %4913 = vmatprep.subr.mxu1 %v4824_v3  ;;  %v5222_v3 = vld [vmem:[#allocation5 + $0xeb0] sm:$0xff] }
 0xc8f   :  { %4914 = vmatpush2.msra.mxu1 %v4823_v56  ;;  %v5221_v56 = vld [vmem:[#allocation5 + $0xea8] sm:$0xff] }
 0xc90   :  { %4915 = vmatprep.subr.mxu1 %v4822_v52  ;;  %v5220_v52 = vld [vmem:[#allocation5 + $0xea0] sm:$0xff] }
 0xc91   :  { %4916 = vmatpush2.msra.mxu1 %v4821_v45  ;;  %v5219_v45 = vld [vmem:[#allocation5 + $0xe98] sm:$0xff] }
 0xc92   :  { %4917 = vmatprep.subr.mxu1 %v4820_v18  ;;  %v5218_v18 = vld [vmem:[#allocation5 + $0xe90] sm:$0xff] }
 0xc93   :  { %4918 = vmatpush2.msra.mxu1 %v4819_v46  ;;  %v5217_v46 = vld [vmem:[#allocation5 + $0xe88] sm:$0xff] }
 0xc94   :  { %4919 = vmatprep.subr.mxu1 %v4818_v35  ;;  %v5216_v35 = vld [vmem:[#allocation5 + $0xe80] sm:$0xff] }
 0xc95   :  { %4920 = vmatpush2.msra.mxu1 %v4817_v43  ;;  %v5215_v43 = vld [vmem:[#allocation5 + $0xe78] sm:$0xff] }
 0xc96   :  { %4921 = vmatprep.subr.mxu1 %v4816_v61  ;;  %v5214_v61 = vld [vmem:[#allocation5 + $0xe70] sm:$0xff] }
 0xc97   :  { %4922 = vmatpush2.msra.mxu1 %v4815_v1  ;;  %v5213_v1 = vld [vmem:[#allocation5 + $0xe68] sm:$0xff] }
 0xc98   :  { %4923 = vmatprep.subr.mxu1 %v4814_v47  ;;  %v5212_v47 = vld [vmem:[#allocation5 + $0xe60] sm:$0xff] }
 0xc99   :  { %4924 = vmatpush2.msra.mxu1 %v4813_v23  ;;  %v5211_v23 = vld [vmem:[#allocation5 + $0xe58] sm:$0xff] }
 0xc9a   :  { %4925 = vmatprep.subr.mxu1 %v4812_v22  ;;  %v5210_v22 = vld [vmem:[#allocation5 + $0xe50] sm:$0xff] }
 0xc9b   :  { %4926 = vmatpush2.msra.mxu1 %v4811_v24 }
 0xc9c   :  { %4927 = vmatprep.subr.mxu1 %v4810_v36  ;;  %v5209_v36 = vld [vmem:[#allocation5 + $0xe48] sm:$0xff] }
 0xc9d   :  { %4928 = vmatpush2.msra.mxu1 %v4809_v26 }
 0xc9e   :  { %4929 = vmatprep.subr.mxu1 %v4808_v40  ;;  %v5208_v40 = vld [vmem:[#allocation5 + $0xe40] sm:$0xff] }
 0xc9f   :  { %4930 = vmatpush2.msra.mxu1 %v4807_v62 }
 0xca0   :  { %4931 = vmatprep.subr.mxu1 %v4806_v29  ;;  %v5207_v29 = vld [vmem:[#allocation5 + $0xe38] sm:$0xff] }
 0xca1   :  { %4932 = vmatpush2.msra.mxu1 %v4805_v13 }
 0xca2   :  { %4934 = vmatmul.mubr.f32.vlgmr.msra.gmra.mxu1 %v8375_v50  ;;  %5309 = vmatprep.subr.mxu1 %v5231_v21  ;;  %v5206_v21 = vld [vmem:[#allocation5 + $0xe30] sm:$0xff] }
 0xca3   :  { %4939 = vmatprep.mubr.f32.mxu1 %v8378_v34  ;;  %5310 = vmatpush1.msra.mxu1 %v5230_v14 }
 0xca4   :  { %5311 = vmatprep.subr.mxu1 %v5229_v51  ;;  %v5205_v51 = vld [vmem:[#allocation5 + $0xe28] sm:$0xff] }
 0xca5   :  { %5312 = vmatpush1.msra.mxu1 %v5228_v38 }
 0xca6   :  { %4940 = vmatmul.mubr.f32.gmra.mxu1 %v8381_v20  ;;  %5313 = vmatprep.subr.mxu1 %v5227_v15  ;;  %v5204_v15 = vld [vmem:[#allocation5 + $0xe20] sm:$0xff] }
 0xca7   :  { %5373 = vmatprep.mubr.f32.mxu1 %v7672_v0  ;;  %5314 = vmatpush1.msra.mxu1 %v5226_v5  ;;  %v5203_v5 = vld [vmem:[#allocation5 + $0xe18] sm:$0xff] }
 0xca8   :  { %5315 = vmatprep.subr.mxu1 %v5225_v10 }
 0xca9   :  { %5316 = vmatpush1.msra.mxu1 %v5224_v33  ;;  %v5202_v33 = vld [vmem:[#allocation5 + $0xe10] sm:$0xff] }
 0xcaa   :  { %5317 = vmatprep.subr.mxu1 %v5223_v28  ;;  %v5201_v28 = vld [vmem:[#allocation5 + $0xe08] sm:$0xff] }
 0xcab   :  { %5318 = vmatpush1.msra.mxu1 %v5222_v3 }
 0xcac   :  { %5319 = vmatprep.subr.mxu1 %v5221_v56  ;;  %v5200_v56 = vld [vmem:[#allocation5 + $0xe00] sm:$0xff] }
 0xcad   :  { %5320 = vmatpush1.msra.mxu1 %v5220_v52 }
 0xcae   :  { %5321 = vmatprep.subr.mxu1 %v5219_v45 }
 0xcaf   :  { %5322 = vmatpush1.msra.mxu1 %v5218_v18 }
 0xcb0   :  { %5323 = vmatprep.subr.mxu1 %v5217_v46 }
 0xcb1   :  { %5324 = vmatpush1.msra.mxu1 %v5216_v35 }
 0xcb2   :  { %5325 = vmatprep.subr.mxu1 %v5215_v43 }
 0xcb3   :  { %5326 = vmatpush1.msra.mxu1 %v5214_v61 }
 0xcb4   :  { %5327 = vmatprep.subr.mxu1 %v5213_v1 }
 0xcb5   :  { %5328 = vmatpush1.msra.mxu1 %v5212_v47 }
 0xcb6   :  { %5329 = vmatprep.subr.mxu1 %v5211_v23 }
 0xcb7   :  { %5330 = vmatpush1.msra.mxu1 %v5210_v22 }
 0xcb8   :  { %5331 = vmatprep.subr.mxu1 %v5209_v36 }
 0xcb9   :  { %5332 = vmatpush1.msra.mxu1 %v5208_v40  ;;  %v5167_v40 = vld [vmem:[#allocation5 + $0xcf8] sm:$0xff] }
 0xcba   :  { %5333 = vmatprep.subr.mxu1 %v5207_v29  ;;  %v5165_v29 = vld [vmem:[#allocation5 + $0xce8] sm:$0xff] }
 0xcbb   :  { %5334 = vmatpush1.msra.mxu1 %v5206_v21  ;;  %v5164_v21 = vld [vmem:[#allocation5 + $0xce0] sm:$0xff] }
 0xcbc   :  { %5335 = vmatprep.subr.mxu1 %v5205_v51  ;;  %v5163_v51 = vld [vmem:[#allocation5 + $0xcd8] sm:$0xff] }
 0xcbd   :  { %5336 = vmatpush1.msra.mxu1 %v5204_v15  ;;  %v5162_v15 = vld [vmem:[#allocation5 + $0xcd0] sm:$0xff] }
 0xcbe   :  { %5337 = vmatprep.subr.mxu1 %v5203_v5  ;;  %v5160_v5 = vld [vmem:[#allocation5 + $0xcc0] sm:$0xff] }
 0xcbf   :  { %5338 = vmatpush1.msra.mxu1 %v5202_v33  ;;  %v7370_v33 = vld [vmem:[%s8861_s1 + $0x70] sm:$0xff] }
 0xcc0   :  { %5339 = vmatprep.subr.mxu1 %v5201_v28  ;;  %v5158_v28 = vld [vmem:[#allocation5 + $0xcb0] sm:$0xff] }
 0xcc1   :  { %5340 = vmatpush1.msra.mxu1 %v5200_v56  ;;  %v5157_v56 = vld [vmem:[#allocation5 + $0xca8] sm:$0xff] }
 0xcc2   :  { %5374 = vmatmul.mubr.f32.vlgmr.msra.gmra.mxu1 %v8397_v55 }
 0xcc3   :  { %5379 = vmatprep.mubr.f32.mxu1 %v7672_v0 }
 0xcc6   :  { %5380 = vmatmul.mubr.f32.gmra.mxu1 %v8405_v41 }
 0xcc7   :  { %5466 = vmatprep.mubr.f32.mxu1 %v7672_v0 }
 0xd22   :  { %v4742_v24 = vpop.f32.mrf.mxu1 }
 0xd23   :  { %v8436_v26 = vadd.f32 %v4742_v24, %v8385_v63 }
 0xd24   :  { %v4744_v62 = vpop.f32.mrf.mxu1 }
 0xd25   :  { %v8439_v13 = vadd.f32 %v4744_v62, %v8387_v27  ;;  %v5166_v62 = vld [vmem:[#allocation5 + $0xcf0] sm:$0xff] }
 0xd26   :  { %v4748_v14 = vpop.f32.mrf.mxu1 }
 0xd27   :  { %v8442_v38 = vadd.f32 %v4748_v14, %v8389_v4  ;;  %v7369_v14 = vld [vmem:[%s8861_s1 + $0x68] sm:$0xff] }
 0xd28   :  { %v4750_v63 = vpop.f32.mrf.mxu1 }
 0xd29   :  { %v8445_v10 = vadd.f32 %v4750_v63, %v8391_v11  ;;  %v5161_v63 = vld [vmem:[#allocation5 + $0xcc8] sm:$0xff] }
 0xd2a   :  { %v4754_v27 = vpop.f32.mrf.mxu1 }
 0xd2b   :  { %v8448_v3 = vadd.f32 %v4754_v27, %v8393_v49  ;;  %v5012_v49 = vpop.f32.mrf.mxu0  ;;  %v5159_v27 = vld [vmem:[#allocation5 + $0xcb8] sm:$0xff] }
 0xd2c   :  { %v4756_v4 = vpop.f32.mrf.mxu1 }
 0xd2d   :  { %v8451_v52 = vadd.f32 %v4756_v4, %v8395_v59  ;;  %v5014_v35 = vpop.f32.mrf.mxu0  ;;  %v5156_v4 = vld [vmem:[#allocation5 + $0xca0] sm:$0xff] }
 0xd2e   :  { %v4760_v45 = vpop.f32.mrf.mxu1 }
 0xd2f   :  { %v8456_v11 = vadd.f32 %v4760_v45, %v8401_v31  ;;  %v5018_v61 = vpop.f32.mrf.mxu0  ;;  %v7371_v45 = vld [vmem:[%s8861_s1 + $0x78] sm:$0xff] }
 0xd30   :  { %v4762_v18 = vpop.f32.mrf.mxu1 }
 0xd31   :  { %v8459_v46 = vadd.f32 %v4762_v18, %v8403_v6  ;;  %v5020_v47 = vpop.f32.mrf.mxu0  ;;  %v7368_v6 = vld [vmem:[%s8861_s1 + $0x60] sm:$0xff]  ;;  %v5155_v18 = vld [vmem:[#allocation5 + $0xc98] sm:$0xff] }
 0xd62   :  { %v4935_v59 = vpop.f32.mrf.mxu1 }
 0xd63   :  { %v5013_v36 = vadd.f32 %v5012_v49, %v4935_v59  ;;  %v5154_v49 = vld [vmem:[#allocation5 + $0xc90] sm:$0xff]  ;;  %v5152_v59 = vld [vmem:[#allocation5 + $0xc80] sm:$0xff] }
 0xd64   :  { %v4937_v43 = vpop.f32.mrf.mxu1 }
 0xd65   :  { %v5015_v31 = vadd.f32 %v5014_v35, %v4937_v43  ;;  %v5153_v35 = vld [vmem:[#allocation5 + $0xc88] sm:$0xff]  ;;  %v5151_v43 = vld [vmem:[#allocation5 + $0xc78] sm:$0xff] }
 0xd66   :  { %v4941_v1 = vpop.f32.mrf.mxu1 }
 0xd67   :  { %v5019_v24 = vadd.f32 %v5018_v61, %v4941_v1  ;;  %v5150_v61 = vld [vmem:[#allocation5 + $0xc70] sm:$0xff]  ;;  %v5149_v1 = vld [vmem:[#allocation5 + $0xc68] sm:$0xff] }
 0xd68   :  { %v4943_v23 = vpop.f32.mrf.mxu1 }
 0xd69   :  { %v5021_v22 = vadd.f32 %v5020_v47, %v4943_v23  ;;  %v5148_v47 = vld [vmem:[#allocation5 + $0xc60] sm:$0xff]  ;;  %v5147_v23 = vld [vmem:[#allocation5 + $0xc58] sm:$0xff] }
 0xd6b   :  { %5067 = vmatprep.subr.mxu0 %v5021_v22  ;;  %v5146_v22 = vld [vmem:[#allocation5 + $0xc50] sm:$0xff] }
 0xd6c   :  { %5068 = vmatpush1.msra.mxu0 %v5019_v24  ;;  %v5145_v24 = vld [vmem:[#allocation5 + $0xc48] sm:$0xff] }
 0xd6d   :  { %5069 = vmatprep.subr.mxu0 %v5015_v31  ;;  %v5144_v31 = vld [vmem:[#allocation5 + $0xc40] sm:$0xff] }
 0xd6e   :  { %5070 = vmatpush1.msra.mxu0 %v5013_v36  ;;  %v5143_v36 = vld [vmem:[#allocation5 + $0xc38] sm:$0xff] }
 0xd6f   :  { %7372 = vmatmul.mubr.msk.f32.vlgmr.msra.gmra.mxu0 %vm600_vm0, %v7368_v6  ;;  %5232 = vmatprep.subr.mxu0 %v5167_v40  ;;  %v5142_v6 = vld [vmem:[#allocation5 + $0xc30] sm:$0xff]  ;;  %v5141_v40 = vld [vmem:[#allocation5 + $0xc28] sm:$0xff] }
 0xd70   :  { %5233 = vmatpush1.msra.mxu0 %v5166_v62  ;;  %5109 = vmatprep.mubr.f32.mxu0 %v7672_v0  ;;  %v5140_v62 = vld [vmem:[#allocation5 + $0xc20] sm:$0xff] }
 0xd71   :  { %5234 = vmatprep.subr.mxu0 %v5165_v29  ;;  %v5139_v29 = vld [vmem:[#allocation5 + $0xc18] sm:$0xff] }
 0xd72   :  { %5235 = vmatpush1.msra.mxu0 %v5164_v21  ;;  %v5138_v21 = vld [vmem:[#allocation5 + $0xc10] sm:$0xff] }
 0xd73   :  { %7373 = vmatmul.mubr.msk.f32.gmra.mxu0 %vm600_vm0, %v7369_v14  ;;  %5236 = vmatprep.subr.mxu0 %v5163_v51  ;;  %v5137_v14 = vld [vmem:[#allocation5 + $0xc08] sm:$0xff]  ;;  %v5136_v51 = vld [vmem:[#allocation5 + $0xc00] sm:$0xff] }
 0xd74   :  { %5237 = vmatpush1.msra.mxu0 %v5162_v15  ;;  %5115 = vmatprep.mubr.f32.mxu0 %v7672_v0  ;;  %v5199_v15 = vld [vmem:[#allocation5 + $0xdf8] sm:$0xff] }
 0xd75   :  { %5238 = vmatprep.subr.mxu0 %v5161_v63  ;;  %v5198_v63 = vld [vmem:[#allocation5 + $0xdf0] sm:$0xff] }
 0xd76   :  { %5239 = vmatpush1.msra.mxu0 %v5160_v5  ;;  %v5197_v5 = vld [vmem:[#allocation5 + $0xde8] sm:$0xff] }
 0xd77   :  { %7374 = vmatmul.mubr.msk.f32.gmra.mxu0 %vm600_vm0, %v7370_v33  ;;  %5240 = vmatprep.subr.mxu0 %v5159_v27  ;;  %v5196_v33 = vld [vmem:[#allocation5 + $0xde0] sm:$0xff]  ;;  %v5195_v27 = vld [vmem:[#allocation5 + $0xdd8] sm:$0xff] }
 0xd78   :  { %5241 = vmatpush1.msra.mxu0 %v5158_v28  ;;  %5121 = vmatprep.mubr.f32.mxu0 %v7672_v0  ;;  %v5194_v28 = vld [vmem:[#allocation5 + $0xdd0] sm:$0xff] }
 0xd79   :  { %5242 = vmatprep.subr.mxu0 %v5157_v56  ;;  %v5193_v56 = vld [vmem:[#allocation5 + $0xdc8] sm:$0xff] }
 0xd7a   :  { %5243 = vmatpush1.msra.mxu0 %v5156_v4  ;;  %v5192_v4 = vld [vmem:[#allocation5 + $0xdc0] sm:$0xff] }
 0xd7b   :  { %7375 = vmatmul.mubr.msk.f32.gmra.mxu0 %vm600_vm0, %v7371_v45  ;;  %5244 = vmatprep.subr.mxu0 %v5155_v18  ;;  %v5191_v45 = vld [vmem:[#allocation5 + $0xdb8] sm:$0xff]  ;;  %v5190_v18 = vld [vmem:[#allocation5 + $0xdb0] sm:$0xff] }
 0xd7c   :  { %5245 = vmatpush1.msra.mxu0 %v5154_v49  ;;  %5296 = vmatprep.mubr.f32.mxu0 %v8428_v57  ;;  %v5189_v49 = vld [vmem:[#allocation5 + $0xda8] sm:$0xff] }
 0xd7d   :  { %5246 = vmatprep.subr.mxu0 %v5153_v35  ;;  %v5188_v35 = vld [vmem:[#allocation5 + $0xda0] sm:$0xff] }
 0xd7e   :  { %5247 = vmatpush1.msra.mxu0 %v5152_v59  ;;  %v5187_v59 = vld [vmem:[#allocation5 + $0xd98] sm:$0xff] }
 0xd7f   :  { %5248 = vmatprep.subr.mxu0 %v5151_v43  ;;  %v5186_v43 = vld [vmem:[#allocation5 + $0xd90] sm:$0xff] }
 0xd80   :  { %5249 = vmatpush1.msra.mxu0 %v5150_v61  ;;  %v5185_v61 = vld [vmem:[#allocation5 + $0xd88] sm:$0xff] }
 0xd81   :  { %5250 = vmatprep.subr.mxu0 %v5149_v1  ;;  %v5184_v1 = vld [vmem:[#allocation5 + $0xd80] sm:$0xff] }
 0xd82   :  { %5251 = vmatpush1.msra.mxu0 %v5148_v47  ;;  %v5183_v47 = vld [vmem:[#allocation5 + $0xd78] sm:$0xff] }
 0xd83   :  { %5252 = vmatprep.subr.mxu0 %v5147_v23  ;;  %v5182_v23 = vld [vmem:[#allocation5 + $0xd70] sm:$0xff] }
 0xd84   :  { %5253 = vmatpush1.msra.mxu0 %v5146_v22  ;;  %v5181_v22 = vld [vmem:[#allocation5 + $0xd68] sm:$0xff] }
 0xd85   :  { %5254 = vmatprep.subr.mxu0 %v5145_v24  ;;  %v5180_v24 = vld [vmem:[#allocation5 + $0xd60] sm:$0xff] }
 0xd86   :  { %5255 = vmatpush1.msra.mxu0 %v5144_v31  ;;  %v5179_v31 = vld [vmem:[#allocation5 + $0xd58] sm:$0xff] }
 0xd87   :  { %5256 = vmatprep.subr.mxu0 %v5143_v36  ;;  %v5178_v36 = vld [vmem:[#allocation5 + $0xd50] sm:$0xff] }
 0xd88   :  { %5257 = vmatpush1.msra.mxu0 %v5142_v6  ;;  %v5177_v6 = vld [vmem:[#allocation5 + $0xd48] sm:$0xff] }
 0xd89   :  { %5258 = vmatprep.subr.mxu0 %v5141_v40  ;;  %v5176_v40 = vld [vmem:[#allocation5 + $0xd40] sm:$0xff] }
 0xd8a   :  { %5259 = vmatpush1.msra.mxu0 %v5140_v62  ;;  %v5175_v62 = vld [vmem:[#allocation5 + $0xd38] sm:$0xff] }
 0xd8b   :  { %5260 = vmatprep.subr.mxu0 %v5139_v29  ;;  %v5174_v29 = vld [vmem:[#allocation5 + $0xd30] sm:$0xff] }
 0xd8c   :  { %5261 = vmatpush1.msra.mxu0 %v5138_v21  ;;  %v5173_v21 = vld [vmem:[#allocation5 + $0xd28] sm:$0xff] }
 0xd8d   :  { %5262 = vmatprep.subr.mxu0 %v5137_v14  ;;  %v5172_v14 = vld [vmem:[#allocation5 + $0xd20] sm:$0xff] }
 0xd8e   :  { %5263 = vmatpush1.msra.mxu0 %v5136_v51  ;;  %v5171_v51 = vld [vmem:[#allocation5 + $0xd18] sm:$0xff] }
 0xd8f   :  { %5264 = vmatprep.subr.mxu0 %v5199_v15  ;;  %v5170_v15 = vld [vmem:[#allocation5 + $0xd10] sm:$0xff] }
 0xd90   :  { %5265 = vmatpush2.msra.mxu0 %v5198_v63  ;;  %v5169_v63 = vld [vmem:[#allocation5 + $0xd08] sm:$0xff] }
 0xd91   :  { %5266 = vmatprep.subr.mxu0 %v5197_v5  ;;  %v5168_v5 = vld [vmem:[#allocation5 + $0xd00] sm:$0xff] }
 0xd92   :  { %5267 = vmatpush2.msra.mxu0 %v5196_v33  ;;  %v5594_v33 = vld [vmem:[#allocation5 + $0x11f8] sm:$0xff] }
 0xd93   :  { %5268 = vmatprep.subr.mxu0 %v5195_v27  ;;  %v5593_v27 = vld [vmem:[#allocation5 + $0x11f0] sm:$0xff] }
 0xd94   :  { %5269 = vmatpush2.msra.mxu0 %v5194_v28  ;;  %v5592_v28 = vld [vmem:[#allocation5 + $0x11e8] sm:$0xff] }
 0xd95   :  { %5270 = vmatprep.subr.mxu0 %v5193_v56  ;;  %v5591_v56 = vld [vmem:[#allocation5 + $0x11e0] sm:$0xff] }
 0xd96   :  { %5271 = vmatpush2.msra.mxu0 %v5192_v4  ;;  %v5590_v4 = vld [vmem:[#allocation5 + $0x11d8] sm:$0xff] }
 0xd97   :  { %5272 = vmatprep.subr.mxu0 %v5191_v45  ;;  %v5589_v45 = vld [vmem:[#allocation5 + $0x11d0] sm:$0xff] }
 0xd98   :  { %5273 = vmatpush2.msra.mxu0 %v5190_v18  ;;  %v5588_v18 = vld [vmem:[#allocation5 + $0x11c8] sm:$0xff] }
 0xd99   :  { %5274 = vmatprep.subr.mxu0 %v5189_v49  ;;  %v5584_v49 = vld [vmem:[#allocation5 + $0x11a8] sm:$0xff] }
 0xd9a   :  { %5275 = vmatpush2.msra.mxu0 %v5188_v35  ;;  %v5583_v35 = vld [vmem:[#allocation5 + $0x11a0] sm:$0xff] }
 0xd9b   :  { %5276 = vmatprep.subr.mxu0 %v5187_v59  ;;  %v5582_v59 = vld [vmem:[#allocation5 + $0x1198] sm:$0xff] }
 0xd9c   :  { %5277 = vmatpush2.msra.mxu0 %v5186_v43  ;;  %v5581_v43 = vld [vmem:[#allocation5 + $0x1190] sm:$0xff] }
 0xd9d   :  { %5278 = vmatprep.subr.mxu0 %v5185_v61  ;;  %v5580_v61 = vld [vmem:[#allocation5 + $0x1188] sm:$0xff] }
 0xd9e   :  { %5279 = vmatpush2.msra.mxu0 %v5184_v1  ;;  %v5579_v1 = vld [vmem:[#allocation5 + $0x1180] sm:$0xff] }
 0xd9f   :  { %5280 = vmatprep.subr.mxu0 %v5183_v47  ;;  %v5578_v47 = vld [vmem:[#allocation5 + $0x1178] sm:$0xff] }
 0xda0   :  { %5281 = vmatpush2.msra.mxu0 %v5182_v23  ;;  %v5577_v23 = vld [vmem:[#allocation5 + $0x1170] sm:$0xff] }
 0xda1   :  { %5282 = vmatprep.subr.mxu0 %v5181_v22  ;;  %v5576_v22 = vld [vmem:[#allocation5 + $0x1168] sm:$0xff] }
 0xda2   :  { %5283 = vmatpush2.msra.mxu0 %v5180_v24  ;;  %v5575_v24 = vld [vmem:[#allocation5 + $0x1160] sm:$0xff] }
 0xda3   :  { %5284 = vmatprep.subr.mxu0 %v5179_v31  ;;  %v5574_v31 = vld [vmem:[#allocation5 + $0x1158] sm:$0xff] }
 0xda4   :  { %5285 = vmatpush2.msra.mxu0 %v5178_v36  ;;  %v5573_v36 = vld [vmem:[#allocation5 + $0x1150] sm:$0xff] }
 0xda5   :  { %5286 = vmatprep.subr.mxu0 %v5177_v6 }
 0xda6   :  { %5287 = vmatpush2.msra.mxu0 %v5176_v40  ;;  %v5572_v40 = vld [vmem:[#allocation5 + $0x1148] sm:$0xff] }
 0xda7   :  { %5288 = vmatprep.subr.mxu0 %v5175_v62 }
 0xda8   :  { %5289 = vmatpush2.msra.mxu0 %v5174_v29  ;;  %v5571_v29 = vld [vmem:[#allocation5 + $0x1140] sm:$0xff] }
 0xda9   :  { %5290 = vmatprep.subr.mxu0 %v5173_v21 }
 0xdaa   :  { %5291 = vmatpush2.msra.mxu0 %v5172_v14  ;;  %v5570_v14 = vld [vmem:[#allocation5 + $0x1138] sm:$0xff] }
 0xdab   :  { %5292 = vmatprep.subr.mxu0 %v5171_v51 }
 0xdac   :  { %5293 = vmatpush2.msra.mxu0 %v5170_v15  ;;  %v5569_v15 = vld [vmem:[#allocation5 + $0x1130] sm:$0xff] }
 0xdad   :  { %5294 = vmatprep.subr.mxu0 %v5169_v63 }
 0xdae   :  { %5295 = vmatpush2.msra.mxu0 %v5168_v5  ;;  %v5568_v5 = vld [vmem:[#allocation5 + $0x1128] sm:$0xff] }
 0xdaf   :  { %5297 = vmatmul.mubr.f32.vlgmr.msra.gmra.mxu0 %v8375_v50  ;;  %5672 = vmatprep.subr.mxu0 %v5594_v33  ;;  %v5587_v50 = vld [vmem:[#allocation5 + $0x11c0] sm:$0xff] }
 0xdb0   :  { %5302 = vmatprep.mubr.f32.mxu0 %v8378_v34  ;;  %5673 = vmatpush1.msra.mxu0 %v5593_v27  ;;  %v5586_v34 = vld [vmem:[#allocation5 + $0x11b8] sm:$0xff]  ;;  %v5567_v27 = vld [vmem:[#allocation5 + $0x1120] sm:$0xff] }
 0xdb1   :  { %5674 = vmatprep.subr.mxu0 %v5592_v28  ;;  %v5566_v28 = vld [vmem:[#allocation5 + $0x1118] sm:$0xff] }
 0xdb2   :  { %5675 = vmatpush1.msra.mxu0 %v5591_v56 }
 0xdb3   :  { %5303 = vmatmul.mubr.f32.gmra.mxu0 %v8381_v20  ;;  %5676 = vmatprep.subr.mxu0 %v5590_v4  ;;  %v5585_v20 = vld [vmem:[#allocation5 + $0x11b0] sm:$0xff] }
 0xdb4   :  { %5736 = vmatprep.mubr.f32.mxu0 %v7672_v0  ;;  %5677 = vmatpush1.msra.mxu0 %v5589_v45  ;;  %v5565_v4 = vld [vmem:[#allocation5 + $0x1110] sm:$0xff]  ;;  %v5564_v45 = vld [vmem:[#allocation5 + $0x1108] sm:$0xff] }
 0xdb5   :  { %5678 = vmatprep.subr.mxu0 %v5588_v18 }
 0xdb6   :  { %5679 = vmatpush1.msra.mxu0 %v5587_v50  ;;  %v5563_v50 = vld [vmem:[#allocation5 + $0x1100] sm:$0xff] }
 0xdb7   :  { %5680 = vmatprep.subr.mxu0 %v5586_v34 }
 0xdb8   :  { %5681 = vmatpush1.msra.mxu0 %v5585_v20 }
 0xdb9   :  { %5682 = vmatprep.subr.mxu0 %v5584_v49 }
 0xdba   :  { %5683 = vmatpush1.msra.mxu0 %v5583_v35 }
 0xdbb   :  { %5684 = vmatprep.subr.mxu0 %v5582_v59 }
 0xdbc   :  { %5685 = vmatpush1.msra.mxu0 %v5581_v43 }
 0xdbd   :  { %5686 = vmatprep.subr.mxu0 %v5580_v61 }
 0xdbe   :  { %5687 = vmatpush1.msra.mxu0 %v5579_v1 }
 0xdbf   :  { %5688 = vmatprep.subr.mxu0 %v5578_v47 }
 0xdc0   :  { %5689 = vmatpush1.msra.mxu0 %v5577_v23 }
 0xdc1   :  { %5690 = vmatprep.subr.mxu0 %v5576_v22 }
 0xdc2   :  { %5691 = vmatpush1.msra.mxu0 %v5575_v24 }
 0xdc3   :  { %5692 = vmatprep.subr.mxu0 %v5574_v31  ;;  %v5529_v31 = vld [vmem:[#allocation5 + $0xff0] sm:$0xff] }
 0xdc4   :  { %5693 = vmatpush1.msra.mxu0 %v5573_v36  ;;  %v5528_v36 = vld [vmem:[#allocation5 + $0xfe8] sm:$0xff] }
 0xdc5   :  { %5694 = vmatprep.subr.mxu0 %v5572_v40  ;;  %v7377_v40 = vld [vmem:[%s8861_s1 + $0x88] sm:$0xff] }
 0xdc6   :  { %5695 = vmatpush1.msra.mxu0 %v5571_v29  ;;  %v5526_v29 = vld [vmem:[#allocation5 + $0xfd8] sm:$0xff] }
 0xdc7   :  { %5696 = vmatprep.subr.mxu0 %v5570_v14  ;;  %v5524_v14 = vld [vmem:[#allocation5 + $0xfc8] sm:$0xff] }
 0xdc8   :  { %5697 = vmatpush1.msra.mxu0 %v5569_v15  ;;  %v5523_v15 = vld [vmem:[#allocation5 + $0xfc0] sm:$0xff] }
 0xdc9   :  { %5698 = vmatprep.subr.mxu0 %v5568_v5  ;;  %v5522_v5 = vld [vmem:[#allocation5 + $0xfb8] sm:$0xff] }
 0xdca   :  { %5699 = vmatpush1.msra.mxu0 %v5567_v27  ;;  %v5521_v27 = vld [vmem:[#allocation5 + $0xfb0] sm:$0xff] }
 0xdcb   :  { %5700 = vmatprep.subr.mxu0 %v5566_v28  ;;  %v5519_v28 = vld [vmem:[#allocation5 + $0xfa0] sm:$0xff] }
 0xdcc   :  { %5701 = vmatpush1.msra.mxu0 %v5565_v4  ;;  %v7379_v4 = vld [vmem:[%s8861_s1 + $0x98] sm:$0xff] }
 0xdcd   :  { %5702 = vmatprep.subr.mxu0 %v5564_v45  ;;  %v5517_v45 = vld [vmem:[#allocation5 + $0xf90] sm:$0xff] }
 0xdce   :  { %5703 = vmatpush1.msra.mxu0 %v5563_v50  ;;  %v5516_v50 = vld [vmem:[#allocation5 + $0xf88] sm:$0xff] }
 0xdcf   :  { %5737 = vmatmul.mubr.f32.vlgmr.msra.gmra.mxu0 %v8397_v55 }
 0xdd0   :  { %5742 = vmatprep.mubr.f32.mxu0 %v7672_v0 }
 0xdd3   :  { %5743 = vmatmul.mubr.f32.gmra.mxu0 %v8405_v41  ;;  %v7376_v41 = vld [vmem:[%s8861_s1 + $0x80] sm:$0xff] }
 0xdd4   :  { %5829 = vmatprep.mubr.f32.mxu0 %v7672_v0 }
 0xe2f   :  { %v5105_v6 = vpop.f32.mrf.mxu0 }
 0xe30   :  { %v8488_v62 = vadd.f32 %v5105_v6, %v8436_v26  ;;  %v5527_v6 = vld [vmem:[#allocation5 + $0xfe0] sm:$0xff] }
 0xe31   :  { %v5107_v21 = vpop.f32.mrf.mxu0 }
 0xe32   :  { %v8491_v51 = vadd.f32 %v5107_v21, %v8439_v13  ;;  %v5525_v21 = vld [vmem:[#allocation5 + $0xfd0] sm:$0xff] }
 0xe33   :  { %v5111_v63 = vpop.f32.mrf.mxu0 }
 0xe34   :  { %v8494_v33 = vadd.f32 %v5111_v63, %v8442_v38  ;;  %v7378_v63 = vld [vmem:[%s8861_s1 + $0x90] sm:$0xff] }
 0xe35   :  { %v5113_v26 = vpop.f32.mrf.mxu0 }
 0xe36   :  { %v8497_v56 = vadd.f32 %v5113_v26, %v8445_v10  ;;  %v5520_v26 = vld [vmem:[#allocation5 + $0xfa8] sm:$0xff] }
 0xe37   :  { %v5117_v13 = vpop.f32.mrf.mxu0 }
 0xe38   :  { %v8500_v18 = vadd.f32 %v5117_v13, %v8448_v3  ;;  %v5375_v3 = vpop.f32.mrf.mxu1  ;;  %v5518_v13 = vld [vmem:[#allocation5 + $0xf98] sm:$0xff] }
 0xe39   :  { %v5119_v38 = vpop.f32.mrf.mxu0 }
 0xe3a   :  { %v8503_v34 = vadd.f32 %v5119_v38, %v8451_v52  ;;  %v5377_v59 = vpop.f32.mrf.mxu1  ;;  %v5515_v38 = vld [vmem:[#allocation5 + $0xf80] sm:$0xff] }
 0xe3b   :  { %v5123_v20 = vpop.f32.mrf.mxu0 }
 0xe3c   :  { %v8508_v10 = vadd.f32 %v5123_v20, %v8456_v11  ;;  %v5381_v61 = vpop.f32.mrf.mxu1  ;;  %v5514_v20 = vld [vmem:[#allocation5 + $0xf78] sm:$0xff] }
 0xe3d   :  { %v5125_v49 = vpop.f32.mrf.mxu0 }
 0xe3e   :  { %v8511_v35 = vadd.f32 %v5125_v49, %v8459_v46  ;;  %v5383_v1 = vpop.f32.mrf.mxu1  ;;  %v5530_v46 = vld [vmem:[#allocation5 + $0xff8] sm:$0xff]  ;;  %v5513_v49 = vld [vmem:[#allocation5 + $0xf70] sm:$0xff] }
 0xe6f   :  { %v5298_v52 = vpop.f32.mrf.mxu0 }
 0xe70   :  { %v5376_v24 = vadd.f32 %v5375_v3, %v5298_v52  ;;  %v5512_v3 = vld [vmem:[#allocation5 + $0xf68] sm:$0xff]  ;;  %v5510_v52 = vld [vmem:[#allocation5 + $0xf58] sm:$0xff] }
 0xe71   :  { %v5300_v43 = vpop.f32.mrf.mxu0 }
 0xe72   :  { %v5378_v11 = vadd.f32 %v5377_v59, %v5300_v43  ;;  %v5511_v59 = vld [vmem:[#allocation5 + $0xf60] sm:$0xff]  ;;  %v5509_v43 = vld [vmem:[#allocation5 + $0xf50] sm:$0xff] }
 0xe73   :  { %v5304_v55 = vpop.f32.mrf.mxu0 }
 0xe74   :  { %v5382_v22 = vadd.f32 %v5381_v61, %v5304_v55  ;;  %v5508_v61 = vld [vmem:[#allocation5 + $0xf48] sm:$0xff]  ;;  %v5507_v55 = vld [vmem:[#allocation5 + $0xf40] sm:$0xff] }
 0xe75   :  { %v5306_v47 = vpop.f32.mrf.mxu0 }
 0xe76   :  { %v5384_v23 = vadd.f32 %v5383_v1, %v5306_v47  ;;  %v5506_v1 = vld [vmem:[#allocation5 + $0xf38] sm:$0xff]  ;;  %v5505_v47 = vld [vmem:[#allocation5 + $0xf30] sm:$0xff] }
 0xe78   :  { %5430 = vmatprep.subr.mxu1 %v5384_v23  ;;  %v5503_v23 = vld [vmem:[#allocation5 + $0xf20] sm:$0xff] }
 0xe79   :  { %5431 = vmatpush1.msra.mxu1 %v5382_v22  ;;  %v5502_v22 = vld [vmem:[#allocation5 + $0xf18] sm:$0xff] }
 0xe7a   :  { %5432 = vmatprep.subr.mxu1 %v5378_v11  ;;  %v5501_v11 = vld [vmem:[#allocation5 + $0xf10] sm:$0xff] }
 0xe7b   :  { %5433 = vmatpush1.msra.mxu1 %v5376_v24  ;;  %v5500_v24 = vld [vmem:[#allocation5 + $0xf08] sm:$0xff] }
 0xe7c   :  { %7380 = vmatmul.mubr.msk.f32.vlgmr.msra.gmra.mxu1 %vm600_vm0, %v7376_v41  ;;  %5595 = vmatprep.subr.mxu1 %v5530_v46  ;;  %v5499_v41 = vld [vmem:[#allocation5 + $0xf00] sm:$0xff]  ;;  %v5562_v46 = vld [vmem:[#allocation5 + $0x10f8] sm:$0xff] }
 0xe7d   :  { %5596 = vmatpush1.msra.mxu1 %v5529_v31  ;;  %5472 = vmatprep.mubr.f32.mxu1 %v7672_v0  ;;  %v5561_v31 = vld [vmem:[#allocation5 + $0x10f0] sm:$0xff] }
 0xe7e   :  { %5597 = vmatprep.subr.mxu1 %v5528_v36  ;;  %v5560_v36 = vld [vmem:[#allocation5 + $0x10e8] sm:$0xff] }
 0xe7f   :  { %5598 = vmatpush1.msra.mxu1 %v5527_v6  ;;  %v5559_v6 = vld [vmem:[#allocation5 + $0x10e0] sm:$0xff] }
 0xe80   :  { %7381 = vmatmul.mubr.msk.f32.gmra.mxu1 %vm600_vm0, %v7377_v40  ;;  %5599 = vmatprep.subr.mxu1 %v5526_v29  ;;  %v5558_v40 = vld [vmem:[#allocation5 + $0x10d8] sm:$0xff]  ;;  %v5557_v29 = vld [vmem:[#allocation5 + $0x10d0] sm:$0xff] }
 0xe81   :  { %5600 = vmatpush1.msra.mxu1 %v5525_v21  ;;  %5478 = vmatprep.mubr.f32.mxu1 %v7672_v0  ;;  %v5556_v21 = vld [vmem:[#allocation5 + $0x10c8] sm:$0xff] }
 0xe82   :  { %5601 = vmatprep.subr.mxu1 %v5524_v14  ;;  %v5555_v14 = vld [vmem:[#allocation5 + $0x10c0] sm:$0xff] }
 0xe83   :  { %5602 = vmatpush1.msra.mxu1 %v5523_v15  ;;  %v5554_v15 = vld [vmem:[#allocation5 + $0x10b8] sm:$0xff] }
 0xe84   :  { %7382 = vmatmul.mubr.msk.f32.gmra.mxu1 %vm600_vm0, %v7378_v63  ;;  %5603 = vmatprep.subr.mxu1 %v5522_v5  ;;  %v5553_v63 = vld [vmem:[#allocation5 + $0x10b0] sm:$0xff]  ;;  %v5552_v5 = vld [vmem:[#allocation5 + $0x10a8] sm:$0xff] }
 0xe85   :  { %5604 = vmatpush1.msra.mxu1 %v5521_v27  ;;  %5484 = vmatprep.mubr.f32.mxu1 %v7672_v0  ;;  %v5551_v27 = vld [vmem:[#allocation5 + $0x10a0] sm:$0xff] }
 0xe86   :  { %5605 = vmatprep.subr.mxu1 %v5520_v26  ;;  %v5550_v26 = vld [vmem:[#allocation5 + $0x1098] sm:$0xff] }
 0xe87   :  { %5606 = vmatpush1.msra.mxu1 %v5519_v28  ;;  %v5549_v28 = vld [vmem:[#allocation5 + $0x1090] sm:$0xff] }
 0xe88   :  { %7383 = vmatmul.mubr.msk.f32.gmra.mxu1 %vm600_vm0, %v7379_v4  ;;  %5607 = vmatprep.subr.mxu1 %v5518_v13  ;;  %v5548_v4 = vld [vmem:[#allocation5 + $0x1088] sm:$0xff]  ;;  %v5547_v13 = vld [vmem:[#allocation5 + $0x1080] sm:$0xff] }
 0xe89   :  { %5608 = vmatpush1.msra.mxu1 %v5517_v45  ;;  %5659 = vmatprep.mubr.f32.mxu1 %v8428_v57  ;;  %v5504_v57 = vld [vmem:[#allocation5 + $0xf28] sm:$0xff]  ;;  %v5546_v45 = vld [vmem:[#allocation5 + $0x1078] sm:$0xff] }
 0xe8a   :  { %5609 = vmatprep.subr.mxu1 %v5516_v50  ;;  %v5545_v50 = vld [vmem:[#allocation5 + $0x1070] sm:$0xff] }
 0xe8b   :  { %5610 = vmatpush1.msra.mxu1 %v5515_v38  ;;  %v5544_v38 = vld [vmem:[#allocation5 + $0x1068] sm:$0xff] }
 0xe8c   :  { %5611 = vmatprep.subr.mxu1 %v5514_v20  ;;  %v5543_v20 = vld [vmem:[#allocation5 + $0x1060] sm:$0xff] }
 0xe8d   :  { %5612 = vmatpush1.msra.mxu1 %v5513_v49  ;;  %v5542_v49 = vld [vmem:[#allocation5 + $0x1058] sm:$0xff] }
 0xe8e   :  { %5613 = vmatprep.subr.mxu1 %v5512_v3  ;;  %v5541_v3 = vld [vmem:[#allocation5 + $0x1050] sm:$0xff] }
 0xe8f   :  { %5614 = vmatpush1.msra.mxu1 %v5511_v59  ;;  %v5540_v59 = vld [vmem:[#allocation5 + $0x1048] sm:$0xff] }
 0xe90   :  { %5615 = vmatprep.subr.mxu1 %v5510_v52  ;;  %v5539_v52 = vld [vmem:[#allocation5 + $0x1040] sm:$0xff] }
 0xe91   :  { %5616 = vmatpush1.msra.mxu1 %v5509_v43  ;;  %v5538_v43 = vld [vmem:[#allocation5 + $0x1038] sm:$0xff] }
 0xe92   :  { %5617 = vmatprep.subr.mxu1 %v5508_v61  ;;  %v5537_v61 = vld [vmem:[#allocation5 + $0x1030] sm:$0xff] }
 0xe93   :  { %5618 = vmatpush1.msra.mxu1 %v5507_v55  ;;  %v5536_v55 = vld [vmem:[#allocation5 + $0x1028] sm:$0xff] }
 0xe94   :  { %5619 = vmatprep.subr.mxu1 %v5506_v1  ;;  %v5535_v1 = vld [vmem:[#allocation5 + $0x1020] sm:$0xff] }
 0xe95   :  { %5620 = vmatpush1.msra.mxu1 %v5505_v47  ;;  %v5534_v47 = vld [vmem:[#allocation5 + $0x1018] sm:$0xff] }
 0xe96   :  { %5621 = vmatprep.subr.mxu1 %v5504_v57  ;;  %v5533_v57 = vld [vmem:[#allocation5 + $0x1010] sm:$0xff] }
 0xe97   :  { %5622 = vmatpush1.msra.mxu1 %v5503_v23  ;;  %v5532_v23 = vld [vmem:[#allocation5 + $0x1008] sm:$0xff] }
 0xe98   :  { %5623 = vmatprep.subr.mxu1 %v5502_v22  ;;  %v5531_v22 = vld [vmem:[#allocation5 + $0x1000] sm:$0xff] }
 0xe99   :  { %5624 = vmatpush1.msra.mxu1 %v5501_v11  ;;  %v8535_v11 = vld [vmem:[#allocation2 + $0x30] sm:$0xff] }
 0xe9a   :  { %5625 = vmatprep.subr.mxu1 %v5500_v24  ;;  %v8538_v24 = vld [vmem:[#allocation2 + $0x50] sm:$0xff] }
 0xe9b   :  { %5626 = vmatpush1.msra.mxu1 %v5499_v41  ;;  %v8541_v41 = vld [vmem:[#allocation2 + $0x48] sm:$0xff] }
 0xe9c   :  { %5627 = vmatprep.subr.mxu1 %v5562_v46  ;;  %v5957_v46 = vld [vmem:[#allocation5 + $0x14f8] sm:$0xff] }
 0xe9d   :  { %5628 = vmatpush2.msra.mxu1 %v5561_v31  ;;  %v5956_v31 = vld [vmem:[#allocation5 + $0x14f0] sm:$0xff] }
 0xe9e   :  { %5629 = vmatprep.subr.mxu1 %v5560_v36  ;;  %v5955_v36 = vld [vmem:[#allocation5 + $0x14e8] sm:$0xff] }
 0xe9f   :  { %5630 = vmatpush2.msra.mxu1 %v5559_v6  ;;  %v5954_v6 = vld [vmem:[#allocation5 + $0x14e0] sm:$0xff] }
 0xea0   :  { %5631 = vmatprep.subr.mxu1 %v5558_v40  ;;  %v5953_v40 = vld [vmem:[#allocation5 + $0x14d8] sm:$0xff] }
 0xea1   :  { %5632 = vmatpush2.msra.mxu1 %v5557_v29  ;;  %v5952_v29 = vld [vmem:[#allocation5 + $0x14d0] sm:$0xff] }
 0xea2   :  { %5633 = vmatprep.subr.mxu1 %v5556_v21  ;;  %v5951_v21 = vld [vmem:[#allocation5 + $0x14c8] sm:$0xff] }
 0xea3   :  { %5634 = vmatpush2.msra.mxu1 %v5555_v14  ;;  %v5950_v14 = vld [vmem:[#allocation5 + $0x14c0] sm:$0xff] }
 0xea4   :  { %5635 = vmatprep.subr.mxu1 %v5554_v15  ;;  %v5949_v15 = vld [vmem:[#allocation5 + $0x14b8] sm:$0xff] }
 0xea5   :  { %5636 = vmatpush2.msra.mxu1 %v5553_v63  ;;  %v5948_v63 = vld [vmem:[#allocation5 + $0x14b0] sm:$0xff] }
 0xea6   :  { %5637 = vmatprep.subr.mxu1 %v5552_v5  ;;  %v5947_v5 = vld [vmem:[#allocation5 + $0x14a8] sm:$0xff] }
 0xea7   :  { %5638 = vmatpush2.msra.mxu1 %v5551_v27  ;;  %v5946_v27 = vld [vmem:[#allocation5 + $0x14a0] sm:$0xff] }
 0xea8   :  { %5639 = vmatprep.subr.mxu1 %v5550_v26  ;;  %v5945_v26 = vld [vmem:[#allocation5 + $0x1498] sm:$0xff] }
 0xea9   :  { %5640 = vmatpush2.msra.mxu1 %v5549_v28  ;;  %v5944_v28 = vld [vmem:[#allocation5 + $0x1490] sm:$0xff] }
 0xeaa   :  { %5641 = vmatprep.subr.mxu1 %v5548_v4  ;;  %v5943_v4 = vld [vmem:[#allocation5 + $0x1488] sm:$0xff] }
 0xeab   :  { %5642 = vmatpush2.msra.mxu1 %v5547_v13  ;;  %v5942_v13 = vld [vmem:[#allocation5 + $0x1480] sm:$0xff] }
 0xeac   :  { %5643 = vmatprep.subr.mxu1 %v5546_v45  ;;  %v5941_v45 = vld [vmem:[#allocation5 + $0x1478] sm:$0xff] }
 0xead   :  { %5644 = vmatpush2.msra.mxu1 %v5545_v50  ;;  %v5940_v50 = vld [vmem:[#allocation5 + $0x1470] sm:$0xff] }
 0xeae   :  { %5645 = vmatprep.subr.mxu1 %v5544_v38  ;;  %v5939_v38 = vld [vmem:[#allocation5 + $0x1468] sm:$0xff] }
 0xeaf   :  { %5646 = vmatpush2.msra.mxu1 %v5543_v20  ;;  %v5938_v20 = vld [vmem:[#allocation5 + $0x1460] sm:$0xff] }
 0xeb0   :  { %5647 = vmatprep.subr.mxu1 %v5542_v49  ;;  %v5937_v49 = vld [vmem:[#allocation5 + $0x1458] sm:$0xff] }
 0xeb1   :  { %5648 = vmatpush2.msra.mxu1 %v5541_v3  ;;  %v5936_v3 = vld [vmem:[#allocation5 + $0x1450] sm:$0xff] }
 0xeb2   :  { %5649 = vmatprep.subr.mxu1 %v5540_v59 }
 0xeb3   :  { %5650 = vmatpush2.msra.mxu1 %v5539_v52  ;;  %v5935_v52 = vld [vmem:[#allocation5 + $0x1448] sm:$0xff] }
 0xeb4   :  { %5651 = vmatprep.subr.mxu1 %v5538_v43 }
 0xeb5   :  { %5652 = vmatpush2.msra.mxu1 %v5537_v61  ;;  %v5934_v61 = vld [vmem:[#allocation5 + $0x1440] sm:$0xff] }
 0xeb6   :  { %5653 = vmatprep.subr.mxu1 %v5536_v55 }
 0xeb7   :  { %5654 = vmatpush2.msra.mxu1 %v5535_v1  ;;  %v5933_v1 = vld [vmem:[#allocation5 + $0x1438] sm:$0xff] }
 0xeb8   :  { %5655 = vmatprep.subr.mxu1 %v5534_v47 }
 0xeb9   :  { %5656 = vmatpush2.msra.mxu1 %v5533_v57  ;;  %v5932_v57 = vld [vmem:[#allocation5 + $0x1430] sm:$0xff] }
 0xeba   :  { %5657 = vmatprep.subr.mxu1 %v5532_v23 }
 0xebb   :  { %5658 = vmatpush2.msra.mxu1 %v5531_v22  ;;  %v5931_v22 = vld [vmem:[#allocation5 + $0x1428] sm:$0xff] }
 0xebc   :  { %5660 = vmatmul.mubr.f32.vlgmr.msra.gmra.mxu1 %v8535_v11  ;;  %6035 = vmatprep.subr.mxu1 %v5957_v46 }
 0xebd   :  { %5665 = vmatprep.mubr.f32.mxu1 %v8538_v24  ;;  %6036 = vmatpush1.msra.mxu1 %v5956_v31  ;;  %v5930_v31 = vld [vmem:[#allocation5 + $0x1420] sm:$0xff] }
 0xebe   :  { %6037 = vmatprep.subr.mxu1 %v5955_v36  ;;  %v5929_v36 = vld [vmem:[#allocation5 + $0x1418] sm:$0xff] }
 0xebf   :  { %6038 = vmatpush1.msra.mxu1 %v5954_v6 }
 0xec0   :  { %5666 = vmatmul.mubr.f32.gmra.mxu1 %v8541_v41  ;;  %6039 = vmatprep.subr.mxu1 %v5953_v40  ;;  %v5928_v40 = vld [vmem:[#allocation5 + $0x1410] sm:$0xff] }
 0xec1   :  { %6099 = vmatprep.mubr.f32.mxu1 %v7672_v0  ;;  %6040 = vmatpush1.msra.mxu1 %v5952_v29  ;;  %v5927_v29 = vld [vmem:[#allocation5 + $0x1408] sm:$0xff] }
 0xec2   :  { %6041 = vmatprep.subr.mxu1 %v5951_v21 }
 0xec3   :  { %6042 = vmatpush1.msra.mxu1 %v5950_v14  ;;  %v5926_v14 = vld [vmem:[#allocation5 + $0x1400] sm:$0xff] }
 0xec4   :  { %6043 = vmatprep.subr.mxu1 %v5949_v15 }
 0xec5   :  { %6044 = vmatpush1.msra.mxu1 %v5948_v63  ;;  %v8563_v63 = vld [vmem:[#allocation2 + $0x40] sm:$0xff] }
 0xec6   :  { %6045 = vmatprep.subr.mxu1 %v5947_v5 }
 0xec7   :  { %6046 = vmatpush1.msra.mxu1 %v5946_v27 }
 0xec8   :  { %6047 = vmatprep.subr.mxu1 %v5945_v26  ;;  %v8573_v26 = vld [vmem:[#allocation2 + $0x58] sm:$0xff] }
 0xec9   :  { %6048 = vmatpush1.msra.mxu1 %v5944_v28 }
 0xeca   :  { %6049 = vmatprep.subr.mxu1 %v5943_v4 }
 0xecb   :  { %6050 = vmatpush1.msra.mxu1 %v5942_v13 }
 0xecc   :  { %6051 = vmatprep.subr.mxu1 %v5941_v45 }
 0xecd   :  { %6052 = vmatpush1.msra.mxu1 %v5940_v50 }
 0xece   :  { %6053 = vmatprep.subr.mxu1 %v5939_v38 }
 0xecf   :  { %6054 = vmatpush1.msra.mxu1 %v5938_v20 }
 0xed0   :  { %6055 = vmatprep.subr.mxu1 %v5937_v49 }
 0xed1   :  { %6056 = vmatpush1.msra.mxu1 %v5936_v3 }
 0xed2   :  { %6057 = vmatprep.subr.mxu1 %v5935_v52  ;;  %v5893_v52 = vld [vmem:[#allocation5 + $0x12f8] sm:$0xff] }
 0xed3   :  { %6058 = vmatpush1.msra.mxu1 %v5934_v61  ;;  %v5892_v61 = vld [vmem:[#allocation5 + $0x12f0] sm:$0xff] }
 0xed4   :  { %6059 = vmatprep.subr.mxu1 %v5933_v1  ;;  %v5890_v1 = vld [vmem:[#allocation5 + $0x12e0] sm:$0xff] }
 0xed5   :  { %6060 = vmatpush1.msra.mxu1 %v5932_v57  ;;  %v7385_v57 = vld [vmem:[%s8861_s1 + $0xa8] sm:$0xff] }
 0xed6   :  { %6061 = vmatprep.subr.mxu1 %v5931_v22  ;;  %v5888_v22 = vld [vmem:[#allocation5 + $0x12d0] sm:$0xff] }
 0xed7   :  { %6062 = vmatpush1.msra.mxu1 %v5930_v31  ;;  %v5887_v31 = vld [vmem:[#allocation5 + $0x12c8] sm:$0xff] }
 0xed8   :  { %6063 = vmatprep.subr.mxu1 %v5929_v36  ;;  %v7386_v36 = vld [vmem:[%s8861_s1 + $0xb0] sm:$0xff] }
 0xed9   :  { %6064 = vmatpush1.msra.mxu1 %v5928_v40  ;;  %v5885_v40 = vld [vmem:[#allocation5 + $0x12b8] sm:$0xff] }
 0xeda   :  { %6065 = vmatprep.subr.mxu1 %v5927_v29  ;;  %v5883_v29 = vld [vmem:[#allocation5 + $0x12a8] sm:$0xff] }
 0xedb   :  { %6066 = vmatpush1.msra.mxu1 %v5926_v14  ;;  %v5882_v14 = vld [vmem:[#allocation5 + $0x12a0] sm:$0xff] }
 0xedc   :  { %6100 = vmatmul.mubr.f32.vlgmr.msra.gmra.mxu1 %v8563_v63 }
 0xedd   :  { %6105 = vmatprep.mubr.f32.mxu1 %v7672_v0 }
 0xee0   :  { %6106 = vmatmul.mubr.f32.gmra.mxu1 %v8573_v26 }
 0xee1   :  { %6192 = vmatprep.mubr.f32.mxu1 %v7672_v0 }
 0xf3c   :  { %v5468_v59 = vpop.f32.mrf.mxu1 }
 0xf3d   :  { %v8546_v43 = vadd.f32 %v5468_v59, %v8488_v62  ;;  %v7384_v59 = vld [vmem:[%s8861_s1 + $0xa0] sm:$0xff] }
 0xf3e   :  { %v5470_v55 = vpop.f32.mrf.mxu1 }
 0xf3f   :  { %v8549_v47 = vadd.f32 %v5470_v55, %v8491_v51  ;;  %v5891_v55 = vld [vmem:[#allocation5 + $0x12e8] sm:$0xff] }
 0xf40   :  { %v5474_v23 = vpop.f32.mrf.mxu1 }
 0xf41   :  { %v8552_v46 = vadd.f32 %v5474_v23, %v8494_v33  ;;  %v5889_v23 = vld [vmem:[#allocation5 + $0x12d8] sm:$0xff] }
 0xf42   :  { %v5476_v62 = vpop.f32.mrf.mxu1 }
 0xf43   :  { %v8555_v6 = vadd.f32 %v5476_v62, %v8497_v56  ;;  %v5886_v62 = vld [vmem:[#allocation5 + $0x12c0] sm:$0xff] }
 0xf44   :  { %v5480_v51 = vpop.f32.mrf.mxu1 }
 0xf45   :  { %v8558_v21 = vadd.f32 %v5480_v51, %v8500_v18  ;;  %v5884_v51 = vld [vmem:[#allocation5 + $0x12b0] sm:$0xff] }
 0xf46   :  { %v5482_v33 = vpop.f32.mrf.mxu1 }
 0xf47   :  { %v8561_v15 = vadd.f32 %v5482_v33, %v8503_v34  ;;  %v5738_v34 = vpop.f32.mrf.mxu0  ;;  %v7387_v33 = vld [vmem:[%s8861_s1 + $0xb8] sm:$0xff] }
 0xf48   :  { %v5486_v56 = vpop.f32.mrf.mxu1 }
 0xf49   :  { %v8568_v5 = vadd.f32 %v5486_v56, %v8508_v10  ;;  %v5740_v28 = vpop.f32.mrf.mxu0  ;;  %v5881_v56 = vld [vmem:[#allocation5 + $0x1298] sm:$0xff] }
 0xf4a   :  { %v5488_v27 = vpop.f32.mrf.mxu1 }
 0xf4b   :  { %v8571_v18 = vadd.f32 %v5488_v27, %v8511_v35  ;;  %v5744_v45 = vpop.f32.mrf.mxu0  ;;  %v5880_v27 = vld [vmem:[#allocation5 + $0x1290] sm:$0xff] }
 0xf4d   :  { %v5746_v38 = vpop.f32.mrf.mxu0 }
 0xf7c   :  { %v5661_v4 = vpop.f32.mrf.mxu1 }
 0xf7d   :  { %v5739_v35 = vadd.f32 %v5738_v34, %v5661_v4  ;;  %v5879_v34 = vld [vmem:[#allocation5 + $0x1288] sm:$0xff]  ;;  %v5877_v4 = vld [vmem:[#allocation5 + $0x1278] sm:$0xff] }
 0xf7e   :  { %v5663_v13 = vpop.f32.mrf.mxu1 }
 0xf7f   :  { %v5741_v3 = vadd.f32 %v5740_v28, %v5663_v13  ;;  %v5878_v28 = vld [vmem:[#allocation5 + $0x1280] sm:$0xff]  ;;  %v8596_v13 = vld [vmem:[#allocation2 + $0x38] sm:$0xff] }
 0xf80   :  { %v5667_v50 = vpop.f32.mrf.mxu1 }
 0xf81   :  { %v5745_v49 = vadd.f32 %v5744_v45, %v5667_v50  ;;  %v5876_v45 = vld [vmem:[#allocation5 + $0x1270] sm:$0xff]  ;;  %v5875_v50 = vld [vmem:[#allocation5 + $0x1268] sm:$0xff] }
 0xf82   :  { %v5669_v20 = vpop.f32.mrf.mxu1 }
 0xf83   :  { %v5747_v10 = vadd.f32 %v5746_v38, %v5669_v20  ;;  %v5874_v38 = vld [vmem:[#allocation5 + $0x1260] sm:$0xff]  ;;  %v5873_v20 = vld [vmem:[#allocation5 + $0x1258] sm:$0xff] }
 0xf85   :  { %5793 = vmatprep.subr.mxu0 %v5747_v10  ;;  %v5872_v10 = vld [vmem:[#allocation5 + $0x1250] sm:$0xff] }
 0xf86   :  { %5794 = vmatpush1.msra.mxu0 %v5745_v49  ;;  %v5871_v49 = vld [vmem:[#allocation5 + $0x1248] sm:$0xff] }
 0xf87   :  { %5795 = vmatprep.subr.mxu0 %v5741_v3  ;;  %v5870_v3 = vld [vmem:[#allocation5 + $0x1240] sm:$0xff] }
 0xf88   :  { %5796 = vmatpush1.msra.mxu0 %v5739_v35  ;;  %v5869_v35 = vld [vmem:[#allocation5 + $0x1238] sm:$0xff] }
 0xf89   :  { %7388 = vmatmul.mubr.msk.f32.vlgmr.msra.gmra.mxu0 %vm600_vm0, %v7384_v59  ;;  %5958 = vmatprep.subr.mxu0 %v5893_v52  ;;  %v5868_v59 = vld [vmem:[#allocation5 + $0x1230] sm:$0xff]  ;;  %v5867_v52 = vld [vmem:[#allocation5 + $0x1228] sm:$0xff] }
 0xf8a   :  { %5959 = vmatpush1.msra.mxu0 %v5892_v61  ;;  %5835 = vmatprep.mubr.f32.mxu0 %v7672_v0  ;;  %v5866_v61 = vld [vmem:[#allocation5 + $0x1220] sm:$0xff] }
 0xf8b   :  { %5960 = vmatprep.subr.mxu0 %v5891_v55  ;;  %v5865_v55 = vld [vmem:[#allocation5 + $0x1218] sm:$0xff] }
 0xf8c   :  { %5961 = vmatpush1.msra.mxu0 %v5890_v1  ;;  %v5864_v1 = vld [vmem:[#allocation5 + $0x1210] sm:$0xff] }
 0xf8d   :  { %7389 = vmatmul.mubr.msk.f32.gmra.mxu0 %vm600_vm0, %v7385_v57  ;;  %5962 = vmatprep.subr.mxu0 %v5889_v23  ;;  %v5863_v57 = vld [vmem:[#allocation5 + $0x1208] sm:$0xff]  ;;  %v5862_v23 = vld [vmem:[#allocation5 + $0x1200] sm:$0xff] }
 0xf8e   :  { %5963 = vmatpush1.msra.mxu0 %v5888_v22  ;;  %5841 = vmatprep.mubr.f32.mxu0 %v7672_v0  ;;  %v5925_v22 = vld [vmem:[#allocation5 + $0x13f8] sm:$0xff] }
 0xf8f   :  { %5964 = vmatprep.subr.mxu0 %v5887_v31  ;;  %v5924_v31 = vld [vmem:[#allocation5 + $0x13f0] sm:$0xff] }
 0xf90   :  { %5965 = vmatpush1.msra.mxu0 %v5886_v62  ;;  %v5923_v62 = vld [vmem:[#allocation5 + $0x13e8] sm:$0xff] }
 0xf91   :  { %7390 = vmatmul.mubr.msk.f32.gmra.mxu0 %vm600_vm0, %v7386_v36  ;;  %5966 = vmatprep.subr.mxu0 %v5885_v40  ;;  %v5922_v36 = vld [vmem:[#allocation5 + $0x13e0] sm:$0xff]  ;;  %v5921_v40 = vld [vmem:[#allocation5 + $0x13d8] sm:$0xff] }
 0xf92   :  { %5967 = vmatpush1.msra.mxu0 %v5884_v51  ;;  %5847 = vmatprep.mubr.f32.mxu0 %v7672_v0  ;;  %v5920_v51 = vld [vmem:[#allocation5 + $0x13d0] sm:$0xff] }
 0xf93   :  { %5968 = vmatprep.subr.mxu0 %v5883_v29  ;;  %v5919_v29 = vld [vmem:[#allocation5 + $0x13c8] sm:$0xff] }
 0xf94   :  { %5969 = vmatpush1.msra.mxu0 %v5882_v14  ;;  %v5918_v14 = vld [vmem:[#allocation5 + $0x13c0] sm:$0xff] }
 0xf95   :  { %7391 = vmatmul.mubr.msk.f32.gmra.mxu0 %vm600_vm0, %v7387_v33  ;;  %5970 = vmatprep.subr.mxu0 %v5881_v56  ;;  %v5917_v33 = vld [vmem:[#allocation5 + $0x13b8] sm:$0xff]  ;;  %v5916_v56 = vld [vmem:[#allocation5 + $0x13b0] sm:$0xff] }
 0xf96   :  { %5971 = vmatpush1.msra.mxu0 %v5880_v27  ;;  %6022 = vmatprep.mubr.f32.mxu0 %v8596_v13  ;;  %v5915_v27 = vld [vmem:[#allocation5 + $0x13a8] sm:$0xff] }
 0xf97   :  { %5972 = vmatprep.subr.mxu0 %v5879_v34  ;;  %v5914_v34 = vld [vmem:[#allocation5 + $0x13a0] sm:$0xff] }
 0xf98   :  { %5973 = vmatpush1.msra.mxu0 %v5878_v28  ;;  %v5913_v28 = vld [vmem:[#allocation5 + $0x1398] sm:$0xff] }
 0xf99   :  { %5974 = vmatprep.subr.mxu0 %v5877_v4  ;;  %v5912_v4 = vld [vmem:[#allocation5 + $0x1390] sm:$0xff] }
 0xf9a   :  { %5975 = vmatpush1.msra.mxu0 %v5876_v45  ;;  %v5911_v45 = vld [vmem:[#allocation5 + $0x1388] sm:$0xff] }
 0xf9b   :  { %5976 = vmatprep.subr.mxu0 %v5875_v50  ;;  %v5910_v50 = vld [vmem:[#allocation5 + $0x1380] sm:$0xff] }
 0xf9c   :  { %5977 = vmatpush1.msra.mxu0 %v5874_v38  ;;  %v5909_v38 = vld [vmem:[#allocation5 + $0x1378] sm:$0xff] }
 0xf9d   :  { %5978 = vmatprep.subr.mxu0 %v5873_v20  ;;  %v5908_v20 = vld [vmem:[#allocation5 + $0x1370] sm:$0xff] }
 0xf9e   :  { %5979 = vmatpush1.msra.mxu0 %v5872_v10  ;;  %v5907_v10 = vld [vmem:[#allocation5 + $0x1368] sm:$0xff] }
 0xf9f   :  { %5980 = vmatprep.subr.mxu0 %v5871_v49  ;;  %v5906_v49 = vld [vmem:[#allocation5 + $0x1360] sm:$0xff] }
 0xfa0   :  { %5981 = vmatpush1.msra.mxu0 %v5870_v3  ;;  %v5905_v3 = vld [vmem:[#allocation5 + $0x1358] sm:$0xff] }
 0xfa1   :  { %5982 = vmatprep.subr.mxu0 %v5869_v35  ;;  %v5904_v35 = vld [vmem:[#allocation5 + $0x1350] sm:$0xff] }
 0xfa2   :  { %5983 = vmatpush1.msra.mxu0 %v5868_v59  ;;  %v5903_v59 = vld [vmem:[#allocation5 + $0x1348] sm:$0xff] }
 0xfa3   :  { %5984 = vmatprep.subr.mxu0 %v5867_v52  ;;  %v5902_v52 = vld [vmem:[#allocation5 + $0x1340] sm:$0xff] }
 0xfa4   :  { %5985 = vmatpush1.msra.mxu0 %v5866_v61  ;;  %v5901_v61 = vld [vmem:[#allocation5 + $0x1338] sm:$0xff] }
 0xfa5   :  { %5986 = vmatprep.subr.mxu0 %v5865_v55  ;;  %v5900_v55 = vld [vmem:[#allocation5 + $0x1330] sm:$0xff] }
 0xfa6   :  { %5987 = vmatpush1.msra.mxu0 %v5864_v1  ;;  %v5899_v1 = vld [vmem:[#allocation5 + $0x1328] sm:$0xff] }
 0xfa7   :  { %5988 = vmatprep.subr.mxu0 %v5863_v57  ;;  %v5898_v57 = vld [vmem:[#allocation5 + $0x1320] sm:$0xff] }
 0xfa8   :  { %5989 = vmatpush1.msra.mxu0 %v5862_v23  ;;  %v5897_v23 = vld [vmem:[#allocation5 + $0x1318] sm:$0xff] }
 0xfa9   :  { %5990 = vmatprep.subr.mxu0 %v5925_v22  ;;  %v5896_v22 = vld [vmem:[#allocation5 + $0x1310] sm:$0xff] }
 0xfaa   :  { %5991 = vmatpush2.msra.mxu0 %v5924_v31  ;;  %v5895_v31 = vld [vmem:[#allocation5 + $0x1308] sm:$0xff] }
 0xfab   :  { %5992 = vmatprep.subr.mxu0 %v5923_v62  ;;  %v5894_v62 = vld [vmem:[#allocation5 + $0x1300] sm:$0xff] }
 0xfac   :  { %5993 = vmatpush2.msra.mxu0 %v5922_v36  ;;  %v6320_v36 = vld [vmem:[#allocation5 + $0x17f8] sm:$0xff] }
 0xfad   :  { %5994 = vmatprep.subr.mxu0 %v5921_v40  ;;  %v6319_v40 = vld [vmem:[#allocation5 + $0x17f0] sm:$0xff] }
 0xfae   :  { %5995 = vmatpush2.msra.mxu0 %v5920_v51  ;;  %v6318_v51 = vld [vmem:[#allocation5 + $0x17e8] sm:$0xff] }
 0xfaf   :  { %5996 = vmatprep.subr.mxu0 %v5919_v29  ;;  %v6317_v29 = vld [vmem:[#allocation5 + $0x17e0] sm:$0xff] }
 0xfb0   :  { %5997 = vmatpush2.msra.mxu0 %v5918_v14  ;;  %v6316_v14 = vld [vmem:[#allocation5 + $0x17d8] sm:$0xff] }
 0xfb1   :  { %5998 = vmatprep.subr.mxu0 %v5917_v33  ;;  %v6315_v33 = vld [vmem:[#allocation5 + $0x17d0] sm:$0xff] }
 0xfb2   :  { %5999 = vmatpush2.msra.mxu0 %v5916_v56  ;;  %v6314_v56 = vld [vmem:[#allocation5 + $0x17c8] sm:$0xff] }
 0xfb3   :  { %6000 = vmatprep.subr.mxu0 %v5915_v27  ;;  %v6313_v27 = vld [vmem:[#allocation5 + $0x17c0] sm:$0xff] }
 0xfb4   :  { %6001 = vmatpush2.msra.mxu0 %v5914_v34  ;;  %v6312_v34 = vld [vmem:[#allocation5 + $0x17b8] sm:$0xff] }
 0xfb5   :  { %6002 = vmatprep.subr.mxu0 %v5913_v28  ;;  %v6311_v28 = vld [vmem:[#allocation5 + $0x17b0] sm:$0xff] }
 0xfb6   :  { %6003 = vmatpush2.msra.mxu0 %v5912_v4  ;;  %v6310_v4 = vld [vmem:[#allocation5 + $0x17a8] sm:$0xff] }
 0xfb7   :  { %6004 = vmatprep.subr.mxu0 %v5911_v45  ;;  %v6309_v45 = vld [vmem:[#allocation5 + $0x17a0] sm:$0xff] }
 0xfb8   :  { %6005 = vmatpush2.msra.mxu0 %v5910_v50  ;;  %v6308_v50 = vld [vmem:[#allocation5 + $0x1798] sm:$0xff] }
 0xfb9   :  { %6006 = vmatprep.subr.mxu0 %v5909_v38  ;;  %v6307_v38 = vld [vmem:[#allocation5 + $0x1790] sm:$0xff] }
 0xfba   :  { %6007 = vmatpush2.msra.mxu0 %v5908_v20  ;;  %v6306_v20 = vld [vmem:[#allocation5 + $0x1788] sm:$0xff] }
 0xfbb   :  { %6008 = vmatprep.subr.mxu0 %v5907_v10  ;;  %v6305_v10 = vld [vmem:[#allocation5 + $0x1780] sm:$0xff] }
 0xfbc   :  { %6009 = vmatpush2.msra.mxu0 %v5906_v49  ;;  %v6304_v49 = vld [vmem:[#allocation5 + $0x1778] sm:$0xff] }
 0xfbd   :  { %6010 = vmatprep.subr.mxu0 %v5905_v3  ;;  %v6303_v3 = vld [vmem:[#allocation5 + $0x1770] sm:$0xff] }
 0xfbe   :  { %6011 = vmatpush2.msra.mxu0 %v5904_v35  ;;  %v6302_v35 = vld [vmem:[#allocation5 + $0x1768] sm:$0xff] }
 0xfbf   :  { %6012 = vmatprep.subr.mxu0 %v5903_v59  ;;  %v6301_v59 = vld [vmem:[#allocation5 + $0x1760] sm:$0xff] }
 0xfc0   :  { %6013 = vmatpush2.msra.mxu0 %v5902_v52  ;;  %v6300_v52 = vld [vmem:[#allocation5 + $0x1758] sm:$0xff] }
 0xfc1   :  { %6014 = vmatprep.subr.mxu0 %v5901_v61  ;;  %v6299_v61 = vld [vmem:[#allocation5 + $0x1750] sm:$0xff] }
 0xfc2   :  { %6015 = vmatpush2.msra.mxu0 %v5900_v55 }
 0xfc3   :  { %6016 = vmatprep.subr.mxu0 %v5899_v1  ;;  %v6298_v1 = vld [vmem:[#allocation5 + $0x1748] sm:$0xff] }
 0xfc4   :  { %6017 = vmatpush2.msra.mxu0 %v5898_v57 }
 0xfc5   :  { %6018 = vmatprep.subr.mxu0 %v5897_v23  ;;  %v6297_v23 = vld [vmem:[#allocation5 + $0x1740] sm:$0xff] }
 0xfc6   :  { %6019 = vmatpush2.msra.mxu0 %v5896_v22 }
 0xfc7   :  { %6020 = vmatprep.subr.mxu0 %v5895_v31  ;;  %v6296_v31 = vld [vmem:[#allocation5 + $0x1738] sm:$0xff] }
 0xfc8   :  { %6021 = vmatpush2.msra.mxu0 %v5894_v62 }
 0xfc9   :  { %6023 = vmatmul.mubr.f32.vlgmr.msra.gmra.mxu0 %v8535_v11  ;;  %6398 = vmatprep.subr.mxu0 %v6320_v36  ;;  %v6295_v36 = vld [vmem:[#allocation5 + $0x1730] sm:$0xff] }
 0xfca   :  { %6028 = vmatprep.mubr.f32.mxu0 %v8538_v24  ;;  %6399 = vmatpush1.msra.mxu0 %v6319_v40 }
 0xfcb   :  { %6400 = vmatprep.subr.mxu0 %v6318_v51  ;;  %v6294_v51 = vld [vmem:[#allocation5 + $0x1728] sm:$0xff] }
 0xfcc   :  { %6401 = vmatpush1.msra.mxu0 %v6317_v29 }
 0xfcd   :  { %6029 = vmatmul.mubr.f32.gmra.mxu0 %v8541_v41  ;;  %6402 = vmatprep.subr.mxu0 %v6316_v14  ;;  %v6293_v14 = vld [vmem:[#allocation5 + $0x1720] sm:$0xff] }
 0xfce   :  { %6462 = vmatprep.mubr.f32.mxu0 %v7672_v0  ;;  %6403 = vmatpush1.msra.mxu0 %v6315_v33  ;;  %v6292_v33 = vld [vmem:[#allocation5 + $0x1718] sm:$0xff] }
 0xfcf   :  { %6404 = vmatprep.subr.mxu0 %v6314_v56 }
 0xfd0   :  { %6405 = vmatpush1.msra.mxu0 %v6313_v27  ;;  %v6291_v27 = vld [vmem:[#allocation5 + $0x1710] sm:$0xff] }
 0xfd1   :  { %6406 = vmatprep.subr.mxu0 %v6312_v34  ;;  %v6290_v34 = vld [vmem:[#allocation5 + $0x1708] sm:$0xff] }
 0xfd2   :  { %6407 = vmatpush1.msra.mxu0 %v6311_v28 }
 0xfd3   :  { %6408 = vmatprep.subr.mxu0 %v6310_v4  ;;  %v6289_v4 = vld [vmem:[#allocation5 + $0x1700] sm:$0xff] }
 0xfd4   :  { %6409 = vmatpush1.msra.mxu0 %v6309_v45 }
 0xfd5   :  { %6410 = vmatprep.subr.mxu0 %v6308_v50 }
 0xfd6   :  { %6411 = vmatpush1.msra.mxu0 %v6307_v38 }
 0xfd7   :  { %6412 = vmatprep.subr.mxu0 %v6306_v20 }
 0xfd8   :  { %6413 = vmatpush1.msra.mxu0 %v6305_v10 }
 0xfd9   :  { %6414 = vmatprep.subr.mxu0 %v6304_v49 }
 0xfda   :  { %6415 = vmatpush1.msra.mxu0 %v6303_v3 }
 0xfdb   :  { %6416 = vmatprep.subr.mxu0 %v6302_v35 }
 0xfdc   :  { %6417 = vmatpush1.msra.mxu0 %v6301_v59 }
 0xfdd   :  { %6418 = vmatprep.subr.mxu0 %v6300_v52 }
 0xfde   :  { %6419 = vmatpush1.msra.mxu0 %v6299_v61 }
 0xfdf   :  { %6420 = vmatprep.subr.mxu0 %v6298_v1 }
 0xfe0   :  { %6421 = vmatpush1.msra.mxu0 %v6297_v23  ;;  %v6256_v23 = vld [vmem:[#allocation5 + $0x15f8] sm:$0xff] }
 0xfe1   :  { %6422 = vmatprep.subr.mxu0 %v6296_v31  ;;  %v6254_v31 = vld [vmem:[#allocation5 + $0x15e8] sm:$0xff] }
 0xfe2   :  { %6423 = vmatpush1.msra.mxu0 %v6295_v36  ;;  %v6253_v36 = vld [vmem:[#allocation5 + $0x15e0] sm:$0xff] }
 0xfe3   :  { %6424 = vmatprep.subr.mxu0 %v6294_v51  ;;  %v6252_v51 = vld [vmem:[#allocation5 + $0x15d8] sm:$0xff] }
 0xfe4   :  { %6425 = vmatpush1.msra.mxu0 %v6293_v14  ;;  %v6251_v14 = vld [vmem:[#allocation5 + $0x15d0] sm:$0xff] }
 0xfe5   :  { %6426 = vmatprep.subr.mxu0 %v6292_v33  ;;  %v6249_v33 = vld [vmem:[#allocation5 + $0x15c0] sm:$0xff] }
 0xfe6   :  { %6427 = vmatpush1.msra.mxu0 %v6291_v27  ;;  %v7394_v27 = vld [vmem:[%s8861_s1 + $0xd0] sm:$0xff] }
 0xfe7   :  { %6428 = vmatprep.subr.mxu0 %v6290_v34  ;;  %v6247_v34 = vld [vmem:[#allocation5 + $0x15b0] sm:$0xff] }
 0xfe8   :  { %6429 = vmatpush1.msra.mxu0 %v6289_v4  ;;  %v6246_v4 = vld [vmem:[#allocation5 + $0x15a8] sm:$0xff] }
 0xfe9   :  { %6463 = vmatmul.mubr.f32.vlgmr.msra.gmra.mxu0 %v8563_v63 }
 0xfea   :  { %6468 = vmatprep.mubr.f32.mxu0 %v7672_v0 }
 0xfed   :  { %6469 = vmatmul.mubr.f32.gmra.mxu0 %v8573_v26 }
 0xfee   :  { %6555 = vmatprep.mubr.f32.mxu0 %v7672_v0 }
0x1049   :  { %v5831_v55 = vpop.f32.mrf.mxu0 }
0x104a   :  { %v8604_v57 = vadd.f32 %v5831_v55, %v8546_v43 }
0x104b   :  { %v5833_v22 = vpop.f32.mrf.mxu0 }
0x104c   :  { %v8607_v62 = vadd.f32 %v5833_v22, %v8549_v47  ;;  %v6255_v22 = vld [vmem:[#allocation5 + $0x15f0] sm:$0xff] }
0x104d   :  { %v5837_v40 = vpop.f32.mrf.mxu0 }
0x104e   :  { %v8610_v29 = vadd.f32 %v5837_v40, %v8552_v46  ;;  %v7393_v40 = vld [vmem:[%s8861_s1 + $0xc8] sm:$0xff] }
0x104f   :  { %v5839_v43 = vpop.f32.mrf.mxu0 }
0x1050   :  { %v8613_v56 = vadd.f32 %v5839_v43, %v8555_v6  ;;  %v6250_v43 = vld [vmem:[#allocation5 + $0x15c8] sm:$0xff] }
0x1051   :  { %v5843_v47 = vpop.f32.mrf.mxu0 }
0x1052   :  { %v8616_v28 = vadd.f32 %v5843_v47, %v8558_v21  ;;  %v6101_v21 = vpop.f32.mrf.mxu1  ;;  %v6248_v47 = vld [vmem:[#allocation5 + $0x15b8] sm:$0xff] }
0x1053   :  { %v5845_v46 = vpop.f32.mrf.mxu0 }
0x1054   :  { %v8619_v45 = vadd.f32 %v5845_v46, %v8561_v15  ;;  %v6103_v10 = vpop.f32.mrf.mxu1  ;;  %v6245_v46 = vld [vmem:[#allocation5 + $0x15a0] sm:$0xff] }
0x1055   :  { %v5849_v50 = vpop.f32.mrf.mxu0 }
0x1056   :  { %v8624_v6 = vadd.f32 %v5849_v50, %v8568_v5  ;;  %v6107_v3 = vpop.f32.mrf.mxu1  ;;  %v7395_v50 = vld [vmem:[%s8861_s1 + $0xd8] sm:$0xff] }
0x1057   :  { %v5851_v38 = vpop.f32.mrf.mxu0 }
0x1058   :  { %v8627_v20 = vadd.f32 %v5851_v38, %v8571_v18  ;;  %v6109_v59 = vpop.f32.mrf.mxu1  ;;  %v7392_v18 = vld [vmem:[%s8861_s1 + $0xc0] sm:$0xff]  ;;  %v6244_v38 = vld [vmem:[#allocation5 + $0x1598] sm:$0xff] }
0x1089   :  { %v6024_v15 = vpop.f32.mrf.mxu0 }
0x108a   :  { %v6102_v1 = vadd.f32 %v6101_v21, %v6024_v15  ;;  %v6243_v21 = vld [vmem:[#allocation5 + $0x1590] sm:$0xff]  ;;  %v6241_v15 = vld [vmem:[#allocation5 + $0x1580] sm:$0xff] }
0x108b   :  { %v6026_v49 = vpop.f32.mrf.mxu0 }
0x108c   :  { %v6104_v5 = vadd.f32 %v6103_v10, %v6026_v49  ;;  %v6242_v10 = vld [vmem:[#allocation5 + $0x1588] sm:$0xff]  ;;  %v6240_v49 = vld [vmem:[#allocation5 + $0x1578] sm:$0xff] }
0x108d   :  { %v6030_v35 = vpop.f32.mrf.mxu0 }
0x108e   :  { %v6108_v55 = vadd.f32 %v6107_v3, %v6030_v35  ;;  %v6239_v3 = vld [vmem:[#allocation5 + $0x1570] sm:$0xff]  ;;  %v6238_v35 = vld [vmem:[#allocation5 + $0x1568] sm:$0xff] }
0x108f   :  { %v6032_v52 = vpop.f32.mrf.mxu0 }
0x1090   :  { %v6110_v61 = vadd.f32 %v6109_v59, %v6032_v52  ;;  %v6237_v59 = vld [vmem:[#allocation5 + $0x1560] sm:$0xff]  ;;  %v6236_v52 = vld [vmem:[#allocation5 + $0x1558] sm:$0xff] }
0x1092   :  { %6156 = vmatprep.subr.mxu1 %v6110_v61  ;;  %v6235_v61 = vld [vmem:[#allocation5 + $0x1550] sm:$0xff] }
0x1093   :  { %6157 = vmatpush1.msra.mxu1 %v6108_v55  ;;  %v6234_v55 = vld [vmem:[#allocation5 + $0x1548] sm:$0xff] }
0x1094   :  { %6158 = vmatprep.subr.mxu1 %v6104_v5  ;;  %v6233_v5 = vld [vmem:[#allocation5 + $0x1540] sm:$0xff] }
0x1095   :  { %6159 = vmatpush1.msra.mxu1 %v6102_v1  ;;  %v6232_v1 = vld [vmem:[#allocation5 + $0x1538] sm:$0xff] }
0x1096   :  { %7396 = vmatmul.mubr.msk.f32.vlgmr.msra.gmra.mxu1 %vm600_vm0, %v7392_v18  ;;  %6321 = vmatprep.subr.mxu1 %v6256_v23  ;;  %v6231_v18 = vld [vmem:[#allocation5 + $0x1530] sm:$0xff]  ;;  %v6230_v23 = vld [vmem:[#allocation5 + $0x1528] sm:$0xff] }
0x1097   :  { %6322 = vmatpush1.msra.mxu1 %v6255_v22  ;;  %6198 = vmatprep.mubr.f32.mxu1 %v7672_v0  ;;  %v6229_v22 = vld [vmem:[#allocation5 + $0x1520] sm:$0xff] }
0x1098   :  { %6323 = vmatprep.subr.mxu1 %v6254_v31  ;;  %v6228_v31 = vld [vmem:[#allocation5 + $0x1518] sm:$0xff] }
0x1099   :  { %6324 = vmatpush1.msra.mxu1 %v6253_v36  ;;  %v6227_v36 = vld [vmem:[#allocation5 + $0x1510] sm:$0xff] }
0x109a   :  { %7397 = vmatmul.mubr.msk.f32.gmra.mxu1 %vm600_vm0, %v7393_v40  ;;  %6325 = vmatprep.subr.mxu1 %v6252_v51  ;;  %v6226_v40 = vld [vmem:[#allocation5 + $0x1508] sm:$0xff]  ;;  %v6225_v51 = vld [vmem:[#allocation5 + $0x1500] sm:$0xff] }
0x109b   :  { %6326 = vmatpush1.msra.mxu1 %v6251_v14  ;;  %6204 = vmatprep.mubr.f32.mxu1 %v7672_v0  ;;  %v6288_v14 = vld [vmem:[#allocation5 + $0x16f8] sm:$0xff] }
0x109c   :  { %6327 = vmatprep.subr.mxu1 %v6250_v43  ;;  %v6287_v43 = vld [vmem:[#allocation5 + $0x16f0] sm:$0xff] }
0x109d   :  { %6328 = vmatpush1.msra.mxu1 %v6249_v33  ;;  %v6286_v33 = vld [vmem:[#allocation5 + $0x16e8] sm:$0xff] }
0x109e   :  { %7398 = vmatmul.mubr.msk.f32.gmra.mxu1 %vm600_vm0, %v7394_v27  ;;  %6329 = vmatprep.subr.mxu1 %v6248_v47  ;;  %v6285_v27 = vld [vmem:[#allocation5 + $0x16e0] sm:$0xff]  ;;  %v6284_v47 = vld [vmem:[#allocation5 + $0x16d8] sm:$0xff] }
0x109f   :  { %6330 = vmatpush1.msra.mxu1 %v6247_v34  ;;  %6210 = vmatprep.mubr.f32.mxu1 %v7672_v0  ;;  %v6283_v34 = vld [vmem:[#allocation5 + $0x16d0] sm:$0xff] }
0x10a0   :  { %6331 = vmatprep.subr.mxu1 %v6246_v4  ;;  %v6282_v4 = vld [vmem:[#allocation5 + $0x16c8] sm:$0xff] }
0x10a1   :  { %6332 = vmatpush1.msra.mxu1 %v6245_v46  ;;  %v6281_v46 = vld [vmem:[#allocation5 + $0x16c0] sm:$0xff] }
0x10a2   :  { %7399 = vmatmul.mubr.msk.f32.gmra.mxu1 %vm600_vm0, %v7395_v50  ;;  %6333 = vmatprep.subr.mxu1 %v6244_v38  ;;  %v6280_v50 = vld [vmem:[#allocation5 + $0x16b8] sm:$0xff]  ;;  %v6279_v38 = vld [vmem:[#allocation5 + $0x16b0] sm:$0xff] }
0x10a3   :  { %6334 = vmatpush1.msra.mxu1 %v6243_v21  ;;  %6385 = vmatprep.mubr.f32.mxu1 %v8596_v13  ;;  %v6278_v21 = vld [vmem:[#allocation5 + $0x16a8] sm:$0xff] }
0x10a4   :  { %6335 = vmatprep.subr.mxu1 %v6242_v10  ;;  %v6277_v10 = vld [vmem:[#allocation5 + $0x16a0] sm:$0xff] }
0x10a5   :  { %6336 = vmatpush1.msra.mxu1 %v6241_v15  ;;  %v6276_v15 = vld [vmem:[#allocation5 + $0x1698] sm:$0xff] }
0x10a6   :  { %6337 = vmatprep.subr.mxu1 %v6240_v49  ;;  %v6275_v49 = vld [vmem:[#allocation5 + $0x1690] sm:$0xff] }
0x10a7   :  { %6338 = vmatpush1.msra.mxu1 %v6239_v3  ;;  %v6274_v3 = vld [vmem:[#allocation5 + $0x1688] sm:$0xff] }
0x10a8   :  { %6339 = vmatprep.subr.mxu1 %v6238_v35  ;;  %v6273_v35 = vld [vmem:[#allocation5 + $0x1680] sm:$0xff] }
0x10a9   :  { %6340 = vmatpush1.msra.mxu1 %v6237_v59  ;;  %v6272_v59 = vld [vmem:[#allocation5 + $0x1678] sm:$0xff] }
0x10aa   :  { %6341 = vmatprep.subr.mxu1 %v6236_v52  ;;  %v6271_v52 = vld [vmem:[#allocation5 + $0x1670] sm:$0xff] }
0x10ab   :  { %6342 = vmatpush1.msra.mxu1 %v6235_v61  ;;  %v6270_v61 = vld [vmem:[#allocation5 + $0x1668] sm:$0xff] }
0x10ac   :  { %6343 = vmatprep.subr.mxu1 %v6234_v55  ;;  %v6269_v55 = vld [vmem:[#allocation5 + $0x1660] sm:$0xff] }
0x10ad   :  { %6344 = vmatpush1.msra.mxu1 %v6233_v5  ;;  %v6268_v5 = vld [vmem:[#allocation5 + $0x1658] sm:$0xff] }
0x10ae   :  { %6345 = vmatprep.subr.mxu1 %v6232_v1  ;;  %v6267_v1 = vld [vmem:[#allocation5 + $0x1650] sm:$0xff] }
0x10af   :  { %6346 = vmatpush1.msra.mxu1 %v6231_v18  ;;  %v6266_v18 = vld [vmem:[#allocation5 + $0x1648] sm:$0xff] }
0x10b0   :  { %6347 = vmatprep.subr.mxu1 %v6230_v23  ;;  %v6265_v23 = vld [vmem:[#allocation5 + $0x1640] sm:$0xff] }
0x10b1   :  { %6348 = vmatpush1.msra.mxu1 %v6229_v22  ;;  %v6264_v22 = vld [vmem:[#allocation5 + $0x1638] sm:$0xff] }
0x10b2   :  { %6349 = vmatprep.subr.mxu1 %v6228_v31  ;;  %v6263_v31 = vld [vmem:[#allocation5 + $0x1630] sm:$0xff] }
0x10b3   :  { %6350 = vmatpush1.msra.mxu1 %v6227_v36  ;;  %v6262_v36 = vld [vmem:[#allocation5 + $0x1628] sm:$0xff] }
0x10b4   :  { %6351 = vmatprep.subr.mxu1 %v6226_v40  ;;  %v6261_v40 = vld [vmem:[#allocation5 + $0x1620] sm:$0xff] }
0x10b5   :  { %6352 = vmatpush1.msra.mxu1 %v6225_v51  ;;  %v6260_v51 = vld [vmem:[#allocation5 + $0x1618] sm:$0xff] }
0x10b6   :  { %6353 = vmatprep.subr.mxu1 %v6288_v14  ;;  %v6259_v14 = vld [vmem:[#allocation5 + $0x1610] sm:$0xff] }
0x10b7   :  { %6354 = vmatpush2.msra.mxu1 %v6287_v43  ;;  %v6258_v43 = vld [vmem:[#allocation5 + $0x1608] sm:$0xff] }
0x10b8   :  { %6355 = vmatprep.subr.mxu1 %v6286_v33  ;;  %v6257_v33 = vld [vmem:[#allocation5 + $0x1600] sm:$0xff] }
0x10b9   :  { %6356 = vmatpush2.msra.mxu1 %v6285_v27  ;;  %v6683_v27 = vld [vmem:[#allocation5 + $0x1af8] sm:$0xff] }
0x10ba   :  { %6357 = vmatprep.subr.mxu1 %v6284_v47  ;;  %v6682_v47 = vld [vmem:[#allocation5 + $0x1af0] sm:$0xff] }
0x10bb   :  { %6358 = vmatpush2.msra.mxu1 %v6283_v34  ;;  %v6681_v34 = vld [vmem:[#allocation5 + $0x1ae8] sm:$0xff] }
0x10bc   :  { %6359 = vmatprep.subr.mxu1 %v6282_v4  ;;  %v6680_v4 = vld [vmem:[#allocation5 + $0x1ae0] sm:$0xff] }
0x10bd   :  { %6360 = vmatpush2.msra.mxu1 %v6281_v46  ;;  %v6679_v46 = vld [vmem:[#allocation5 + $0x1ad8] sm:$0xff] }
0x10be   :  { %6361 = vmatprep.subr.mxu1 %v6280_v50  ;;  %v6678_v50 = vld [vmem:[#allocation5 + $0x1ad0] sm:$0xff] }
0x10bf   :  { %6362 = vmatpush2.msra.mxu1 %v6279_v38  ;;  %v6677_v38 = vld [vmem:[#allocation5 + $0x1ac8] sm:$0xff] }
0x10c0   :  { %6363 = vmatprep.subr.mxu1 %v6278_v21  ;;  %v6673_v21 = vld [vmem:[#allocation5 + $0x1aa8] sm:$0xff] }
0x10c1   :  { %6364 = vmatpush2.msra.mxu1 %v6277_v10  ;;  %v6672_v10 = vld [vmem:[#allocation5 + $0x1aa0] sm:$0xff] }
0x10c2   :  { %6365 = vmatprep.subr.mxu1 %v6276_v15  ;;  %v6671_v15 = vld [vmem:[#allocation5 + $0x1a98] sm:$0xff] }
0x10c3   :  { %6366 = vmatpush2.msra.mxu1 %v6275_v49  ;;  %v6670_v49 = vld [vmem:[#allocation5 + $0x1a90] sm:$0xff] }
0x10c4   :  { %6367 = vmatprep.subr.mxu1 %v6274_v3  ;;  %v6669_v3 = vld [vmem:[#allocation5 + $0x1a88] sm:$0xff] }
0x10c5   :  { %6368 = vmatpush2.msra.mxu1 %v6273_v35  ;;  %v6668_v35 = vld [vmem:[#allocation5 + $0x1a80] sm:$0xff] }
0x10c6   :  { %6369 = vmatprep.subr.mxu1 %v6272_v59  ;;  %v6667_v59 = vld [vmem:[#allocation5 + $0x1a78] sm:$0xff] }
0x10c7   :  { %6370 = vmatpush2.msra.mxu1 %v6271_v52  ;;  %v6666_v52 = vld [vmem:[#allocation5 + $0x1a70] sm:$0xff] }
0x10c8   :  { %6371 = vmatprep.subr.mxu1 %v6270_v61  ;;  %v6665_v61 = vld [vmem:[#allocation5 + $0x1a68] sm:$0xff] }
0x10c9   :  { %6372 = vmatpush2.msra.mxu1 %v6269_v55  ;;  %v6664_v55 = vld [vmem:[#allocation5 + $0x1a60] sm:$0xff] }
0x10ca   :  { %6373 = vmatprep.subr.mxu1 %v6268_v5  ;;  %v6663_v5 = vld [vmem:[#allocation5 + $0x1a58] sm:$0xff] }
0x10cb   :  { %6374 = vmatpush2.msra.mxu1 %v6267_v1  ;;  %v6662_v1 = vld [vmem:[#allocation5 + $0x1a50] sm:$0xff] }
0x10cc   :  { %6375 = vmatprep.subr.mxu1 %v6266_v18 }
0x10cd   :  { %6376 = vmatpush2.msra.mxu1 %v6265_v23  ;;  %v6661_v23 = vld [vmem:[#allocation5 + $0x1a48] sm:$0xff] }
0x10ce   :  { %6377 = vmatprep.subr.mxu1 %v6264_v22 }
0x10cf   :  { %6378 = vmatpush2.msra.mxu1 %v6263_v31  ;;  %v6660_v31 = vld [vmem:[#allocation5 + $0x1a40] sm:$0xff] }
0x10d0   :  { %6379 = vmatprep.subr.mxu1 %v6262_v36 }
0x10d1   :  { %6380 = vmatpush2.msra.mxu1 %v6261_v40  ;;  %v6659_v40 = vld [vmem:[#allocation5 + $0x1a38] sm:$0xff] }
0x10d2   :  { %6381 = vmatprep.subr.mxu1 %v6260_v51 }
0x10d3   :  { %6382 = vmatpush2.msra.mxu1 %v6259_v14  ;;  %v6658_v14 = vld [vmem:[#allocation5 + $0x1a30] sm:$0xff] }
0x10d4   :  { %6383 = vmatprep.subr.mxu1 %v6258_v43 }
0x10d5   :  { %6384 = vmatpush2.msra.mxu1 %v6257_v33  ;;  %v6657_v33 = vld [vmem:[#allocation5 + $0x1a28] sm:$0xff] }
0x10d6   :  { %6386 = vmatmul.mubr.f32.vlgmr.msra.gmra.mxu1 %v8535_v11  ;;  %6761 = vmatprep.subr.mxu1 %v6683_v27  ;;  %v6676_v11 = vld [vmem:[#allocation5 + $0x1ac0] sm:$0xff] }
0x10d7   :  { %6391 = vmatprep.mubr.f32.mxu1 %v8538_v24  ;;  %6762 = vmatpush1.msra.mxu1 %v6682_v47  ;;  %v6675_v24 = vld [vmem:[#allocation5 + $0x1ab8] sm:$0xff]  ;;  %v6656_v47 = vld [vmem:[#allocation5 + $0x1a20] sm:$0xff] }
0x10d8   :  { %6763 = vmatprep.subr.mxu1 %v6681_v34  ;;  %v6655_v34 = vld [vmem:[#allocation5 + $0x1a18] sm:$0xff] }
0x10d9   :  { %6764 = vmatpush1.msra.mxu1 %v6680_v4 }
0x10da   :  { %6392 = vmatmul.mubr.f32.gmra.mxu1 %v8541_v41  ;;  %6765 = vmatprep.subr.mxu1 %v6679_v46  ;;  %v6674_v41 = vld [vmem:[#allocation5 + $0x1ab0] sm:$0xff] }
0x10db   :  { %6825 = vmatprep.mubr.f32.mxu1 %v7672_v0  ;;  %6766 = vmatpush1.msra.mxu1 %v6678_v50  ;;  %v6654_v46 = vld [vmem:[#allocation5 + $0x1a10] sm:$0xff]  ;;  %v6653_v50 = vld [vmem:[#allocation5 + $0x1a08] sm:$0xff] }
0x10dc   :  { %6767 = vmatprep.subr.mxu1 %v6677_v38 }
0x10dd   :  { %6768 = vmatpush1.msra.mxu1 %v6676_v11  ;;  %v6652_v11 = vld [vmem:[#allocation5 + $0x1a00] sm:$0xff] }
0x10de   :  { %6769 = vmatprep.subr.mxu1 %v6675_v24 }
0x10df   :  { %6770 = vmatpush1.msra.mxu1 %v6674_v41 }
0x10e0   :  { %6771 = vmatprep.subr.mxu1 %v6673_v21 }
0x10e1   :  { %6772 = vmatpush1.msra.mxu1 %v6672_v10 }
0x10e2   :  { %6773 = vmatprep.subr.mxu1 %v6671_v15 }
0x10e3   :  { %6774 = vmatpush1.msra.mxu1 %v6670_v49 }
0x10e4   :  { %6775 = vmatprep.subr.mxu1 %v6669_v3 }
0x10e5   :  { %6776 = vmatpush1.msra.mxu1 %v6668_v35 }
0x10e6   :  { %6777 = vmatprep.subr.mxu1 %v6667_v59 }
0x10e7   :  { %6778 = vmatpush1.msra.mxu1 %v6666_v52 }
0x10e8   :  { %6779 = vmatprep.subr.mxu1 %v6665_v61 }
0x10e9   :  { %6780 = vmatpush1.msra.mxu1 %v6664_v55 }
0x10ea   :  { %6781 = vmatprep.subr.mxu1 %v6663_v5  ;;  %v6618_v5 = vld [vmem:[#allocation5 + $0x18f0] sm:$0xff] }
0x10eb   :  { %6782 = vmatpush1.msra.mxu1 %v6662_v1  ;;  %v6617_v1 = vld [vmem:[#allocation5 + $0x18e8] sm:$0xff] }
0x10ec   :  { %6783 = vmatprep.subr.mxu1 %v6661_v23  ;;  %v7401_v23 = vld [vmem:[%s8861_s1 + $0xe8] sm:$0xff] }
0x10ed   :  { %6784 = vmatpush1.msra.mxu1 %v6660_v31  ;;  %v6615_v31 = vld [vmem:[#allocation5 + $0x18d8] sm:$0xff] }
0x10ee   :  { %6785 = vmatprep.subr.mxu1 %v6659_v40  ;;  %v6613_v40 = vld [vmem:[#allocation5 + $0x18c8] sm:$0xff] }
0x10ef   :  { %6786 = vmatpush1.msra.mxu1 %v6658_v14  ;;  %v6612_v14 = vld [vmem:[#allocation5 + $0x18c0] sm:$0xff] }
0x10f0   :  { %6787 = vmatprep.subr.mxu1 %v6657_v33  ;;  %v6611_v33 = vld [vmem:[#allocation5 + $0x18b8] sm:$0xff] }
0x10f1   :  { %6788 = vmatpush1.msra.mxu1 %v6656_v47  ;;  %v6610_v47 = vld [vmem:[#allocation5 + $0x18b0] sm:$0xff] }
0x10f2   :  { %6789 = vmatprep.subr.mxu1 %v6655_v34  ;;  %v6608_v34 = vld [vmem:[#allocation5 + $0x18a0] sm:$0xff] }
0x10f3   :  { %6790 = vmatpush1.msra.mxu1 %v6654_v46  ;;  %v7403_v46 = vld [vmem:[%s8861_s1 + $0xf8] sm:$0xff] }
0x10f4   :  { %6791 = vmatprep.subr.mxu1 %v6653_v50  ;;  %v6606_v50 = vld [vmem:[#allocation5 + $0x1890] sm:$0xff] }
0x10f5   :  { %6792 = vmatpush1.msra.mxu1 %v6652_v11  ;;  %v6605_v11 = vld [vmem:[#allocation5 + $0x1888] sm:$0xff] }
0x10f6   :  { %6826 = vmatmul.mubr.f32.vlgmr.msra.gmra.mxu1 %v8563_v63 }
0x10f7   :  { %6831 = vmatprep.mubr.f32.mxu1 %v7672_v0 }
0x10fa   :  { %6832 = vmatmul.mubr.f32.gmra.mxu1 %v8573_v26  ;;  %v7400_v26 = vld [vmem:[%s8861_s1 + $0xe0] sm:$0xff] }
0x10fb   :  { %6918 = vmatprep.mubr.f32.mxu1 %v7672_v0 }
0x1156   :  { %v6194_v18 = vpop.f32.mrf.mxu1 }
0x1157   :  { %v8656_v22 = vadd.f32 %v6194_v18, %v8604_v57  ;;  %v6616_v18 = vld [vmem:[#allocation5 + $0x18e0] sm:$0xff] }
0x1158   :  { %v6196_v36 = vpop.f32.mrf.mxu1 }
0x1159   :  { %v8659_v51 = vadd.f32 %v6196_v36, %v8607_v62  ;;  %v6614_v36 = vld [vmem:[#allocation5 + $0x18d0] sm:$0xff] }
0x115a   :  { %v6200_v43 = vpop.f32.mrf.mxu1 }
0x115b   :  { %v8662_v27 = vadd.f32 %v6200_v43, %v8610_v29  ;;  %v7402_v43 = vld [vmem:[%s8861_s1 + $0xf0] sm:$0xff] }
0x115c   :  { %v6202_v57 = vpop.f32.mrf.mxu1 }
0x115d   :  { %v8665_v4 = vadd.f32 %v6202_v57, %v8613_v56  ;;  %v6609_v57 = vld [vmem:[#allocation5 + $0x18a8] sm:$0xff] }
0x115e   :  { %v6206_v62 = vpop.f32.mrf.mxu1 }
0x115f   :  { %v8668_v38 = vadd.f32 %v6206_v62, %v8616_v28  ;;  %v6464_v28 = vpop.f32.mrf.mxu0  ;;  %v6607_v62 = vld [vmem:[#allocation5 + $0x1898] sm:$0xff] }
0x1160   :  { %v6208_v29 = vpop.f32.mrf.mxu1 }
0x1161   :  { %v8671_v24 = vadd.f32 %v6208_v29, %v8619_v45  ;;  %v6466_v15 = vpop.f32.mrf.mxu0  ;;  %v6604_v29 = vld [vmem:[#allocation5 + $0x1880] sm:$0xff] }
0x1162   :  { %v6212_v41 = vpop.f32.mrf.mxu1 }
0x1163   :  { %v8676_v56 = vadd.f32 %v6212_v41, %v8624_v6  ;;  %v6470_v3 = vpop.f32.mrf.mxu0  ;;  %v6603_v41 = vld [vmem:[#allocation5 + $0x1878] sm:$0xff] }
0x1164   :  { %v6214_v21 = vpop.f32.mrf.mxu1 }
0x1165   :  { %v8679_v10 = vadd.f32 %v6214_v21, %v8627_v20  ;;  %v6472_v35 = vpop.f32.mrf.mxu0  ;;  %v6619_v20 = vld [vmem:[#allocation5 + $0x18f8] sm:$0xff]  ;;  %v6602_v21 = vld [vmem:[#allocation5 + $0x1870] sm:$0xff] }
0x1196   :  { %v6387_v45 = vpop.f32.mrf.mxu1 }
0x1197   :  { %v6465_v55 = vadd.f32 %v6464_v28, %v6387_v45  ;;  %v6601_v28 = vld [vmem:[#allocation5 + $0x1868] sm:$0xff]  ;;  %v6599_v45 = vld [vmem:[#allocation5 + $0x1858] sm:$0xff] }
0x1198   :  { %v6389_v49 = vpop.f32.mrf.mxu1 }
0x1199   :  { %v6467_v6 = vadd.f32 %v6466_v15, %v6389_v49  ;;  %v6600_v15 = vld [vmem:[#allocation5 + $0x1860] sm:$0xff]  ;;  %v6598_v49 = vld [vmem:[#allocation5 + $0x1850] sm:$0xff] }
0x119a   :  { %v6393_v63 = vpop.f32.mrf.mxu1 }
0x119b   :  { %v6471_v61 = vadd.f32 %v6470_v3, %v6393_v63  ;;  %v6597_v3 = vld [vmem:[#allocation5 + $0x1848] sm:$0xff]  ;;  %v6596_v63 = vld [vmem:[#allocation5 + $0x1840] sm:$0xff] }
0x119c   :  { %v6395_v59 = vpop.f32.mrf.mxu1 }
0x119d   :  { %v6473_v52 = vadd.f32 %v6472_v35, %v6395_v59  ;;  %v6595_v35 = vld [vmem:[#allocation5 + $0x1838] sm:$0xff]  ;;  %v6594_v59 = vld [vmem:[#allocation5 + $0x1830] sm:$0xff] }
0x119f   :  { %6519 = vmatprep.subr.mxu0 %v6473_v52  ;;  %v6592_v52 = vld [vmem:[#allocation5 + $0x1820] sm:$0xff] }
0x11a0   :  { %6520 = vmatpush1.msra.mxu0 %v6471_v61  ;;  %v6591_v61 = vld [vmem:[#allocation5 + $0x1818] sm:$0xff] }
0x11a1   :  { %6521 = vmatprep.subr.mxu0 %v6467_v6  ;;  %v6590_v6 = vld [vmem:[#allocation5 + $0x1810] sm:$0xff] }
0x11a2   :  { %6522 = vmatpush1.msra.mxu0 %v6465_v55  ;;  %v6589_v55 = vld [vmem:[#allocation5 + $0x1808] sm:$0xff] }
0x11a3   :  { %7404 = vmatmul.mubr.msk.f32.vlgmr.msra.gmra.mxu0 %vm600_vm0, %v7400_v26  ;;  %6684 = vmatprep.subr.mxu0 %v6619_v20  ;;  %v6588_v26 = vld [vmem:[#allocation5 + $0x1800] sm:$0xff]  ;;  %v6651_v20 = vld [vmem:[#allocation5 + $0x19f8] sm:$0xff] }
0x11a4   :  { %6685 = vmatpush1.msra.mxu0 %v6618_v5  ;;  %6561 = vmatprep.mubr.f32.mxu0 %v7672_v0  ;;  %v6650_v5 = vld [vmem:[#allocation5 + $0x19f0] sm:$0xff] }
0x11a5   :  { %6686 = vmatprep.subr.mxu0 %v6617_v1  ;;  %v6649_v1 = vld [vmem:[#allocation5 + $0x19e8] sm:$0xff] }
0x11a6   :  { %6687 = vmatpush1.msra.mxu0 %v6616_v18  ;;  %v6648_v18 = vld [vmem:[#allocation5 + $0x19e0] sm:$0xff] }
0x11a7   :  { %7405 = vmatmul.mubr.msk.f32.gmra.mxu0 %vm600_vm0, %v7401_v23  ;;  %6688 = vmatprep.subr.mxu0 %v6615_v31  ;;  %v6647_v23 = vld [vmem:[#allocation5 + $0x19d8] sm:$0xff]  ;;  %v6646_v31 = vld [vmem:[#allocation5 + $0x19d0] sm:$0xff] }
0x11a8   :  { %6689 = vmatpush1.msra.mxu0 %v6614_v36  ;;  %6567 = vmatprep.mubr.f32.mxu0 %v7672_v0  ;;  %v6645_v36 = vld [vmem:[#allocation5 + $0x19c8] sm:$0xff] }
0x11a9   :  { %6690 = vmatprep.subr.mxu0 %v6613_v40  ;;  %v6644_v40 = vld [vmem:[#allocation5 + $0x19c0] sm:$0xff] }
0x11aa   :  { %6691 = vmatpush1.msra.mxu0 %v6612_v14  ;;  %v6643_v14 = vld [vmem:[#allocation5 + $0x19b8] sm:$0xff] }
0x11ab   :  { %7406 = vmatmul.mubr.msk.f32.gmra.mxu0 %vm600_vm0, %v7402_v43  ;;  %6692 = vmatprep.subr.mxu0 %v6611_v33  ;;  %v6642_v43 = vld [vmem:[#allocation5 + $0x19b0] sm:$0xff]  ;;  %v6641_v33 = vld [vmem:[#allocation5 + $0x19a8] sm:$0xff] }
0x11ac   :  { %6693 = vmatpush1.msra.mxu0 %v6610_v47  ;;  %6573 = vmatprep.mubr.f32.mxu0 %v7672_v0  ;;  %v6640_v47 = vld [vmem:[#allocation5 + $0x19a0] sm:$0xff] }
0x11ad   :  { %6694 = vmatprep.subr.mxu0 %v6609_v57  ;;  %v6639_v57 = vld [vmem:[#allocation5 + $0x1998] sm:$0xff] }
0x11ae   :  { %6695 = vmatpush1.msra.mxu0 %v6608_v34  ;;  %v6638_v34 = vld [vmem:[#allocation5 + $0x1990] sm:$0xff] }
0x11af   :  { %7407 = vmatmul.mubr.msk.f32.gmra.mxu0 %vm600_vm0, %v7403_v46  ;;  %6696 = vmatprep.subr.mxu0 %v6607_v62  ;;  %v6637_v46 = vld [vmem:[#allocation5 + $0x1988] sm:$0xff]  ;;  %v6636_v62 = vld [vmem:[#allocation5 + $0x1980] sm:$0xff] }
0x11b0   :  { %6697 = vmatpush1.msra.mxu0 %v6606_v50  ;;  %6748 = vmatprep.mubr.f32.mxu0 %v8596_v13  ;;  %v6593_v13 = vld [vmem:[#allocation5 + $0x1828] sm:$0xff]  ;;  %v6635_v50 = vld [vmem:[#allocation5 + $0x1978] sm:$0xff] }
0x11b1   :  { %6698 = vmatprep.subr.mxu0 %v6605_v11  ;;  %v6634_v11 = vld [vmem:[#allocation5 + $0x1970] sm:$0xff] }
0x11b2   :  { %6699 = vmatpush1.msra.mxu0 %v6604_v29  ;;  %v6633_v29 = vld [vmem:[#allocation5 + $0x1968] sm:$0xff] }
0x11b3   :  { %6700 = vmatprep.subr.mxu0 %v6603_v41  ;;  %v6632_v41 = vld [vmem:[#allocation5 + $0x1960] sm:$0xff] }
0x11b4   :  { %6701 = vmatpush1.msra.mxu0 %v6602_v21  ;;  %v6631_v21 = vld [vmem:[#allocation5 + $0x1958] sm:$0xff] }
0x11b5   :  { %6702 = vmatprep.subr.mxu0 %v6601_v28  ;;  %v6630_v28 = vld [vmem:[#allocation5 + $0x1950] sm:$0xff] }
0x11b6   :  { %6703 = vmatpush1.msra.mxu0 %v6600_v15  ;;  %v6629_v15 = vld [vmem:[#allocation5 + $0x1948] sm:$0xff] }
0x11b7   :  { %6704 = vmatprep.subr.mxu0 %v6599_v45  ;;  %v6628_v45 = vld [vmem:[#allocation5 + $0x1940] sm:$0xff] }
0x11b8   :  { %6705 = vmatpush1.msra.mxu0 %v6598_v49  ;;  %v6627_v49 = vld [vmem:[#allocation5 + $0x1938] sm:$0xff] }
0x11b9   :  { %6706 = vmatprep.subr.mxu0 %v6597_v3  ;;  %v6626_v3 = vld [vmem:[#allocation5 + $0x1930] sm:$0xff] }
0x11ba   :  { %6707 = vmatpush1.msra.mxu0 %v6596_v63  ;;  %v6625_v63 = vld [vmem:[#allocation5 + $0x1928] sm:$0xff] }
0x11bb   :  { %6708 = vmatprep.subr.mxu0 %v6595_v35  ;;  %v6624_v35 = vld [vmem:[#allocation5 + $0x1920] sm:$0xff] }
0x11bc   :  { %6709 = vmatpush1.msra.mxu0 %v6594_v59  ;;  %v6623_v59 = vld [vmem:[#allocation5 + $0x1918] sm:$0xff] }
0x11bd   :  { %6710 = vmatprep.subr.mxu0 %v6593_v13  ;;  %v6622_v13 = vld [vmem:[#allocation5 + $0x1910] sm:$0xff] }
0x11be   :  { %6711 = vmatpush1.msra.mxu0 %v6592_v52  ;;  %v6621_v52 = vld [vmem:[#allocation5 + $0x1908] sm:$0xff] }
0x11bf   :  { %6712 = vmatprep.subr.mxu0 %v6591_v61  ;;  %v6620_v61 = vld [vmem:[#allocation5 + $0x1900] sm:$0xff] }
0x11c0   :  { %6713 = vmatpush1.msra.mxu0 %v6590_v6  ;;  %v7566_v6 = vld [vmem:[#allocation2 + $0x30] sm:$0xff] }
0x11c1   :  { %6714 = vmatprep.subr.mxu0 %v6589_v55  ;;  %v7567_v55 = vld [vmem:[#allocation2 + $0x50] sm:$0xff] }
0x11c2   :  { %6715 = vmatpush1.msra.mxu0 %v6588_v26  ;;  %v7568_v26 = vld [vmem:[#allocation2 + $0x48] sm:$0xff] }
0x11c3   :  { %6716 = vmatprep.subr.mxu0 %v6651_v20 }
0x11c4   :  { %6717 = vmatpush2.msra.mxu0 %v6650_v5 }
0x11c5   :  { %6718 = vmatprep.subr.mxu0 %v6649_v1 }
0x11c6   :  { %6719 = vmatpush2.msra.mxu0 %v6648_v18 }
0x11c7   :  { %6720 = vmatprep.subr.mxu0 %v6647_v23 }
0x11c8   :  { %6721 = vmatpush2.msra.mxu0 %v6646_v31 }
0x11c9   :  { %6722 = vmatprep.subr.mxu0 %v6645_v36 }
0x11ca   :  { %6723 = vmatpush2.msra.mxu0 %v6644_v40 }
0x11cb   :  { %6724 = vmatprep.subr.mxu0 %v6643_v14 }
0x11cc   :  { %6725 = vmatpush2.msra.mxu0 %v6642_v43 }
0x11cd   :  { %6726 = vmatprep.subr.mxu0 %v6641_v33 }
0x11ce   :  { %6727 = vmatpush2.msra.mxu0 %v6640_v47 }
0x11cf   :  { %6728 = vmatprep.subr.mxu0 %v6639_v57 }
0x11d0   :  { %6729 = vmatpush2.msra.mxu0 %v6638_v34 }
0x11d1   :  { %6730 = vmatprep.subr.mxu0 %v6637_v46 }
0x11d2   :  { %6731 = vmatpush2.msra.mxu0 %v6636_v62  ;;  %v6827_v62 = vpop.f32.mrf.mxu1 }
0x11d3   :  { %6732 = vmatprep.subr.mxu0 %v6635_v50 }
0x11d4   :  { %6733 = vmatpush2.msra.mxu0 %v6634_v11 }
0x11d5   :  { %6734 = vmatprep.subr.mxu0 %v6633_v29 }
0x11d6   :  { %6735 = vmatpush2.msra.mxu0 %v6632_v41 }
0x11d7   :  { %6736 = vmatprep.subr.mxu0 %v6631_v21 }
0x11d8   :  { %6737 = vmatpush2.msra.mxu0 %v6630_v28 }
0x11d9   :  { %6738 = vmatprep.subr.mxu0 %v6629_v15 }
0x11da   :  { %6739 = vmatpush2.msra.mxu0 %v6628_v45  ;;  %v7411_v45 = vld [vmem:[%s8861_s1 + $0x118] sm:$0xff] }
0x11db   :  { %6740 = vmatprep.subr.mxu0 %v6627_v49  ;;  %v8730_v49 = vld [vmem:[#allocation7] sm:$0xff] }
0x11dc   :  { %6741 = vmatpush2.msra.mxu0 %v6626_v3 }
0x11dd   :  { %6742 = vmatprep.subr.mxu0 %v6625_v63 }
0x11de   :  { %6743 = vmatpush2.msra.mxu0 %v6624_v35 }
0x11df   :  { %6744 = vmatprep.subr.mxu0 %v6623_v59 }
0x11e0   :  { %6745 = vmatpush2.msra.mxu0 %v6622_v13 }
0x11e1   :  { %6746 = vmatprep.subr.mxu0 %v6621_v52 }
0x11e2   :  { %6747 = vmatpush2.msra.mxu0 %v6620_v61 }
0x11e3   :  { %6749 = vmatmul.mubr.f32.vlgmr.msra.gmra.mxu0 %v7566_v6 }
0x11e4   :  { %6754 = vmatprep.mubr.f32.mxu0 %v7567_v55 }
0x11e7   :  { %6755 = vmatmul.mubr.f32.gmra.mxu0 %v7568_v26 }
0x1263   :  { %v6557_v20 = vpop.f32.mrf.mxu0 }
0x1264   :  { %v6580_v5 = vadd.f32 %v6557_v20, %v8656_v22 }
0x1265   :  { %v6559_v1 = vpop.f32.mrf.mxu0 }
0x1266   :  { %v6581_v18 = vadd.f32 %v6559_v1, %v8659_v51  ;;  %v6829_v51 = vpop.f32.mrf.mxu1 }
0x1267   :  { %v6563_v23 = vpop.f32.mrf.mxu0 }
0x1268   :  { %v6582_v31 = vadd.f32 %v6563_v23, %v8662_v27  ;;  %v6833_v27 = vpop.f32.mrf.mxu1 }
0x1269   :  { %v6565_v36 = vpop.f32.mrf.mxu0 }
0x126a   :  { %v6583_v40 = vadd.f32 %v6565_v36, %v8665_v4  ;;  %v6835_v41 = vpop.f32.mrf.mxu1 }
0x126b   :  { %v6569_v14 = vpop.f32.mrf.mxu0 }
0x126c   :  { %v6584_v43 = vadd.f32 %v6569_v14, %v8668_v38 }
0x126d   :  { %v6571_v33 = vpop.f32.mrf.mxu0 }
0x126e   :  { %v6585_v47 = vadd.f32 %v6571_v33, %v8671_v24  ;;  %v7408_v24 = vld [vmem:[%s8861_s1 + $0x100] sm:$0xff] }
0x126f   :  { %v6575_v57 = vpop.f32.mrf.mxu0 }
0x1270   :  { %v6586_v34 = vadd.f32 %v6575_v57, %v8676_v56  ;;  %v7409_v56 = vld [vmem:[%s8861_s1 + $0x108] sm:$0xff] }
0x1271   :  { %v6577_v46 = vpop.f32.mrf.mxu0 }
0x1272   :  { %v6587_v22 = vadd.f32 %v6577_v46, %v8679_v10  ;;  %v7410_v10 = vld [vmem:[%s8861_s1 + $0x110] sm:$0xff] }
0x12a3   :  { %v6750_v50 = vpop.f32.mrf.mxu0 }
0x12a4   :  { %v6828_v15 = vadd.f32 %v6827_v62, %v6750_v50 }
0x12a5   :  { %v6752_v11 = vpop.f32.mrf.mxu0 }
0x12a6   :  { %v6830_v38 = vadd.f32 %v6829_v51, %v6752_v11 }
0x12a7   :  { %v6756_v29 = vpop.f32.mrf.mxu0 }
0x12a8   :  { %v6834_v28 = vadd.f32 %v6833_v27, %v6756_v29 }
0x12a9   :  { %v6758_v4 = vpop.f32.mrf.mxu0 }
0x12aa   :  { %v6836_v21 = vadd.f32 %v6835_v41, %v6758_v4 }
0x12ac   :  { %6882 = vmatprep.subr.mxu1 %v6836_v21 }
0x12ad   :  { %6883 = vmatpush1.msra.mxu1 %v6834_v28  ;;  %v8786_v28 = vld [vmem:[%s8866_s6] sm:$0xff] }
0x12ae   :  { %6884 = vmatprep.subr.mxu1 %v6830_v38  ;;  %v3625_v38 = vsub.f32 %v8786_v28, %v8319_v9  ;;  %v8810_v9 = vld [vmem:[%s8866_s6 + $0x18] sm:$0xff] }
0x12af   :  { %6885 = vmatpush1.msra.mxu1 %v6828_v15  ;;  %v8795_v15 = vld [vmem:[%s8866_s6 + $0x10] sm:$0xff] }
0x12b0   :  { %7412 = vmatmul.mubr.msk.f32.vlgmr.msra.gmra.mxu1 %vm600_vm0, %v7408_v24  ;;  %v8802_v24 = vld [vmem:[%s8866_s6 + $0x8] sm:$0xff] }
0x12b1   :  { %6924 = vmatprep.mubr.f32.mxu1 %v7672_v0 }
0x12b4   :  { %7413 = vmatmul.mubr.msk.f32.gmra.mxu1 %vm600_vm0, %v7409_v56 }
0x12b5   :  { %6930 = vmatprep.mubr.f32.mxu1 %v7672_v0 }
0x12b8   :  { %7414 = vmatmul.mubr.msk.f32.gmra.mxu1 %vm600_vm0, %v7410_v10 }
0x12b9   :  { %6936 = vmatprep.mubr.f32.mxu1 %v7672_v0 }
0x12bc   :  { %7415 = vmatmul.mubr.msk.f32.gmra.mxu1 %vm600_vm0, %v7411_v45 }
0x12bd   :  { %7492 = vmatprep.mubr.msk.f32.mxu1 %vm3418_vm1, %v8730_v49 }
0x1370   :  { %v6920_v3 = vpop.f32.mrf.mxu1 }
0x1371   :  { %v6943_v26 = vadd.f32 %v6920_v3, %v6580_v5  ;;  %v7570_v3 = vld [vmem:[#allocation7 + $0x8] sm:$0xff] }
0x1372   :  { %v6922_v63 = vpop.f32.mrf.mxu1 }
0x1373   :  { %v6944_v6 = vadd.f32 %v6922_v63, %v6581_v18  ;;  %v8746_v18 = vadd.f32 %v6943_v26, %v8235_v8 }
0x1374   :  { %v6926_v35 = vpop.f32.mrf.mxu1 }
0x1375   :  { %v8741_v14 = vadd.f32 %v6944_v6, %v8235_v8  ;;  %v6945_v5 = vadd.f32 %v6926_v35, %v6582_v31  ;;  %v6971_v11 = vmul.f32 %v8746_v18, %v8746_v18 }
0x1376   :  { %v6928_v59 = vpop.f32.mrf.mxu1 }
0x1377   :  { %v6946_v33 = vadd.f32 %v6928_v59, %v6583_v40  ;;  %v6959_v46 = vadd.f32 %v8741_v14, %v8746_v18  ;;  %v8764_v31 = vadd.f32 %v6945_v5, %v8214_v2  ;;  %v6972_v50 = vmul.f32 %v8741_v14, %v8741_v14  ;;  %v7572_v59 = vld [vmem:[#allocation7 + $0x18] sm:$0xff] }
0x1378   :  { %v6932_v13 = vpop.f32.mrf.mxu1 }
0x1379   :  { %v6947_v52 = vadd.f32 %v6932_v13, %v6584_v43  ;;  %v6979_v29 = vadd.f32 %v6972_v50, %v6971_v11  ;;  %v6973_v4 = vmul.f32 %v8764_v31, %v8764_v31 }
0x137a   :  { %v6934_v61 = vpop.f32.mrf.mxu1 }
0x137b   :  { %v6948_v0 = vadd.f32 %v6934_v61, %v6585_v47  ;;  %v8735_v20 = vadd.f32 %v6947_v52, %v8197_v58 }
0x137c   :  { %v6938_v55 = vpop.f32.mrf.mxu1 }
0x137d   :  { %v8738_v1 = vadd.f32 %v6948_v0, %v8197_v58  ;;  %v6949_v23 = vadd.f32 %v6938_v55, %v6586_v34  ;;  %v8755_v34 = vadd.f32 %v6946_v33, %v8214_v2 }
0x137e   :  { %v6940_v36 = vpop.f32.mrf.mxu1 }
0x137f   :  { %v6950_v57 = vadd.f32 %v6940_v36, %v6587_v22  ;;  %v6965_v43 = vadd.f32 %v8738_v1, %v8735_v20  ;;  %v8749_v47 = vadd.f32 %v6949_v23, %v8195_v39  ;;  %v6976_v8 = vmul.f32 %v8738_v1, %v8738_v1 }
0x1380   :  { %v6962_v22 = vadd.f32 %v8755_v34, %v8764_v31  ;;  %v6974_v41 = vmul.f32 %v8755_v34, %v8755_v34 }
0x1381   :  { %v8752_v58 = vadd.f32 %v6950_v57, %v8195_v39  ;;  %6966 = vadd.xlane.f32.xlu0 %v6965_v43  ;;  %v6975_v39 = vmul.f32 %v8735_v20, %v8735_v20  ;;  %v6977_v2 = vmul.f32 %v8749_v47, %v8749_v47 }
0x1382   :  { %v6982_v21 = vadd.f32 %v6974_v41, %v6973_v4 }
0x1383   :  { %v6968_v40 = vadd.f32 %v8752_v58, %v8749_v47  ;;  %v6985_v62 = vadd.f32 %v6976_v8, %v6975_v39  ;;  %v6978_v51 = vmul.f32 %v8752_v58, %v8752_v58 }
0x1385   :  { %6969 = vadd.xlane.f32.xlu1 %v6968_v40  ;;  %6960 = vadd.xlane.f32.xlu0 %v6959_v46  ;;  %v6988_v27 = vadd.f32 %v6978_v51, %v6977_v2 }
0x1389   :  { %6963 = vadd.xlane.f32.xlu1 %v6962_v22  ;;  %6986 = vadd.xlane.f32.xlu0 %v6985_v62 }
0x138d   :  { %6989 = vadd.xlane.f32.xlu1 %v6988_v27  ;;  %6980 = vadd.xlane.f32.xlu0 %v6979_v29 }
0x1391   :  { %6983 = vadd.xlane.f32.xlu1 %v6982_v21 }
0x13a2   :  { %3631 = vperm.xlu1 %7525, %v8310_v30   ;;  %v3627_v30 = vsub.f32 %v8795_v15, %v8329_v60 }
0x13a3   :  { %3636 = vperm.xlu0 %7524, %v8305_v48   ;;  %v3626_v48 = vsub.f32 %v8802_v24, %v8313_v32 }
0x13a6   :  { %3641 = vperm.xlu1 %7525, %v8323_v16   ;;  %v3628_v16 = vsub.f32 %v8810_v9, %v8326_v54  ;;  %v7571_v54 = vld [vmem:[#allocation7 + $0x10] sm:$0xff] }
0x13a7   :  { %3659 = vperm.xlu0 %7524, %v3625_v38  }
0x13aa   :  { %3646 = vperm.xlu1 %7525, %v8321_v7  }
0x13ab   :  { %3669 = vperm.xlu0 %7524, %v3627_v30  }
0x13ae   :  { %3664 = vperm.xlu1 %7525, %v3626_v48  }
0x13b2   :  { %3674 = vperm.xlu1 %7525, %v3628_v16  }
0x140a   :  { %v6967_v60 = vpop.xlane.xlu0 %6966 }
0x140e   :  { %v6970_v56 = vpop.xlane.xlu1 %6969  ;;  %v6961_v10 = vpop.xlane.xlu0 %6960 }
0x140f   :  { %7484 = vmatprep.subr.mxu1 %v6970_v56 }
0x1410   :  { %7485 = vmatpush3.msra.mxu1 %v6970_v56 }
0x1411   :  { %7486 = vmatprep.subr.mxu1 %v6967_v60 }
0x1412   :  { %7487 = vmatpush3.msra.mxu1 %v6967_v60  ;;  %v6964_v7 = vpop.xlane.xlu1 %6963  ;;  %v6987_v32 = vpop.xlane.xlu0 %6986 }
0x1413   :  { %7488 = vmatprep.subr.mxu1 %v6964_v7 }
0x1414   :  { %7489 = vmatpush3.msra.mxu1 %v6964_v7 }
0x1415   :  { %7490 = vmatprep.subr.mxu1 %v6961_v10 }
0x1416   :  { %v6990_v45 = vpop.xlane.xlu1 %6989  ;;  %7491 = vmatpush3.msra.mxu1 %v6961_v10  ;;  %v6981_v63 = vpop.xlane.xlu0 %6980 }
0x1417   :  { %7493 = vmatmul.mubr.msk.f32.vlgmr.msra.gmra.mxu1 %vm3418_vm1, %v7570_v3  ;;  %7498 = vmatprep.subr.mxu1 %v6990_v45 }
0x1418   :  { %7499 = vmatpush3.msra.mxu1 %v6990_v45  ;;  %7495 = vmatprep.mubr.msk.f32.mxu1 %vm3418_vm1, %v7571_v54 }
0x1419   :  { %7500 = vmatprep.subr.mxu1 %v6987_v32 }
0x141a   :  { %v6984_v35 = vpop.xlane.xlu1 %6983  ;;  %7501 = vmatpush3.msra.mxu1 %v6987_v32  ;;  %v7573_v32 = vld [vmem:[%s8865_s5 + $0x8] sm:$0xff] }
0x141b   :  { %7496 = vmatmul.mubr.msk.f32.gmra.mxu1 %vm3418_vm1, %v7572_v59  ;;  %7502 = vmatprep.subr.mxu1 %v6984_v35 }
0x141c   :  { %7503 = vmatpush3.msra.mxu1 %v6984_v35  ;;  %7506 = vmatprep.mubr.msk.f32.mxu1 %vm3418_vm1, %v8730_v49 }
0x141d   :  { %7504 = vmatprep.subr.mxu1 %v6981_v63 }
0x141e   :  { %v3632_v13 = vpop.permute.xlu1 %3631  ;;  %7505 = vmatpush3.msra.mxu1 %v6981_v63  ;;  %v3637_v52 = vpop.permute.xlu0 %3636 }
0x141f   :  { %7507 = vmatmul.mubr.msk.f32.vlgmr.msra.gmra.mxu1 %vm3418_vm1, %v7570_v3  ;;  %v3649_v61 = vmul.f32 %v3632_v13, %v8245_v42  ;;  %v3650_v6 = vmul.f32 %v3632_v13, %v8238_v12  ;;  %v3651_v42 = vmul.f32 %v3637_v52, %v8224_v25  ;;  %v3652_v12 = vmul.f32 %v3637_v52, %v8217_v44  ;;  %v7575_v13 = vld [vmem:[%s8865_s5 + $0x18] sm:$0xff] }
0x1420   :  { %7509 = vmatprep.mubr.msk.f32.mxu1 %vm3418_vm1, %v7571_v54  ;;  %v7574_v54 = vld [vmem:[%s8865_s5] sm:$0xff] }
0x1422   :  { %v3660_v0 = vpop.permute.xlu0 %3659  ;;  %v3642_v55 = vpop.permute.xlu1 %3641 }
0x1423   :  { %v3677_v26 = vadd.f32 %v3660_v0, %v3649_v61  ;;  %v3678_v23 = vadd.f32 %v3660_v0, %v3650_v6  ;;  %7510 = vmatmul.mubr.msk.f32.gmra.mxu1 %vm3418_vm1, %v7572_v59  ;;  %v3653_v49 = vmul.f32 %v3642_v55, %v8201_v17  ;;  %v3654_v36 = vmul.f32 %v3642_v55, %v8204_v37  ;;  %v7576_v55 = vld [vmem:[%s8865_s5 + $0x10] sm:$0xff]  ;;  %s7674_s5 = smov [#allocation8]  }
0x1424   :  { %s7259_s3 = sshll.u32 %s7674_s5, 4  ;;  %s7260_s3 = int_to_ptr.vmem [resolvable:$true] %s7259_s3 }
0x1425   :  { %3685 = vst [vmem:[#allocation8] sm:$0xff] %v3677_v26  ;;  %3686 = vst [vmem:[#allocation8 + $0x8] sm:$0xff] %v3678_v23  ;;  %s7637_s21 = scalar_lea.vmem %s7260_s3, 2048  ;;  %p7642_p2 = scmp.lt.s32.totalorder %s7260_s3, %s7260_s3 }
0x1426   :  { %v3647_v33 = vpop.permute.xlu1 %3646  ;;  %v3670_v57 = vpop.permute.xlu0 %3669  ;;  %p7638_p1 = scmp.ne.s32.totalorder %s7260_s3, %s7637_s21  ;;  %p7643_p3 = scmp.lt.s32.totalorder %s7637_s21, %s7637_s21 }
0x1427   :  { %v3681_v43 = vadd.f32 %v3670_v57, %v3653_v49  ;;  %v3682_v5 = vadd.f32 %v3670_v57, %v3654_v36  ;;  %v3655_v39 = vmul.f32 %v3647_v33, %v8209_v53  ;;  %v3656_v22 = vmul.f32 %v3647_v33, %v8220_v19 }
0x1428   :  { %p7644_p4 = por %p7643_p3, %p7642_p2 }
0x1429   :  { %3689 = vst [vmem:[#allocation8 + $0x20] sm:$0xff] %v3681_v43  ;;  %3690 = vst [vmem:[#allocation8 + $0x28] sm:$0xff] %v3682_v5 }
0x142a   :  { %v3665_v40 = vpop.permute.xlu1 %3664  ;;  %p7645_p5 = pnand %p7644_p4, %p7638_p1 }
0x142b   :  { %v3679_v46 = vadd.f32 %v3665_v40, %v3651_v42  ;;  %v3680_v8 = vadd.f32 %v3665_v40, %v3652_v12 }
0x142d   :  { %3687 = vst [vmem:[#allocation8 + $0x10] sm:$0xff] %v3679_v46  ;;  %3688 = vst [vmem:[#allocation8 + $0x18] sm:$0xff] %v3680_v8 }
0x142e   :  { %v3675_v17 = vpop.permute.xlu1 %3674 }
0x142f   :  { %v3683_v37 = vadd.f32 %v3675_v17, %v3655_v39  ;;  %v3684_v62 = vadd.f32 %v3675_v17, %v3656_v22 }
0x1431   :  { %3691 = vst [vmem:[#allocation8 + $0x30] sm:$0xff] %v3683_v37  ;;  %3692 = vst [vmem:[#allocation8 + $0x38] sm:$0xff] %v3684_v62 }
0x14d7   :  { %v7494_v51 = vpop.f32.mrf.mxu1 }
0x14d8   :  { %v7162_v2 = vmul.f32 %v7494_v51, %v7494_v51 }
0x14d9   :  { %v7057_v25 = vpop.f32.mrf.mxu1 }
0x14da   :  { %v7161_v27 = vmul.f32 %v7057_v25, %v7057_v25 }
0x14db   :  { %v7497_v50 = vpop.f32.mrf.mxu1 }
0x14dc   :  { %v7164_v4 = vmul.f32 %v7497_v50, %v7497_v50 }
0x14dd   :  { %v7067_v44 = vpop.f32.mrf.mxu1 }
0x14de   :  { %v7163_v38 = vmul.f32 %v7067_v44, %v7067_v44 }
0x14df   :  { %v7508_v11 = vpop.f32.mrf.mxu1 }
0x14e0   :  { %v7166_v29 = vsub.f32 %v7508_v11, %v7162_v2 }
0x14e1   :  { %v7142_v41 = vpop.f32.mrf.mxu1 }
0x14e2   :  { %v7170_v53 = vadd.f32 1e-05, %v7166_v29  ;;  %v7165_v21 = vsub.f32 %v7142_v41, %v7161_v27 }
0x14e3   :  { %v7511_v19 = vpop.f32.mrf.mxu1 }
0x14e4   :  { %7534 = vrsqrt.f32 %v7170_v53  ;;  %v7169_v30 = vadd.f32 1e-05, %v7165_v21  ;;  %v7168_v48 = vsub.f32 %v7511_v19, %v7164_v4 }
0x14e5   :  { %v7152_v16 = vpop.f32.mrf.mxu1 }
0x14e6   :  { %7536 = vrsqrt.f32 %v7169_v30  ;;  %v7172_v60 = vadd.f32 1e-05, %v7168_v48  ;;  %v7167_v56 = vsub.f32 %v7152_v16, %v7163_v38 }
0x14e8   :  { %7538 = vrsqrt.f32 %v7172_v60  ;;  %v7171_v10 = vadd.f32 1e-05, %v7167_v56 }
0x14ea   :  { %7540 = vrsqrt.f32 %v7171_v10 }
0x14f1   :  { %v7535_v7 = vpop.eup %7534 }
0x14f2   :  { %v7178_v45 = vmul.f32 %v7573_v32, %v7535_v7 }
0x14f3   :  { %v7537_v3 = vpop.eup %7536 }
0x14f4   :  { %7196 = vperm.xlu0 %7524, %v7178_v45   ;;  %v7177_v63 = vmul.f32 %v7574_v54, %v7537_v3  ;;  %v7182_v35 = vmul.f32 %v7494_v51, %v7178_v45 }
0x14f5   :  { %v7539_v59 = vpop.eup %7538 }
0x14f6   :  { %7191 = vperm.xlu1 %7525, %v7177_v63   ;;  %v7180_v52 = vmul.f32 %v7575_v13, %v7539_v59  ;;  %v7181_v61 = vmul.f32 %v7177_v63, %v7057_v25  ;;  %v7186_v0 = vsub.f32 %v8802_v24, %v7182_v35 }
0x14f7   :  { %v7541_v6 = vpop.eup %7540 }
0x14f8   :  { %7206 = vperm.xlu0 %7524, %v7180_v52   ;;  %v7179_v26 = vmul.f32 %v7576_v55, %v7541_v6  ;;  %v7185_v23 = vsub.f32 %v8786_v28, %v7181_v61  ;;  %v7184_v36 = vmul.f32 %v7497_v50, %v7180_v52 }
0x14fa   :  { %7224 = vperm.xlu1 %7525, %v7186_v0   ;;  %v7183_v49 = vmul.f32 %v7179_v26, %v7067_v44  ;;  %v7188_v57 = vsub.f32 %v8810_v9, %v7184_v36 }
0x14fc   :  { %7219 = vperm.xlu0 %7524, %v7185_v23   ;;  %v7187_v33 = vsub.f32 %v8795_v15, %v7183_v49 }
0x14fe   :  { %7201 = vperm.xlu1 %7525, %v7179_v26  }
0x1500   :  { %7229 = vperm.xlu0 %7524, %v7187_v33  }
0x1502   :  { %7234 = vperm.xlu1 %7525, %v7188_v57  }
0x156f   :  { %v7197_v43 = vpop.permute.xlu0 %7196 }
0x1570   :  { %v7211_v42 = vmul.f32 %v7197_v43, %v8764_v31  ;;  %v7212_v12 = vmul.f32 %v7197_v43, %v8755_v34 }
0x1571   :  { %v7192_v24 = vpop.permute.xlu1 %7191 }
0x1572   :  { %v7209_v28 = vmul.f32 %v7192_v24, %v8746_v18  ;;  %v7210_v46 = vmul.f32 %v7192_v24, %v8741_v14 }
0x1573   :  { %v7207_v5 = vpop.permute.xlu0 %7206 }
0x1574   :  { %v7215_v18 = vmul.f32 %v7207_v5, %v8749_v47  ;;  %v7216_v14 = vmul.f32 %v7207_v5, %v8752_v58 }
0x1575   :  { %v7225_v40 = vpop.permute.xlu1 %7224 }
0x1576   :  { %v7239_v8 = vadd.f32 %v7225_v40, %v7211_v42  ;;  %v7240_v39 = vadd.f32 %v7225_v40, %v7212_v12 }
0x1577   :  { %v7220_v22 = vpop.permute.xlu0 %7219 }
0x1578   :  { %7248 = vst [vmem:[#allocation8 + $0x50] sm:$0xff] %v7239_v8  ;;  %7249 = vst [vmem:[#allocation8 + $0x58] sm:$0xff] %v7240_v39  ;;  %v7237_v15 = vadd.f32 %v7220_v22, %v7209_v28  ;;  %v7238_v9 = vadd.f32 %v7220_v22, %v7210_v46 }
0x1579   :  { %v7202_v17 = vpop.permute.xlu1 %7201 }
0x157a   :  { %7246 = vst [vmem:[#allocation8 + $0x40] sm:$0xff] %v7237_v15  ;;  %7247 = vst [vmem:[#allocation8 + $0x48] sm:$0xff] %v7238_v9  ;;  %v7213_v37 = vmul.f32 %v7202_v17, %v8735_v20  ;;  %v7214_v31 = vmul.f32 %v7202_v17, %v8738_v1 }
0x157b   :  { %v7230_v34 = vpop.permute.xlu0 %7229 }
0x157c   :  { %v7241_v62 = vadd.f32 %v7230_v34, %v7213_v37  ;;  %v7242_v51 = vadd.f32 %v7230_v34, %v7214_v31 }
0x157d   :  { %v7235_v25 = vpop.permute.xlu1 %7234 }
0x157e   :  { %7250 = vst [vmem:[#allocation8 + $0x60] sm:$0xff] %v7241_v62  ;;  %7251 = vst [vmem:[#allocation8 + $0x68] sm:$0xff] %v7242_v51  ;;  %v7243_v50 = vadd.f32 %v7235_v25, %v7215_v18  ;;  %v7244_v44 = vadd.f32 %v7235_v25, %v7216_v14 }
0x1580   :  { %7252 = vst [vmem:[#allocation8 + $0x70] sm:$0xff] %v7243_v50  ;;  %7253 = vst [vmem:[#allocation8 + $0x78] sm:$0xff] %v7244_v44 }
0x1581   :  { %7648 = shalt.err (!%p7645_p5)
}
0x1582   :  { %7265 = dma.vmem_to_hbm [thread:$0]  %s7260_s3, 2048, %s8867_s7, [#allocation4], %s7664_s27, %s7664_s27, %s7665_s28  }
0x1583   :  { %7661 = dma.done.wait [#allocation4], 2048  }
0x1584   :  { %7662 = vsyncadd [#allocation4], 4294965248 }
0x1585   :  { %7269 = vsyncpa [#allocation3], 1 }
0x1586   :  { %7270 = vsyncpa [#allocation6], 1 }
0x1587   :  { %7271 = vsyncpa [#allocation4], 1 }

</bundles_post_ra>
